<compile_context>
chip_gen: v7x
topology: tpu7x:2x2x1
jax: 0.10.0
libtpu: 0.0.40
codegen_flags: <defaults>
</compile_context>

<pallas_src>
import functools

import jax
import jax.numpy as jnp
import numpy as np
from jax.experimental import pallas as pl
from jax.experimental.pallas import tpu as pltpu

LANES = 128  # TPU lane width; all channel dims are zero-padded to this.


# ---------------------------------------------------------------------------
# Fused Pallas kernel: entire features[:12] chain for ONE image per grid step
# ---------------------------------------------------------------------------
def _fused_features_kernel(x_ref, w_ref, b_ref, o_ref, buf_a, buf_b, acc_ref,
                           *, spatial, pool_after):
    """x_ref : (1, H0, W0, 128)   f32 input image, channels zero-padded to 128
       w_ref : (L, 9, 128, 128)   bf16 conv weights, one padded (Cin,Cout) per tap
       b_ref : (L, 1, 128)        f32 biases (zero-padded)
       o_ref : (1, Hf, Wf, 128)   f32 output (padded channels are exactly 0)
       buf_a/buf_b : (H0+2, W0+2, 128) f32 VMEM ping-pong padded activations
       acc_ref     : (H0*W0, 128) f32 VMEM accumulator
    """
    n_layers = len(spatial)
    h0, w0 = spatial[0]

    # Stage the input into the zero-bordered buffer (in-kernel 'same' padding).
    buf_a[...] = jnp.zeros_like(buf_a)
    buf_a[1:h0 + 1, 1:w0 + 1, :] = x_ref[0]

    src, dst = buf_a, buf_b
    for l in range(n_layers):
        h, w = spatial[l]
        hw = h * w

        # Bias folded into accumulator init (single broadcast per layer).
        acc_ref[0:hw, :] = jnp.broadcast_to(b_ref[l], (hw, LANES))

        # 3x3 conv as 9 tap matmuls.  Channels padded to 128 lanes so every
        # matmul is (hw, 128) x (128, 128), bf16 in / f32 accumulate on MXU.
        for dy in range(3):
            for dx in range(3):
                patch = src[dy:dy + h, dx:dx + w, :]              # (h, w, 128)
                acc_ref[0:hw, :] += jnp.dot(
                    patch.reshape(hw, LANES).astype(jnp.bfloat16),
                    w_ref[l, dy * 3 + dx],
                    preferred_element_type=jnp.float32)

        act = jnp.maximum(acc_ref[0:hw, :], 0.0).reshape(h, w, LANES)  # ReLU

        if pool_after[l]:
            # 2x2 / stride-2 max pool fused into the conv epilogue (VPU).
            act = jnp.max(act.reshape(h // 2, 2, w, LANES), axis=1)
            act = jnp.max(act.reshape(h // 2, w // 2, 2, LANES), axis=2)
            h, w = h // 2, w // 2

        if l == n_layers - 1:
            o_ref[...] = act[None].astype(o_ref.dtype)
        else:
            # Re-establish the zero 'same'-padding border, store next layer's
            # activation in the other ping-pong buffer (stays in VMEM).
            dst[...] = jnp.zeros_like(dst)
            dst[1:h + 1, 1:w + 1, :] = act
            src, dst = dst, src


# ---------------------------------------------------------------------------
# Wrapper: packs weights once, pads channels to 128 lanes, single pallas_call
# ---------------------------------------------------------------------------
def feature_extractor_forward(x_nchw, params):
    """Equivalent of FeatureExtractor(cnn, feature_layer=11).forward(x). Input NCHW."""
    n, c_in0, h0, w0 = x_nchw.shape
    n_layers = len(params)
    pool_after = tuple(i in (1, 3) for i in range(n_layers))   # pools after convs 1 & 3

    # --- pack weights / biases once: channel dims zero-padded to 128 lanes ---
    w_list, b_list = [], []
    for wgt, bias in params:
        cin, cout = wgt.shape[2], wgt.shape[3]
        wp = jnp.zeros((9, LANES, LANES), jnp.float32)
        wp = wp.at[:, :cin, :cout].set(wgt.reshape(9, cin, cout))
        w_list.append(wp)
        b_list.append(jnp.zeros((1, LANES), jnp.float32).at[0, :cout].set(bias))
    w_all = jnp.stack(w_list).astype(jnp.bfloat16)     # (L, 9, 128, 128) bf16
    b_all = jnp.stack(b_list)                          # (L, 1, 128)      f32

    # --- lane-dense input: NCHW -> NHWC, channels zero-padded to 128 ---
    x = jnp.transpose(x_nchw, (0, 2, 3, 1))
    x = jnp.pad(x, ((0, 0), (0, 0), (0, 0), (0, LANES - c_in0))).astype(jnp.float32)

    # --- per-layer spatial sizes (pool halves H, W) ---
    spatial = []
    h, w = h0, w0
    for i in range(n_layers):
        spatial.append((h, w))
        if pool_after[i]:
            h, w = h // 2, w // 2
    h_out, w_out = h, w
    c_out = params[-1][0].shape[-1]

    kernel = functools.partial(_fused_features_kernel,
                               spatial=tuple(spatial), pool_after=pool_after)
    out = pl.pallas_call(
        kernel,
        out_shape=jax.ShapeDtypeStruct((n, h_out, w_out, LANES), jnp.float32),
        grid=(n,),
        in_specs=[
            pl.BlockSpec((1, h0, w0, LANES), lambda i: (i, 0, 0, 0)),
            pl.BlockSpec((n_layers, 9, LANES, LANES), lambda i: (0, 0, 0, 0)),
            pl.BlockSpec((n_layers, 1, LANES), lambda i: (0, 0, 0)),
        ],
        out_specs=pl.BlockSpec((1, h_out, w_out, LANES), lambda i: (i, 0, 0, 0)),
        scratch_shapes=[
            pltpu.VMEM((h0 + 2, w0 + 2, LANES), jnp.float32),   # ping
            pltpu.VMEM((h0 + 2, w0 + 2, LANES), jnp.float32),   # pong
            pltpu.VMEM((h0 * w0, LANES), jnp.float32),          # conv accumulator
        ],
        compiler_params=pltpu.CompilerParams(
            dimension_semantics=("parallel",)),                 # images across TCs
    )(x, w_all, b_all)

    out = out[..., :c_out]                         # drop channel padding (zeros)
    return jnp.transpose(out, (0, 3, 1, 2))        # NHWC -> NCHW


# ---------------------------------------------------------------------------
# Parameter init (synthetic VGG-ish weights) and pure-JAX reference
# ---------------------------------------------------------------------------
def init_params(key, channels=(3, 16, 16, 32, 32, 64)):
    """Deterministic synthetic weights for the 5 conv layers (HWIO) + biases."""
    params = []
    for i, (cin, cout) in enumerate(zip(channels[:-1], channels[1:])):
        kw, kb = jax.random.split(jax.random.fold_in(key, i))
        scale = 1.0 / np.sqrt(9.0 * cin)
        w = jax.random.normal(kw, (3, 3, cin, cout), jnp.float32) * scale
        b = jax.random.normal(kb, (cout,), jnp.float32) * 0.01
        params.append((w, b))
    return params


def _ref_forward(x_nchw, params):
    """Pure-JAX reference mirroring the kernel numerics (bf16 MXU inputs, f32 accum)."""
    dn = ("NHWC", "HWIO", "NHWC")

    def conv_relu(x, w, b):
        y = jax.lax.conv_general_dilated(
            x.astype(jnp.bfloat16), w.astype(jnp.bfloat16), (1, 1), "SAME",
            dimension_numbers=dn, preferred_element_type=jnp.float32)
        return jnp.maximum(y + b[None, None, None, :], 0.0)

    def pool(x):
        return jax.lax.reduce_window(x, -jnp.inf, jax.lax.max,
                                     (1, 2, 2, 1), (1, 2, 2, 1), "VALID")

    x = jnp.transpose(x_nchw, (0, 2, 3, 1)).astype(jnp.float32)
    (w0, b0), (w1, b1), (w2, b2), (w3, b3), (w4, b4) = params
    x = conv_relu(x, w0, b0); x = conv_relu(x, w1, b1); x = pool(x)
    x = conv_relu(x, w2, b2); x = conv_relu(x, w3, b3); x = pool(x)
    x = conv_relu(x, w4, b4)
    return jnp.transpose(x, (0, 3, 1, 2))


if __name__ == "__main__":
    key = jax.random.PRNGKey(0)
    kx, kp = jax.random.split(key)
    x = jax.random.normal(kx, (2, 3, 16, 16), jnp.float32)      # NCHW, like PyTorch
    params = init_params(kp)

    fwd = jax.jit(feature_extractor_forward)
    out = jax.block_until_ready(fwd(x, params))
    assert out.shape == (2, 64, 4, 4), out.shape

    ref = jax.block_until_ready(_ref_forward(x, params))
    np.testing.assert_allclose(np.asarray(out), np.asarray(ref), rtol=2e-3, atol=2e-3)

    print("KERNEL_OK")
</pallas_src>

<mosaic_0001>
module attributes {stable_mosaic.version = 11 : i64} {
  func.func @_fused_features_kernel(%arg0: i32, %arg1: memref<1x16x16x128xf32, #tpu.memory_space<vmem>>, %arg2: memref<5x9x128x128xbf16, #tpu.memory_space<vmem>>, %arg3: memref<5x1x128xf32, #tpu.memory_space<vmem>>, %arg4: memref<1x4x4x128xf32, #tpu.memory_space<vmem>>, %arg5: memref<18x18x128xf32, #tpu.memory_space<vmem>>, %arg6: memref<18x18x128xf32, #tpu.memory_space<vmem>>, %arg7: memref<256x128xf32, #tpu.memory_space<vmem>>) attributes {dimension_semantics = [#tpu.dimension_semantics<parallel>], iteration_bounds = array<i64: 2>, scalar_prefetch = 0 : i64, scratch_operands = 3 : i64, tpu.core_type = #tpu.core_type<tc>, window_params = [{transform_indices = @transform_0, window_bounds = array<i64: 1, 16, 16, 128>}, {pipeline_mode = #tpu.pipeline_mode<synchronous>, transform_indices = @transform_1, window_bounds = array<i64: 5, 9, 128, 128>}, {pipeline_mode = #tpu.pipeline_mode<synchronous>, transform_indices = @transform_2, window_bounds = array<i64: 5, 1, 128>}, {transform_indices = @transform_3, window_bounds = array<i64: 1, 4, 4, 128>}]} {
    %cst = arith.constant 0.000000e+00 : f32
    %0 = vector.broadcast %cst : f32 to vector<18x18x128xf32>
    %c0 = arith.constant 0 : index
    %c0_0 = arith.constant 0 : index
    %c0_1 = arith.constant 0 : index
    %1 = vector.load %arg5[%c0, %c0_0, %c0_1] : memref<18x18x128xf32, #tpu.memory_space<vmem>>, vector<18x18x128xf32>
    tpu.vector_store %arg5[%c0, %c0_0, %c0_1], %0 {strides = array<i32>} : memref<18x18x128xf32, #tpu.memory_space<vmem>>, vector<18x18x128xf32>,
    %c0_2 = arith.constant 0 : index
    %c0_3 = arith.constant 0 : index
    %c0_4 = arith.constant 0 : index
    %c0_5 = arith.constant 0 : index
    %2 = vector.load %arg1[%c0_2, %c0_3, %c0_4, %c0_5] : memref<1x16x16x128xf32, #tpu.memory_space<vmem>>, vector<1x16x16x128xf32>
    %3 = vector.shape_cast %2 : vector<1x16x16x128xf32> to vector<16x16x128xf32>
    %c1 = arith.constant 1 : index
    %c1_6 = arith.constant 1 : index
    %c0_7 = arith.constant 0 : index
    %4 = vector.load %arg5[%c1, %c1_6, %c0_7] : memref<18x18x128xf32, #tpu.memory_space<vmem>>, vector<16x16x128xf32>
    tpu.vector_store %arg5[%c1, %c1_6, %c0_7], %3 {strides = array<i32>} : memref<18x18x128xf32, #tpu.memory_space<vmem>>, vector<16x16x128xf32>,
    %c0_8 = arith.constant 0 : index
    %c0_9 = arith.constant 0 : index
    %c0_10 = arith.constant 0 : index
    %5 = vector.load %arg3[%c0_8, %c0_9, %c0_10] : memref<5x1x128xf32, #tpu.memory_space<vmem>>, vector<1x1x128xf32>
    %6 = vector.shape_cast %5 : vector<1x1x128xf32> to vector<1x128xf32>
    %7 = vector.shape_cast %6 : vector<1x128xf32> to vector<1x128xf32>
    %8 = vector.broadcast %7 : vector<1x128xf32> to vector<256x128xf32>
    %c0_11 = arith.constant 0 : index
    %c0_12 = arith.constant 0 : index
    %9 = vector.load %arg7[%c0_11, %c0_12] : memref<256x128xf32, #tpu.memory_space<vmem>>, vector<256x128xf32>
    tpu.vector_store %arg7[%c0_11, %c0_12], %8 {strides = array<i32>} : memref<256x128xf32, #tpu.memory_space<vmem>>, vector<256x128xf32>,
    %c0_13 = arith.constant 0 : index
    %c0_14 = arith.constant 0 : index
    %c0_15 = arith.constant 0 : index
    %10 = vector.load %arg5[%c0_13, %c0_14, %c0_15] : memref<18x18x128xf32, #tpu.memory_space<vmem>>, vector<16x16x128xf32>
    %c0_16 = arith.constant 0 : index
    %c0_17 = arith.constant 0 : index
    %11 = vector.load %arg7[%c0_16, %c0_17] : memref<256x128xf32, #tpu.memory_space<vmem>>, vector<256x128xf32>
    %12 = vector.shape_cast %10 : vector<16x16x128xf32> to vector<256x128xf32>
    %13 = arith.truncf %12 : vector<256x128xf32> to vector<256x128xbf16>
    %c0_18 = arith.constant 0 : index
    %c0_19 = arith.constant 0 : index
    %c0_20 = arith.constant 0 : index
    %c0_21 = arith.constant 0 : index
    %14 = vector.load %arg2[%c0_18, %c0_19, %c0_20, %c0_21] : memref<5x9x128x128xbf16, #tpu.memory_space<vmem>>, vector<1x1x128x128xbf16>
    %15 = vector.shape_cast %14 : vector<1x1x128x128xbf16> to vector<128x128xbf16>
    %cst_22 = arith.constant dense<0.000000e+00> : vector<256x128xf32>
    %16 = tpu.matmul %13, %15, %cst_22 {dimension_numbers = #tpu.dot_dimension_numbers<[1], [0], [0], [1], [0, 0, 1, 1], [], []>} : vector<256x128xbf16>, vector<128x128xbf16>, vector<256x128xf32> -> vector<256x128xf32>
    %17 = arith.addf %11, %16 : vector<256x128xf32>
    %c0_23 = arith.constant 0 : index
    %c0_24 = arith.constant 0 : index
    %18 = vector.load %arg7[%c0_23, %c0_24] : memref<256x128xf32, #tpu.memory_space<vmem>>, vector<256x128xf32>
    tpu.vector_store %arg7[%c0_23, %c0_24], %17 {strides = array<i32>} : memref<256x128xf32, #tpu.memory_space<vmem>>, vector<256x128xf32>,
    %c0_25 = arith.constant 0 : index
    %c1_26 = arith.constant 1 : index
    %c0_27 = arith.constant 0 : index
    %19 = vector.load %arg5[%c0_25, %c1_26, %c0_27] : memref<18x18x128xf32, #tpu.memory_space<vmem>>, vector<16x16x128xf32>
    %c0_28 = arith.constant 0 : index
    %c0_29 = arith.constant 0 : index
    %20 = vector.load %arg7[%c0_28, %c0_29] : memref<256x128xf32, #tpu.memory_space<vmem>>, vector<256x128xf32>
    %21 = vector.shape_cast %19 : vector<16x16x128xf32> to vector<256x128xf32>
    %22 = arith.truncf %21 : vector<256x128xf32> to vector<256x128xbf16>
    %c0_30 = arith.constant 0 : index
    %c1_31 = arith.constant 1 : index
    %c0_32 = arith.constant 0 : index
    %c0_33 = arith.constant 0 : index
    %23 = vector.load %arg2[%c0_30, %c1_31, %c0_32, %c0_33] : memref<5x9x128x128xbf16, #tpu.memory_space<vmem>>, vector<1x1x128x128xbf16>
    %24 = vector.shape_cast %23 : vector<1x1x128x128xbf16> to vector<128x128xbf16>
    %cst_34 = arith.constant dense<0.000000e+00> : vector<256x128xf32>
    %25 = tpu.matmul %22, %24, %cst_34 {dimension_numbers = #tpu.dot_dimension_numbers<[1], [0], [0], [1], [0, 0, 1, 1], [], []>} : vector<256x128xbf16>, vector<128x128xbf16>, vector<256x128xf32> -> vector<256x128xf32>
    %26 = arith.addf %20, %25 : vector<256x128xf32>
    %c0_35 = arith.constant 0 : index
    %c0_36 = arith.constant 0 : index
    %27 = vector.load %arg7[%c0_35, %c0_36] : memref<256x128xf32, #tpu.memory_space<vmem>>, vector<256x128xf32>
    tpu.vector_store %arg7[%c0_35, %c0_36], %26 {strides = array<i32>} : memref<256x128xf32, #tpu.memory_space<vmem>>, vector<256x128xf32>,
    %c0_37 = arith.constant 0 : index
    %c2 = arith.constant 2 : index
    %c0_38 = arith.constant 0 : index
    %28 = vector.load %arg5[%c0_37, %c2, %c0_38] : memref<18x18x128xf32, #tpu.memory_space<vmem>>, vector<16x16x128xf32>
    %c0_39 = arith.constant 0 : index
    %c0_40 = arith.constant 0 : index
    %29 = vector.load %arg7[%c0_39, %c0_40] : memref<256x128xf32, #tpu.memory_space<vmem>>, vector<256x128xf32>
    %30 = vector.shape_cast %28 : vector<16x16x128xf32> to vector<256x128xf32>
    %31 = arith.truncf %30 : vector<256x128xf32> to vector<256x128xbf16>
    %c0_41 = arith.constant 0 : index
    %c2_42 = arith.constant 2 : index
    %c0_43 = arith.constant 0 : index
    %c0_44 = arith.constant 0 : index
    %32 = vector.load %arg2[%c0_41, %c2_42, %c0_43, %c0_44] : memref<5x9x128x128xbf16, #tpu.memory_space<vmem>>, vector<1x1x128x128xbf16>
    %33 = vector.shape_cast %32 : vector<1x1x128x128xbf16> to vector<128x128xbf16>
    %cst_45 = arith.constant dense<0.000000e+00> : vector<256x128xf32>
    %34 = tpu.matmul %31, %33, %cst_45 {dimension_numbers = #tpu.dot_dimension_numbers<[1], [0], [0], [1], [0, 0, 1, 1], [], []>} : vector<256x128xbf16>, vector<128x128xbf16>, vector<256x128xf32> -> vector<256x128xf32>
    %35 = arith.addf %29, %34 : vector<256x128xf32>
    %c0_46 = arith.constant 0 : index
    %c0_47 = arith.constant 0 : index
    %36 = vector.load %arg7[%c0_46, %c0_47] : memref<256x128xf32, #tpu.memory_space<vmem>>, vector<256x128xf32>
    tpu.vector_store %arg7[%c0_46, %c0_47], %35 {strides = array<i32>} : memref<256x128xf32, #tpu.memory_space<vmem>>, vector<256x128xf32>,
    %c1_48 = arith.constant 1 : index
    %c0_49 = arith.constant 0 : index
    %c0_50 = arith.constant 0 : index
    %37 = vector.load %arg5[%c1_48, %c0_49, %c0_50] : memref<18x18x128xf32, #tpu.memory_space<vmem>>, vector<16x16x128xf32>
    %c0_51 = arith.constant 0 : index
    %c0_52 = arith.constant 0 : index
    %38 = vector.load %arg7[%c0_51, %c0_52] : memref<256x128xf32, #tpu.memory_space<vmem>>, vector<256x128xf32>
    %39 = vector.shape_cast %37 : vector<16x16x128xf32> to vector<256x128xf32>
    %40 = arith.truncf %39 : vector<256x128xf32> to vector<256x128xbf16>
    %c0_53 = arith.constant 0 : index
    %c3 = arith.constant 3 : index
    %c0_54 = arith.constant 0 : index
    %c0_55 = arith.constant 0 : index
    %41 = vector.load %arg2[%c0_53, %c3, %c0_54, %c0_55] : memref<5x9x128x128xbf16, #tpu.memory_space<vmem>>, vector<1x1x128x128xbf16>
    %42 = vector.shape_cast %41 : vector<1x1x128x128xbf16> to vector<128x128xbf16>
    %cst_56 = arith.constant dense<0.000000e+00> : vector<256x128xf32>
    %43 = tpu.matmul %40, %42, %cst_56 {dimension_numbers = #tpu.dot_dimension_numbers<[1], [0], [0], [1], [0, 0, 1, 1], [], []>} : vector<256x128xbf16>, vector<128x128xbf16>, vector<256x128xf32> -> vector<256x128xf32>
    %44 = arith.addf %38, %43 : vector<256x128xf32>
    %c0_57 = arith.constant 0 : index
    %c0_58 = arith.constant 0 : index
    %45 = vector.load %arg7[%c0_57, %c0_58] : memref<256x128xf32, #tpu.memory_space<vmem>>, vector<256x128xf32>
    tpu.vector_store %arg7[%c0_57, %c0_58], %44 {strides = array<i32>} : memref<256x128xf32, #tpu.memory_space<vmem>>, vector<256x128xf32>,
    %c1_59 = arith.constant 1 : index
    %c1_60 = arith.constant 1 : index
    %c0_61 = arith.constant 0 : index
    %46 = vector.load %arg5[%c1_59, %c1_60, %c0_61] : memref<18x18x128xf32, #tpu.memory_space<vmem>>, vector<16x16x128xf32>
    %c0_62 = arith.constant 0 : index
    %c0_63 = arith.constant 0 : index
    %47 = vector.load %arg7[%c0_62, %c0_63] : memref<256x128xf32, #tpu.memory_space<vmem>>, vector<256x128xf32>
    %48 = vector.shape_cast %46 : vector<16x16x128xf32> to vector<256x128xf32>
    %49 = arith.truncf %48 : vector<256x128xf32> to vector<256x128xbf16>
    %c0_64 = arith.constant 0 : index
    %c4 = arith.constant 4 : index
    %c0_65 = arith.constant 0 : index
    %c0_66 = arith.constant 0 : index
    %50 = vector.load %arg2[%c0_64, %c4, %c0_65, %c0_66] : memref<5x9x128x128xbf16, #tpu.memory_space<vmem>>, vector<1x1x128x128xbf16>
    %51 = vector.shape_cast %50 : vector<1x1x128x128xbf16> to vector<128x128xbf16>
    %cst_67 = arith.constant dense<0.000000e+00> : vector<256x128xf32>
    %52 = tpu.matmul %49, %51, %cst_67 {dimension_numbers = #tpu.dot_dimension_numbers<[1], [0], [0], [1], [0, 0, 1, 1], [], []>} : vector<256x128xbf16>, vector<128x128xbf16>, vector<256x128xf32> -> vector<256x128xf32>
    %53 = arith.addf %47, %52 : vector<256x128xf32>
    %c0_68 = arith.constant 0 : index
    %c0_69 = arith.constant 0 : index
    %54 = vector.load %arg7[%c0_68, %c0_69] : memref<256x128xf32, #tpu.memory_space<vmem>>, vector<256x128xf32>
    tpu.vector_store %arg7[%c0_68, %c0_69], %53 {strides = array<i32>} : memref<256x128xf32, #tpu.memory_space<vmem>>, vector<256x128xf32>,
    %c1_70 = arith.constant 1 : index
    %c2_71 = arith.constant 2 : index
    %c0_72 = arith.constant 0 : index
    %55 = vector.load %arg5[%c1_70, %c2_71, %c0_72] : memref<18x18x128xf32, #tpu.memory_space<vmem>>, vector<16x16x128xf32>
    %c0_73 = arith.constant 0 : index
    %c0_74 = arith.constant 0 : index
    %56 = vector.load %arg7[%c0_73, %c0_74] : memref<256x128xf32, #tpu.memory_space<vmem>>, vector<256x128xf32>
    %57 = vector.shape_cast %55 : vector<16x16x128xf32> to vector<256x128xf32>
    %58 = arith.truncf %57 : vector<256x128xf32> to vector<256x128xbf16>
    %c0_75 = arith.constant 0 : index
    %c5 = arith.constant 5 : index
    %c0_76 = arith.constant 0 : index
    %c0_77 = arith.constant 0 : index
    %59 = vector.load %arg2[%c0_75, %c5, %c0_76, %c0_77] : memref<5x9x128x128xbf16, #tpu.memory_space<vmem>>, vector<1x1x128x128xbf16>
    %60 = vector.shape_cast %59 : vector<1x1x128x128xbf16> to vector<128x128xbf16>
    %cst_78 = arith.constant dense<0.000000e+00> : vector<256x128xf32>
    %61 = tpu.matmul %58, %60, %cst_78 {dimension_numbers = #tpu.dot_dimension_numbers<[1], [0], [0], [1], [0, 0, 1, 1], [], []>} : vector<256x128xbf16>, vector<128x128xbf16>, vector<256x128xf32> -> vector<256x128xf32>
    %62 = arith.addf %56, %61 : vector<256x128xf32>
    %c0_79 = arith.constant 0 : index
    %c0_80 = arith.constant 0 : index
    %63 = vector.load %arg7[%c0_79, %c0_80] : memref<256x128xf32, #tpu.memory_space<vmem>>, vector<256x128xf32>
    tpu.vector_store %arg7[%c0_79, %c0_80], %62 {strides = array<i32>} : memref<256x128xf32, #tpu.memory_space<vmem>>, vector<256x128xf32>,
    %c2_81 = arith.constant 2 : index
    %c0_82 = arith.constant 0 : index
    %c0_83 = arith.constant 0 : index
    %64 = vector.load %arg5[%c2_81, %c0_82, %c0_83] : memref<18x18x128xf32, #tpu.memory_space<vmem>>, vector<16x16x128xf32>
    %c0_84 = arith.constant 0 : index
    %c0_85 = arith.constant 0 : index
    %65 = vector.load %arg7[%c0_84, %c0_85] : memref<256x128xf32, #tpu.memory_space<vmem>>, vector<256x128xf32>
    %66 = vector.shape_cast %64 : vector<16x16x128xf32> to vector<256x128xf32>
    %67 = arith.truncf %66 : vector<256x128xf32> to vector<256x128xbf16>
    %c0_86 = arith.constant 0 : index
    %c6 = arith.constant 6 : index
    %c0_87 = arith.constant 0 : index
    %c0_88 = arith.constant 0 : index
    %68 = vector.load %arg2[%c0_86, %c6, %c0_87, %c0_88] : memref<5x9x128x128xbf16, #tpu.memory_space<vmem>>, vector<1x1x128x128xbf16>
    %69 = vector.shape_cast %68 : vector<1x1x128x128xbf16> to vector<128x128xbf16>
    %cst_89 = arith.constant dense<0.000000e+00> : vector<256x128xf32>
    %70 = tpu.matmul %67, %69, %cst_89 {dimension_numbers = #tpu.dot_dimension_numbers<[1], [0], [0], [1], [0, 0, 1, 1], [], []>} : vector<256x128xbf16>, vector<128x128xbf16>, vector<256x128xf32> -> vector<256x128xf32>
    %71 = arith.addf %65, %70 : vector<256x128xf32>
    %c0_90 = arith.constant 0 : index
    %c0_91 = arith.constant 0 : index
    %72 = vector.load %arg7[%c0_90, %c0_91] : memref<256x128xf32, #tpu.memory_space<vmem>>, vector<256x128xf32>
    tpu.vector_store %arg7[%c0_90, %c0_91], %71 {strides = array<i32>} : memref<256x128xf32, #tpu.memory_space<vmem>>, vector<256x128xf32>,
    %c2_92 = arith.constant 2 : index
    %c1_93 = arith.constant 1 : index
    %c0_94 = arith.constant 0 : index
    %73 = vector.load %arg5[%c2_92, %c1_93, %c0_94] : memref<18x18x128xf32, #tpu.memory_space<vmem>>, vector<16x16x128xf32>
    %c0_95 = arith.constant 0 : index
    %c0_96 = arith.constant 0 : index
    %74 = vector.load %arg7[%c0_95, %c0_96] : memref<256x128xf32, #tpu.memory_space<vmem>>, vector<256x128xf32>
    %75 = vector.shape_cast %73 : vector<16x16x128xf32> to vector<256x128xf32>
    %76 = arith.truncf %75 : vector<256x128xf32> to vector<256x128xbf16>
    %c0_97 = arith.constant 0 : index
    %c7 = arith.constant 7 : index
    %c0_98 = arith.constant 0 : index
    %c0_99 = arith.constant 0 : index
    %77 = vector.load %arg2[%c0_97, %c7, %c0_98, %c0_99] : memref<5x9x128x128xbf16, #tpu.memory_space<vmem>>, vector<1x1x128x128xbf16>
    %78 = vector.shape_cast %77 : vector<1x1x128x128xbf16> to vector<128x128xbf16>
    %cst_100 = arith.constant dense<0.000000e+00> : vector<256x128xf32>
    %79 = tpu.matmul %76, %78, %cst_100 {dimension_numbers = #tpu.dot_dimension_numbers<[1], [0], [0], [1], [0, 0, 1, 1], [], []>} : vector<256x128xbf16>, vector<128x128xbf16>, vector<256x128xf32> -> vector<256x128xf32>
    %80 = arith.addf %74, %79 : vector<256x128xf32>
    %c0_101 = arith.constant 0 : index
    %c0_102 = arith.constant 0 : index
    %81 = vector.load %arg7[%c0_101, %c0_102] : memref<256x128xf32, #tpu.memory_space<vmem>>, vector<256x128xf32>
    tpu.vector_store %arg7[%c0_101, %c0_102], %80 {strides = array<i32>} : memref<256x128xf32, #tpu.memory_space<vmem>>, vector<256x128xf32>,
    %c2_103 = arith.constant 2 : index
    %c2_104 = arith.constant 2 : index
    %c0_105 = arith.constant 0 : index
    %82 = vector.load %arg5[%c2_103, %c2_104, %c0_105] : memref<18x18x128xf32, #tpu.memory_space<vmem>>, vector<16x16x128xf32>
    %c0_106 = arith.constant 0 : index
    %c0_107 = arith.constant 0 : index
    %83 = vector.load %arg7[%c0_106, %c0_107] : memref<256x128xf32, #tpu.memory_space<vmem>>, vector<256x128xf32>
    %84 = vector.shape_cast %82 : vector<16x16x128xf32> to vector<256x128xf32>
    %85 = arith.truncf %84 : vector<256x128xf32> to vector<256x128xbf16>
    %c0_108 = arith.constant 0 : index
    %c8 = arith.constant 8 : index
    %c0_109 = arith.constant 0 : index
    %c0_110 = arith.constant 0 : index
    %86 = vector.load %arg2[%c0_108, %c8, %c0_109, %c0_110] : memref<5x9x128x128xbf16, #tpu.memory_space<vmem>>, vector<1x1x128x128xbf16>
    %87 = vector.shape_cast %86 : vector<1x1x128x128xbf16> to vector<128x128xbf16>
    %cst_111 = arith.constant dense<0.000000e+00> : vector<256x128xf32>
    %88 = tpu.matmul %85, %87, %cst_111 {dimension_numbers = #tpu.dot_dimension_numbers<[1], [0], [0], [1], [0, 0, 1, 1], [], []>} : vector<256x128xbf16>, vector<128x128xbf16>, vector<256x128xf32> -> vector<256x128xf32>
    %89 = arith.addf %83, %88 : vector<256x128xf32>
    %c0_112 = arith.constant 0 : index
    %c0_113 = arith.constant 0 : index
    %90 = vector.load %arg7[%c0_112, %c0_113] : memref<256x128xf32, #tpu.memory_space<vmem>>, vector<256x128xf32>
    tpu.vector_store %arg7[%c0_112, %c0_113], %89 {strides = array<i32>} : memref<256x128xf32, #tpu.memory_space<vmem>>, vector<256x128xf32>,
    %c0_114 = arith.constant 0 : index
    %c0_115 = arith.constant 0 : index
    %91 = vector.load %arg7[%c0_114, %c0_115] : memref<256x128xf32, #tpu.memory_space<vmem>>, vector<256x128xf32>
    %cst_116 = arith.constant 0.000000e+00 : f32
    %92 = vector.broadcast %cst_116 : f32 to vector<256x128xf32>
    %93 = arith.maximumf %91, %92 : vector<256x128xf32>
    %94 = vector.shape_cast %93 : vector<256x128xf32> to vector<16x16x128xf32>
    %cst_117 = arith.constant 0.000000e+00 : f32
    %95 = vector.broadcast %cst_117 : f32 to vector<18x18x128xf32>
    %c0_118 = arith.constant 0 : index
    %c0_119 = arith.constant 0 : index
    %c0_120 = arith.constant 0 : index
    %96 = vector.load %arg6[%c0_118, %c0_119, %c0_120] : memref<18x18x128xf32, #tpu.memory_space<vmem>>, vector<18x18x128xf32>
    tpu.vector_store %arg6[%c0_118, %c0_119, %c0_120], %95 {strides = array<i32>} : memref<18x18x128xf32, #tpu.memory_space<vmem>>, vector<18x18x128xf32>,
    %c1_121 = arith.constant 1 : index
    %c1_122 = arith.constant 1 : index
    %c0_123 = arith.constant 0 : index
    %97 = vector.load %arg6[%c1_121, %c1_122, %c0_123] : memref<18x18x128xf32, #tpu.memory_space<vmem>>, vector<16x16x128xf32>
    tpu.vector_store %arg6[%c1_121, %c1_122, %c0_123], %94 {strides = array<i32>} : memref<18x18x128xf32, #tpu.memory_space<vmem>>, vector<16x16x128xf32>,
    %c1_124 = arith.constant 1 : index
    %c0_125 = arith.constant 0 : index
    %c0_126 = arith.constant 0 : index
    %98 = vector.load %arg3[%c1_124, %c0_125, %c0_126] : memref<5x1x128xf32, #tpu.memory_space<vmem>>, vector<1x1x128xf32>
    %99 = vector.shape_cast %98 : vector<1x1x128xf32> to vector<1x128xf32>
    %100 = vector.shape_cast %99 : vector<1x128xf32> to vector<1x128xf32>
    %101 = vector.broadcast %100 : vector<1x128xf32> to vector<256x128xf32>
    %c0_127 = arith.constant 0 : index
    %c0_128 = arith.constant 0 : index
    %102 = vector.load %arg7[%c0_127, %c0_128] : memref<256x128xf32, #tpu.memory_space<vmem>>, vector<256x128xf32>
    tpu.vector_store %arg7[%c0_127, %c0_128], %101 {strides = array<i32>} : memref<256x128xf32, #tpu.memory_space<vmem>>, vector<256x128xf32>,
    %c0_129 = arith.constant 0 : index
    %c0_130 = arith.constant 0 : index
    %c0_131 = arith.constant 0 : index
    %103 = vector.load %arg6[%c0_129, %c0_130, %c0_131] : memref<18x18x128xf32, #tpu.memory_space<vmem>>, vector<16x16x128xf32>
    %c0_132 = arith.constant 0 : index
    %c0_133 = arith.constant 0 : index
    %104 = vector.load %arg7[%c0_132, %c0_133] : memref<256x128xf32, #tpu.memory_space<vmem>>, vector<256x128xf32>
    %105 = vector.shape_cast %103 : vector<16x16x128xf32> to vector<256x128xf32>
    %106 = arith.truncf %105 : vector<256x128xf32> to vector<256x128xbf16>
    %c1_134 = arith.constant 1 : index
    %c0_135 = arith.constant 0 : index
    %c0_136 = arith.constant 0 : index
    %c0_137 = arith.constant 0 : index
    %107 = vector.load %arg2[%c1_134, %c0_135, %c0_136, %c0_137] : memref<5x9x128x128xbf16, #tpu.memory_space<vmem>>, vector<1x1x128x128xbf16>
    %108 = vector.shape_cast %107 : vector<1x1x128x128xbf16> to vector<128x128xbf16>
    %cst_138 = arith.constant dense<0.000000e+00> : vector<256x128xf32>
    %109 = tpu.matmul %106, %108, %cst_138 {dimension_numbers = #tpu.dot_dimension_numbers<[1], [0], [0], [1], [0, 0, 1, 1], [], []>} : vector<256x128xbf16>, vector<128x128xbf16>, vector<256x128xf32> -> vector<256x128xf32>
    %110 = arith.addf %104, %109 : vector<256x128xf32>
    %c0_139 = arith.constant 0 : index
    %c0_140 = arith.constant 0 : index
    %111 = vector.load %arg7[%c0_139, %c0_140] : memref<256x128xf32, #tpu.memory_space<vmem>>, vector<256x128xf32>
    tpu.vector_store %arg7[%c0_139, %c0_140], %110 {strides = array<i32>} : memref<256x128xf32, #tpu.memory_space<vmem>>, vector<256x128xf32>,
    %c0_141 = arith.constant 0 : index
    %c1_142 = arith.constant 1 : index
    %c0_143 = arith.constant 0 : index
    %112 = vector.load %arg6[%c0_141, %c1_142, %c0_143] : memref<18x18x128xf32, #tpu.memory_space<vmem>>, vector<16x16x128xf32>
    %c0_144 = arith.constant 0 : index
    %c0_145 = arith.constant 0 : index
    %113 = vector.load %arg7[%c0_144, %c0_145] : memref<256x128xf32, #tpu.memory_space<vmem>>, vector<256x128xf32>
    %114 = vector.shape_cast %112 : vector<16x16x128xf32> to vector<256x128xf32>
    %115 = arith.truncf %114 : vector<256x128xf32> to vector<256x128xbf16>
    %c1_146 = arith.constant 1 : index
    %c1_147 = arith.constant 1 : index
    %c0_148 = arith.constant 0 : index
    %c0_149 = arith.constant 0 : index
    %116 = vector.load %arg2[%c1_146, %c1_147, %c0_148, %c0_149] : memref<5x9x128x128xbf16, #tpu.memory_space<vmem>>, vector<1x1x128x128xbf16>
    %117 = vector.shape_cast %116 : vector<1x1x128x128xbf16> to vector<128x128xbf16>
    %cst_150 = arith.constant dense<0.000000e+00> : vector<256x128xf32>
    %118 = tpu.matmul %115, %117, %cst_150 {dimension_numbers = #tpu.dot_dimension_numbers<[1], [0], [0], [1], [0, 0, 1, 1], [], []>} : vector<256x128xbf16>, vector<128x128xbf16>, vector<256x128xf32> -> vector<256x128xf32>
    %119 = arith.addf %113, %118 : vector<256x128xf32>
    %c0_151 = arith.constant 0 : index
    %c0_152 = arith.constant 0 : index
    %120 = vector.load %arg7[%c0_151, %c0_152] : memref<256x128xf32, #tpu.memory_space<vmem>>, vector<256x128xf32>
    tpu.vector_store %arg7[%c0_151, %c0_152], %119 {strides = array<i32>} : memref<256x128xf32, #tpu.memory_space<vmem>>, vector<256x128xf32>,
    %c0_153 = arith.constant 0 : index
    %c2_154 = arith.constant 2 : index
    %c0_155 = arith.constant 0 : index
    %121 = vector.load %arg6[%c0_153, %c2_154, %c0_155] : memref<18x18x128xf32, #tpu.memory_space<vmem>>, vector<16x16x128xf32>
    %c0_156 = arith.constant 0 : index
    %c0_157 = arith.constant 0 : index
    %122 = vector.load %arg7[%c0_156, %c0_157] : memref<256x128xf32, #tpu.memory_space<vmem>>, vector<256x128xf32>
    %123 = vector.shape_cast %121 : vector<16x16x128xf32> to vector<256x128xf32>
    %124 = arith.truncf %123 : vector<256x128xf32> to vector<256x128xbf16>
    %c1_158 = arith.constant 1 : index
    %c2_159 = arith.constant 2 : index
    %c0_160 = arith.constant 0 : index
    %c0_161 = arith.constant 0 : index
    %125 = vector.load %arg2[%c1_158, %c2_159, %c0_160, %c0_161] : memref<5x9x128x128xbf16, #tpu.memory_space<vmem>>, vector<1x1x128x128xbf16>
    %126 = vector.shape_cast %125 : vector<1x1x128x128xbf16> to vector<128x128xbf16>
    %cst_162 = arith.constant dense<0.000000e+00> : vector<256x128xf32>
    %127 = tpu.matmul %124, %126, %cst_162 {dimension_numbers = #tpu.dot_dimension_numbers<[1], [0], [0], [1], [0, 0, 1, 1], [], []>} : vector<256x128xbf16>, vector<128x128xbf16>, vector<256x128xf32> -> vector<256x128xf32>
    %128 = arith.addf %122, %127 : vector<256x128xf32>
    %c0_163 = arith.constant 0 : index
    %c0_164 = arith.constant 0 : index
    %129 = vector.load %arg7[%c0_163, %c0_164] : memref<256x128xf32, #tpu.memory_space<vmem>>, vector<256x128xf32>
    tpu.vector_store %arg7[%c0_163, %c0_164], %128 {strides = array<i32>} : memref<256x128xf32, #tpu.memory_space<vmem>>, vector<256x128xf32>,
    %c1_165 = arith.constant 1 : index
    %c0_166 = arith.constant 0 : index
    %c0_167 = arith.constant 0 : index
    %130 = vector.load %arg6[%c1_165, %c0_166, %c0_167] : memref<18x18x128xf32, #tpu.memory_space<vmem>>, vector<16x16x128xf32>
    %c0_168 = arith.constant 0 : index
    %c0_169 = arith.constant 0 : index
    %131 = vector.load %arg7[%c0_168, %c0_169] : memref<256x128xf32, #tpu.memory_space<vmem>>, vector<256x128xf32>
    %132 = vector.shape_cast %130 : vector<16x16x128xf32> to vector<256x128xf32>
    %133 = arith.truncf %132 : vector<256x128xf32> to vector<256x128xbf16>
    %c1_170 = arith.constant 1 : index
    %c3_171 = arith.constant 3 : index
    %c0_172 = arith.constant 0 : index
    %c0_173 = arith.constant 0 : index
    %134 = vector.load %arg2[%c1_170, %c3_171, %c0_172, %c0_173] : memref<5x9x128x128xbf16, #tpu.memory_space<vmem>>, vector<1x1x128x128xbf16>
    %135 = vector.shape_cast %134 : vector<1x1x128x128xbf16> to vector<128x128xbf16>
    %cst_174 = arith.constant dense<0.000000e+00> : vector<256x128xf32>
    %136 = tpu.matmul %133, %135, %cst_174 {dimension_numbers = #tpu.dot_dimension_numbers<[1], [0], [0], [1], [0, 0, 1, 1], [], []>} : vector<256x128xbf16>, vector<128x128xbf16>, vector<256x128xf32> -> vector<256x128xf32>
    %137 = arith.addf %131, %136 : vector<256x128xf32>
    %c0_175 = arith.constant 0 : index
    %c0_176 = arith.constant 0 : index
    %138 = vector.load %arg7[%c0_175, %c0_176] : memref<256x128xf32, #tpu.memory_space<vmem>>, vector<256x128xf32>
    tpu.vector_store %arg7[%c0_175, %c0_176], %137 {strides = array<i32>} : memref<256x128xf32, #tpu.memory_space<vmem>>, vector<256x128xf32>,
    %c1_177 = arith.constant 1 : index
    %c1_178 = arith.constant 1 : index
    %c0_179 = arith.constant 0 : index
    %139 = vector.load %arg6[%c1_177, %c1_178, %c0_179] : memref<18x18x128xf32, #tpu.memory_space<vmem>>, vector<16x16x128xf32>
    %c0_180 = arith.constant 0 : index
    %c0_181 = arith.constant 0 : index
    %140 = vector.load %arg7[%c0_180, %c0_181] : memref<256x128xf32, #tpu.memory_space<vmem>>, vector<256x128xf32>
    %141 = vector.shape_cast %139 : vector<16x16x128xf32> to vector<256x128xf32>
    %142 = arith.truncf %141 : vector<256x128xf32> to vector<256x128xbf16>
    %c1_182 = arith.constant 1 : index
    %c4_183 = arith.constant 4 : index
    %c0_184 = arith.constant 0 : index
    %c0_185 = arith.constant 0 : index
    %143 = vector.load %arg2[%c1_182, %c4_183, %c0_184, %c0_185] : memref<5x9x128x128xbf16, #tpu.memory_space<vmem>>, vector<1x1x128x128xbf16>
    %144 = vector.shape_cast %143 : vector<1x1x128x128xbf16> to vector<128x128xbf16>
    %cst_186 = arith.constant dense<0.000000e+00> : vector<256x128xf32>
    %145 = tpu.matmul %142, %144, %cst_186 {dimension_numbers = #tpu.dot_dimension_numbers<[1], [0], [0], [1], [0, 0, 1, 1], [], []>} : vector<256x128xbf16>, vector<128x128xbf16>, vector<256x128xf32> -> vector<256x128xf32>
    %146 = arith.addf %140, %145 : vector<256x128xf32>
    %c0_187 = arith.constant 0 : index
    %c0_188 = arith.constant 0 : index
    %147 = vector.load %arg7[%c0_187, %c0_188] : memref<256x128xf32, #tpu.memory_space<vmem>>, vector<256x128xf32>
    tpu.vector_store %arg7[%c0_187, %c0_188], %146 {strides = array<i32>} : memref<256x128xf32, #tpu.memory_space<vmem>>, vector<256x128xf32>,
    %c1_189 = arith.constant 1 : index
    %c2_190 = arith.constant 2 : index
    %c0_191 = arith.constant 0 : index
    %148 = vector.load %arg6[%c1_189, %c2_190, %c0_191] : memref<18x18x128xf32, #tpu.memory_space<vmem>>, vector<16x16x128xf32>
    %c0_192 = arith.constant 0 : index
    %c0_193 = arith.constant 0 : index
    %149 = vector.load %arg7[%c0_192, %c0_193] : memref<256x128xf32, #tpu.memory_space<vmem>>, vector<256x128xf32>
    %150 = vector.shape_cast %148 : vector<16x16x128xf32> to vector<256x128xf32>
    %151 = arith.truncf %150 : vector<256x128xf32> to vector<256x128xbf16>
    %c1_194 = arith.constant 1 : index
    %c5_195 = arith.constant 5 : index
    %c0_196 = arith.constant 0 : index
    %c0_197 = arith.constant 0 : index
    %152 = vector.load %arg2[%c1_194, %c5_195, %c0_196, %c0_197] : memref<5x9x128x128xbf16, #tpu.memory_space<vmem>>, vector<1x1x128x128xbf16>
    %153 = vector.shape_cast %152 : vector<1x1x128x128xbf16> to vector<128x128xbf16>
    %cst_198 = arith.constant dense<0.000000e+00> : vector<256x128xf32>
    %154 = tpu.matmul %151, %153, %cst_198 {dimension_numbers = #tpu.dot_dimension_numbers<[1], [0], [0], [1], [0, 0, 1, 1], [], []>} : vector<256x128xbf16>, vector<128x128xbf16>, vector<256x128xf32> -> vector<256x128xf32>
    %155 = arith.addf %149, %154 : vector<256x128xf32>
    %c0_199 = arith.constant 0 : index
    %c0_200 = arith.constant 0 : index
    %156 = vector.load %arg7[%c0_199, %c0_200] : memref<256x128xf32, #tpu.memory_space<vmem>>, vector<256x128xf32>
    tpu.vector_store %arg7[%c0_199, %c0_200], %155 {strides = array<i32>} : memref<256x128xf32, #tpu.memory_space<vmem>>, vector<256x128xf32>,
    %c2_201 = arith.constant 2 : index
    %c0_202 = arith.constant 0 : index
    %c0_203 = arith.constant 0 : index
    %157 = vector.load %arg6[%c2_201, %c0_202, %c0_203] : memref<18x18x128xf32, #tpu.memory_space<vmem>>, vector<16x16x128xf32>
    %c0_204 = arith.constant 0 : index
    %c0_205 = arith.constant 0 : index
    %158 = vector.load %arg7[%c0_204, %c0_205] : memref<256x128xf32, #tpu.memory_space<vmem>>, vector<256x128xf32>
    %159 = vector.shape_cast %157 : vector<16x16x128xf32> to vector<256x128xf32>
    %160 = arith.truncf %159 : vector<256x128xf32> to vector<256x128xbf16>
    %c1_206 = arith.constant 1 : index
    %c6_207 = arith.constant 6 : index
    %c0_208 = arith.constant 0 : index
    %c0_209 = arith.constant 0 : index
    %161 = vector.load %arg2[%c1_206, %c6_207, %c0_208, %c0_209] : memref<5x9x128x128xbf16, #tpu.memory_space<vmem>>, vector<1x1x128x128xbf16>
    %162 = vector.shape_cast %161 : vector<1x1x128x128xbf16> to vector<128x128xbf16>
    %cst_210 = arith.constant dense<0.000000e+00> : vector<256x128xf32>
    %163 = tpu.matmul %160, %162, %cst_210 {dimension_numbers = #tpu.dot_dimension_numbers<[1], [0], [0], [1], [0, 0, 1, 1], [], []>} : vector<256x128xbf16>, vector<128x128xbf16>, vector<256x128xf32> -> vector<256x128xf32>
    %164 = arith.addf %158, %163 : vector<256x128xf32>
    %c0_211 = arith.constant 0 : index
    %c0_212 = arith.constant 0 : index
    %165 = vector.load %arg7[%c0_211, %c0_212] : memref<256x128xf32, #tpu.memory_space<vmem>>, vector<256x128xf32>
    tpu.vector_store %arg7[%c0_211, %c0_212], %164 {strides = array<i32>} : memref<256x128xf32, #tpu.memory_space<vmem>>, vector<256x128xf32>,
    %c2_213 = arith.constant 2 : index
    %c1_214 = arith.constant 1 : index
    %c0_215 = arith.constant 0 : index
    %166 = vector.load %arg6[%c2_213, %c1_214, %c0_215] : memref<18x18x128xf32, #tpu.memory_space<vmem>>, vector<16x16x128xf32>
    %c0_216 = arith.constant 0 : index
    %c0_217 = arith.constant 0 : index
    %167 = vector.load %arg7[%c0_216, %c0_217] : memref<256x128xf32, #tpu.memory_space<vmem>>, vector<256x128xf32>
    %168 = vector.shape_cast %166 : vector<16x16x128xf32> to vector<256x128xf32>
    %169 = arith.truncf %168 : vector<256x128xf32> to vector<256x128xbf16>
    %c1_218 = arith.constant 1 : index
    %c7_219 = arith.constant 7 : index
    %c0_220 = arith.constant 0 : index
    %c0_221 = arith.constant 0 : index
    %170 = vector.load %arg2[%c1_218, %c7_219, %c0_220, %c0_221] : memref<5x9x128x128xbf16, #tpu.memory_space<vmem>>, vector<1x1x128x128xbf16>
    %171 = vector.shape_cast %170 : vector<1x1x128x128xbf16> to vector<128x128xbf16>
    %cst_222 = arith.constant dense<0.000000e+00> : vector<256x128xf32>
    %172 = tpu.matmul %169, %171, %cst_222 {dimension_numbers = #tpu.dot_dimension_numbers<[1], [0], [0], [1], [0, 0, 1, 1], [], []>} : vector<256x128xbf16>, vector<128x128xbf16>, vector<256x128xf32> -> vector<256x128xf32>
    %173 = arith.addf %167, %172 : vector<256x128xf32>
    %c0_223 = arith.constant 0 : index
    %c0_224 = arith.constant 0 : index
    %174 = vector.load %arg7[%c0_223, %c0_224] : memref<256x128xf32, #tpu.memory_space<vmem>>, vector<256x128xf32>
    tpu.vector_store %arg7[%c0_223, %c0_224], %173 {strides = array<i32>} : memref<256x128xf32, #tpu.memory_space<vmem>>, vector<256x128xf32>,
    %c2_225 = arith.constant 2 : index
    %c2_226 = arith.constant 2 : index
    %c0_227 = arith.constant 0 : index
    %175 = vector.load %arg6[%c2_225, %c2_226, %c0_227] : memref<18x18x128xf32, #tpu.memory_space<vmem>>, vector<16x16x128xf32>
    %c0_228 = arith.constant 0 : index
    %c0_229 = arith.constant 0 : index
    %176 = vector.load %arg7[%c0_228, %c0_229] : memref<256x128xf32, #tpu.memory_space<vmem>>, vector<256x128xf32>
    %177 = vector.shape_cast %175 : vector<16x16x128xf32> to vector<256x128xf32>
    %178 = arith.truncf %177 : vector<256x128xf32> to vector<256x128xbf16>
    %c1_230 = arith.constant 1 : index
    %c8_231 = arith.constant 8 : index
    %c0_232 = arith.constant 0 : index
    %c0_233 = arith.constant 0 : index
    %179 = vector.load %arg2[%c1_230, %c8_231, %c0_232, %c0_233] : memref<5x9x128x128xbf16, #tpu.memory_space<vmem>>, vector<1x1x128x128xbf16>
    %180 = vector.shape_cast %179 : vector<1x1x128x128xbf16> to vector<128x128xbf16>
    %cst_234 = arith.constant dense<0.000000e+00> : vector<256x128xf32>
    %181 = tpu.matmul %178, %180, %cst_234 {dimension_numbers = #tpu.dot_dimension_numbers<[1], [0], [0], [1], [0, 0, 1, 1], [], []>} : vector<256x128xbf16>, vector<128x128xbf16>, vector<256x128xf32> -> vector<256x128xf32>
    %182 = arith.addf %176, %181 : vector<256x128xf32>
    %c0_235 = arith.constant 0 : index
    %c0_236 = arith.constant 0 : index
    %183 = vector.load %arg7[%c0_235, %c0_236] : memref<256x128xf32, #tpu.memory_space<vmem>>, vector<256x128xf32>
    tpu.vector_store %arg7[%c0_235, %c0_236], %182 {strides = array<i32>} : memref<256x128xf32, #tpu.memory_space<vmem>>, vector<256x128xf32>,
    %c0_237 = arith.constant 0 : index
    %c0_238 = arith.constant 0 : index
    %184 = vector.load %arg7[%c0_237, %c0_238] : memref<256x128xf32, #tpu.memory_space<vmem>>, vector<256x128xf32>
    %cst_239 = arith.constant 0.000000e+00 : f32
    %185 = vector.broadcast %cst_239 : f32 to vector<256x128xf32>
    %186 = arith.maximumf %184, %185 : vector<256x128xf32>
    %187 = vector.shape_cast %186 : vector<256x128xf32> to vector<16x16x128xf32>
    %188 = vector.shape_cast %187 : vector<16x16x128xf32> to vector<8x2x16x128xf32>
    %cst_240 = arith.constant dense<0xFF800000> : vector<8x16x128xf32>
    %189 = vector.multi_reduction <maximumf>, %188, %cst_240 [1] : vector<8x2x16x128xf32> to vector<8x16x128xf32>
    %190 = vector.shape_cast %189 : vector<8x16x128xf32> to vector<8x8x2x128xf32>
    %cst_241 = arith.constant dense<0xFF800000> : vector<8x8x128xf32>
    %191 = vector.multi_reduction <maximumf>, %190, %cst_241 [2] : vector<8x8x2x128xf32> to vector<8x8x128xf32>
    %cst_242 = arith.constant 0.000000e+00 : f32
    %192 = vector.broadcast %cst_242 : f32 to vector<18x18x128xf32>
    %c0_243 = arith.constant 0 : index
    %c0_244 = arith.constant 0 : index
    %c0_245 = arith.constant 0 : index
    %193 = vector.load %arg5[%c0_243, %c0_244, %c0_245] : memref<18x18x128xf32, #tpu.memory_space<vmem>>, vector<18x18x128xf32>
    tpu.vector_store %arg5[%c0_243, %c0_244, %c0_245], %192 {strides = array<i32>} : memref<18x18x128xf32, #tpu.memory_space<vmem>>, vector<18x18x128xf32>,
    %c1_246 = arith.constant 1 : index
    %c1_247 = arith.constant 1 : index
    %c0_248 = arith.constant 0 : index
    %194 = vector.load %arg5[%c1_246, %c1_247, %c0_248] : memref<18x18x128xf32, #tpu.memory_space<vmem>>, vector<8x8x128xf32>
    tpu.vector_store %arg5[%c1_246, %c1_247, %c0_248], %191 {strides = array<i32>} : memref<18x18x128xf32, #tpu.memory_space<vmem>>, vector<8x8x128xf32>,
    %c2_249 = arith.constant 2 : index
    %c0_250 = arith.constant 0 : index
    %c0_251 = arith.constant 0 : index
    %195 = vector.load %arg3[%c2_249, %c0_250, %c0_251] : memref<5x1x128xf32, #tpu.memory_space<vmem>>, vector<1x1x128xf32>
    %196 = vector.shape_cast %195 : vector<1x1x128xf32> to vector<1x128xf32>
    %197 = vector.shape_cast %196 : vector<1x128xf32> to vector<1x128xf32>
    %198 = vector.broadcast %197 : vector<1x128xf32> to vector<64x128xf32>
    %c0_252 = arith.constant 0 : index
    %c0_253 = arith.constant 0 : index
    %199 = vector.load %arg7[%c0_252, %c0_253] : memref<256x128xf32, #tpu.memory_space<vmem>>, vector<64x128xf32>
    tpu.vector_store %arg7[%c0_252, %c0_253], %198 {strides = array<i32>} : memref<256x128xf32, #tpu.memory_space<vmem>>, vector<64x128xf32>,
    %c0_254 = arith.constant 0 : index
    %c0_255 = arith.constant 0 : index
    %c0_256 = arith.constant 0 : index
    %200 = vector.load %arg5[%c0_254, %c0_255, %c0_256] : memref<18x18x128xf32, #tpu.memory_space<vmem>>, vector<8x8x128xf32>
    %c0_257 = arith.constant 0 : index
    %c0_258 = arith.constant 0 : index
    %201 = vector.load %arg7[%c0_257, %c0_258] : memref<256x128xf32, #tpu.memory_space<vmem>>, vector<64x128xf32>
    %202 = vector.shape_cast %200 : vector<8x8x128xf32> to vector<64x128xf32>
    %203 = arith.truncf %202 : vector<64x128xf32> to vector<64x128xbf16>
    %c2_259 = arith.constant 2 : index
    %c0_260 = arith.constant 0 : index
    %c0_261 = arith.constant 0 : index
    %c0_262 = arith.constant 0 : index
    %204 = vector.load %arg2[%c2_259, %c0_260, %c0_261, %c0_262] : memref<5x9x128x128xbf16, #tpu.memory_space<vmem>>, vector<1x1x128x128xbf16>
    %205 = vector.shape_cast %204 : vector<1x1x128x128xbf16> to vector<128x128xbf16>
    %cst_263 = arith.constant dense<0.000000e+00> : vector<64x128xf32>
    %206 = tpu.matmul %203, %205, %cst_263 {dimension_numbers = #tpu.dot_dimension_numbers<[1], [0], [0], [1], [0, 0, 1, 1], [], []>} : vector<64x128xbf16>, vector<128x128xbf16>, vector<64x128xf32> -> vector<64x128xf32>
    %207 = arith.addf %201, %206 : vector<64x128xf32>
    %c0_264 = arith.constant 0 : index
    %c0_265 = arith.constant 0 : index
    %208 = vector.load %arg7[%c0_264, %c0_265] : memref<256x128xf32, #tpu.memory_space<vmem>>, vector<64x128xf32>
    tpu.vector_store %arg7[%c0_264, %c0_265], %207 {strides = array<i32>} : memref<256x128xf32, #tpu.memory_space<vmem>>, vector<64x128xf32>,
    %c0_266 = arith.constant 0 : index
    %c1_267 = arith.constant 1 : index
    %c0_268 = arith.constant 0 : index
    %209 = vector.load %arg5[%c0_266, %c1_267, %c0_268] : memref<18x18x128xf32, #tpu.memory_space<vmem>>, vector<8x8x128xf32>
    %c0_269 = arith.constant 0 : index
    %c0_270 = arith.constant 0 : index
    %210 = vector.load %arg7[%c0_269, %c0_270] : memref<256x128xf32, #tpu.memory_space<vmem>>, vector<64x128xf32>
    %211 = vector.shape_cast %209 : vector<8x8x128xf32> to vector<64x128xf32>
    %212 = arith.truncf %211 : vector<64x128xf32> to vector<64x128xbf16>
    %c2_271 = arith.constant 2 : index
    %c1_272 = arith.constant 1 : index
    %c0_273 = arith.constant 0 : index
    %c0_274 = arith.constant 0 : index
    %213 = vector.load %arg2[%c2_271, %c1_272, %c0_273, %c0_274] : memref<5x9x128x128xbf16, #tpu.memory_space<vmem>>, vector<1x1x128x128xbf16>
    %214 = vector.shape_cast %213 : vector<1x1x128x128xbf16> to vector<128x128xbf16>
    %cst_275 = arith.constant dense<0.000000e+00> : vector<64x128xf32>
    %215 = tpu.matmul %212, %214, %cst_275 {dimension_numbers = #tpu.dot_dimension_numbers<[1], [0], [0], [1], [0, 0, 1, 1], [], []>} : vector<64x128xbf16>, vector<128x128xbf16>, vector<64x128xf32> -> vector<64x128xf32>
    %216 = arith.addf %210, %215 : vector<64x128xf32>
    %c0_276 = arith.constant 0 : index
    %c0_277 = arith.constant 0 : index
    %217 = vector.load %arg7[%c0_276, %c0_277] : memref<256x128xf32, #tpu.memory_space<vmem>>, vector<64x128xf32>
    tpu.vector_store %arg7[%c0_276, %c0_277], %216 {strides = array<i32>} : memref<256x128xf32, #tpu.memory_space<vmem>>, vector<64x128xf32>,
    %c0_278 = arith.constant 0 : index
    %c2_279 = arith.constant 2 : index
    %c0_280 = arith.constant 0 : index
    %218 = vector.load %arg5[%c0_278, %c2_279, %c0_280] : memref<18x18x128xf32, #tpu.memory_space<vmem>>, vector<8x8x128xf32>
    %c0_281 = arith.constant 0 : index
    %c0_282 = arith.constant 0 : index
    %219 = vector.load %arg7[%c0_281, %c0_282] : memref<256x128xf32, #tpu.memory_space<vmem>>, vector<64x128xf32>
    %220 = vector.shape_cast %218 : vector<8x8x128xf32> to vector<64x128xf32>
    %221 = arith.truncf %220 : vector<64x128xf32> to vector<64x128xbf16>
    %c2_283 = arith.constant 2 : index
    %c2_284 = arith.constant 2 : index
    %c0_285 = arith.constant 0 : index
    %c0_286 = arith.constant 0 : index
    %222 = vector.load %arg2[%c2_283, %c2_284, %c0_285, %c0_286] : memref<5x9x128x128xbf16, #tpu.memory_space<vmem>>, vector<1x1x128x128xbf16>
    %223 = vector.shape_cast %222 : vector<1x1x128x128xbf16> to vector<128x128xbf16>
    %cst_287 = arith.constant dense<0.000000e+00> : vector<64x128xf32>
    %224 = tpu.matmul %221, %223, %cst_287 {dimension_numbers = #tpu.dot_dimension_numbers<[1], [0], [0], [1], [0, 0, 1, 1], [], []>} : vector<64x128xbf16>, vector<128x128xbf16>, vector<64x128xf32> -> vector<64x128xf32>
    %225 = arith.addf %219, %224 : vector<64x128xf32>
    %c0_288 = arith.constant 0 : index
    %c0_289 = arith.constant 0 : index
    %226 = vector.load %arg7[%c0_288, %c0_289] : memref<256x128xf32, #tpu.memory_space<vmem>>, vector<64x128xf32>
    tpu.vector_store %arg7[%c0_288, %c0_289], %225 {strides = array<i32>} : memref<256x128xf32, #tpu.memory_space<vmem>>, vector<64x128xf32>,
    %c1_290 = arith.constant 1 : index
    %c0_291 = arith.constant 0 : index
    %c0_292 = arith.constant 0 : index
    %227 = vector.load %arg5[%c1_290, %c0_291, %c0_292] : memref<18x18x128xf32, #tpu.memory_space<vmem>>, vector<8x8x128xf32>
    %c0_293 = arith.constant 0 : index
    %c0_294 = arith.constant 0 : index
    %228 = vector.load %arg7[%c0_293, %c0_294] : memref<256x128xf32, #tpu.memory_space<vmem>>, vector<64x128xf32>
    %229 = vector.shape_cast %227 : vector<8x8x128xf32> to vector<64x128xf32>
    %230 = arith.truncf %229 : vector<64x128xf32> to vector<64x128xbf16>
    %c2_295 = arith.constant 2 : index
    %c3_296 = arith.constant 3 : index
    %c0_297 = arith.constant 0 : index
    %c0_298 = arith.constant 0 : index
    %231 = vector.load %arg2[%c2_295, %c3_296, %c0_297, %c0_298] : memref<5x9x128x128xbf16, #tpu.memory_space<vmem>>, vector<1x1x128x128xbf16>
    %232 = vector.shape_cast %231 : vector<1x1x128x128xbf16> to vector<128x128xbf16>
    %cst_299 = arith.constant dense<0.000000e+00> : vector<64x128xf32>
    %233 = tpu.matmul %230, %232, %cst_299 {dimension_numbers = #tpu.dot_dimension_numbers<[1], [0], [0], [1], [0, 0, 1, 1], [], []>} : vector<64x128xbf16>, vector<128x128xbf16>, vector<64x128xf32> -> vector<64x128xf32>
    %234 = arith.addf %228, %233 : vector<64x128xf32>
    %c0_300 = arith.constant 0 : index
    %c0_301 = arith.constant 0 : index
    %235 = vector.load %arg7[%c0_300, %c0_301] : memref<256x128xf32, #tpu.memory_space<vmem>>, vector<64x128xf32>
    tpu.vector_store %arg7[%c0_300, %c0_301], %234 {strides = array<i32>} : memref<256x128xf32, #tpu.memory_space<vmem>>, vector<64x128xf32>,
    %c1_302 = arith.constant 1 : index
    %c1_303 = arith.constant 1 : index
    %c0_304 = arith.constant 0 : index
    %236 = vector.load %arg5[%c1_302, %c1_303, %c0_304] : memref<18x18x128xf32, #tpu.memory_space<vmem>>, vector<8x8x128xf32>
    %c0_305 = arith.constant 0 : index
    %c0_306 = arith.constant 0 : index
    %237 = vector.load %arg7[%c0_305, %c0_306] : memref<256x128xf32, #tpu.memory_space<vmem>>, vector<64x128xf32>
    %238 = vector.shape_cast %236 : vector<8x8x128xf32> to vector<64x128xf32>
    %239 = arith.truncf %238 : vector<64x128xf32> to vector<64x128xbf16>
    %c2_307 = arith.constant 2 : index
    %c4_308 = arith.constant 4 : index
    %c0_309 = arith.constant 0 : index
    %c0_310 = arith.constant 0 : index
    %240 = vector.load %arg2[%c2_307, %c4_308, %c0_309, %c0_310] : memref<5x9x128x128xbf16, #tpu.memory_space<vmem>>, vector<1x1x128x128xbf16>
    %241 = vector.shape_cast %240 : vector<1x1x128x128xbf16> to vector<128x128xbf16>
    %cst_311 = arith.constant dense<0.000000e+00> : vector<64x128xf32>
    %242 = tpu.matmul %239, %241, %cst_311 {dimension_numbers = #tpu.dot_dimension_numbers<[1], [0], [0], [1], [0, 0, 1, 1], [], []>} : vector<64x128xbf16>, vector<128x128xbf16>, vector<64x128xf32> -> vector<64x128xf32>
    %243 = arith.addf %237, %242 : vector<64x128xf32>
    %c0_312 = arith.constant 0 : index
    %c0_313 = arith.constant 0 : index
    %244 = vector.load %arg7[%c0_312, %c0_313] : memref<256x128xf32, #tpu.memory_space<vmem>>, vector<64x128xf32>
    tpu.vector_store %arg7[%c0_312, %c0_313], %243 {strides = array<i32>} : memref<256x128xf32, #tpu.memory_space<vmem>>, vector<64x128xf32>,
    %c1_314 = arith.constant 1 : index
    %c2_315 = arith.constant 2 : index
    %c0_316 = arith.constant 0 : index
    %245 = vector.load %arg5[%c1_314, %c2_315, %c0_316] : memref<18x18x128xf32, #tpu.memory_space<vmem>>, vector<8x8x128xf32>
    %c0_317 = arith.constant 0 : index
    %c0_318 = arith.constant 0 : index
    %246 = vector.load %arg7[%c0_317, %c0_318] : memref<256x128xf32, #tpu.memory_space<vmem>>, vector<64x128xf32>
    %247 = vector.shape_cast %245 : vector<8x8x128xf32> to vector<64x128xf32>
    %248 = arith.truncf %247 : vector<64x128xf32> to vector<64x128xbf16>
    %c2_319 = arith.constant 2 : index
    %c5_320 = arith.constant 5 : index
    %c0_321 = arith.constant 0 : index
    %c0_322 = arith.constant 0 : index
    %249 = vector.load %arg2[%c2_319, %c5_320, %c0_321, %c0_322] : memref<5x9x128x128xbf16, #tpu.memory_space<vmem>>, vector<1x1x128x128xbf16>
    %250 = vector.shape_cast %249 : vector<1x1x128x128xbf16> to vector<128x128xbf16>
    %cst_323 = arith.constant dense<0.000000e+00> : vector<64x128xf32>
    %251 = tpu.matmul %248, %250, %cst_323 {dimension_numbers = #tpu.dot_dimension_numbers<[1], [0], [0], [1], [0, 0, 1, 1], [], []>} : vector<64x128xbf16>, vector<128x128xbf16>, vector<64x128xf32> -> vector<64x128xf32>
    %252 = arith.addf %246, %251 : vector<64x128xf32>
    %c0_324 = arith.constant 0 : index
    %c0_325 = arith.constant 0 : index
    %253 = vector.load %arg7[%c0_324, %c0_325] : memref<256x128xf32, #tpu.memory_space<vmem>>, vector<64x128xf32>
    tpu.vector_store %arg7[%c0_324, %c0_325], %252 {strides = array<i32>} : memref<256x128xf32, #tpu.memory_space<vmem>>, vector<64x128xf32>,
    %c2_326 = arith.constant 2 : index
    %c0_327 = arith.constant 0 : index
    %c0_328 = arith.constant 0 : index
    %254 = vector.load %arg5[%c2_326, %c0_327, %c0_328] : memref<18x18x128xf32, #tpu.memory_space<vmem>>, vector<8x8x128xf32>
    %c0_329 = arith.constant 0 : index
    %c0_330 = arith.constant 0 : index
    %255 = vector.load %arg7[%c0_329, %c0_330] : memref<256x128xf32, #tpu.memory_space<vmem>>, vector<64x128xf32>
    %256 = vector.shape_cast %254 : vector<8x8x128xf32> to vector<64x128xf32>
    %257 = arith.truncf %256 : vector<64x128xf32> to vector<64x128xbf16>
    %c2_331 = arith.constant 2 : index
    %c6_332 = arith.constant 6 : index
    %c0_333 = arith.constant 0 : index
    %c0_334 = arith.constant 0 : index
    %258 = vector.load %arg2[%c2_331, %c6_332, %c0_333, %c0_334] : memref<5x9x128x128xbf16, #tpu.memory_space<vmem>>, vector<1x1x128x128xbf16>
    %259 = vector.shape_cast %258 : vector<1x1x128x128xbf16> to vector<128x128xbf16>
    %cst_335 = arith.constant dense<0.000000e+00> : vector<64x128xf32>
    %260 = tpu.matmul %257, %259, %cst_335 {dimension_numbers = #tpu.dot_dimension_numbers<[1], [0], [0], [1], [0, 0, 1, 1], [], []>} : vector<64x128xbf16>, vector<128x128xbf16>, vector<64x128xf32> -> vector<64x128xf32>
    %261 = arith.addf %255, %260 : vector<64x128xf32>
    %c0_336 = arith.constant 0 : index
    %c0_337 = arith.constant 0 : index
    %262 = vector.load %arg7[%c0_336, %c0_337] : memref<256x128xf32, #tpu.memory_space<vmem>>, vector<64x128xf32>
    tpu.vector_store %arg7[%c0_336, %c0_337], %261 {strides = array<i32>} : memref<256x128xf32, #tpu.memory_space<vmem>>, vector<64x128xf32>,
    %c2_338 = arith.constant 2 : index
    %c1_339 = arith.constant 1 : index
    %c0_340 = arith.constant 0 : index
    %263 = vector.load %arg5[%c2_338, %c1_339, %c0_340] : memref<18x18x128xf32, #tpu.memory_space<vmem>>, vector<8x8x128xf32>
    %c0_341 = arith.constant 0 : index
    %c0_342 = arith.constant 0 : index
    %264 = vector.load %arg7[%c0_341, %c0_342] : memref<256x128xf32, #tpu.memory_space<vmem>>, vector<64x128xf32>
    %265 = vector.shape_cast %263 : vector<8x8x128xf32> to vector<64x128xf32>
    %266 = arith.truncf %265 : vector<64x128xf32> to vector<64x128xbf16>
    %c2_343 = arith.constant 2 : index
    %c7_344 = arith.constant 7 : index
    %c0_345 = arith.constant 0 : index
    %c0_346 = arith.constant 0 : index
    %267 = vector.load %arg2[%c2_343, %c7_344, %c0_345, %c0_346] : memref<5x9x128x128xbf16, #tpu.memory_space<vmem>>, vector<1x1x128x128xbf16>
    %268 = vector.shape_cast %267 : vector<1x1x128x128xbf16> to vector<128x128xbf16>
    %cst_347 = arith.constant dense<0.000000e+00> : vector<64x128xf32>
    %269 = tpu.matmul %266, %268, %cst_347 {dimension_numbers = #tpu.dot_dimension_numbers<[1], [0], [0], [1], [0, 0, 1, 1], [], []>} : vector<64x128xbf16>, vector<128x128xbf16>, vector<64x128xf32> -> vector<64x128xf32>
    %270 = arith.addf %264, %269 : vector<64x128xf32>
    %c0_348 = arith.constant 0 : index
    %c0_349 = arith.constant 0 : index
    %271 = vector.load %arg7[%c0_348, %c0_349] : memref<256x128xf32, #tpu.memory_space<vmem>>, vector<64x128xf32>
    tpu.vector_store %arg7[%c0_348, %c0_349], %270 {strides = array<i32>} : memref<256x128xf32, #tpu.memory_space<vmem>>, vector<64x128xf32>,
    %c2_350 = arith.constant 2 : index
    %c2_351 = arith.constant 2 : index
    %c0_352 = arith.constant 0 : index
    %272 = vector.load %arg5[%c2_350, %c2_351, %c0_352] : memref<18x18x128xf32, #tpu.memory_space<vmem>>, vector<8x8x128xf32>
    %c0_353 = arith.constant 0 : index
    %c0_354 = arith.constant 0 : index
    %273 = vector.load %arg7[%c0_353, %c0_354] : memref<256x128xf32, #tpu.memory_space<vmem>>, vector<64x128xf32>
    %274 = vector.shape_cast %272 : vector<8x8x128xf32> to vector<64x128xf32>
    %275 = arith.truncf %274 : vector<64x128xf32> to vector<64x128xbf16>
    %c2_355 = arith.constant 2 : index
    %c8_356 = arith.constant 8 : index
    %c0_357 = arith.constant 0 : index
    %c0_358 = arith.constant 0 : index
    %276 = vector.load %arg2[%c2_355, %c8_356, %c0_357, %c0_358] : memref<5x9x128x128xbf16, #tpu.memory_space<vmem>>, vector<1x1x128x128xbf16>
    %277 = vector.shape_cast %276 : vector<1x1x128x128xbf16> to vector<128x128xbf16>
    %cst_359 = arith.constant dense<0.000000e+00> : vector<64x128xf32>
    %278 = tpu.matmul %275, %277, %cst_359 {dimension_numbers = #tpu.dot_dimension_numbers<[1], [0], [0], [1], [0, 0, 1, 1], [], []>} : vector<64x128xbf16>, vector<128x128xbf16>, vector<64x128xf32> -> vector<64x128xf32>
    %279 = arith.addf %273, %278 : vector<64x128xf32>
    %c0_360 = arith.constant 0 : index
    %c0_361 = arith.constant 0 : index
    %280 = vector.load %arg7[%c0_360, %c0_361] : memref<256x128xf32, #tpu.memory_space<vmem>>, vector<64x128xf32>
    tpu.vector_store %arg7[%c0_360, %c0_361], %279 {strides = array<i32>} : memref<256x128xf32, #tpu.memory_space<vmem>>, vector<64x128xf32>,
    %c0_362 = arith.constant 0 : index
    %c0_363 = arith.constant 0 : index
    %281 = vector.load %arg7[%c0_362, %c0_363] : memref<256x128xf32, #tpu.memory_space<vmem>>, vector<64x128xf32>
    %cst_364 = arith.constant 0.000000e+00 : f32
    %282 = vector.broadcast %cst_364 : f32 to vector<64x128xf32>
    %283 = arith.maximumf %281, %282 : vector<64x128xf32>
    %284 = vector.shape_cast %283 : vector<64x128xf32> to vector<8x8x128xf32>
    %cst_365 = arith.constant 0.000000e+00 : f32
    %285 = vector.broadcast %cst_365 : f32 to vector<18x18x128xf32>
    %c0_366 = arith.constant 0 : index
    %c0_367 = arith.constant 0 : index
    %c0_368 = arith.constant 0 : index
    %286 = vector.load %arg6[%c0_366, %c0_367, %c0_368] : memref<18x18x128xf32, #tpu.memory_space<vmem>>, vector<18x18x128xf32>
    tpu.vector_store %arg6[%c0_366, %c0_367, %c0_368], %285 {strides = array<i32>} : memref<18x18x128xf32, #tpu.memory_space<vmem>>, vector<18x18x128xf32>,
    %c1_369 = arith.constant 1 : index
    %c1_370 = arith.constant 1 : index
    %c0_371 = arith.constant 0 : index
    %287 = vector.load %arg6[%c1_369, %c1_370, %c0_371] : memref<18x18x128xf32, #tpu.memory_space<vmem>>, vector<8x8x128xf32>
    tpu.vector_store %arg6[%c1_369, %c1_370, %c0_371], %284 {strides = array<i32>} : memref<18x18x128xf32, #tpu.memory_space<vmem>>, vector<8x8x128xf32>,
    %c3_372 = arith.constant 3 : index
    %c0_373 = arith.constant 0 : index
    %c0_374 = arith.constant 0 : index
    %288 = vector.load %arg3[%c3_372, %c0_373, %c0_374] : memref<5x1x128xf32, #tpu.memory_space<vmem>>, vector<1x1x128xf32>
    %289 = vector.shape_cast %288 : vector<1x1x128xf32> to vector<1x128xf32>
    %290 = vector.shape_cast %289 : vector<1x128xf32> to vector<1x128xf32>
    %291 = vector.broadcast %290 : vector<1x128xf32> to vector<64x128xf32>
    %c0_375 = arith.constant 0 : index
    %c0_376 = arith.constant 0 : index
    %292 = vector.load %arg7[%c0_375, %c0_376] : memref<256x128xf32, #tpu.memory_space<vmem>>, vector<64x128xf32>
    tpu.vector_store %arg7[%c0_375, %c0_376], %291 {strides = array<i32>} : memref<256x128xf32, #tpu.memory_space<vmem>>, vector<64x128xf32>,
    %c0_377 = arith.constant 0 : index
    %c0_378 = arith.constant 0 : index
    %c0_379 = arith.constant 0 : index
    %293 = vector.load %arg6[%c0_377, %c0_378, %c0_379] : memref<18x18x128xf32, #tpu.memory_space<vmem>>, vector<8x8x128xf32>
    %c0_380 = arith.constant 0 : index
    %c0_381 = arith.constant 0 : index
    %294 = vector.load %arg7[%c0_380, %c0_381] : memref<256x128xf32, #tpu.memory_space<vmem>>, vector<64x128xf32>
    %295 = vector.shape_cast %293 : vector<8x8x128xf32> to vector<64x128xf32>
    %296 = arith.truncf %295 : vector<64x128xf32> to vector<64x128xbf16>
    %c3_382 = arith.constant 3 : index
    %c0_383 = arith.constant 0 : index
    %c0_384 = arith.constant 0 : index
    %c0_385 = arith.constant 0 : index
    %297 = vector.load %arg2[%c3_382, %c0_383, %c0_384, %c0_385] : memref<5x9x128x128xbf16, #tpu.memory_space<vmem>>, vector<1x1x128x128xbf16>
    %298 = vector.shape_cast %297 : vector<1x1x128x128xbf16> to vector<128x128xbf16>
    %cst_386 = arith.constant dense<0.000000e+00> : vector<64x128xf32>
    %299 = tpu.matmul %296, %298, %cst_386 {dimension_numbers = #tpu.dot_dimension_numbers<[1], [0], [0], [1], [0, 0, 1, 1], [], []>} : vector<64x128xbf16>, vector<128x128xbf16>, vector<64x128xf32> -> vector<64x128xf32>
    %300 = arith.addf %294, %299 : vector<64x128xf32>
    %c0_387 = arith.constant 0 : index
    %c0_388 = arith.constant 0 : index
    %301 = vector.load %arg7[%c0_387, %c0_388] : memref<256x128xf32, #tpu.memory_space<vmem>>, vector<64x128xf32>
    tpu.vector_store %arg7[%c0_387, %c0_388], %300 {strides = array<i32>} : memref<256x128xf32, #tpu.memory_space<vmem>>, vector<64x128xf32>,
    %c0_389 = arith.constant 0 : index
    %c1_390 = arith.constant 1 : index
    %c0_391 = arith.constant 0 : index
    %302 = vector.load %arg6[%c0_389, %c1_390, %c0_391] : memref<18x18x128xf32, #tpu.memory_space<vmem>>, vector<8x8x128xf32>
    %c0_392 = arith.constant 0 : index
    %c0_393 = arith.constant 0 : index
    %303 = vector.load %arg7[%c0_392, %c0_393] : memref<256x128xf32, #tpu.memory_space<vmem>>, vector<64x128xf32>
    %304 = vector.shape_cast %302 : vector<8x8x128xf32> to vector<64x128xf32>
    %305 = arith.truncf %304 : vector<64x128xf32> to vector<64x128xbf16>
    %c3_394 = arith.constant 3 : index
    %c1_395 = arith.constant 1 : index
    %c0_396 = arith.constant 0 : index
    %c0_397 = arith.constant 0 : index
    %306 = vector.load %arg2[%c3_394, %c1_395, %c0_396, %c0_397] : memref<5x9x128x128xbf16, #tpu.memory_space<vmem>>, vector<1x1x128x128xbf16>
    %307 = vector.shape_cast %306 : vector<1x1x128x128xbf16> to vector<128x128xbf16>
    %cst_398 = arith.constant dense<0.000000e+00> : vector<64x128xf32>
    %308 = tpu.matmul %305, %307, %cst_398 {dimension_numbers = #tpu.dot_dimension_numbers<[1], [0], [0], [1], [0, 0, 1, 1], [], []>} : vector<64x128xbf16>, vector<128x128xbf16>, vector<64x128xf32> -> vector<64x128xf32>
    %309 = arith.addf %303, %308 : vector<64x128xf32>
    %c0_399 = arith.constant 0 : index
    %c0_400 = arith.constant 0 : index
    %310 = vector.load %arg7[%c0_399, %c0_400] : memref<256x128xf32, #tpu.memory_space<vmem>>, vector<64x128xf32>
    tpu.vector_store %arg7[%c0_399, %c0_400], %309 {strides = array<i32>} : memref<256x128xf32, #tpu.memory_space<vmem>>, vector<64x128xf32>,
    %c0_401 = arith.constant 0 : index
    %c2_402 = arith.constant 2 : index
    %c0_403 = arith.constant 0 : index
    %311 = vector.load %arg6[%c0_401, %c2_402, %c0_403] : memref<18x18x128xf32, #tpu.memory_space<vmem>>, vector<8x8x128xf32>
    %c0_404 = arith.constant 0 : index
    %c0_405 = arith.constant 0 : index
    %312 = vector.load %arg7[%c0_404, %c0_405] : memref<256x128xf32, #tpu.memory_space<vmem>>, vector<64x128xf32>
    %313 = vector.shape_cast %311 : vector<8x8x128xf32> to vector<64x128xf32>
    %314 = arith.truncf %313 : vector<64x128xf32> to vector<64x128xbf16>
    %c3_406 = arith.constant 3 : index
    %c2_407 = arith.constant 2 : index
    %c0_408 = arith.constant 0 : index
    %c0_409 = arith.constant 0 : index
    %315 = vector.load %arg2[%c3_406, %c2_407, %c0_408, %c0_409] : memref<5x9x128x128xbf16, #tpu.memory_space<vmem>>, vector<1x1x128x128xbf16>
    %316 = vector.shape_cast %315 : vector<1x1x128x128xbf16> to vector<128x128xbf16>
    %cst_410 = arith.constant dense<0.000000e+00> : vector<64x128xf32>
    %317 = tpu.matmul %314, %316, %cst_410 {dimension_numbers = #tpu.dot_dimension_numbers<[1], [0], [0], [1], [0, 0, 1, 1], [], []>} : vector<64x128xbf16>, vector<128x128xbf16>, vector<64x128xf32> -> vector<64x128xf32>
    %318 = arith.addf %312, %317 : vector<64x128xf32>
    %c0_411 = arith.constant 0 : index
    %c0_412 = arith.constant 0 : index
    %319 = vector.load %arg7[%c0_411, %c0_412] : memref<256x128xf32, #tpu.memory_space<vmem>>, vector<64x128xf32>
    tpu.vector_store %arg7[%c0_411, %c0_412], %318 {strides = array<i32>} : memref<256x128xf32, #tpu.memory_space<vmem>>, vector<64x128xf32>,
    %c1_413 = arith.constant 1 : index
    %c0_414 = arith.constant 0 : index
    %c0_415 = arith.constant 0 : index
    %320 = vector.load %arg6[%c1_413, %c0_414, %c0_415] : memref<18x18x128xf32, #tpu.memory_space<vmem>>, vector<8x8x128xf32>
    %c0_416 = arith.constant 0 : index
    %c0_417 = arith.constant 0 : index
    %321 = vector.load %arg7[%c0_416, %c0_417] : memref<256x128xf32, #tpu.memory_space<vmem>>, vector<64x128xf32>
    %322 = vector.shape_cast %320 : vector<8x8x128xf32> to vector<64x128xf32>
    %323 = arith.truncf %322 : vector<64x128xf32> to vector<64x128xbf16>
    %c3_418 = arith.constant 3 : index
    %c3_419 = arith.constant 3 : index
    %c0_420 = arith.constant 0 : index
    %c0_421 = arith.constant 0 : index
    %324 = vector.load %arg2[%c3_418, %c3_419, %c0_420, %c0_421] : memref<5x9x128x128xbf16, #tpu.memory_space<vmem>>, vector<1x1x128x128xbf16>
    %325 = vector.shape_cast %324 : vector<1x1x128x128xbf16> to vector<128x128xbf16>
    %cst_422 = arith.constant dense<0.000000e+00> : vector<64x128xf32>
    %326 = tpu.matmul %323, %325, %cst_422 {dimension_numbers = #tpu.dot_dimension_numbers<[1], [0], [0], [1], [0, 0, 1, 1], [], []>} : vector<64x128xbf16>, vector<128x128xbf16>, vector<64x128xf32> -> vector<64x128xf32>
    %327 = arith.addf %321, %326 : vector<64x128xf32>
    %c0_423 = arith.constant 0 : index
    %c0_424 = arith.constant 0 : index
    %328 = vector.load %arg7[%c0_423, %c0_424] : memref<256x128xf32, #tpu.memory_space<vmem>>, vector<64x128xf32>
    tpu.vector_store %arg7[%c0_423, %c0_424], %327 {strides = array<i32>} : memref<256x128xf32, #tpu.memory_space<vmem>>, vector<64x128xf32>,
    %c1_425 = arith.constant 1 : index
    %c1_426 = arith.constant 1 : index
    %c0_427 = arith.constant 0 : index
    %329 = vector.load %arg6[%c1_425, %c1_426, %c0_427] : memref<18x18x128xf32, #tpu.memory_space<vmem>>, vector<8x8x128xf32>
    %c0_428 = arith.constant 0 : index
    %c0_429 = arith.constant 0 : index
    %330 = vector.load %arg7[%c0_428, %c0_429] : memref<256x128xf32, #tpu.memory_space<vmem>>, vector<64x128xf32>
    %331 = vector.shape_cast %329 : vector<8x8x128xf32> to vector<64x128xf32>
    %332 = arith.truncf %331 : vector<64x128xf32> to vector<64x128xbf16>
    %c3_430 = arith.constant 3 : index
    %c4_431 = arith.constant 4 : index
    %c0_432 = arith.constant 0 : index
    %c0_433 = arith.constant 0 : index
    %333 = vector.load %arg2[%c3_430, %c4_431, %c0_432, %c0_433] : memref<5x9x128x128xbf16, #tpu.memory_space<vmem>>, vector<1x1x128x128xbf16>
    %334 = vector.shape_cast %333 : vector<1x1x128x128xbf16> to vector<128x128xbf16>
    %cst_434 = arith.constant dense<0.000000e+00> : vector<64x128xf32>
    %335 = tpu.matmul %332, %334, %cst_434 {dimension_numbers = #tpu.dot_dimension_numbers<[1], [0], [0], [1], [0, 0, 1, 1], [], []>} : vector<64x128xbf16>, vector<128x128xbf16>, vector<64x128xf32> -> vector<64x128xf32>
    %336 = arith.addf %330, %335 : vector<64x128xf32>
    %c0_435 = arith.constant 0 : index
    %c0_436 = arith.constant 0 : index
    %337 = vector.load %arg7[%c0_435, %c0_436] : memref<256x128xf32, #tpu.memory_space<vmem>>, vector<64x128xf32>
    tpu.vector_store %arg7[%c0_435, %c0_436], %336 {strides = array<i32>} : memref<256x128xf32, #tpu.memory_space<vmem>>, vector<64x128xf32>,
    %c1_437 = arith.constant 1 : index
    %c2_438 = arith.constant 2 : index
    %c0_439 = arith.constant 0 : index
    %338 = vector.load %arg6[%c1_437, %c2_438, %c0_439] : memref<18x18x128xf32, #tpu.memory_space<vmem>>, vector<8x8x128xf32>
    %c0_440 = arith.constant 0 : index
    %c0_441 = arith.constant 0 : index
    %339 = vector.load %arg7[%c0_440, %c0_441] : memref<256x128xf32, #tpu.memory_space<vmem>>, vector<64x128xf32>
    %340 = vector.shape_cast %338 : vector<8x8x128xf32> to vector<64x128xf32>
    %341 = arith.truncf %340 : vector<64x128xf32> to vector<64x128xbf16>
    %c3_442 = arith.constant 3 : index
    %c5_443 = arith.constant 5 : index
    %c0_444 = arith.constant 0 : index
    %c0_445 = arith.constant 0 : index
    %342 = vector.load %arg2[%c3_442, %c5_443, %c0_444, %c0_445] : memref<5x9x128x128xbf16, #tpu.memory_space<vmem>>, vector<1x1x128x128xbf16>
    %343 = vector.shape_cast %342 : vector<1x1x128x128xbf16> to vector<128x128xbf16>
    %cst_446 = arith.constant dense<0.000000e+00> : vector<64x128xf32>
    %344 = tpu.matmul %341, %343, %cst_446 {dimension_numbers = #tpu.dot_dimension_numbers<[1], [0], [0], [1], [0, 0, 1, 1], [], []>} : vector<64x128xbf16>, vector<128x128xbf16>, vector<64x128xf32> -> vector<64x128xf32>
    %345 = arith.addf %339, %344 : vector<64x128xf32>
    %c0_447 = arith.constant 0 : index
    %c0_448 = arith.constant 0 : index
    %346 = vector.load %arg7[%c0_447, %c0_448] : memref<256x128xf32, #tpu.memory_space<vmem>>, vector<64x128xf32>
    tpu.vector_store %arg7[%c0_447, %c0_448], %345 {strides = array<i32>} : memref<256x128xf32, #tpu.memory_space<vmem>>, vector<64x128xf32>,
    %c2_449 = arith.constant 2 : index
    %c0_450 = arith.constant 0 : index
    %c0_451 = arith.constant 0 : index
    %347 = vector.load %arg6[%c2_449, %c0_450, %c0_451] : memref<18x18x128xf32, #tpu.memory_space<vmem>>, vector<8x8x128xf32>
    %c0_452 = arith.constant 0 : index
    %c0_453 = arith.constant 0 : index
    %348 = vector.load %arg7[%c0_452, %c0_453] : memref<256x128xf32, #tpu.memory_space<vmem>>, vector<64x128xf32>
    %349 = vector.shape_cast %347 : vector<8x8x128xf32> to vector<64x128xf32>
    %350 = arith.truncf %349 : vector<64x128xf32> to vector<64x128xbf16>
    %c3_454 = arith.constant 3 : index
    %c6_455 = arith.constant 6 : index
    %c0_456 = arith.constant 0 : index
    %c0_457 = arith.constant 0 : index
    %351 = vector.load %arg2[%c3_454, %c6_455, %c0_456, %c0_457] : memref<5x9x128x128xbf16, #tpu.memory_space<vmem>>, vector<1x1x128x128xbf16>
    %352 = vector.shape_cast %351 : vector<1x1x128x128xbf16> to vector<128x128xbf16>
    %cst_458 = arith.constant dense<0.000000e+00> : vector<64x128xf32>
    %353 = tpu.matmul %350, %352, %cst_458 {dimension_numbers = #tpu.dot_dimension_numbers<[1], [0], [0], [1], [0, 0, 1, 1], [], []>} : vector<64x128xbf16>, vector<128x128xbf16>, vector<64x128xf32> -> vector<64x128xf32>
    %354 = arith.addf %348, %353 : vector<64x128xf32>
    %c0_459 = arith.constant 0 : index
    %c0_460 = arith.constant 0 : index
    %355 = vector.load %arg7[%c0_459, %c0_460] : memref<256x128xf32, #tpu.memory_space<vmem>>, vector<64x128xf32>
    tpu.vector_store %arg7[%c0_459, %c0_460], %354 {strides = array<i32>} : memref<256x128xf32, #tpu.memory_space<vmem>>, vector<64x128xf32>,
    %c2_461 = arith.constant 2 : index
    %c1_462 = arith.constant 1 : index
    %c0_463 = arith.constant 0 : index
    %356 = vector.load %arg6[%c2_461, %c1_462, %c0_463] : memref<18x18x128xf32, #tpu.memory_space<vmem>>, vector<8x8x128xf32>
    %c0_464 = arith.constant 0 : index
    %c0_465 = arith.constant 0 : index
    %357 = vector.load %arg7[%c0_464, %c0_465] : memref<256x128xf32, #tpu.memory_space<vmem>>, vector<64x128xf32>
    %358 = vector.shape_cast %356 : vector<8x8x128xf32> to vector<64x128xf32>
    %359 = arith.truncf %358 : vector<64x128xf32> to vector<64x128xbf16>
    %c3_466 = arith.constant 3 : index
    %c7_467 = arith.constant 7 : index
    %c0_468 = arith.constant 0 : index
    %c0_469 = arith.constant 0 : index
    %360 = vector.load %arg2[%c3_466, %c7_467, %c0_468, %c0_469] : memref<5x9x128x128xbf16, #tpu.memory_space<vmem>>, vector<1x1x128x128xbf16>
    %361 = vector.shape_cast %360 : vector<1x1x128x128xbf16> to vector<128x128xbf16>
    %cst_470 = arith.constant dense<0.000000e+00> : vector<64x128xf32>
    %362 = tpu.matmul %359, %361, %cst_470 {dimension_numbers = #tpu.dot_dimension_numbers<[1], [0], [0], [1], [0, 0, 1, 1], [], []>} : vector<64x128xbf16>, vector<128x128xbf16>, vector<64x128xf32> -> vector<64x128xf32>
    %363 = arith.addf %357, %362 : vector<64x128xf32>
    %c0_471 = arith.constant 0 : index
    %c0_472 = arith.constant 0 : index
    %364 = vector.load %arg7[%c0_471, %c0_472] : memref<256x128xf32, #tpu.memory_space<vmem>>, vector<64x128xf32>
    tpu.vector_store %arg7[%c0_471, %c0_472], %363 {strides = array<i32>} : memref<256x128xf32, #tpu.memory_space<vmem>>, vector<64x128xf32>,
    %c2_473 = arith.constant 2 : index
    %c2_474 = arith.constant 2 : index
    %c0_475 = arith.constant 0 : index
    %365 = vector.load %arg6[%c2_473, %c2_474, %c0_475] : memref<18x18x128xf32, #tpu.memory_space<vmem>>, vector<8x8x128xf32>
    %c0_476 = arith.constant 0 : index
    %c0_477 = arith.constant 0 : index
    %366 = vector.load %arg7[%c0_476, %c0_477] : memref<256x128xf32, #tpu.memory_space<vmem>>, vector<64x128xf32>
    %367 = vector.shape_cast %365 : vector<8x8x128xf32> to vector<64x128xf32>
    %368 = arith.truncf %367 : vector<64x128xf32> to vector<64x128xbf16>
    %c3_478 = arith.constant 3 : index
    %c8_479 = arith.constant 8 : index
    %c0_480 = arith.constant 0 : index
    %c0_481 = arith.constant 0 : index
    %369 = vector.load %arg2[%c3_478, %c8_479, %c0_480, %c0_481] : memref<5x9x128x128xbf16, #tpu.memory_space<vmem>>, vector<1x1x128x128xbf16>
    %370 = vector.shape_cast %369 : vector<1x1x128x128xbf16> to vector<128x128xbf16>
    %cst_482 = arith.constant dense<0.000000e+00> : vector<64x128xf32>
    %371 = tpu.matmul %368, %370, %cst_482 {dimension_numbers = #tpu.dot_dimension_numbers<[1], [0], [0], [1], [0, 0, 1, 1], [], []>} : vector<64x128xbf16>, vector<128x128xbf16>, vector<64x128xf32> -> vector<64x128xf32>
    %372 = arith.addf %366, %371 : vector<64x128xf32>
    %c0_483 = arith.constant 0 : index
    %c0_484 = arith.constant 0 : index
    %373 = vector.load %arg7[%c0_483, %c0_484] : memref<256x128xf32, #tpu.memory_space<vmem>>, vector<64x128xf32>
    tpu.vector_store %arg7[%c0_483, %c0_484], %372 {strides = array<i32>} : memref<256x128xf32, #tpu.memory_space<vmem>>, vector<64x128xf32>,
    %c0_485 = arith.constant 0 : index
    %c0_486 = arith.constant 0 : index
    %374 = vector.load %arg7[%c0_485, %c0_486] : memref<256x128xf32, #tpu.memory_space<vmem>>, vector<64x128xf32>
    %cst_487 = arith.constant 0.000000e+00 : f32
    %375 = vector.broadcast %cst_487 : f32 to vector<64x128xf32>
    %376 = arith.maximumf %374, %375 : vector<64x128xf32>
    %377 = vector.shape_cast %376 : vector<64x128xf32> to vector<8x8x128xf32>
    %378 = vector.shape_cast %377 : vector<8x8x128xf32> to vector<4x2x8x128xf32>
    %cst_488 = arith.constant dense<0xFF800000> : vector<4x8x128xf32>
    %379 = vector.multi_reduction <maximumf>, %378, %cst_488 [1] : vector<4x2x8x128xf32> to vector<4x8x128xf32>
    %380 = vector.shape_cast %379 : vector<4x8x128xf32> to vector<4x4x2x128xf32>
    %cst_489 = arith.constant dense<0xFF800000> : vector<4x4x128xf32>
    %381 = vector.multi_reduction <maximumf>, %380, %cst_489 [2] : vector<4x4x2x128xf32> to vector<4x4x128xf32>
    %cst_490 = arith.constant 0.000000e+00 : f32
    %382 = vector.broadcast %cst_490 : f32 to vector<18x18x128xf32>
    %c0_491 = arith.constant 0 : index
    %c0_492 = arith.constant 0 : index
    %c0_493 = arith.constant 0 : index
    %383 = vector.load %arg5[%c0_491, %c0_492, %c0_493] : memref<18x18x128xf32, #tpu.memory_space<vmem>>, vector<18x18x128xf32>
    tpu.vector_store %arg5[%c0_491, %c0_492, %c0_493], %382 {strides = array<i32>} : memref<18x18x128xf32, #tpu.memory_space<vmem>>, vector<18x18x128xf32>,
    %c1_494 = arith.constant 1 : index
    %c1_495 = arith.constant 1 : index
    %c0_496 = arith.constant 0 : index
    %384 = vector.load %arg5[%c1_494, %c1_495, %c0_496] : memref<18x18x128xf32, #tpu.memory_space<vmem>>, vector<4x4x128xf32>
    tpu.vector_store %arg5[%c1_494, %c1_495, %c0_496], %381 {strides = array<i32>} : memref<18x18x128xf32, #tpu.memory_space<vmem>>, vector<4x4x128xf32>,
    %c4_497 = arith.constant 4 : index
    %c0_498 = arith.constant 0 : index
    %c0_499 = arith.constant 0 : index
    %385 = vector.load %arg3[%c4_497, %c0_498, %c0_499] : memref<5x1x128xf32, #tpu.memory_space<vmem>>, vector<1x1x128xf32>
    %386 = vector.shape_cast %385 : vector<1x1x128xf32> to vector<1x128xf32>
    %387 = vector.shape_cast %386 : vector<1x128xf32> to vector<1x128xf32>
    %388 = vector.broadcast %387 : vector<1x128xf32> to vector<16x128xf32>
    %c0_500 = arith.constant 0 : index
    %c0_501 = arith.constant 0 : index
    %389 = vector.load %arg7[%c0_500, %c0_501] : memref<256x128xf32, #tpu.memory_space<vmem>>, vector<16x128xf32>
    tpu.vector_store %arg7[%c0_500, %c0_501], %388 {strides = array<i32>} : memref<256x128xf32, #tpu.memory_space<vmem>>, vector<16x128xf32>,
    %c0_502 = arith.constant 0 : index
    %c0_503 = arith.constant 0 : index
    %c0_504 = arith.constant 0 : index
    %390 = vector.load %arg5[%c0_502, %c0_503, %c0_504] : memref<18x18x128xf32, #tpu.memory_space<vmem>>, vector<4x4x128xf32>
    %c0_505 = arith.constant 0 : index
    %c0_506 = arith.constant 0 : index
    %391 = vector.load %arg7[%c0_505, %c0_506] : memref<256x128xf32, #tpu.memory_space<vmem>>, vector<16x128xf32>
    %392 = vector.shape_cast %390 : vector<4x4x128xf32> to vector<16x128xf32>
    %393 = arith.truncf %392 : vector<16x128xf32> to vector<16x128xbf16>
    %c4_507 = arith.constant 4 : index
    %c0_508 = arith.constant 0 : index
    %c0_509 = arith.constant 0 : index
    %c0_510 = arith.constant 0 : index
    %394 = vector.load %arg2[%c4_507, %c0_508, %c0_509, %c0_510] : memref<5x9x128x128xbf16, #tpu.memory_space<vmem>>, vector<1x1x128x128xbf16>
    %395 = vector.shape_cast %394 : vector<1x1x128x128xbf16> to vector<128x128xbf16>
    %cst_511 = arith.constant dense<0.000000e+00> : vector<16x128xf32>
    %396 = tpu.matmul %393, %395, %cst_511 {dimension_numbers = #tpu.dot_dimension_numbers<[1], [0], [0], [1], [0, 0, 1, 1], [], []>} : vector<16x128xbf16>, vector<128x128xbf16>, vector<16x128xf32> -> vector<16x128xf32>
    %397 = arith.addf %391, %396 : vector<16x128xf32>
    %c0_512 = arith.constant 0 : index
    %c0_513 = arith.constant 0 : index
    %398 = vector.load %arg7[%c0_512, %c0_513] : memref<256x128xf32, #tpu.memory_space<vmem>>, vector<16x128xf32>
    tpu.vector_store %arg7[%c0_512, %c0_513], %397 {strides = array<i32>} : memref<256x128xf32, #tpu.memory_space<vmem>>, vector<16x128xf32>,
    %c0_514 = arith.constant 0 : index
    %c1_515 = arith.constant 1 : index
    %c0_516 = arith.constant 0 : index
    %399 = vector.load %arg5[%c0_514, %c1_515, %c0_516] : memref<18x18x128xf32, #tpu.memory_space<vmem>>, vector<4x4x128xf32>
    %c0_517 = arith.constant 0 : index
    %c0_518 = arith.constant 0 : index
    %400 = vector.load %arg7[%c0_517, %c0_518] : memref<256x128xf32, #tpu.memory_space<vmem>>, vector<16x128xf32>
    %401 = vector.shape_cast %399 : vector<4x4x128xf32> to vector<16x128xf32>
    %402 = arith.truncf %401 : vector<16x128xf32> to vector<16x128xbf16>
    %c4_519 = arith.constant 4 : index
    %c1_520 = arith.constant 1 : index
    %c0_521 = arith.constant 0 : index
    %c0_522 = arith.constant 0 : index
    %403 = vector.load %arg2[%c4_519, %c1_520, %c0_521, %c0_522] : memref<5x9x128x128xbf16, #tpu.memory_space<vmem>>, vector<1x1x128x128xbf16>
    %404 = vector.shape_cast %403 : vector<1x1x128x128xbf16> to vector<128x128xbf16>
    %cst_523 = arith.constant dense<0.000000e+00> : vector<16x128xf32>
    %405 = tpu.matmul %402, %404, %cst_523 {dimension_numbers = #tpu.dot_dimension_numbers<[1], [0], [0], [1], [0, 0, 1, 1], [], []>} : vector<16x128xbf16>, vector<128x128xbf16>, vector<16x128xf32> -> vector<16x128xf32>
    %406 = arith.addf %400, %405 : vector<16x128xf32>
    %c0_524 = arith.constant 0 : index
    %c0_525 = arith.constant 0 : index
    %407 = vector.load %arg7[%c0_524, %c0_525] : memref<256x128xf32, #tpu.memory_space<vmem>>, vector<16x128xf32>
    tpu.vector_store %arg7[%c0_524, %c0_525], %406 {strides = array<i32>} : memref<256x128xf32, #tpu.memory_space<vmem>>, vector<16x128xf32>,
    %c0_526 = arith.constant 0 : index
    %c2_527 = arith.constant 2 : index
    %c0_528 = arith.constant 0 : index
    %408 = vector.load %arg5[%c0_526, %c2_527, %c0_528] : memref<18x18x128xf32, #tpu.memory_space<vmem>>, vector<4x4x128xf32>
    %c0_529 = arith.constant 0 : index
    %c0_530 = arith.constant 0 : index
    %409 = vector.load %arg7[%c0_529, %c0_530] : memref<256x128xf32, #tpu.memory_space<vmem>>, vector<16x128xf32>
    %410 = vector.shape_cast %408 : vector<4x4x128xf32> to vector<16x128xf32>
    %411 = arith.truncf %410 : vector<16x128xf32> to vector<16x128xbf16>
    %c4_531 = arith.constant 4 : index
    %c2_532 = arith.constant 2 : index
    %c0_533 = arith.constant 0 : index
    %c0_534 = arith.constant 0 : index
    %412 = vector.load %arg2[%c4_531, %c2_532, %c0_533, %c0_534] : memref<5x9x128x128xbf16, #tpu.memory_space<vmem>>, vector<1x1x128x128xbf16>
    %413 = vector.shape_cast %412 : vector<1x1x128x128xbf16> to vector<128x128xbf16>
    %cst_535 = arith.constant dense<0.000000e+00> : vector<16x128xf32>
    %414 = tpu.matmul %411, %413, %cst_535 {dimension_numbers = #tpu.dot_dimension_numbers<[1], [0], [0], [1], [0, 0, 1, 1], [], []>} : vector<16x128xbf16>, vector<128x128xbf16>, vector<16x128xf32> -> vector<16x128xf32>
    %415 = arith.addf %409, %414 : vector<16x128xf32>
    %c0_536 = arith.constant 0 : index
    %c0_537 = arith.constant 0 : index
    %416 = vector.load %arg7[%c0_536, %c0_537] : memref<256x128xf32, #tpu.memory_space<vmem>>, vector<16x128xf32>
    tpu.vector_store %arg7[%c0_536, %c0_537], %415 {strides = array<i32>} : memref<256x128xf32, #tpu.memory_space<vmem>>, vector<16x128xf32>,
    %c1_538 = arith.constant 1 : index
    %c0_539 = arith.constant 0 : index
    %c0_540 = arith.constant 0 : index
    %417 = vector.load %arg5[%c1_538, %c0_539, %c0_540] : memref<18x18x128xf32, #tpu.memory_space<vmem>>, vector<4x4x128xf32>
    %c0_541 = arith.constant 0 : index
    %c0_542 = arith.constant 0 : index
    %418 = vector.load %arg7[%c0_541, %c0_542] : memref<256x128xf32, #tpu.memory_space<vmem>>, vector<16x128xf32>
    %419 = vector.shape_cast %417 : vector<4x4x128xf32> to vector<16x128xf32>
    %420 = arith.truncf %419 : vector<16x128xf32> to vector<16x128xbf16>
    %c4_543 = arith.constant 4 : index
    %c3_544 = arith.constant 3 : index
    %c0_545 = arith.constant 0 : index
    %c0_546 = arith.constant 0 : index
    %421 = vector.load %arg2[%c4_543, %c3_544, %c0_545, %c0_546] : memref<5x9x128x128xbf16, #tpu.memory_space<vmem>>, vector<1x1x128x128xbf16>
    %422 = vector.shape_cast %421 : vector<1x1x128x128xbf16> to vector<128x128xbf16>
    %cst_547 = arith.constant dense<0.000000e+00> : vector<16x128xf32>
    %423 = tpu.matmul %420, %422, %cst_547 {dimension_numbers = #tpu.dot_dimension_numbers<[1], [0], [0], [1], [0, 0, 1, 1], [], []>} : vector<16x128xbf16>, vector<128x128xbf16>, vector<16x128xf32> -> vector<16x128xf32>
    %424 = arith.addf %418, %423 : vector<16x128xf32>
    %c0_548 = arith.constant 0 : index
    %c0_549 = arith.constant 0 : index
    %425 = vector.load %arg7[%c0_548, %c0_549] : memref<256x128xf32, #tpu.memory_space<vmem>>, vector<16x128xf32>
    tpu.vector_store %arg7[%c0_548, %c0_549], %424 {strides = array<i32>} : memref<256x128xf32, #tpu.memory_space<vmem>>, vector<16x128xf32>,
    %c1_550 = arith.constant 1 : index
    %c1_551 = arith.constant 1 : index
    %c0_552 = arith.constant 0 : index
    %426 = vector.load %arg5[%c1_550, %c1_551, %c0_552] : memref<18x18x128xf32, #tpu.memory_space<vmem>>, vector<4x4x128xf32>
    %c0_553 = arith.constant 0 : index
    %c0_554 = arith.constant 0 : index
    %427 = vector.load %arg7[%c0_553, %c0_554] : memref<256x128xf32, #tpu.memory_space<vmem>>, vector<16x128xf32>
    %428 = vector.shape_cast %426 : vector<4x4x128xf32> to vector<16x128xf32>
    %429 = arith.truncf %428 : vector<16x128xf32> to vector<16x128xbf16>
    %c4_555 = arith.constant 4 : index
    %c4_556 = arith.constant 4 : index
    %c0_557 = arith.constant 0 : index
    %c0_558 = arith.constant 0 : index
    %430 = vector.load %arg2[%c4_555, %c4_556, %c0_557, %c0_558] : memref<5x9x128x128xbf16, #tpu.memory_space<vmem>>, vector<1x1x128x128xbf16>
    %431 = vector.shape_cast %430 : vector<1x1x128x128xbf16> to vector<128x128xbf16>
    %cst_559 = arith.constant dense<0.000000e+00> : vector<16x128xf32>
    %432 = tpu.matmul %429, %431, %cst_559 {dimension_numbers = #tpu.dot_dimension_numbers<[1], [0], [0], [1], [0, 0, 1, 1], [], []>} : vector<16x128xbf16>, vector<128x128xbf16>, vector<16x128xf32> -> vector<16x128xf32>
    %433 = arith.addf %427, %432 : vector<16x128xf32>
    %c0_560 = arith.constant 0 : index
    %c0_561 = arith.constant 0 : index
    %434 = vector.load %arg7[%c0_560, %c0_561] : memref<256x128xf32, #tpu.memory_space<vmem>>, vector<16x128xf32>
    tpu.vector_store %arg7[%c0_560, %c0_561], %433 {strides = array<i32>} : memref<256x128xf32, #tpu.memory_space<vmem>>, vector<16x128xf32>,
    %c1_562 = arith.constant 1 : index
    %c2_563 = arith.constant 2 : index
    %c0_564 = arith.constant 0 : index
    %435 = vector.load %arg5[%c1_562, %c2_563, %c0_564] : memref<18x18x128xf32, #tpu.memory_space<vmem>>, vector<4x4x128xf32>
    %c0_565 = arith.constant 0 : index
    %c0_566 = arith.constant 0 : index
    %436 = vector.load %arg7[%c0_565, %c0_566] : memref<256x128xf32, #tpu.memory_space<vmem>>, vector<16x128xf32>
    %437 = vector.shape_cast %435 : vector<4x4x128xf32> to vector<16x128xf32>
    %438 = arith.truncf %437 : vector<16x128xf32> to vector<16x128xbf16>
    %c4_567 = arith.constant 4 : index
    %c5_568 = arith.constant 5 : index
    %c0_569 = arith.constant 0 : index
    %c0_570 = arith.constant 0 : index
    %439 = vector.load %arg2[%c4_567, %c5_568, %c0_569, %c0_570] : memref<5x9x128x128xbf16, #tpu.memory_space<vmem>>, vector<1x1x128x128xbf16>
    %440 = vector.shape_cast %439 : vector<1x1x128x128xbf16> to vector<128x128xbf16>
    %cst_571 = arith.constant dense<0.000000e+00> : vector<16x128xf32>
    %441 = tpu.matmul %438, %440, %cst_571 {dimension_numbers = #tpu.dot_dimension_numbers<[1], [0], [0], [1], [0, 0, 1, 1], [], []>} : vector<16x128xbf16>, vector<128x128xbf16>, vector<16x128xf32> -> vector<16x128xf32>
    %442 = arith.addf %436, %441 : vector<16x128xf32>
    %c0_572 = arith.constant 0 : index
    %c0_573 = arith.constant 0 : index
    %443 = vector.load %arg7[%c0_572, %c0_573] : memref<256x128xf32, #tpu.memory_space<vmem>>, vector<16x128xf32>
    tpu.vector_store %arg7[%c0_572, %c0_573], %442 {strides = array<i32>} : memref<256x128xf32, #tpu.memory_space<vmem>>, vector<16x128xf32>,
    %c2_574 = arith.constant 2 : index
    %c0_575 = arith.constant 0 : index
    %c0_576 = arith.constant 0 : index
    %444 = vector.load %arg5[%c2_574, %c0_575, %c0_576] : memref<18x18x128xf32, #tpu.memory_space<vmem>>, vector<4x4x128xf32>
    %c0_577 = arith.constant 0 : index
    %c0_578 = arith.constant 0 : index
    %445 = vector.load %arg7[%c0_577, %c0_578] : memref<256x128xf32, #tpu.memory_space<vmem>>, vector<16x128xf32>
    %446 = vector.shape_cast %444 : vector<4x4x128xf32> to vector<16x128xf32>
    %447 = arith.truncf %446 : vector<16x128xf32> to vector<16x128xbf16>
    %c4_579 = arith.constant 4 : index
    %c6_580 = arith.constant 6 : index
    %c0_581 = arith.constant 0 : index
    %c0_582 = arith.constant 0 : index
    %448 = vector.load %arg2[%c4_579, %c6_580, %c0_581, %c0_582] : memref<5x9x128x128xbf16, #tpu.memory_space<vmem>>, vector<1x1x128x128xbf16>
    %449 = vector.shape_cast %448 : vector<1x1x128x128xbf16> to vector<128x128xbf16>
    %cst_583 = arith.constant dense<0.000000e+00> : vector<16x128xf32>
    %450 = tpu.matmul %447, %449, %cst_583 {dimension_numbers = #tpu.dot_dimension_numbers<[1], [0], [0], [1], [0, 0, 1, 1], [], []>} : vector<16x128xbf16>, vector<128x128xbf16>, vector<16x128xf32> -> vector<16x128xf32>
    %451 = arith.addf %445, %450 : vector<16x128xf32>
    %c0_584 = arith.constant 0 : index
    %c0_585 = arith.constant 0 : index
    %452 = vector.load %arg7[%c0_584, %c0_585] : memref<256x128xf32, #tpu.memory_space<vmem>>, vector<16x128xf32>
    tpu.vector_store %arg7[%c0_584, %c0_585], %451 {strides = array<i32>} : memref<256x128xf32, #tpu.memory_space<vmem>>, vector<16x128xf32>,
    %c2_586 = arith.constant 2 : index
    %c1_587 = arith.constant 1 : index
    %c0_588 = arith.constant 0 : index
    %453 = vector.load %arg5[%c2_586, %c1_587, %c0_588] : memref<18x18x128xf32, #tpu.memory_space<vmem>>, vector<4x4x128xf32>
    %c0_589 = arith.constant 0 : index
    %c0_590 = arith.constant 0 : index
    %454 = vector.load %arg7[%c0_589, %c0_590] : memref<256x128xf32, #tpu.memory_space<vmem>>, vector<16x128xf32>
    %455 = vector.shape_cast %453 : vector<4x4x128xf32> to vector<16x128xf32>
    %456 = arith.truncf %455 : vector<16x128xf32> to vector<16x128xbf16>
    %c4_591 = arith.constant 4 : index
    %c7_592 = arith.constant 7 : index
    %c0_593 = arith.constant 0 : index
    %c0_594 = arith.constant 0 : index
    %457 = vector.load %arg2[%c4_591, %c7_592, %c0_593, %c0_594] : memref<5x9x128x128xbf16, #tpu.memory_space<vmem>>, vector<1x1x128x128xbf16>
    %458 = vector.shape_cast %457 : vector<1x1x128x128xbf16> to vector<128x128xbf16>
    %cst_595 = arith.constant dense<0.000000e+00> : vector<16x128xf32>
    %459 = tpu.matmul %456, %458, %cst_595 {dimension_numbers = #tpu.dot_dimension_numbers<[1], [0], [0], [1], [0, 0, 1, 1], [], []>} : vector<16x128xbf16>, vector<128x128xbf16>, vector<16x128xf32> -> vector<16x128xf32>
    %460 = arith.addf %454, %459 : vector<16x128xf32>
    %c0_596 = arith.constant 0 : index
    %c0_597 = arith.constant 0 : index
    %461 = vector.load %arg7[%c0_596, %c0_597] : memref<256x128xf32, #tpu.memory_space<vmem>>, vector<16x128xf32>
    tpu.vector_store %arg7[%c0_596, %c0_597], %460 {strides = array<i32>} : memref<256x128xf32, #tpu.memory_space<vmem>>, vector<16x128xf32>,
    %c2_598 = arith.constant 2 : index
    %c2_599 = arith.constant 2 : index
    %c0_600 = arith.constant 0 : index
    %462 = vector.load %arg5[%c2_598, %c2_599, %c0_600] : memref<18x18x128xf32, #tpu.memory_space<vmem>>, vector<4x4x128xf32>
    %c0_601 = arith.constant 0 : index
    %c0_602 = arith.constant 0 : index
    %463 = vector.load %arg7[%c0_601, %c0_602] : memref<256x128xf32, #tpu.memory_space<vmem>>, vector<16x128xf32>
    %464 = vector.shape_cast %462 : vector<4x4x128xf32> to vector<16x128xf32>
    %465 = arith.truncf %464 : vector<16x128xf32> to vector<16x128xbf16>
    %c4_603 = arith.constant 4 : index
    %c8_604 = arith.constant 8 : index
    %c0_605 = arith.constant 0 : index
    %c0_606 = arith.constant 0 : index
    %466 = vector.load %arg2[%c4_603, %c8_604, %c0_605, %c0_606] : memref<5x9x128x128xbf16, #tpu.memory_space<vmem>>, vector<1x1x128x128xbf16>
    %467 = vector.shape_cast %466 : vector<1x1x128x128xbf16> to vector<128x128xbf16>
    %cst_607 = arith.constant dense<0.000000e+00> : vector<16x128xf32>
    %468 = tpu.matmul %465, %467, %cst_607 {dimension_numbers = #tpu.dot_dimension_numbers<[1], [0], [0], [1], [0, 0, 1, 1], [], []>} : vector<16x128xbf16>, vector<128x128xbf16>, vector<16x128xf32> -> vector<16x128xf32>
    %469 = arith.addf %463, %468 : vector<16x128xf32>
    %c0_608 = arith.constant 0 : index
    %c0_609 = arith.constant 0 : index
    %470 = vector.load %arg7[%c0_608, %c0_609] : memref<256x128xf32, #tpu.memory_space<vmem>>, vector<16x128xf32>
    tpu.vector_store %arg7[%c0_608, %c0_609], %469 {strides = array<i32>} : memref<256x128xf32, #tpu.memory_space<vmem>>, vector<16x128xf32>,
    %c0_610 = arith.constant 0 : index
    %c0_611 = arith.constant 0 : index
    %471 = vector.load %arg7[%c0_610, %c0_611] : memref<256x128xf32, #tpu.memory_space<vmem>>, vector<16x128xf32>
    %cst_612 = arith.constant 0.000000e+00 : f32
    %472 = vector.broadcast %cst_612 : f32 to vector<16x128xf32>
    %473 = arith.maximumf %471, %472 : vector<16x128xf32>
    %474 = vector.shape_cast %473 : vector<16x128xf32> to vector<4x4x128xf32>
    %475 = vector.shape_cast %474 : vector<4x4x128xf32> to vector<1x4x4x128xf32>
    %c0_613 = arith.constant 0 : index
    %c0_614 = arith.constant 0 : index
    %c0_615 = arith.constant 0 : index
    %c0_616 = arith.constant 0 : index
    %476 = vector.load %arg4[%c0_613, %c0_614, %c0_615, %c0_616] : memref<1x4x4x128xf32, #tpu.memory_space<vmem>>, vector<1x4x4x128xf32>
    tpu.vector_store %arg4[%c0_613, %c0_614, %c0_615, %c0_616], %475 {strides = array<i32>} : memref<1x4x4x128xf32, #tpu.memory_space<vmem>>, vector<1x4x4x128xf32>,
    return
  }
  func.func @transform_0(%arg0: i32) -> (i32, i32, i32, i32) {
    %c0_i32 = arith.constant 0 : i32
    %c0_i32_0 = arith.constant 0 : i32
    %c0_i32_1 = arith.constant 0 : i32
    %c0_i32_2 = arith.constant 0 : i32
    return %arg0, %c0_i32, %c0_i32_0, %c0_i32_1 : i32, i32, i32, i32
  }
  func.func @transform_1(%arg0: i32) -> (i32, i32, i32, i32) {
    %c0_i32 = arith.constant 0 : i32
    %c0_i32_0 = arith.constant 0 : i32
    %c0_i32_1 = arith.constant 0 : i32
    %c0_i32_2 = arith.constant 0 : i32
    %c0_i32_3 = arith.constant 0 : i32
    return %c0_i32, %c0_i32_0, %c0_i32_1, %c0_i32_2 : i32, i32, i32, i32
  }
  func.func @transform_2(%arg0: i32) -> (i32, i32, i32) {
    %c0_i32 = arith.constant 0 : i32
    %c0_i32_0 = arith.constant 0 : i32
    %c0_i32_1 = arith.constant 0 : i32
    %c0_i32_2 = arith.constant 0 : i32
    return %c0_i32, %c0_i32_0, %c0_i32_1 : i32, i32, i32
  }
  func.func @transform_3(%arg0: i32) -> (i32, i32, i32, i32) {
    %c0_i32 = arith.constant 0 : i32
    %c0_i32_0 = arith.constant 0 : i32
    %c0_i32_1 = arith.constant 0 : i32
    %c0_i32_2 = arith.constant 0 : i32
    return %arg0, %c0_i32, %c0_i32_0, %c0_i32_1 : i32, i32, i32, i32
  }
}

</mosaic_0001>

<bundles_post_ra>
// kernel: feature_extractor_forward.1
= control target key start
LH: loop header
LB: loop body
LE: loop exit
PB: predicated region body
PF: predicated region fallthrough
CT: control target
= control target key end

     0   :  { %s17346_s12 = smov 0   ;;  %s20878_s0 = inlined_call_operand.vmem [shape: f32[2,16,16,128], index: 0, kind: input, shape index: {}]   ;;  %s20879_s1 = inlined_call_operand.vmem [shape: bf16[5,9,128,128], index: 1, kind: input, shape index: {}]   ;;  %s20880_s2 = inlined_call_operand.vmem [shape: f32[5,1,128], index: 2, kind: input, shape index: {}]   ;;  %s20881_s3 = inlined_call_operand.vmem [shape: f32[2,4,4,128], index: 3, kind: output, shape index: {}]  }
   0x1 LB: > { %s12872_s13 = sadd.s32 4294967295, %s17321_s12   ;;  %p12876_p0 = scmp.ge.s32.totalorder %s17321_s12, 1  ;;  %s17321_s12 = sphi %s17346_s12, %s13_s12  }
   0x2   : > { %p137_p1 = scmp.lt.s32.totalorder %s17321_s12, 3 }
   0x4   : > { %p138_p2 = pnand %p12876_p0, %p137_p1 }
   0x6   : > { %141 = sbr.rel (%p138_p2) target bundleno = 3091 (0xc13), region = 32 }
   0xd   : > { %v17357_v0 = vld [vmem:[%s20879_s1 + $0x80] sm:$0xff]   ;;  %v17362_v1 = vld [vmem:[%s20879_s1 + $0x88] sm:$0xff]   ;;  %v17323_v2 = vmov 0.0   ;;  %p161_p3 = scmp.lt.s32.totalorder %s12872_s13, 1  ;;  %v16930_v3 = vld [vmem:[%s20879_s1 + $0x90] sm:$0xff]   ;;  %vm7614_vm0 = vcmask 1041408  }
   0xe   : > { %172 = vst [vmem:[#allocation2] sm:$0xff] %v17323_v2  ;;  %173 = vst [vmem:[#allocation2 + $0x8] sm:$0xff] %v17323_v2  ;;  %14783 = vmatprep.subr.bf16.mxu0 %v17357_v0  ;;  %v16931_v4 = vld [vmem:[%s20879_s1 + $0x98] sm:$0xff]   ;;  %v16932_v14 = vld [vmem:[%s20879_s1 + $0xa0] sm:$0xff]   ;;  %vm8181_vm1 = vcmask 1041409   ;;  %vm8183_vm2 = vcmask 1042434  }
   0xf   : > { %174 = vst [vmem:[#allocation2 + $0x10] sm:$0x3] %v17323_v2  ;;  %175 = vst [vmem:[#allocation2 + $0x18] sm:$0xff] %v17323_v2  ;;  %14784 = vmatpush3.bf16.msra.mxu0 %v17357_v0  ;;  %s21202_s13 = smov (!%p161_p3, %s12872_s13), 1  ;;  %v16933_v19 = vld [vmem:[%s20879_s1 + $0xa8] sm:$0xff]   ;;  %v16934_v25 = vld [vmem:[%s20879_s1 + $0xb0] sm:$0xff]  }
  0x10   : > { %176 = vst [vmem:[#allocation2 + $0x20] sm:$0xff] %v17323_v2  ;;  %177 = vst [vmem:[#allocation2 + $0x28] sm:$0x3] %v17323_v2  ;;  %14785 = vmatprep.subr.bf16.mxu0 %v17362_v1  ;;  %s13956_s20 = sshll.u32 %s21202_s13, 8  ;;  %v16935_v30 = vld [vmem:[%s20879_s1 + $0xb8] sm:$0xff]   ;;  %v16936_v34 = vld [vmem:[%s20879_s1 + $0xc0] sm:$0xff]  }
  0x11   : > { %178 = vst [vmem:[#allocation2 + $0x30] sm:$0xff] %v17323_v2  ;;  %179 = vst [vmem:[#allocation2 + $0x38] sm:$0xff] %v17323_v2  ;;  %s17488_s23 = scalar_lea.vmem %s20878_s0, %s13956_s20  ;;  %v16937_v51 = vld [vmem:[%s20879_s1 + $0xc8] sm:$0xff]   ;;  %v16938_v52 = vld [vmem:[%s20879_s1 + $0xd0] sm:$0xff]   ;;  %vm8185_vm3 = vcmask 1043459   ;;  %vm8187_vm4 = vcmask 1044484  }
  0x12   : > { %180 = vst [vmem:[#allocation2 + $0x40] sm:$0x3] %v17323_v2  ;;  %181 = vst [vmem:[#allocation2 + $0x48] sm:$0xff] %v17323_v2  ;;  %v17495_v7 = vld [vmem:[%s17488_s23] sm:$0xff]  ;;  %v17498_v9 = vld [vmem:[%s17488_s23 + $0x8] sm:$0xff]  ;;  %vm8189_vm5 = vcmask 1045509  }
  0x13   : > { %182 = vst [vmem:[#allocation2 + $0x50] sm:$0xff] %v17323_v2  ;;  %183 = vst [vmem:[#allocation2 + $0x58] sm:$0x3] %v17323_v2  ;;  %14786 = vmatpush3.bf16.msra.mxu0 %v17362_v1  ;;  %v17503_v10 = vld [vmem:[%s17488_s23 + $0x10] sm:$0xff]  ;;  %v17506_v11 = vld [vmem:[%s17488_s23 + $0x18] sm:$0xff]  ;;  %vm8191_vm6 = vcmask 1046534  }
  0x14   : > { %184 = vst [vmem:[#allocation2 + $0x60] sm:$0xff] %v17323_v2  ;;  %185 = vst [vmem:[#allocation2 + $0x68] sm:$0xff] %v17323_v2  ;;  %14787 = vmatprep.subr.bf16.mxu0 %v16930_v3  ;;  %v17511_v12 = vld [vmem:[%s17488_s23 + $0x20] sm:$0xff]  ;;  %v17514_v13 = vld [vmem:[%s17488_s23 + $0x28] sm:$0xff]  ;;  %vm8193_vm7 = vcmask 1047559   ;;  %vm17325_vm8 = vmmov 0  }
  0x15   : > { %186 = vst [vmem:[#allocation2 + $0x70] sm:$0x3] %v17323_v2  ;;  %187 = vst [vmem:[#allocation2 + $0x78] sm:$0xff] %v17323_v2  ;;  %v1069_v5 = vld [vmem:[#allocation2 + $0x2] sm:$0xff]  ;;  %v17522_v15 = vld [vmem:[%s17488_s23 + $0x30] sm:$0xff]  ;;  %s13957_s27 = sshll.u32 %s21202_s13, 4 }
  0x16   : > { %188 = vst [vmem:[#allocation2 + $0x80] sm:$0xff] %v17323_v2  ;;  %189 = vst [vmem:[#allocation2 + $0x88] sm:$0x3] %v17323_v2  ;;  %v1070_v6 = vld [vmem:[#allocation2 + $0xa] sm:$0xff]  ;;  %v17525_v16 = vld [vmem:[%s17488_s23 + $0x38] sm:$0xff]  ;;  %s170_s30 = scalar_lea.vmem %s20881_s3, %s13957_s27 }
  0x17   : > { %190 = vst [vmem:[#allocation2 + $0x90] sm:$0xff] %v17323_v2  ;;  %191 = vst [vmem:[#allocation2 + $0x98] sm:$0xff] %v17323_v2  ;;  %v1133_v8 = vpack.c.bf16 %v1070_v6, %v1069_v5  ;;  %14788 = vmatpush3.bf16.msra.mxu0 %v16930_v3  ;;  %v17529_v17 = vld [vmem:[%s17488_s23 + $0x40] sm:$0xff]  ;;  %v17532_v18 = vld [vmem:[%s17488_s23 + $0x48] sm:$0xff] }
  0x18   : > { %192 = vst [vmem:[#allocation2 + $0xa0] sm:$0x3] %v17323_v2  ;;  %193 = vst [vmem:[#allocation2 + $0xa8] sm:$0xff] %v17323_v2  ;;  %14789 = vmatprep.subr.bf16.mxu0 %v16931_v4  ;;  %v17541_v20 = vld [vmem:[%s17488_s23 + $0x50] sm:$0xff]  ;;  %v17544_v21 = vld [vmem:[%s17488_s23 + $0x58] sm:$0xff] }
  0x19   : > { %194 = vst [vmem:[#allocation2 + $0xb0] sm:$0xff] %v17323_v2  ;;  %195 = vst [vmem:[#allocation2 + $0xb8] sm:$0x3] %v17323_v2  ;;  %14799 = vmatprep.mubr.bf16.mxu0 %v1133_v8  ;;  %v17547_v22 = vld [vmem:[%s17488_s23 + $0x60] sm:$0xff]  ;;  %v17552_v23 = vld [vmem:[%s17488_s23 + $0x68] sm:$0xff] }
  0x1a   : > { %196 = vst [vmem:[#allocation2 + $0xc0] sm:$0xff] %v17323_v2  ;;  %197 = vst [vmem:[#allocation2 + $0xc8] sm:$0xff] %v17323_v2  ;;  %v17557_v24 = vld [vmem:[%s17488_s23 + $0x70] sm:$0xff]  ;;  %v17563_v26 = vld [vmem:[%s17488_s23 + $0x78] sm:$0xff] }
  0x1b   : > { %198 = vst [vmem:[#allocation2 + $0xd0] sm:$0x3] %v17323_v2  ;;  %199 = vst [vmem:[#allocation2 + $0xd8] sm:$0xff] %v17323_v2  ;;  %14790 = vmatpush3.bf16.msra.mxu0 %v16931_v4  ;;  %v17568_v27 = vld [vmem:[%s17488_s23 + $0x80] sm:$0xff]  ;;  %v17571_v28 = vld [vmem:[%s17488_s23 + $0x88] sm:$0xff] }
  0x1c   : > { %200 = vst [vmem:[#allocation2 + $0xe0] sm:$0xff] %v17323_v2  ;;  %201 = vst [vmem:[#allocation2 + $0xe8] sm:$0x3] %v17323_v2  ;;  %14791 = vmatprep.subr.bf16.mxu0 %v16932_v14  ;;  %v17576_v29 = vld [vmem:[%s17488_s23 + $0x90] sm:$0xff]  ;;  %v17582_v31 = vld [vmem:[%s17488_s23 + $0x98] sm:$0xff] }
  0x1d   : > { %202 = vst [vmem:[#allocation2 + $0xf0] sm:$0xff] %v17323_v2  ;;  %203 = vst [vmem:[#allocation2 + $0xf8] sm:$0xff] %v17323_v2  ;;  %v17587_v32 = vld [vmem:[%s17488_s23 + $0xa0] sm:$0xff]  ;;  %v17590_v33 = vld [vmem:[%s17488_s23 + $0xa8] sm:$0xff] }
  0x1e   : > { %204 = vst [vmem:[#allocation2 + $0x100] sm:$0x3] %v17323_v2  ;;  %205 = vst [vmem:[#allocation2 + $0x108] sm:$0xff] %v17323_v2  ;;  %v17598_v35 = vld [vmem:[%s17488_s23 + $0xb0] sm:$0xff]  ;;  %v17603_v39 = vld [vmem:[%s17488_s23 + $0xb8] sm:$0xff] }
  0x1f   : > { %206 = vst [vmem:[#allocation2 + $0x110] sm:$0xff] %v17323_v2  ;;  %207 = vst [vmem:[#allocation2 + $0x118] sm:$0x3] %v17323_v2  ;;  %14792 = vmatpush3.bf16.msra.mxu0 %v16932_v14  ;;  %v17610_v43 = vld [vmem:[%s17488_s23 + $0xc0] sm:$0xff]  ;;  %v17613_v44 = vld [vmem:[%s17488_s23 + $0xc8] sm:$0xff] }
  0x20   : > { %208 = vst [vmem:[#allocation2 + $0x120] sm:$0xff] %v17323_v2  ;;  %209 = vst [vmem:[#allocation2 + $0x128] sm:$0xff] %v17323_v2  ;;  %14793 = vmatprep.subr.bf16.mxu0 %v16933_v19  ;;  %v17620_v46 = vld [vmem:[%s17488_s23 + $0xd0] sm:$0xff]  ;;  %v17623_v47 = vld [vmem:[%s17488_s23 + $0xd8] sm:$0xff] }
  0x21   : > { %210 = vst [vmem:[#allocation2 + $0x130] sm:$0x3] %v17323_v2  ;;  %211 = vst [vmem:[#allocation2 + $0x138] sm:$0xff] %v17323_v2  ;;  %v17630_v49 = vld [vmem:[%s17488_s23 + $0xe0] sm:$0xff]  ;;  %v17633_v50 = vld [vmem:[%s17488_s23 + $0xe8] sm:$0xff] }
  0x22   : > { %212 = vst [vmem:[#allocation2 + $0x140] sm:$0xff] %v17323_v2  ;;  %213 = vst [vmem:[#allocation2 + $0x148] sm:$0x3] %v17323_v2  ;;  %v16939_v61 = vld [vmem:[%s20879_s1 + $0xd8] sm:$0xff]   ;;  %v16940_v4 = vld [vmem:[%s20879_s1 + $0xe0] sm:$0xff]  }
  0x23   : > { %214 = vst [vmem:[#allocation2 + $0x150] sm:$0xff] %v17323_v2  ;;  %215 = vst [vmem:[#allocation2 + $0x158] sm:$0xff] %v17323_v2  ;;  %14794 = vmatpush3.bf16.msra.mxu0 %v16933_v19  ;;  %v16941_v8 = vld [vmem:[%s20879_s1 + $0xe8] sm:$0xff]  }
  0x24   : > { %216 = vst [vmem:[#allocation2 + $0x160] sm:$0x3] %v17323_v2  ;;  %217 = vst [vmem:[#allocation2 + $0x168] sm:$0xff] %v17323_v2  ;;  %14795 = vmatprep.subr.bf16.mxu0 %v16934_v25  ;;  %v16945_v19 = vld [vmem:[%s20879_s1 + $0x108] sm:$0xff]  }
  0x25   : > { %218 = vst [vmem:[#allocation2 + $0x170] sm:$0xff] %v17323_v2  ;;  %219 = vst [vmem:[#allocation2 + $0x178] sm:$0x3] %v17323_v2 }
  0x26   : > { %220 = vst [vmem:[#allocation2 + $0x180] sm:$0xff] %v17323_v2  ;;  %221 = vst [vmem:[#allocation2 + $0x188] sm:$0xff] %v17323_v2 }
  0x27   : > { %222 = vst [vmem:[#allocation2 + $0x190] sm:$0x3] %v17323_v2  ;;  %223 = vst [vmem:[#allocation2 + $0x198] sm:$0xff] %v17323_v2  ;;  %14796 = vmatpush3.bf16.msra.mxu0 %v16934_v25 }
  0x28   : > { %224 = vst [vmem:[#allocation2 + $0x1a0] sm:$0xff] %v17323_v2  ;;  %225 = vst [vmem:[#allocation2 + $0x1a8] sm:$0x3] %v17323_v2  ;;  %14797 = vmatprep.subr.bf16.mxu0 %v16935_v30 }
  0x29   : > { %3724 = vst [vmem:[#allocation3] sm:$0xff] %v17323_v2  ;;  %3725 = vst [vmem:[#allocation3 + $0x8] sm:$0xff] %v17323_v2 }
  0x2a   : > { %3726 = vst [vmem:[#allocation3 + $0x10] sm:$0x3] %v17323_v2  ;;  %3727 = vst [vmem:[#allocation3 + $0x18] sm:$0xff] %v17323_v2 }
  0x2b   : > { %3728 = vst [vmem:[#allocation3 + $0x20] sm:$0xff] %v17323_v2  ;;  %3729 = vst [vmem:[#allocation3 + $0x28] sm:$0x3] %v17323_v2  ;;  %14798 = vmatpush3.bf16.msra.mxu0 %v16935_v30 }
  0x2c   : > { %3730 = vst [vmem:[#allocation3 + $0x30] sm:$0xff] %v17323_v2  ;;  %3731 = vst [vmem:[#allocation3 + $0x38] sm:$0xff] %v17323_v2  ;;  %14831 = vmatprep.subr.bf16.mxu0 %v16936_v34 }
  0x2d   : > { %3732 = vst [vmem:[#allocation3 + $0x40] sm:$0x3] %v17323_v2  ;;  %3733 = vst [vmem:[#allocation3 + $0x48] sm:$0xff] %v17323_v2 }
  0x2e   : > { %3734 = vst [vmem:[#allocation3 + $0x50] sm:$0xff] %v17323_v2  ;;  %3735 = vst [vmem:[#allocation3 + $0x58] sm:$0x3] %v17323_v2 }
  0x2f   : > { %3736 = vst [vmem:[#allocation3 + $0x60] sm:$0xff] %v17323_v2  ;;  %3737 = vst [vmem:[#allocation3 + $0x68] sm:$0xff] %v17323_v2 }
  0x30   : > { %3738 = vst [vmem:[#allocation3 + $0x70] sm:$0x3] %v17323_v2  ;;  %3739 = vst [vmem:[#allocation3 + $0x78] sm:$0xff] %v17323_v2 }
  0x31   : > { %3740 = vst [vmem:[#allocation3 + $0x80] sm:$0xff] %v17323_v2  ;;  %3741 = vst [vmem:[#allocation3 + $0x88] sm:$0x3] %v17323_v2 }
  0x32   : > { %3742 = vst [vmem:[#allocation3 + $0x90] sm:$0xff] %v17323_v2  ;;  %3743 = vst [vmem:[#allocation3 + $0x98] sm:$0xff] %v17323_v2 }
  0x33   : > { %3744 = vst [vmem:[#allocation3 + $0xa0] sm:$0x3] %v17323_v2  ;;  %3745 = vst [vmem:[#allocation3 + $0xa8] sm:$0xff] %v17323_v2 }
  0x34   : > { %3746 = vst [vmem:[#allocation3 + $0xb0] sm:$0xff] %v17323_v2  ;;  %3747 = vst [vmem:[#allocation3 + $0xb8] sm:$0x3] %v17323_v2 }
  0x35   : > { %3748 = vst [vmem:[#allocation3 + $0xc0] sm:$0xff] %v17323_v2  ;;  %3749 = vst [vmem:[#allocation3 + $0xc8] sm:$0xff] %v17323_v2 }
  0x36   : > { %3750 = vst [vmem:[#allocation3 + $0xd0] sm:$0x3] %v17323_v2  ;;  %3751 = vst [vmem:[#allocation3 + $0xd8] sm:$0xff] %v17323_v2 }
  0x37   : > { %3752 = vst [vmem:[#allocation3 + $0xe0] sm:$0xff] %v17323_v2  ;;  %3753 = vst [vmem:[#allocation3 + $0xe8] sm:$0x3] %v17323_v2 }
  0x38   : > { %3754 = vst [vmem:[#allocation3 + $0xf0] sm:$0xff] %v17323_v2  ;;  %3755 = vst [vmem:[#allocation3 + $0xf8] sm:$0xff] %v17323_v2 }
  0x39   : > { %3756 = vst [vmem:[#allocation3 + $0x100] sm:$0x3] %v17323_v2  ;;  %3757 = vst [vmem:[#allocation3 + $0x108] sm:$0xff] %v17323_v2 }
  0x3a   : > { %3758 = vst [vmem:[#allocation3 + $0x110] sm:$0xff] %v17323_v2  ;;  %3759 = vst [vmem:[#allocation3 + $0x118] sm:$0x3] %v17323_v2 }
  0x3b   : > { %3760 = vst [vmem:[#allocation3 + $0x120] sm:$0xff] %v17323_v2  ;;  %3761 = vst [vmem:[#allocation3 + $0x128] sm:$0xff] %v17323_v2 }
  0x3c   : > { %3762 = vst [vmem:[#allocation3 + $0x130] sm:$0x3] %v17323_v2  ;;  %3763 = vst [vmem:[#allocation3 + $0x138] sm:$0xff] %v17323_v2 }
  0x3d   : > { %3764 = vst [vmem:[#allocation3 + $0x140] sm:$0xff] %v17323_v2  ;;  %3765 = vst [vmem:[#allocation3 + $0x148] sm:$0x3] %v17323_v2 }
  0x3e   : > { %3766 = vst [vmem:[#allocation3 + $0x150] sm:$0xff] %v17323_v2  ;;  %3767 = vst [vmem:[#allocation3 + $0x158] sm:$0xff] %v17323_v2 }
  0x3f   : > { %3768 = vst [vmem:[#allocation3 + $0x160] sm:$0x3] %v17323_v2  ;;  %3769 = vst [vmem:[#allocation3 + $0x168] sm:$0xff] %v17323_v2 }
  0x40   : > { %3770 = vst [vmem:[#allocation3 + $0x170] sm:$0xff] %v17323_v2  ;;  %3771 = vst [vmem:[#allocation3 + $0x178] sm:$0x3] %v17323_v2 }
  0x41   : > { %3772 = vst [vmem:[#allocation3 + $0x180] sm:$0xff] %v17323_v2  ;;  %3773 = vst [vmem:[#allocation3 + $0x188] sm:$0xff] %v17323_v2 }
  0x42   : > { %3774 = vst [vmem:[#allocation3 + $0x190] sm:$0x3] %v17323_v2  ;;  %3775 = vst [vmem:[#allocation3 + $0x198] sm:$0xff] %v17323_v2 }
  0x43   : > { %3776 = vst [vmem:[#allocation3 + $0x1a0] sm:$0xff] %v17323_v2  ;;  %3777 = vst [vmem:[#allocation3 + $0x1a8] sm:$0x3] %v17323_v2 }
  0x44   : > { %259 = vst [vmem:[#allocation2 + $0x19] sm:$0xff] %v17495_v7  ;;  %260 = vst [vmem:[#allocation2 + $0x21] sm:$0xff] %v17498_v9 }
  0x45   : > { %261 = vst [vmem:[#allocation2 + $0x31] sm:$0xff] %v17503_v10  ;;  %262 = vst [vmem:[#allocation2 + $0x39] sm:$0xff] %v17506_v11 }
  0x46   : > { %263 = vst [vmem:[#allocation2 + $0x49] sm:$0xff] %v17511_v12  ;;  %264 = vst [vmem:[#allocation2 + $0x51] sm:$0xff] %v17514_v13 }
  0x47   : > { %265 = vst [vmem:[#allocation2 + $0x61] sm:$0xff] %v17522_v15  ;;  %266 = vst [vmem:[#allocation2 + $0x69] sm:$0xff] %v17525_v16 }
  0x48   : > { %267 = vst [vmem:[#allocation2 + $0x79] sm:$0xff] %v17529_v17  ;;  %268 = vst [vmem:[#allocation2 + $0x81] sm:$0xff] %v17532_v18 }
  0x49   : > { %269 = vst [vmem:[#allocation2 + $0x91] sm:$0xff] %v17541_v20  ;;  %270 = vst [vmem:[#allocation2 + $0x99] sm:$0xff] %v17544_v21 }
  0x4a   : > { %271 = vst [vmem:[#allocation2 + $0xa9] sm:$0xff] %v17547_v22  ;;  %272 = vst [vmem:[#allocation2 + $0xb1] sm:$0xff] %v17552_v23 }
  0x4b   : > { %273 = vst [vmem:[#allocation2 + $0xc1] sm:$0xff] %v17557_v24  ;;  %274 = vst [vmem:[#allocation2 + $0xc9] sm:$0xff] %v17563_v26  ;;  %v1071_v37 = vld [vmem:[#allocation2 + $0x1a] sm:$0xff]  ;;  %v1072_v38 = vld [vmem:[#allocation2 + $0x22] sm:$0xff] }
  0x4c   : > { %275 = vst [vmem:[#allocation2 + $0xd9] sm:$0xff] %v17568_v27  ;;  %276 = vst [vmem:[#allocation2 + $0xe1] sm:$0xff] %v17571_v28  ;;  %v1073_v41 = vld [vmem:[#allocation2 + $0x32] sm:$0xff]  ;;  %v1074_v42 = vld [vmem:[#allocation2 + $0x3a] sm:$0xff]  ;;  %v17616_v45 = vpack.c.bf16 %v1072_v38, %v1071_v37 }
  0x4d   : > { %277 = vst [vmem:[#allocation2 + $0xf1] sm:$0xff] %v17576_v29  ;;  %278 = vst [vmem:[#allocation2 + $0xf9] sm:$0xff] %v17582_v31  ;;  %v17625_v48 = vpack.c.bf16 %v1074_v42, %v1073_v41  ;;  %v1075_v53 = vld [vmem:[#allocation2 + $0x4a] sm:$0xff]  ;;  %v1076_v54 = vld [vmem:[#allocation2 + $0x52] sm:$0xff] }
  0x4e   : > { %279 = vst [vmem:[#allocation2 + $0x109] sm:$0xff] %v17587_v32  ;;  %280 = vst [vmem:[#allocation2 + $0x111] sm:$0xff] %v17590_v33  ;;  %14800 = vmatmul.mubr.bf16.vlgmr.msra.gmra.mrb[0].mxu0 %v17616_v45  ;;  %v1077_v55 = vld [vmem:[#allocation2 + $0x62] sm:$0xff]  ;;  %v1078_v58 = vld [vmem:[#allocation2 + $0x6a] sm:$0xff]  ;;  %v17649_v59 = vpack.c.bf16 %v1076_v54, %v1075_v53 }
  0x4f   : > { %281 = vst [vmem:[#allocation2 + $0x121] sm:$0xff] %v17598_v35  ;;  %282 = vst [vmem:[#allocation2 + $0x129] sm:$0xff] %v17603_v39  ;;  %14832 = vmatpush3.bf16.msra.mxu0 %v16936_v34  ;;  %14803 = vmatprep.mubr.bf16.mxu0 %v17625_v48  ;;  %v17651_v60 = vpack.c.bf16 %v1078_v58, %v1077_v55  ;;  %v1079_v63 = vld [vmem:[#allocation2 + $0x7a] sm:$0xff]  ;;  %v1080_v0 = vld [vmem:[#allocation2 + $0x82] sm:$0xff] }
  0x50   : > { %283 = vst [vmem:[#allocation2 + $0x139] sm:$0xff] %v17610_v43  ;;  %284 = vst [vmem:[#allocation2 + $0x141] sm:$0xff] %v17613_v44  ;;  %14833 = vmatprep.subr.bf16.mxu0 %v16937_v51  ;;  %v1081_v2 = vld [vmem:[#allocation2 + $0x92] sm:$0xff]  ;;  %v1082_v3 = vld [vmem:[#allocation2 + $0x9a] sm:$0xff]  ;;  %v17665_v5 = vpack.c.bf16 %v1080_v0, %v1079_v63 }
  0x51   : > { %285 = vst [vmem:[#allocation2 + $0x151] sm:$0xff] %v17620_v46  ;;  %286 = vst [vmem:[#allocation2 + $0x159] sm:$0xff] %v17623_v47  ;;  %v17667_v6 = vpack.c.bf16 %v1082_v3, %v1081_v2  ;;  %v1083_v14 = vld [vmem:[#allocation2 + $0xaa] sm:$0xff]  ;;  %v1084_v25 = vld [vmem:[#allocation2 + $0xb2] sm:$0xff] }
  0x52   : > { %287 = vst [vmem:[#allocation2 + $0x169] sm:$0xff] %v17630_v49  ;;  %288 = vst [vmem:[#allocation2 + $0x171] sm:$0xff] %v17633_v50  ;;  %v1085_v30 = vld [vmem:[#allocation2 + $0xc2] sm:$0xff]  ;;  %v1086_v34 = vld [vmem:[#allocation2 + $0xca] sm:$0xff]  ;;  %v17684_v42 = vpack.c.bf16 %v1084_v25, %v1083_v14 }
  0x53   : > { %14834 = vmatpush3.bf16.msra.mxu0 %v16937_v51  ;;  %v16942_v38 = vld [vmem:[%s20879_s1 + $0xf0] sm:$0xff]   ;;  %v17687_v51 = vld [vmem:[%s17488_s23 + $0xf8] sm:$0xff]  ;;  %v1088_v55 = vld [vmem:[#allocation2 + $0xe2] sm:$0xff] }
  0x54   : > { %14835 = vmatprep.subr.bf16.mxu0 %v16938_v52  ;;  %v17682_v41 = vld [vmem:[%s17488_s23 + $0xf0] sm:$0xff]  ;;  %290 = vst [vmem:[#allocation2 + $0x189] sm:$0xff] %v17687_v51  ;;  %v16943_v53 = vld [vmem:[%s20879_s1 + $0xf8] sm:$0xff]   ;;  %v16944_v0 = vld [vmem:[%s20879_s1 + $0x100] sm:$0xff]  }
  0x55   : > { %289 = vst [vmem:[#allocation2 + $0x181] sm:$0xff] %v17682_v41  ;;  %v1087_v54 = vld [vmem:[#allocation2 + $0xda] sm:$0xff]  ;;  %v1089_v58 = vld [vmem:[#allocation2 + $0xf2] sm:$0xff]  ;;  %v1451_v40 = vld [vmem:[#allocation2 + $0xa8] sm:$0xff] }
  0x56   : > { %14804 = vmatmul.mubr.bf16.gmra.mrb[4].mxu0 %v17649_v59  ;;  %v17705_v3 = vpack.c.bf16 %v1088_v55, %v1087_v54  ;;  %v1092_v14 = vld [vmem:[#allocation2 + $0x112] sm:$0xff]  ;;  %v1093_v25 = vld [vmem:[#allocation2 + $0x122] sm:$0xff] }
  0x57   : > { %14807 = vmatprep.mubr.bf16.mxu0 %v17651_v60  ;;  %14836 = vmatpush3.bf16.msra.mxu0 %v16938_v52  ;;  %v17690_v52 = vpack.c.bf16 %v1086_v34, %v1085_v30  ;;  %v1094_v30 = vld [vmem:[#allocation2 + $0x12a] sm:$0xff]  ;;  %v1450_v56 = vld [vmem:[#allocation2 + $0x98] sm:$0xff] }
  0x58   : > { %14837 = vmatprep.subr.bf16.mxu0 %v16939_v61  ;;  %20955 = vst [vmem:[#allocation6_spill] sm:$0xff] %v17705_v3  ;;  %v17717_v55 = vpack.c.bf16 %v1094_v30, %v1093_v25  ;;  %v1098_v2 = vld [vmem:[#allocation2 + $0x15a] sm:$0xff]  ;;  %v1444_v34 = vld [vmem:[#allocation2 + $0x50] sm:$0xff] }
  0x59   : > { %20954 = vst [vmem:[#allocation5_spill] sm:$0xff] %v17690_v52  ;;  %v1100_v25 = vld [vmem:[#allocation2 + $0x172] sm:$0xff] }
  0x5a   : > { %20958 = vst [vmem:[#allocation9_spill] sm:$0xff] %v17717_v55  ;;  %v1439_v30 = vld [vmem:[#allocation2 + $0x18] sm:$0xff]  ;;  %v16946_v63 = vld [vmem:[%s20879_s1 + $0x110] sm:$0xff]  }
  0x5b   : > { %14838 = vmatpush3.bf16.msra.mxu0 %v16939_v61  ;;  %v1090_v61 = vld [vmem:[#allocation2 + $0xfa] sm:$0xff]  ;;  %v1452_v36 = vld [vmem:[#allocation2 + $0xb0] sm:$0xff] }
  0x5c   : > { %14839 = vmatprep.subr.bf16.mxu0 %v16940_v4 }
  0x5e   : > { %14808 = vmatmul.mubr.bf16.gmra.mrb[8].mxu0 %v17665_v5 }
  0x5f   : > { %14811 = vmatprep.mubr.bf16.mxu0 %v17667_v6  ;;  %14840 = vmatpush3.bf16.msra.mxu0 %v16940_v4  ;;  %v17707_v4 = vpack.c.bf16 %v1090_v61, %v1089_v58  ;;  %v1096_v58 = vld [vmem:[#allocation2 + $0x142] sm:$0xff]  ;;  %v1097_v61 = vld [vmem:[#allocation2 + $0x152] sm:$0xff] }
  0x60   : > { %14841 = vmatprep.subr.bf16.mxu0 %v16941_v8 }
  0x61   : > { %20956 = vst [vmem:[#allocation7_spill] sm:$0xff] %v17707_v4 }
  0x63   : > { %14842 = vmatpush3.bf16.msra.mxu0 %v16941_v8  ;;  %v1091_v8 = vld [vmem:[#allocation2 + $0x10a] sm:$0xff] }
  0x64   : > { %14843 = vmatprep.subr.bf16.mxu0 %v16942_v38  ;;  %v17715_v54 = vpack.c.bf16 %v1092_v14, %v1091_v8  ;;  %v17727_v8 = vpack.c.bf16 %v1098_v2, %v1097_v61  ;;  %v1099_v14 = vld [vmem:[#allocation2 + $0x16a] sm:$0xff] }
  0x65   : > { %v17735_v1 = vpack.c.bf16 %v1100_v25, %v1099_v14  ;;  %v1441_v2 = vld [vmem:[#allocation2 + $0x30] sm:$0xff]  ;;  %v1443_v61 = vld [vmem:[#allocation2 + $0x48] sm:$0xff]  ;;  %v1445_v14 = vld [vmem:[#allocation2 + $0x60] sm:$0xff] }
  0x66   : > { %14812 = vmatmul.mubr.bf16.gmra.mrb[12].mxu0 %v17684_v42  ;;  %20957 = vst [vmem:[#allocation8_spill] sm:$0xff] %v17715_v54  ;;  %20960 = vst [vmem:[#allocation11_spill] sm:$0xff] %v17727_v8  ;;  %v17746_v57 = vpack.c.bf16 %v1444_v34, %v1443_v61  ;;  %v1446_v25 = vld [vmem:[#allocation2 + $0x68] sm:$0xff]  ;;  %v16947_v34 = vld [vmem:[%s20879_s1 + $0x118] sm:$0xff]  }
  0x67   : > { %14815 = vmatprep.mubr.bf16.mxu0 %v17690_v52  ;;  %14844 = vmatpush3.bf16.msra.mxu0 %v16942_v38  ;;  %v1440_v38 = vld [vmem:[#allocation2 + $0x20] sm:$0xff]  ;;  %20961 = vst [vmem:[#allocation12_spill] sm:$0xff] %v17735_v1  ;;  %v1449_v61 = vld [vmem:[#allocation2 + $0x90] sm:$0xff] }
  0x68   : > { %14845 = vmatprep.subr.bf16.mxu0 %v16943_v53  ;;  %v16970_v52 = vld [vmem:[%s20879_s1 + $0x20] sm:$0xff]  }
  0x6b   : > { %14846 = vmatpush3.bf16.msra.mxu0 %v16943_v53  ;;  %v1095_v53 = vld [vmem:[#allocation2 + $0x13a] sm:$0xff] }
  0x6c   : > { %14879 = vmatprep.subr.bf16.mxu0 %v16944_v0  ;;  %v17725_v37 = vpack.c.bf16 %v1096_v58, %v1095_v53  ;;  %v17737_v53 = vpack.c.bf16 %v1440_v38, %v1439_v30  ;;  %v1442_v58 = vld [vmem:[#allocation2 + $0x38] sm:$0xff]  ;;  %v1448_v30 = vld [vmem:[#allocation2 + $0x80] sm:$0xff] }
  0x6d   : > { %v17741_v62 = vpack.c.bf16 %v1442_v58, %v1441_v2  ;;  %v1447_v38 = vld [vmem:[#allocation2 + $0x78] sm:$0xff]  ;;  %v17753_v2 = vpack.c.bf16 %v1446_v25, %v1445_v14  ;;  %v17765_v14 = vpack.c.bf16 %v1450_v56, %v1449_v61  ;;  %v17770_v25 = vpack.c.bf16 %v1452_v36, %v1451_v40 }
  0x6e   : > { %14816 = vmatmul.mubr.bf16.gmra.mrb[16].mxu0 %v17705_v3  ;;  %20959 = vst [vmem:[#allocation10_spill] sm:$0xff] %v17725_v37  ;;  %v17758_v58 = vpack.c.bf16 %v1448_v30, %v1447_v38  ;;  %v1453_v38 = vld [vmem:[#allocation2 + $0xc0] sm:$0xff]  ;;  %v1454_v30 = vld [vmem:[#allocation2 + $0xc8] sm:$0xff]  ;;  %v16951_v36 = vld [vmem:[%s20879_s1 + $0x138] sm:$0xff]  }
  0x6f   : > { %14819 = vmatprep.mubr.bf16.mxu0 %v17707_v4  ;;  %v17777_v56 = vpack.c.bf16 %v1454_v30, %v1453_v38  ;;  %v1458_v61 = vld [vmem:[#allocation2 + $0xf8] sm:$0xff]  ;;  %v16964_v38 = vld [vmem:[%s20879_s1] sm:$0xff]   ;;  %v16967_v3 = vld [vmem:[%s20879_s1 + $0x10] sm:$0xff]  }
  0x70   : > { %14687 = vmatprep.subr.bf16.mxu1 %v16964_v38  ;;  %v1461_v30 = vld [vmem:[#allocation2 + $0x120] sm:$0xff] }
  0x71   : > { %14688 = vmatpush3.bf16.msra.mxu1 %v16964_v38  ;;  %v1464_v4 = vld [vmem:[#allocation2 + $0x140] sm:$0xff]  ;;  %v1467_v38 = vld [vmem:[#allocation2 + $0x168] sm:$0xff] }
  0x76   : > { %14820 = vmatmul.mubr.bf16.gmra.mrb[20].mxu0 %v17715_v54  ;;  %v1462_v54 = vld [vmem:[#allocation2 + $0x128] sm:$0xff] }
  0x77   : > { %14823 = vmatprep.mubr.bf16.mxu0 %v17717_v55  ;;  %v1460_v55 = vld [vmem:[#allocation2 + $0x110] sm:$0xff] }
  0x7e   : > { %14824 = vmatmul.mubr.bf16.gmra.mrb[24].mxu0 %v17725_v37  ;;  %v1459_v37 = vld [vmem:[#allocation2 + $0x108] sm:$0xff] }
  0x7f   : > { %14827 = vmatprep.mubr.bf16.mxu0 %v17727_v8  ;;  %v1456_v8 = vld [vmem:[#allocation2 + $0xe0] sm:$0xff] }
  0x86   : > { %14828 = vmatmul.mubr.bf16.gmra.mrb[28].mxu0 %v17735_v1  ;;  %v1455_v1 = vld [vmem:[#allocation2 + $0xd8] sm:$0xff] }
  0x87   : > { %14847 = vmatprep.mubr.bf16.mxu0 %v17737_v53  ;;  %v17782_v40 = vpack.c.bf16 %v1456_v8, %v1455_v1  ;;  %v16965_v1 = vld [vmem:[%s20879_s1 + $0x8] sm:$0xff]  }
  0x88   : > { %14689 = vmatprep.subr.bf16.mxu1 %v16965_v1 }
  0x89   : > { %14690 = vmatpush3.bf16.msra.mxu1 %v16965_v1  ;;  %v1468_v1 = vld [vmem:[#allocation2 + $0x170] sm:$0xff] }
  0x8a   : > { %14691 = vmatprep.subr.bf16.mxu1 %v16967_v3 }
  0x8d   : > { %14692 = vmatpush3.bf16.msra.mxu1 %v16967_v3  ;;  %v16971_v3 = vld [vmem:[%s20879_s1 + $0x28] sm:$0xff]  }
  0x8e   : > { %14848 = vmatmul.mubr.bf16.vlgmr.msra.gmra.mrb[0].mxu0 %v17741_v62 }
  0x8f   : > { %14880 = vmatpush3.bf16.msra.mxu0 %v16944_v0  ;;  %14851 = vmatprep.mubr.bf16.mxu0 %v17746_v57  ;;  %v16948_v0 = vld [vmem:[%s20879_s1 + $0x120] sm:$0xff]  }
  0x90   : > { %14881 = vmatprep.subr.bf16.mxu0 %v16945_v19 }
  0x93   : > { %14882 = vmatpush3.bf16.msra.mxu0 %v16945_v19  ;;  %v16949_v19 = vld [vmem:[%s20879_s1 + $0x128] sm:$0xff]  }
  0x94   : > { %14883 = vmatprep.subr.bf16.mxu0 %v16946_v63 }
  0x96   : > { %14852 = vmatmul.mubr.bf16.gmra.mrb[4].mxu0 %v17753_v2 }
  0x97   : > { %14855 = vmatprep.mubr.bf16.mxu0 %v17758_v58  ;;  %14884 = vmatpush3.bf16.msra.mxu0 %v16946_v63  ;;  %v16950_v63 = vld [vmem:[%s20879_s1 + $0x130] sm:$0xff]  }
  0x98   : > { %14885 = vmatprep.subr.bf16.mxu0 %v16947_v34 }
  0x9b   : > { %14886 = vmatpush3.bf16.msra.mxu0 %v16947_v34  ;;  %v1457_v34 = vld [vmem:[#allocation2 + $0xf0] sm:$0xff] }
  0x9c   : > { %14887 = vmatprep.subr.bf16.mxu0 %v16948_v0  ;;  %v17797_v8 = vpack.c.bf16 %v1458_v61, %v1457_v34  ;;  %v1465_v34 = vld [vmem:[#allocation2 + $0x150] sm:$0xff]  ;;  %v1466_v61 = vld [vmem:[#allocation2 + $0x158] sm:$0xff] }
  0x9e   : > { %14856 = vmatmul.mubr.bf16.gmra.mrb[8].mxu0 %v17765_v14 }
  0x9f   : > { %14859 = vmatprep.mubr.bf16.mxu0 %v17770_v25  ;;  %14888 = vmatpush3.bf16.msra.mxu0 %v16948_v0  ;;  %v17788_v0 = vld [vmem:[%s20879_s1 + $0x140] sm:$0xff]  }
  0xa0   : > { %14889 = vmatprep.subr.bf16.mxu0 %v16949_v19 }
  0xa3   : > { %14890 = vmatpush3.bf16.msra.mxu0 %v16949_v19  ;;  %v17799_v19 = vpack.c.bf16 %v1460_v55, %v1459_v37  ;;  %v16968_v37 = vld [vmem:[%s20879_s1 + $0x18] sm:$0xff]   ;;  %v17810_v55 = vpack.c.bf16 %v1462_v54, %v1461_v30  ;;  %v17824_v54 = vpack.c.bf16 %v1468_v1, %v1467_v38  ;;  %v16973_v30 = vld [vmem:[%s20879_s1 + $0x30] sm:$0xff]   ;;  %v17843_v1 = vld [vmem:[#allocation2 + $0x1] sm:$0xff] }
  0xa4   : > { %14891 = vmatprep.subr.bf16.mxu0 %v16950_v63  ;;  %14693 = vmatprep.subr.bf16.mxu1 %v16968_v37 }
  0xa5   : > { %14694 = vmatpush3.bf16.msra.mxu1 %v16968_v37  ;;  %v1470_v37 = vld [vmem:[#allocation2 + $0x188] sm:$0xff] }
  0xa6   : > { %14860 = vmatmul.mubr.bf16.gmra.mrb[12].mxu0 %v17777_v56  ;;  %14695 = vmatprep.subr.bf16.mxu1 %v16970_v52 }
  0xa7   : > { %14863 = vmatprep.mubr.bf16.mxu0 %v17782_v40  ;;  %14892 = vmatpush3.bf16.msra.mxu0 %v16950_v63  ;;  %v1463_v63 = vld [vmem:[#allocation2 + $0x138] sm:$0xff] }
  0xa8   : > { %14893 = vmatprep.subr.bf16.mxu0 %v16951_v36 }
  0xa9   : > { %14696 = vmatpush3.bf16.msra.mxu1 %v16970_v52  ;;  %v16974_v52 = vld [vmem:[%s20879_s1 + $0x38] sm:$0xff]  }
  0xaa   : > { %14697 = vmatprep.subr.bf16.mxu1 %v16971_v3 }
  0xab   : > { %14894 = vmatpush3.bf16.msra.mxu0 %v16951_v36  ;;  %v17812_v36 = vpack.c.bf16 %v1464_v4, %v1463_v63  ;;  %v17822_v4 = vpack.c.bf16 %v1466_v61, %v1465_v34  ;;  %v1469_v63 = vld [vmem:[#allocation2 + $0x180] sm:$0xff] }
  0xac   : > { %14927 = vmatprep.subr.bf16.mxu0 %v17788_v0  ;;  %v17834_v34 = vpack.c.bf16 %v1470_v37, %v1469_v63  ;;  %v17837_v61 = vld [vmem:[#allocation2] sm:$0xff]  ;;  %v20963_v63 = vpack.c.bf16 %v17506_v11, %v17503_v10  ;;  %v20965_v10 = vpack.c.bf16 %v17525_v16, %v17522_v15  ;;  %v20967_v15 = vpack.c.bf16 %v17544_v21, %v17541_v20  ;;  %v16958_v16 = vld [vmem:[%s20879_s1 + $0x170] sm:$0xff]  }
  0xad   : > { %14698 = vmatpush3.bf16.msra.mxu1 %v16971_v3  ;;  %v17841_v38 = vpack.c.bf16 %v17837_v61, %v17837_v61  ;;  %v20962_v3 = vpack.c.bf16 %v17498_v9, %v17495_v7  ;;  %8063 = vst [vmem:[#allocation2] sm:$0xff] %v17837_v61  ;;  %v16954_v7 = vld [vmem:[%s20879_s1 + $0x150] sm:$0xff]   ;;  %v20964_v9 = vpack.c.bf16 %v17514_v13, %v17511_v12  ;;  %v16956_v11 = vld [vmem:[%s20879_s1 + $0x160] sm:$0xff]   ;;  %v16957_v13 = vld [vmem:[%s20879_s1 + $0x168] sm:$0xff]  }
  0xae   : > { %14864 = vmatmul.mubr.bf16.gmra.mrb[16].mxu0 %v17797_v8  ;;  %14699 = vmatprep.subr.bf16.mxu1 %v16973_v30  ;;  %v20966_v12 = vpack.c.bf16 %v17532_v18, %v17529_v17  ;;  %v20968_v17 = vpack.c.bf16 %v17552_v23, %v17547_v22  ;;  %v16959_v18 = vld [vmem:[%s20879_s1 + $0x178] sm:$0xff]   ;;  %v20969_v20 = vpack.c.bf16 %v17563_v26, %v17557_v24  ;;  %v17904_v21 = vld [vmem:[%s20879_s1 + $0x180] sm:$0xff]   ;;  %v16983_v26 = vld [vmem:[%s20879_s1 + $0x50] sm:$0xff]  }
  0xaf   : > { %14867 = vmatprep.mubr.bf16.mxu0 %v17799_v19  ;;  %14703 = vmatprep.mubr.bf16.mxu1 %v17841_v38  ;;  %v16980_v22 = vld [vmem:[%s20879_s1 + $0x40] sm:$0xff]   ;;  %v20970_v23 = vpack.c.bf16 %v17571_v28, %v17568_v27  ;;  %v20971_v24 = vpack.c.bf16 %v17582_v31, %v17576_v29  ;;  %v20972_v27 = vpack.c.bf16 %v17590_v33, %v17587_v32  ;;  %v16984_v28 = vld [vmem:[%s20879_s1 + $0x58] sm:$0xff]   ;;  %v16987_v33 = vld [vmem:[%s20879_s1 + $0x68] sm:$0xff]  }
  0xb0   : > { %v20973_v29 = vpack.c.bf16 %v17603_v39, %v17598_v35  ;;  %v16986_v31 = vld [vmem:[%s20879_s1 + $0x60] sm:$0xff]   ;;  %v20974_v32 = vpack.c.bf16 %v17613_v44, %v17610_v43  ;;  %v20975_v35 = vpack.c.bf16 %v17623_v47, %v17620_v46  ;;  %v16989_v39 = vld [vmem:[%s20879_s1 + $0x70] sm:$0xff]   ;;  %v20976_v43 = vpack.c.bf16 %v17633_v50, %v17630_v49  ;;  %v16990_v44 = vld [vmem:[%s20879_s1 + $0x78] sm:$0xff]  }
  0xb1   : > { %14700 = vmatpush3.bf16.msra.mxu1 %v16973_v30  ;;  %v16953_v30 = vld [vmem:[%s20879_s1 + $0x148] sm:$0xff]   ;;  %v20977_v47 = vpack.c.bf16 %v17687_v51, %v17682_v41  ;;  %v701_v49 = vld [vmem:[#allocation2 + $0x19] sm:$0xff]  ;;  %v2920_v41 = vld [vmem:[#allocation2 + $0x31] sm:$0xff] }
  0xb2   : > { %14701 = vmatprep.subr.bf16.mxu1 %v16974_v52  ;;  %v700_v46 = vld [vmem:[#allocation2 + $0x9] sm:$0xff]  ;;  %v702_v50 = vld [vmem:[#allocation2 + $0x21] sm:$0xff]  ;;  %8066 = vst [vmem:[#allocation2 + $0x18] sm:$0xff] %v17837_v61  ;;  %v2921_v51 = vld [vmem:[#allocation2 + $0x39] sm:$0xff] }
  0xb3   : > { %v763_v37 = vpack.c.bf16 %v700_v46, %v17843_v1  ;;  %8064 = vst [vmem:[#allocation2 + $0x8] sm:$0xff] %v17837_v61  ;;  %8065 = vst [vmem:[#allocation2 + $0x10] sm:$0x3] %v17837_v61  ;;  %v17971_v1 = vpack.c.bf16 %v2921_v51, %v2920_v41  ;;  %v20981_v46 = vld [vmem:[#allocation8_spill] sm:$0xff] }
  0xb4   : > { %11580 = vst [vmem:[#allocation2 + $0x10] sm:$0x3] %v17837_v61  ;;  %8068 = vst [vmem:[#allocation2 + $0x28] sm:$0x3] %v17837_v61  ;;  %v2944_v41 = vld [vmem:[#allocation2 + $0x151] sm:$0xff]  ;;  %v2945_v51 = vld [vmem:[#allocation2 + $0x159] sm:$0xff] }
  0xb5   : > { %14702 = vmatpush3.bf16.msra.mxu1 %v16974_v52  ;;  %v764_v52 = vpack.c.bf16 %v702_v50, %v701_v49  ;;  %8067 = vst [vmem:[#allocation2 + $0x20] sm:$0xff] %v17837_v61  ;;  %11583 = vst [vmem:[#allocation2 + $0x28] sm:$0x3] %v17837_v61  ;;  %v2924_v61 = vld [vmem:[#allocation2 + $0x61] sm:$0xff]  ;;  %v2942_v49 = vld [vmem:[#allocation2 + $0x139] sm:$0xff] }
  0xb6   : > { %14868 = vmatmul.mubr.bf16.gmra.mrb[20].mxu0 %v17810_v55  ;;  %14735 = vmatprep.subr.bf16.mxu1 %v16980_v22  ;;  %v2943_v50 = vld [vmem:[#allocation2 + $0x141] sm:$0xff] }
  0xb7   : > { %14871 = vmatprep.mubr.bf16.mxu0 %v17812_v36 }
  0xb8   : > { %14704 = vmatmul.mubr.bf16.vlgmr.msra.gmra.mrb[0].mxu1 %v17737_v53  ;;  %v16955_v53 = vld [vmem:[%s20879_s1 + $0x158] sm:$0xff]  }
  0xb9   : > { %14707 = vmatprep.mubr.bf16.mxu1 %v17741_v62  ;;  %14736 = vmatpush3.bf16.msra.mxu1 %v16980_v22 }
  0xbe   : > { %14872 = vmatmul.mubr.bf16.gmra.mrb[24].mxu0 %v17822_v4 }
  0xbf   : > { %14875 = vmatprep.mubr.bf16.mxu0 %v17824_v54 }
  0xc0   : > { %14708 = vmatmul.mubr.bf16.gmra.mrb[4].mxu1 %v17746_v57 }
  0xc1   : > { %14711 = vmatprep.mubr.bf16.mxu1 %v17753_v2 }
  0xc6   : > { %14876 = vmatmul.mubr.bf16.gmra.mrb[28].mxu0 %v17834_v34 }
  0xc7   : > { %14895 = vmatprep.mubr.bf16.mxu0 %v20962_v3  ;;  %v2922_v3 = vld [vmem:[#allocation2 + $0x49] sm:$0xff] }
  0xc8   : > { %14712 = vmatmul.mubr.bf16.gmra.mrb[8].mxu1 %v17758_v58 }
  0xc9   : > { %14715 = vmatprep.mubr.bf16.mxu1 %v17765_v14 }
  0xce   : > { %14896 = vmatmul.mubr.bf16.vlgmr.msra.gmra.mrb[0].mxu0 %v20963_v63 }
  0xcf   : > { %14928 = vmatpush3.bf16.msra.mxu0 %v17788_v0  ;;  %14899 = vmatprep.mubr.bf16.mxu0 %v20964_v9  ;;  %v16981_v0 = vld [vmem:[%s20879_s1 + $0x48] sm:$0xff]   ;;  %v16962_v9 = vld [vmem:[%s20879_s1 + $0x190] sm:$0xff]  }
  0xd0   : > { %14929 = vmatprep.subr.bf16.mxu0 %v16953_v30  ;;  %14716 = vmatmul.mubr.bf16.gmra.mrb[12].mxu1 %v17770_v25 }
  0xd1   : > { %14719 = vmatprep.mubr.bf16.mxu1 %v17777_v56  ;;  %14737 = vmatprep.subr.bf16.mxu1 %v16981_v0 }
  0xd2   : > { %14738 = vmatpush3.bf16.msra.mxu1 %v16981_v0  ;;  %v2934_v0 = vld [vmem:[#allocation2 + $0xd9] sm:$0xff] }
  0xd3   : > { %14930 = vmatpush3.bf16.msra.mxu0 %v16953_v30  ;;  %14739 = vmatprep.subr.bf16.mxu1 %v16983_v26  ;;  %v2923_v30 = vld [vmem:[#allocation2 + $0x51] sm:$0xff] }
  0xd4   : > { %14931 = vmatprep.subr.bf16.mxu0 %v16954_v7  ;;  %v17980_v63 = vpack.c.bf16 %v2923_v30, %v2922_v3  ;;  %v18041_v3 = vpack.c.bf16 %v2943_v50, %v2942_v49  ;;  %v18043_v30 = vpack.c.bf16 %v2945_v51, %v2944_v41  ;;  %v18159_v49 = vld [vmem:[#allocation2 + $0x112] sm:$0xff]  ;;  %v18175_v50 = vld [vmem:[#allocation2 + $0x122] sm:$0xff]  ;;  %v18185_v51 = vld [vmem:[#allocation2 + $0x13a] sm:$0xff] }
  0xd6   : > { %14900 = vmatmul.mubr.bf16.gmra.mrb[4].mxu0 %v20965_v10  ;;  %14740 = vmatpush3.bf16.msra.mxu1 %v16983_v26  ;;  %v2926_v10 = vld [vmem:[#allocation2 + $0x79] sm:$0xff]  ;;  %v2936_v26 = vld [vmem:[#allocation2 + $0xf1] sm:$0xff] }
  0xd7   : > { %14903 = vmatprep.mubr.bf16.mxu0 %v20966_v12  ;;  %14932 = vmatpush3.bf16.msra.mxu0 %v16954_v7  ;;  %v2925_v7 = vld [vmem:[#allocation2 + $0x69] sm:$0xff]  ;;  %v2929_v12 = vld [vmem:[#allocation2 + $0x99] sm:$0xff] }
  0xd8   : > { %14933 = vmatprep.subr.bf16.mxu0 %v16955_v53  ;;  %14720 = vmatmul.mubr.bf16.gmra.mrb[16].mxu1 %v17782_v40 }
  0xd9   : > { %14723 = vmatprep.mubr.bf16.mxu1 %v17797_v8  ;;  %14741 = vmatprep.subr.bf16.mxu1 %v16984_v28 }
  0xda   : > { %14742 = vmatpush3.bf16.msra.mxu1 %v16984_v28  ;;  %v20979_v28 = vld [vmem:[#allocation6_spill] sm:$0xff] }
  0xdb   : > { %14934 = vmatpush3.bf16.msra.mxu0 %v16955_v53  ;;  %14743 = vmatprep.subr.bf16.mxu1 %v16986_v31  ;;  %v17985_v53 = vpack.c.bf16 %v2925_v7, %v2924_v61  ;;  %v2946_v61 = vld [vmem:[#allocation2 + $0x169] sm:$0xff]  ;;  %v2947_v7 = vld [vmem:[#allocation2 + $0x171] sm:$0xff] }
  0xdc   : > { %14935 = vmatprep.subr.bf16.mxu0 %v16956_v11 }
  0xde   : > { %14904 = vmatmul.mubr.bf16.gmra.mrb[8].mxu0 %v20967_v15  ;;  %14744 = vmatpush3.bf16.msra.mxu1 %v16986_v31 }
  0xdf   : > { %14907 = vmatprep.mubr.bf16.mxu0 %v20968_v17  ;;  %14936 = vmatpush3.bf16.msra.mxu0 %v16956_v11  ;;  %v2927_v11 = vld [vmem:[#allocation2 + $0x81] sm:$0xff]  ;;  %v2930_v17 = vld [vmem:[#allocation2 + $0xa9] sm:$0xff] }
  0xe0   : > { %14937 = vmatprep.subr.bf16.mxu0 %v16957_v13  ;;  %14724 = vmatmul.mubr.bf16.gmra.mrb[20].mxu1 %v17799_v19  ;;  %v17997_v15 = vpack.c.bf16 %v2927_v11, %v2926_v10  ;;  %v2209_v10 = vld [vmem:[#allocation2 + $0x182] sm:$0xff]  ;;  %v2210_v11 = vld [vmem:[#allocation2 + $0x18a] sm:$0xff] }
  0xe1   : > { %14727 = vmatprep.mubr.bf16.mxu1 %v17810_v55  ;;  %14745 = vmatprep.subr.bf16.mxu1 %v16987_v33 }
  0xe2   : > { %14746 = vmatpush3.bf16.msra.mxu1 %v16987_v33  ;;  %v2938_v33 = vld [vmem:[#allocation2 + $0x109] sm:$0xff] }
  0xe3   : > { %14938 = vmatpush3.bf16.msra.mxu0 %v16957_v13  ;;  %14747 = vmatprep.subr.bf16.mxu1 %v16989_v39  ;;  %v16966_v13 = vld [vmem:[%s20879_s1 + $0x1a0] sm:$0xff]  }
  0xe4   : > { %14939 = vmatprep.subr.bf16.mxu0 %v16958_v16 }
  0xe6   : > { %14908 = vmatmul.mubr.bf16.gmra.mrb[12].mxu0 %v20969_v20  ;;  %14748 = vmatpush3.bf16.msra.mxu1 %v16989_v39  ;;  %v2933_v20 = vld [vmem:[#allocation2 + $0xc9] sm:$0xff] }
  0xe7   : > { %14911 = vmatprep.mubr.bf16.mxu0 %v20970_v23  ;;  %14940 = vmatpush3.bf16.msra.mxu0 %v16958_v16  ;;  %v20980_v39 = vld [vmem:[#allocation7_spill] sm:$0xff] }
  0xe8   : > { %14941 = vmatprep.subr.bf16.mxu0 %v16959_v18  ;;  %14728 = vmatmul.mubr.bf16.gmra.mrb[24].mxu1 %v17812_v36 }
  0xe9   : > { %14731 = vmatprep.mubr.bf16.mxu1 %v17822_v4  ;;  %14749 = vmatprep.subr.bf16.mxu1 %v16990_v44 }
  0xea   : > { %14750 = vmatpush3.bf16.msra.mxu1 %v16990_v44  ;;  %v2941_v44 = vld [vmem:[#allocation2 + $0x129] sm:$0xff] }
  0xeb   : > { %14942 = vmatpush3.bf16.msra.mxu0 %v16959_v18  ;;  %v2931_v18 = vld [vmem:[#allocation2 + $0xb1] sm:$0xff] }
  0xec   : > { %14975 = vmatprep.subr.bf16.mxu0 %v17904_v21  ;;  %v18011_v22 = vpack.c.bf16 %v2931_v18, %v2930_v17  ;;  %v18057_v17 = vld [vmem:[#allocation2 + $0x198] sm:$0xff]  ;;  %v18062_v18 = vld [vmem:[#allocation2 + $0x4a] sm:$0xff] }
  0xed   : > { %8072 = vst [vmem:[#allocation2 + $0x48] sm:$0xff] %v18057_v17  ;;  %11617 = vst [vmem:[#allocation2 + $0x138] sm:$0xff] %v18057_v17 }
  0xee   : > { %14912 = vmatmul.mubr.bf16.gmra.mrb[16].mxu0 %v20971_v24  ;;  %v2935_v24 = vld [vmem:[#allocation2 + $0xe1] sm:$0xff] }
  0xef   : > { %14915 = vmatprep.mubr.bf16.mxu0 %v20972_v27  ;;  %v2937_v27 = vld [vmem:[#allocation2 + $0xf9] sm:$0xff]  ;;  %v18025_v31 = vpack.c.bf16 %v2935_v24, %v2934_v0 }
  0xf0   : > { %14732 = vmatmul.mubr.bf16.gmra.mrb[28].mxu1 %v17824_v54  ;;  %v18086_v0 = vld [vmem:[#allocation2 + $0x7a] sm:$0xff] }
  0xf1   : > { %14751 = vmatprep.mubr.bf16.mxu1 %v763_v37  ;;  %8078 = vst [vmem:[#allocation2 + $0x78] sm:$0xff] %v18057_v17  ;;  %v16982_v24 = vld [vmem:[%s20879_s1 + $0x1e0] sm:$0xff]  }
  0xf6   : > { %14916 = vmatmul.mubr.bf16.gmra.mrb[20].mxu0 %v20973_v29  ;;  %v16976_v29 = vld [vmem:[%s20879_s1 + $0x1c0] sm:$0xff]  }
  0xf7   : > { %14919 = vmatprep.mubr.bf16.mxu0 %v20974_v32  ;;  %v18027_v32 = vpack.c.bf16 %v2937_v27, %v2936_v26  ;;  %v18104_v26 = vld [vmem:[#allocation2 + $0x9a] sm:$0xff]  ;;  %v18110_v27 = vld [vmem:[#allocation2 + $0xaa] sm:$0xff] }
  0xf8   : > { %14752 = vmatmul.mubr.bf16.vlgmr.msra.gmra.mrb[0].mxu1 %v764_v52  ;;  %v20982_v52 = vld [vmem:[#allocation9_spill] sm:$0xff]  ;;  %8083 = vst [vmem:[#allocation2 + $0xa0] sm:$0x3] %v18057_v17  ;;  %8084 = vst [vmem:[#allocation2 + $0xa8] sm:$0xff] %v18057_v17 }
  0xf9   : > { %14755 = vmatprep.mubr.bf16.mxu1 %v17971_v1  ;;  %11598 = vst [vmem:[#allocation2 + $0xa0] sm:$0x3] %v18057_v17 }
  0xfe   : > { %14920 = vmatmul.mubr.bf16.gmra.mrb[24].mxu0 %v20975_v35  ;;  %v2939_v35 = vld [vmem:[#allocation2 + $0x111] sm:$0xff] }
  0xff   : > { %14923 = vmatprep.mubr.bf16.mxu0 %v20976_v43  ;;  %v2940_v43 = vld [vmem:[#allocation2 + $0x121] sm:$0xff]  ;;  %8098 = vst [vmem:[#allocation2 + $0x118] sm:$0x3] %v18057_v17 }
 0x100   : > { %14756 = vmatmul.mubr.bf16.gmra.mrb[4].mxu1 %v17980_v63  ;;  %v18035_v37 = vpack.c.bf16 %v2941_v44, %v2940_v43  ;;  %v18149_v43 = vld [vmem:[#allocation2 + $0xfa] sm:$0xff]  ;;  %11613 = vst [vmem:[#allocation2 + $0x118] sm:$0x3] %v18057_v17  ;;  %11614 = vst [vmem:[#allocation2 + $0x120] sm:$0xff] %v18057_v17 }
 0x101   : > { %14759 = vmatprep.mubr.bf16.mxu1 %v17985_v53  ;;  %8095 = vst [vmem:[#allocation2 + $0x100] sm:$0x3] %v18057_v17 }
 0x102   : > { %11610 = vst [vmem:[#allocation2 + $0x100] sm:$0x3] %v18057_v17 }
 0x106   : > { %14924 = vmatmul.mubr.bf16.gmra.mrb[28].mxu0 %v20977_v47  ;;  %v18033_v47 = vpack.c.bf16 %v2939_v35, %v2938_v33  ;;  %v18128_v33 = vld [vmem:[#allocation2 + $0xca] sm:$0xff]  ;;  %v18134_v35 = vld [vmem:[#allocation2 + $0xda] sm:$0xff] }
 0x107   : > { %14943 = vmatprep.mubr.bf16.mxu0 %v17616_v45  ;;  %v16961_v45 = vld [vmem:[%s20879_s1 + $0x188] sm:$0xff]   ;;  %8089 = vst [vmem:[#allocation2 + $0xd0] sm:$0x3] %v18057_v17  ;;  %8090 = vst [vmem:[#allocation2 + $0xd8] sm:$0xff] %v18057_v17 }
 0x108   : > { %14760 = vmatmul.mubr.bf16.gmra.mrb[8].mxu1 %v17997_v15  ;;  %11604 = vst [vmem:[#allocation2 + $0xd0] sm:$0x3] %v18057_v17 }
 0x10e   : > { %14944 = vmatmul.mubr.bf16.vlgmr.msra.gmra.mrb[0].mxu0 %v17625_v48  ;;  %v16963_v48 = vld [vmem:[%s20879_s1 + $0x198] sm:$0xff]  }
 0x10f   : > { %14976 = vmatpush3.bf16.msra.mxu0 %v17904_v21  ;;  %14947 = vmatprep.mubr.bf16.mxu0 %v17649_v59  ;;  %v2928_v59 = vld [vmem:[#allocation2 + $0x91] sm:$0xff] }
 0x110   : > { %14977 = vmatprep.subr.bf16.mxu0 %v16961_v45  ;;  %v17999_v16 = vpack.c.bf16 %v2929_v12, %v2928_v59  ;;  %v16972_v21 = vld [vmem:[%s20879_s1 + $0x1b0] sm:$0xff]   ;;  %v18049_v59 = vpack.c.bf16 %v2947_v7, %v2946_v61  ;;  %v2258_v12 = vpack.c.bf16 %v2210_v11, %v2209_v10  ;;  %v18199_v61 = vld [vmem:[#allocation2 + $0x15a] sm:$0xff] }
 0x111   : > { %8107 = vst [vmem:[#allocation2 + $0x160] sm:$0x3] %v18057_v17  ;;  %v18220_v10 = vld [vmem:[#allocation2 + $0x189] sm:$0xff]  ;;  %v18223_v11 = vld [vmem:[#allocation2 + $0x199] sm:$0xff] }
 0x112   : > { %14763 = vmatprep.mubr.bf16.mxu1 %v17999_v16  ;;  %11622 = vst [vmem:[#allocation2 + $0x160] sm:$0x3] %v18057_v17 }
 0x113   : > { %14978 = vmatpush3.bf16.msra.mxu0 %v16961_v45  ;;  %14764 = vmatmul.mubr.bf16.gmra.mrb[12].mxu1 %v18011_v22  ;;  %v20983_v45 = vld [vmem:[#allocation10_spill] sm:$0xff] }
 0x114   : > { %14979 = vmatprep.subr.bf16.mxu0 %v16962_v9 }
 0x116   : > { %14948 = vmatmul.mubr.bf16.gmra.mrb[4].mxu0 %v17651_v60  ;;  %v16969_v60 = vld [vmem:[%s20879_s1 + $0x1a8] sm:$0xff]  }
 0x117   : > { %14951 = vmatprep.mubr.bf16.mxu0 %v17665_v5  ;;  %14980 = vmatpush3.bf16.msra.mxu0 %v16962_v9  ;;  %v2932_v5 = vld [vmem:[#allocation2 + $0xc1] sm:$0xff]  ;;  %v20984_v9 = vld [vmem:[#allocation11_spill] sm:$0xff] }
 0x118   : > { %14981 = vmatprep.subr.bf16.mxu0 %v16963_v48  ;;  %v18013_v23 = vpack.c.bf16 %v2933_v20, %v2932_v5  ;;  %v18064_v5 = vld [vmem:[#allocation2 + $0x52] sm:$0xff] }
 0x119   : > { %8074 = vst [vmem:[#allocation2 + $0x58] sm:$0x3] %v18057_v17  ;;  %8073 = vst [vmem:[#allocation2 + $0x50] sm:$0xff] %v18057_v17  ;;  %v16978_v20 = vld [vmem:[%s20879_s1 + $0x1d0] sm:$0xff]  }
 0x11a   : > { %14767 = vmatprep.mubr.bf16.mxu1 %v18013_v23  ;;  %11589 = vst [vmem:[#allocation2 + $0x58] sm:$0x3] %v18057_v17 }
 0x11b   : > { %14982 = vmatpush3.bf16.msra.mxu0 %v16963_v48  ;;  %14768 = vmatmul.mubr.bf16.gmra.mrb[16].mxu1 %v18025_v31  ;;  %v20985_v48 = vld [vmem:[#allocation12_spill] sm:$0xff] }
 0x11c   : > { %14983 = vmatprep.subr.bf16.mxu0 %v16966_v13  ;;  %14771 = vmatprep.mubr.bf16.mxu1 %v18027_v32 }
 0x11e   : > { %14952 = vmatmul.mubr.bf16.gmra.mrb[8].mxu0 %v17667_v6  ;;  %v16975_v6 = vld [vmem:[%s20879_s1 + $0x1b8] sm:$0xff]  }
 0x11f   : > { %14955 = vmatprep.mubr.bf16.mxu0 %v17684_v42  ;;  %14984 = vmatpush3.bf16.msra.mxu0 %v16966_v13  ;;  %v20978_v42 = vld [vmem:[#allocation5_spill] sm:$0xff]  ;;  %v18052_v13 = vld [vmem:[#allocation2 + $0x32] sm:$0xff] }
 0x120   : > { %14985 = vmatprep.subr.bf16.mxu0 %v16969_v60  ;;  %8069 = vst [vmem:[#allocation2 + $0x30] sm:$0xff] %v18057_v17 }
 0x123   : > { %14986 = vmatpush3.bf16.msra.mxu0 %v16969_v60  ;;  %14772 = vmatmul.mubr.bf16.gmra.mrb[20].mxu1 %v18033_v47  ;;  %v18054_v60 = vld [vmem:[#allocation2 + $0x3a] sm:$0xff] }
 0x124   : > { %14987 = vmatprep.subr.bf16.mxu0 %v16972_v21  ;;  %14775 = vmatprep.mubr.bf16.mxu1 %v18035_v37  ;;  %8071 = vst [vmem:[#allocation2 + $0x40] sm:$0x3] %v18057_v17  ;;  %8070 = vst [vmem:[#allocation2 + $0x38] sm:$0xff] %v18057_v17 }
 0x125   : > { %11586 = vst [vmem:[#allocation2 + $0x40] sm:$0x3] %v18057_v17 }
 0x126   : > { %14956 = vmatmul.mubr.bf16.gmra.mrb[12].mxu0 %v20978_v42  ;;  %v18102_v42 = vld [vmem:[#allocation2 + $0x92] sm:$0xff] }
 0x127   : > { %14959 = vmatprep.mubr.bf16.mxu0 %v20979_v28  ;;  %14988 = vmatpush3.bf16.msra.mxu0 %v16972_v21  ;;  %v18078_v21 = vld [vmem:[#allocation2 + $0x62] sm:$0xff]  ;;  %8081 = vst [vmem:[#allocation2 + $0x90] sm:$0xff] %v18057_v17  ;;  %8082 = vst [vmem:[#allocation2 + $0x98] sm:$0xff] %v18057_v17  ;;  %v16988_v28 = vld [vmem:[%s20879_s1 + $0x1f0] sm:$0xff]  }
 0x128   : > { %14989 = vmatprep.subr.bf16.mxu0 %v16975_v6  ;;  %8075 = vst [vmem:[#allocation2 + $0x60] sm:$0xff] %v18057_v17 }
 0x12b   : > { %14990 = vmatpush3.bf16.msra.mxu0 %v16975_v6  ;;  %14776 = vmatmul.mubr.bf16.gmra.mrb[24].mxu1 %v18041_v3  ;;  %v18080_v6 = vld [vmem:[#allocation2 + $0x6a] sm:$0xff] }
 0x12c   : > { %15023 = vmatprep.subr.bf16.mxu0 %v16976_v29  ;;  %14779 = vmatprep.mubr.bf16.mxu1 %v18043_v30  ;;  %8077 = vst [vmem:[#allocation2 + $0x70] sm:$0x3] %v18057_v17  ;;  %8076 = vst [vmem:[#allocation2 + $0x68] sm:$0xff] %v18057_v17 }
 0x12d   : > { %11592 = vst [vmem:[#allocation2 + $0x70] sm:$0x3] %v18057_v17 }
 0x12e   : > { %14960 = vmatmul.mubr.bf16.gmra.mrb[16].mxu0 %v20980_v39  ;;  %v18147_v39 = vld [vmem:[#allocation2 + $0xf2] sm:$0xff] }
 0x12f   : > { %14963 = vmatprep.mubr.bf16.mxu0 %v20981_v46  ;;  %v3362_v44 = vpack.c.bf16 %v18149_v43, %v18147_v39  ;;  %11608 = vst [vmem:[#allocation2 + $0xf0] sm:$0xff] %v18057_v17  ;;  %11609 = vst [vmem:[#allocation2 + $0xf8] sm:$0xff] %v18057_v17  ;;  %v18157_v46 = vld [vmem:[#allocation2 + $0x10a] sm:$0xff] }
 0x130   : > { %11611 = vst [vmem:[#allocation2 + $0x108] sm:$0xff] %v18057_v17  ;;  %11612 = vst [vmem:[#allocation2 + $0x110] sm:$0xff] %v18057_v17 }
 0x133   : > { %14780 = vmatmul.mubr.bf16.gmra.mrb[28].mxu1 %v18049_v59 }
 0x136   : > { %14964 = vmatmul.mubr.bf16.gmra.mrb[20].mxu0 %v20982_v52  ;;  %v18177_v52 = vld [vmem:[#allocation2 + $0x12a] sm:$0xff] }
 0x137   : > { %14967 = vmatprep.mubr.bf16.mxu0 %v20983_v45  ;;  %v3364_v41 = vpack.c.bf16 %v18177_v52, %v18175_v50  ;;  %8101 = vst [vmem:[#allocation2 + $0x130] sm:$0x3] %v18057_v17  ;;  %11615 = vst [vmem:[#allocation2 + $0x128] sm:$0xff] %v18057_v17  ;;  %v18187_v45 = vld [vmem:[#allocation2 + $0x142] sm:$0xff] }
 0x138   : > { %11616 = vst [vmem:[#allocation2 + $0x130] sm:$0x3] %v18057_v17  ;;  %8104 = vst [vmem:[#allocation2 + $0x148] sm:$0x3] %v18057_v17 }
 0x139   : > { %11618 = vst [vmem:[#allocation2 + $0x140] sm:$0xff] %v18057_v17  ;;  %11619 = vst [vmem:[#allocation2 + $0x148] sm:$0x3] %v18057_v17 }
 0x13e   : > { %14968 = vmatmul.mubr.bf16.gmra.mrb[24].mxu0 %v20984_v9  ;;  %v18207_v9 = vld [vmem:[#allocation2 + $0x16a] sm:$0xff] }
 0x13f   : > { %14971 = vmatprep.mubr.bf16.mxu0 %v20985_v48  ;;  %v18209_v48 = vld [vmem:[#allocation2 + $0x172] sm:$0xff]  ;;  %11623 = vst [vmem:[#allocation2 + $0x168] sm:$0xff] %v18057_v17 }
 0x140   : > { %8110 = vst [vmem:[#allocation2 + $0x178] sm:$0x3] %v18057_v17  ;;  %11624 = vst [vmem:[#allocation2 + $0x170] sm:$0xff] %v18057_v17 }
 0x141   : > { %11625 = vst [vmem:[#allocation2 + $0x178] sm:$0x3] %v18057_v17 }
 0x146   : > { %14972 = vmatmul.mubr.bf16.gmra.mrb[28].mxu0 %v2258_v12  ;;  %v18225_v12 = vld [vmem:[#allocation2 + $0x182] sm:$0xff] }
 0x147   : > { %14991 = vmatprep.mubr.bf16.mxu0 %v17741_v62  ;;  %v16977_v62 = vld [vmem:[%s20879_s1 + $0x1c8] sm:$0xff]  }
 0x14e   : > { %14992 = vmatmul.mubr.bf16.vlgmr.msra.gmra.mrb[0].mxu0 %v17746_v57  ;;  %v18088_v57 = vld [vmem:[#allocation2 + $0x82] sm:$0xff] }
 0x14f   : > { %15024 = vmatpush3.bf16.msra.mxu0 %v16976_v29  ;;  %14995 = vmatprep.mubr.bf16.mxu0 %v17753_v2  ;;  %8080 = vst [vmem:[#allocation2 + $0x88] sm:$0x3] %v18057_v17  ;;  %8079 = vst [vmem:[#allocation2 + $0x80] sm:$0xff] %v18057_v17  ;;  %v16979_v2 = vld [vmem:[%s20879_s1 + $0x1d8] sm:$0xff]   ;;  %v18126_v29 = vld [vmem:[#allocation2 + $0xc2] sm:$0xff] }
 0x150   : > { %15025 = vmatprep.subr.bf16.mxu0 %v16977_v62  ;;  %11595 = vst [vmem:[#allocation2 + $0x88] sm:$0x3] %v18057_v17  ;;  %8087 = vst [vmem:[#allocation2 + $0xc0] sm:$0xff] %v18057_v17 }
 0x151   : > { %8088 = vst [vmem:[#allocation2 + $0xc8] sm:$0xff] %v18057_v17 }
 0x153   : > { %15026 = vmatpush3.bf16.msra.mxu0 %v16977_v62  ;;  %v18227_v62 = vld [vmem:[#allocation2 + $0x18a] sm:$0xff] }
 0x154   : > { %15027 = vmatprep.subr.bf16.mxu0 %v16978_v20  ;;  %8113 = vst [vmem:[#allocation2 + $0x190] sm:$0x3] %v18057_v17 }
 0x155   : > { %11628 = vst [vmem:[#allocation2 + $0x190] sm:$0x3] %v18057_v17 }
 0x156   : > { %14996 = vmatmul.mubr.bf16.gmra.mrb[4].mxu0 %v17758_v58  ;;  %v18112_v58 = vld [vmem:[#allocation2 + $0xb2] sm:$0xff] }
 0x157   : > { %14999 = vmatprep.mubr.bf16.mxu0 %v17765_v14  ;;  %15028 = vmatpush3.bf16.msra.mxu0 %v16978_v20  ;;  %8086 = vst [vmem:[#allocation2 + $0xb8] sm:$0x3] %v18057_v17  ;;  %8085 = vst [vmem:[#allocation2 + $0xb0] sm:$0xff] %v18057_v17  ;;  %v16985_v14 = vld [vmem:[%s20879_s1 + $0x1e8] sm:$0xff]  }
 0x158   : > { %15029 = vmatprep.subr.bf16.mxu0 %v16979_v2  ;;  %11601 = vst [vmem:[#allocation2 + $0xb8] sm:$0x3] %v18057_v17  ;;  %v18230_v20 = vld [vmem:[#allocation2 + $0x1a1] sm:$0xff] }
 0x15b   : > { %15030 = vmatpush3.bf16.msra.mxu0 %v16979_v2  ;;  %v3368_v2 = vpack.c.bf16 %v18227_v62, %v18225_v12  ;;  %v18414_v12 = vld [vmem:[%s20879_s1 + $0x280] sm:$0xff]  }
 0x15c   : > { %15031 = vmatprep.subr.bf16.mxu0 %v16982_v24  ;;  %v18420_v62 = vld [vmem:[%s20880_s2] ss:$0 sm:$0xff] }
 0x15e   : > { %15000 = vmatmul.mubr.bf16.gmra.mrb[8].mxu0 %v17770_v25  ;;  %v18136_v25 = vld [vmem:[#allocation2 + $0xe2] sm:$0xff] }
 0x15f   : > { %15003 = vmatprep.mubr.bf16.mxu0 %v17777_v56  ;;  %15032 = vmatpush3.bf16.msra.mxu0 %v16982_v24  ;;  %8092 = vst [vmem:[#allocation2 + $0xe8] sm:$0x3] %v18057_v17  ;;  %8091 = vst [vmem:[#allocation2 + $0xe0] sm:$0xff] %v18057_v17  ;;  %v16991_v56 = vld [vmem:[%s20879_s1 + $0x1f8] sm:$0xff]   ;;  %v18239_v24 = vld [vmem:[#allocation2 + $0x1a2] sm:$0xff] }
 0x160   : > { %15033 = vmatprep.subr.bf16.mxu0 %v16985_v14  ;;  %11607 = vst [vmem:[#allocation2 + $0xe8] sm:$0x3] %v18057_v17  ;;  %8116 = vst [vmem:[#allocation2 + $0x1a8] sm:$0x3] %v18057_v17 }
 0x161   : > { %11631 = vst [vmem:[#allocation2 + $0x1a8] sm:$0x3] %v18057_v17 }
 0x163   : > { %15034 = vmatpush3.bf16.msra.mxu0 %v16985_v14  ;;  %v17000_v14 = vld [vmem:[%s20879_s1 + $0x240] sm:$0xff]  }
 0x164   : > { %15035 = vmatprep.subr.bf16.mxu0 %v16988_v28  ;;  %15119 = vmatprep.subr.bf16.mxu1 %v17000_v14 }
 0x165   : > { %15120 = vmatpush3.bf16.msra.mxu1 %v17000_v14  ;;  %v16995_v14 = vld [vmem:[%s20879_s1 + $0x218] sm:$0xff]  }
 0x166   : > { %15004 = vmatmul.mubr.bf16.gmra.mrb[12].mxu0 %v17782_v40  ;;  %v18164_v40 = vld [vmem:[%s20879_s1 + $0x200] sm:$0xff]  }
 0x167   : > { %15007 = vmatprep.mubr.bf16.mxu0 %v17797_v8  ;;  %15036 = vmatpush3.bf16.msra.mxu0 %v16988_v28  ;;  %v3363_v8 = vpack.c.bf16 %v18159_v49, %v18157_v46  ;;  %v17001_v28 = vld [vmem:[%s20879_s1 + $0x248] sm:$0xff]  }
 0x168   : > { %15037 = vmatprep.subr.bf16.mxu0 %v16991_v56  ;;  %15121 = vmatprep.subr.bf16.mxu1 %v17001_v28 }
 0x169   : > { %15122 = vmatpush3.bf16.msra.mxu1 %v17001_v28 }
 0x16b   : > { %15038 = vmatpush3.bf16.msra.mxu0 %v16991_v56  ;;  %v17002_v56 = vld [vmem:[%s20879_s1 + $0x250] sm:$0xff]  }
 0x16c   : > { %15071 = vmatprep.subr.bf16.mxu0 %v18164_v40  ;;  %15123 = vmatprep.subr.bf16.mxu1 %v17002_v56 }
 0x16d   : > { %15124 = vmatpush3.bf16.msra.mxu1 %v17002_v56 }
 0x16e   : > { %15008 = vmatmul.mubr.bf16.gmra.mrb[16].mxu0 %v17799_v19  ;;  %v3365_v19 = vpack.c.bf16 %v18187_v45, %v18185_v51 }
 0x16f   : > { %15011 = vmatprep.mubr.bf16.mxu0 %v17810_v55  ;;  %v18197_v55 = vld [vmem:[#allocation2 + $0x152] sm:$0xff] }
 0x170   : > { %v3366_v7 = vpack.c.bf16 %v18199_v61, %v18197_v55  ;;  %11620 = vst [vmem:[#allocation2 + $0x150] sm:$0xff] %v18057_v17  ;;  %11621 = vst [vmem:[#allocation2 + $0x158] sm:$0xff] %v18057_v17 }
 0x176   : > { %15012 = vmatmul.mubr.bf16.gmra.mrb[20].mxu0 %v17812_v36  ;;  %v3367_v36 = vpack.c.bf16 %v18209_v48, %v18207_v9 }
 0x177   : > { %15015 = vmatprep.mubr.bf16.mxu0 %v17822_v4  ;;  %v18218_v4 = vld [vmem:[#allocation2 + $0x181] sm:$0xff] }
 0x178   : > { %11626 = vst [vmem:[#allocation2 + $0x180] sm:$0xff] %v18057_v17  ;;  %11627 = vst [vmem:[#allocation2 + $0x188] sm:$0xff] %v18057_v17 }
 0x17e   : > { %15016 = vmatmul.mubr.bf16.gmra.mrb[24].mxu0 %v17824_v54  ;;  %v18237_v54 = vld [vmem:[#allocation2 + $0x19a] sm:$0xff] }
 0x17f   : > { %15019 = vmatprep.mubr.bf16.mxu0 %v17834_v34  ;;  %11629 = vst [vmem:[#allocation2 + $0x198] sm:$0xff] %v18057_v17  ;;  %11630 = vst [vmem:[#allocation2 + $0x1a0] sm:$0xff] %v18057_v17  ;;  %v17003_v34 = vld [vmem:[%s20879_s1 + $0x258] sm:$0xff]   ;;  %v20986_v52 = vpack.c.bf16 %v18239_v24, %v18237_v54 }
 0x180   : > { %15125 = vmatprep.subr.bf16.mxu1 %v17003_v34 }
 0x181   : > { %15126 = vmatpush3.bf16.msra.mxu1 %v17003_v34  ;;  %v16999_v34 = vld [vmem:[%s20879_s1 + $0x238] sm:$0xff]  }
 0x186   : > { %15020 = vmatmul.mubr.bf16.gmra.mrb[28].mxu0 %v17841_v38  ;;  %v16993_v38 = vld [vmem:[%s20879_s1 + $0x208] sm:$0xff]  }
 0x187   : > { %15039 = vmatprep.mubr.bf16.mxu0 %v17971_v1  ;;  %v16994_v1 = vld [vmem:[%s20879_s1 + $0x210] sm:$0xff]  }
 0x18e   : > { %15040 = vmatmul.mubr.bf16.vlgmr.msra.gmra.mrb[0].mxu0 %v17980_v63  ;;  %v17004_v63 = vld [vmem:[%s20879_s1 + $0x260] sm:$0xff]  }
 0x18f   : > { %15072 = vmatpush3.bf16.msra.mxu0 %v18164_v40  ;;  %15043 = vmatprep.mubr.bf16.mxu0 %v17985_v53  ;;  %v16996_v53 = vld [vmem:[%s20879_s1 + $0x220] sm:$0xff]   ;;  %v17005_v40 = vld [vmem:[%s20879_s1 + $0x268] sm:$0xff]  }
 0x190   : > { %15073 = vmatprep.subr.bf16.mxu0 %v16993_v38  ;;  %15127 = vmatprep.subr.bf16.mxu1 %v17004_v63 }
 0x191   : > { %15128 = vmatpush3.bf16.msra.mxu1 %v17004_v63 }
 0x192   : > { %15129 = vmatprep.subr.bf16.mxu1 %v17005_v40 }
 0x193   : > { %15074 = vmatpush3.bf16.msra.mxu0 %v16993_v38 }
 0x194   : > { %15075 = vmatprep.subr.bf16.mxu0 %v16994_v1 }
 0x195   : > { %15130 = vmatpush3.bf16.msra.mxu1 %v17005_v40 }
 0x196   : > { %15044 = vmatmul.mubr.bf16.gmra.mrb[4].mxu0 %v17997_v15  ;;  %v16997_v15 = vld [vmem:[%s20879_s1 + $0x228] sm:$0xff]  }
 0x197   : > { %15047 = vmatprep.mubr.bf16.mxu0 %v17999_v16  ;;  %15076 = vmatpush3.bf16.msra.mxu0 %v16994_v1  ;;  %v16998_v16 = vld [vmem:[%s20879_s1 + $0x230] sm:$0xff]  }
 0x198   : > { %15077 = vmatprep.subr.bf16.mxu0 %v16995_v14 }
 0x19b   : > { %15078 = vmatpush3.bf16.msra.mxu0 %v16995_v14 }
 0x19c   : > { %15079 = vmatprep.subr.bf16.mxu0 %v16996_v53 }
 0x19e   : > { %15048 = vmatmul.mubr.bf16.gmra.mrb[8].mxu0 %v18011_v22  ;;  %v2998_v22 = vpack.c.bf16 %v18220_v10, %v18218_v4  ;;  %v17006_v4 = vld [vmem:[%s20879_s1 + $0x270] sm:$0xff]   ;;  %v17007_v10 = vld [vmem:[%s20879_s1 + $0x278] sm:$0xff]  }
 0x19f   : > { %15051 = vmatprep.mubr.bf16.mxu0 %v18013_v23  ;;  %15080 = vmatpush3.bf16.msra.mxu0 %v16996_v53  ;;  %v2999_v23 = vpack.c.bf16 %v18230_v20, %v18223_v11  ;;  %v3915_v11 = vpack.c.bf16 %v18057_v17, %v18057_v17 }
 0x1a0   : > { %15081 = vmatprep.subr.bf16.mxu0 %v16997_v15  ;;  %15131 = vmatprep.subr.bf16.mxu1 %v17006_v4 }
 0x1a1   : > { %15132 = vmatpush3.bf16.msra.mxu1 %v17006_v4  ;;  %15135 = vmatprep.mubr.bf16.mxu1 %v3915_v11 }
 0x1a2   : > { %15133 = vmatprep.subr.bf16.mxu1 %v17007_v10 }
 0x1a3   : > { %15082 = vmatpush3.bf16.msra.mxu0 %v16997_v15 }
 0x1a4   : > { %15083 = vmatprep.subr.bf16.mxu0 %v16998_v16 }
 0x1a5   : > { %15134 = vmatpush3.bf16.msra.mxu1 %v17007_v10 }
 0x1a6   : > { %15052 = vmatmul.mubr.bf16.gmra.mrb[12].mxu0 %v18025_v31  ;;  %v3354_v31 = vpack.c.bf16 %v18054_v60, %v18052_v13  ;;  %15167 = vmatprep.subr.bf16.mxu1 %v18414_v12 }
 0x1a7   : > { %15055 = vmatprep.mubr.bf16.mxu0 %v18027_v32  ;;  %15084 = vmatpush3.bf16.msra.mxu0 %v16998_v16  ;;  %v3355_v32 = vpack.c.bf16 %v18064_v5, %v18062_v18 }
 0x1a8   : > { %15085 = vmatprep.subr.bf16.mxu0 %v16999_v34 }
 0x1ab   : > { %15086 = vmatpush3.bf16.msra.mxu0 %v16999_v34 }
 0x1ae   : > { %15056 = vmatmul.mubr.bf16.gmra.mrb[16].mxu0 %v18033_v47  ;;  %v3356_v47 = vpack.c.bf16 %v18080_v6, %v18078_v21  ;;  %v3361_v21 = vpack.c.bf16 %v18136_v25, %v18134_v35 }
 0x1af   : > { %15059 = vmatprep.mubr.bf16.mxu0 %v18035_v37  ;;  %v3357_v37 = vpack.c.bf16 %v18088_v57, %v18086_v0 }
 0x1b6   : > { %15060 = vmatmul.mubr.bf16.gmra.mrb[20].mxu0 %v18041_v3  ;;  %v3358_v3 = vpack.c.bf16 %v18104_v26, %v18102_v42 }
 0x1b7   : > { %15063 = vmatprep.mubr.bf16.mxu0 %v18043_v30  ;;  %v3359_v30 = vpack.c.bf16 %v18112_v58, %v18110_v27 }
 0x1be   : > { %15064 = vmatmul.mubr.bf16.gmra.mrb[24].mxu0 %v18049_v59  ;;  %v3360_v59 = vpack.c.bf16 %v18128_v33, %v18126_v29 }
 0x1bf   : > { %15067 = vmatprep.mubr.bf16.mxu0 %v2998_v22 }
 0x1c6   : > { %15068 = vmatmul.mubr.bf16.gmra.mrb[28].mxu0 %v2999_v23 }
 0x1c7   : > { %15087 = vmatprep.mubr.bf16.mxu0 %v3354_v31 }
 0x1cb   : > { %v14753_v13 = vpop.f32.mrb[0].mxu1 }
 0x1cc   : > { %v878_v60 = vpop.f32.mrb[1].mxu1  ;;  %v16163_v20 = vadd.f32 %v14753_v13, %v18420_v62  ;;  %v18436_v13 = vld [vmem:[#allocation3 + $0x1] sm:$0xff] }
 0x1cd   : > { %v14754_v18 = vpop.f32.mrb[2].mxu1 }
 0x1ce   : > { %15088 = vmatmul.mubr.bf16.vlgmr.msra.gmra.mrb[0].mxu0 %v3355_v32  ;;  %v881_v5 = vpop.f32.mrb[3].mxu1  ;;  %v16167_v24 = vadd.f32 %v14754_v18, %v18420_v62 }
 0x1cf   : > { %15091 = vmatprep.mubr.bf16.mxu0 %v3356_v47  ;;  %v16169_v38 = vadd.f32 %v18420_v62, %v881_v5 }
 0x1d3   : > { %v18323_v6 = vpop.f32.mrb[4].mxu1 }
 0x1d4   : > { %v18325_v0 = vpop.f32.mrb[5].mxu1  ;;  %v16171_v23 = vadd.f32 %v18323_v6, %v18420_v62  ;;  %v18442_v6 = vld [vmem:[#allocation3 + $0x2] sm:$0xff] }
 0x1d5   : > { %v18327_v57 = vpop.f32.mrb[6].mxu1  ;;  %v16173_v32 = vadd.f32 %v18420_v62, %v18325_v0  ;;  %v18444_v0 = vld [vmem:[#allocation3 + $0xa] sm:$0xff]  ;;  %9786 = vst [vmem:[#allocation3] sm:$0xff] %v18057_v17 }
 0x1d6   : > { %15092 = vmatmul.mubr.bf16.gmra.mrb[4].mxu0 %v3357_v37  ;;  %v18332_v42 = vpop.f32.mrb[7].mxu1 }
 0x1d7   : > { %15095 = vmatprep.mubr.bf16.mxu0 %v3358_v3  ;;  %v16175_v3 = vadd.f32 %v18327_v57, %v18420_v62 }
 0x1db   : > { %v18334_v26 = vpop.f32.mrb[8].mxu1 }
 0x1dc   : > { %v18336_v27 = vpop.f32.mrb[9].mxu1 }
 0x1dd   : > { %v18341_v58 = vpop.f32.mrb[10].mxu1 }
 0x1de   : > { %15096 = vmatmul.mubr.bf16.gmra.mrb[8].mxu0 %v3359_v30  ;;  %v18346_v29 = vpop.f32.mrb[11].mxu1 }
 0x1df   : > { %15099 = vmatprep.mubr.bf16.mxu0 %v3360_v59 }
 0x1e6   : > { %15100 = vmatmul.mubr.bf16.gmra.mrb[12].mxu0 %v3361_v21  ;;  %v18348_v33 = vpop.f32.mrb[12].mxu1  ;;  %v18440_v21 = vld [vmem:[#allocation3 + $0x9] sm:$0xff] }
 0x1e7   : > { %15103 = vmatprep.mubr.bf16.mxu0 %v3362_v44  ;;  %v18350_v35 = vpop.f32.mrb[13].mxu1  ;;  %9787 = vst [vmem:[#allocation3 + $0x8] sm:$0xff] %v18057_v17  ;;  %9788 = vst [vmem:[#allocation3 + $0x10] sm:$0x3] %v18057_v17 }
 0x1e8   : > { %v18355_v25 = vpop.f32.mrb[14].mxu1 }
 0x1e9   : > { %v18360_v39 = vpop.f32.mrb[15].mxu1 }
 0x1ee   : > { %15104 = vmatmul.mubr.bf16.gmra.mrb[16].mxu0 %v3363_v8  ;;  %v18362_v43 = vpop.f32.mrb[16].mxu1 }
 0x1ef   : > { %15107 = vmatprep.mubr.bf16.mxu0 %v3364_v41  ;;  %v18364_v44 = vpop.f32.mrb[17].mxu1 }
 0x1f0   : > { %v18369_v46 = vpop.f32.mrb[18].mxu1 }
 0x1f1   : > { %v18374_v49 = vpop.f32.mrb[19].mxu1 }
 0x1f6   : > { %15108 = vmatmul.mubr.bf16.gmra.mrb[20].mxu0 %v3365_v19  ;;  %v18376_v8 = vpop.f32.mrb[20].mxu1 }
 0x1f7   : > { %15111 = vmatprep.mubr.bf16.mxu0 %v3366_v7  ;;  %v18378_v50 = vpop.f32.mrb[21].mxu1 }
 0x1f8   : > { %v18383_v41 = vpop.f32.mrb[22].mxu1 }
 0x1f9   : > { %v18385_v51 = vpop.f32.mrb[23].mxu1 }
 0x1fe   : > { %15112 = vmatmul.mubr.bf16.gmra.mrb[24].mxu0 %v3367_v36  ;;  %v18387_v45 = vpop.f32.mrb[24].mxu1 }
 0x1ff   : > { %15115 = vmatprep.mubr.bf16.mxu0 %v3368_v2  ;;  %v18389_v19 = vpop.f32.mrb[25].mxu1  ;;  %v16165_v2 = vadd.f32 %v18420_v62, %v878_v60  ;;  %v16177_v60 = vadd.f32 %v18420_v62, %v18332_v42 }
 0x200   : > { %v18391_v55 = vpop.f32.mrb[26].mxu1 }
 0x201   : > { %v18393_v61 = vpop.f32.mrb[27].mxu1 }
 0x206   : > { %15116 = vmatmul.mubr.bf16.gmra.mrb[28].mxu0 %v20986_v52  ;;  %v18395_v7 = vpop.f32.mrb[28].mxu1 }
 0x207   : > { %v18397_v9 = vpop.f32.mrb[29].mxu1 }
 0x208   : > { %v18399_v48 = vpop.f32.mrb[30].mxu1 }
 0x209   : > { %v18401_v36 = vpop.f32.mrb[31].mxu1 }
 0x2a1   : > { %v15089_v54 = vpop.f32.mrb[0].mxu0 }
 0x2a2   : > { %v16164_v28 = vadd.f32 %v16163_v20, %v15089_v54  ;;  %v3469_v56 = vpop.f32.mrb[1].mxu0 }
 0x2a3   : > { %v16166_v1 = vadd.f32 %v16165_v2, %v3469_v56  ;;  %v15090_v63 = vpop.f32.mrb[2].mxu0  ;;  %v17009_v56 = vld [vmem:[%s20879_s1 + $0x288] sm:$0xff]  }
 0x2a4   : > { %v3694_v14 = vmax.f32 %v16164_v28, 0.0  ;;  %v16168_v53 = vadd.f32 %v16167_v24, %v15090_v63  ;;  %v3472_v40 = vpop.f32.mrb[3].mxu0  ;;  %v16179_v63 = vadd.f32 %v18334_v26, %v18420_v62 }
 0x2a5   : > { %v3692_v15 = vmax.f32 %v16166_v1, 0.0  ;;  %v16170_v16 = vadd.f32 %v16169_v38, %v3472_v40 }
 0x2a6   : > { %3781 = vst [vmem:[#allocation3 + $0x31] sm:$0xff] %v3694_v14  ;;  %v3695_v34 = vmax.f32 %v16168_v53, 0.0 }
 0x2a7   : > { %3779 = vst [vmem:[#allocation3 + $0x19] sm:$0xff] %v3692_v15  ;;  %v3693_v22 = vmax.f32 %v16170_v16, 0.0 }
 0x2a8   : > { %3782 = vst [vmem:[#allocation3 + $0x39] sm:$0xff] %v3695_v34  ;;  %v18428_v31 = vpack.c.bf16 %v3695_v34, %v3694_v14 }
 0x2a9   : > { %3780 = vst [vmem:[#allocation3 + $0x21] sm:$0xff] %v3693_v22  ;;  %v15093_v47 = vpop.f32.mrb[4].mxu0  ;;  %v18432_v37 = vpack.c.bf16 %v3693_v22, %v3692_v15  ;;  %v16181_v22 = vadd.f32 %v18420_v62, %v18336_v27 }
 0x2aa   : > { %v16172_v30 = vadd.f32 %v16171_v23, %v15093_v47  ;;  %v3485_v59 = vpop.f32.mrb[5].mxu0 }
 0x2ab   : > { %v16174_v18 = vadd.f32 %v16173_v32, %v3485_v59  ;;  %v15094_v5 = vpop.f32.mrb[6].mxu0  ;;  %v16183_v59 = vadd.f32 %v18341_v58, %v18420_v62  ;;  %v16185_v58 = vadd.f32 %v18420_v62, %v18346_v29  ;;  %v17010_v29 = vld [vmem:[%s20879_s1 + $0x290] sm:$0xff]  }
 0x2ac   : > { %v3698_v52 = vmax.f32 %v16172_v30, 0.0  ;;  %v16176_v4 = vadd.f32 %v16175_v3, %v15094_v5  ;;  %v3488_v10 = vpop.f32.mrb[7].mxu0 }
 0x2ad   : > { %v3696_v42 = vmax.f32 %v16174_v18, 0.0  ;;  %v16178_v11 = vadd.f32 %v16177_v60, %v3488_v10  ;;  %v3855_v24 = vld [vmem:[#allocation3 + $0x30] sm:$0xff] }
 0x2ae   : > { %3785 = vst [vmem:[#allocation3 + $0x61] sm:$0xff] %v3698_v52  ;;  %v3699_v20 = vmax.f32 %v16176_v4, 0.0  ;;  %v3853_v54 = vld [vmem:[#allocation3 + $0x18] sm:$0xff]  ;;  %v18456_v1 = vld [vmem:[#allocation3 + $0x30] sm:$0xff] }
 0x2af   : > { %3783 = vst [vmem:[#allocation3 + $0x49] sm:$0xff] %v3696_v42  ;;  %v3697_v2 = vmax.f32 %v16178_v11, 0.0  ;;  %v3856_v28 = vld [vmem:[#allocation3 + $0x38] sm:$0xff]  ;;  %20988 = vst [vmem:[#allocation6_spill] sm:$0xff] %v18456_v1 }
 0x2b0   : > { %v18454_v38 = vld [vmem:[#allocation3 + $0x19] sm:$0xff]  ;;  %3786 = vst [vmem:[#allocation3 + $0x69] sm:$0xff] %v3699_v20  ;;  %v18460_v53 = vpack.c.bf16 %v3699_v20, %v3698_v52  ;;  %v18468_v34 = vld [vmem:[#allocation3 + $0x31] sm:$0xff]  ;;  %v18476_v47 = vld [vmem:[#allocation3 + $0x22] sm:$0xff]  ;;  %v18485_v27 = vpack.c.bf16 %v3856_v28, %v3855_v24 }
 0x2b1   : > { %20987 = vst [vmem:[#allocation5_spill] sm:$0xff] %v18454_v38  ;;  %v3854_v14 = vld [vmem:[#allocation3 + $0x20] sm:$0xff]  ;;  %v18464_v15 = vld [vmem:[#allocation3 + $0x32] sm:$0xff]  ;;  %20989 = vst [vmem:[#allocation7_spill] sm:$0xff] %v18468_v34  ;;  %v15097_v23 = vpop.f32.mrb[8].mxu0  ;;  %v18474_v26 = vpack.c.bf16 %v3697_v2, %v3696_v42 }
 0x2b2   : > { %v18462_v40 = vld [vmem:[#allocation3 + $0x1a] sm:$0xff]  ;;  %3784 = vst [vmem:[#allocation3 + $0x51] sm:$0xff] %v3697_v2  ;;  %v18472_v32 = vpack.c.bf16 %v3854_v14, %v3853_v54  ;;  %v16180_v60 = vadd.f32 %v16179_v63, %v15097_v23  ;;  %v3501_v18 = vpop.f32.mrb[9].mxu0  ;;  %20993 = vst [vmem:[#allocation11_spill] sm:$0xff] %v18485_v27  ;;  %v18493_v4 = vld [vmem:[#allocation3 + $0x32] sm:$0xff] }
 0x2b3   : > { %v18466_v16 = vld [vmem:[#allocation3 + $0x3a] sm:$0xff]  ;;  %9789 = vst [vmem:[#allocation3 + $0x18] sm:$0xff] %v18057_v17  ;;  %20995 = vst [vmem:[#allocation13_spill] sm:$0xff] %v18493_v4  ;;  %v16182_v42 = vadd.f32 %v16181_v22, %v3501_v18  ;;  %v15098_v11 = vpop.f32.mrb[10].mxu0 }
 0x2b4   : > { %20990 = vst [vmem:[#allocation8_spill] sm:$0xff] %v18472_v32  ;;  %v18478_v3 = vld [vmem:[#allocation3 + $0x21] sm:$0xff]  ;;  %v18481_v30 = vld [vmem:[#allocation3 + $0x38] sm:$0xff]  ;;  %15136 = vmatmul.mubr.bf16.vlgmr.msra.gmra.mrb[32].mxu1 %v18472_v32  ;;  %9792 = vst [vmem:[#allocation3 + $0x30] sm:$0xff] %v18057_v17  ;;  %v3702_v20 = vmax.f32 %v16180_v60, 0.0  ;;  %v16184_v2 = vadd.f32 %v16183_v59, %v15098_v11  ;;  %v3504_v54 = vpop.f32.mrb[11].mxu0 }
 0x2b5   : > { %20991 = vst [vmem:[#allocation9_spill] sm:$0xff] %v18478_v3  ;;  %20992 = vst [vmem:[#allocation10_spill] sm:$0xff] %v18481_v30  ;;  %v18487_v5 = vld [vmem:[#allocation3 + $0x39] sm:$0xff]  ;;  %15139 = vmatprep.mubr.bf16.mxu1 %v18485_v27  ;;  %15168 = vmatpush3.bf16.msra.mxu1 %v18414_v12  ;;  %v3700_v24 = vmax.f32 %v16182_v42, 0.0  ;;  %v16186_v28 = vadd.f32 %v16185_v58, %v3504_v54  ;;  %v18511_v59 = vld [vmem:[%s20879_s1 + $0x298] sm:$0xff]   ;;  %v16187_v12 = vadd.f32 %v18348_v33, %v18420_v62 }
 0x2b6   : > { %20994 = vst [vmem:[#allocation12_spill] sm:$0xff] %v18487_v5  ;;  %9791 = vst [vmem:[#allocation3 + $0x28] sm:$0x3] %v18057_v17  ;;  %v18495_v10 = vld [vmem:[#allocation3 + $0x3a] sm:$0xff]  ;;  %15169 = vmatprep.subr.bf16.mxu1 %v17009_v56  ;;  %v3703_v63 = vmax.f32 %v16184_v2, 0.0  ;;  %v3857_v22 = vld [vmem:[#allocation3 + $0x48] sm:$0xff] }
 0x2b7   : > { %9790 = vst [vmem:[#allocation3 + $0x20] sm:$0xff] %v18057_v17  ;;  %20996 = vst [vmem:[#allocation14_spill] sm:$0xff] %v18495_v10  ;;  %v3701_v14 = vmax.f32 %v16186_v28, 0.0  ;;  %v3859_v23 = vld [vmem:[#allocation3 + $0x60] sm:$0xff]  ;;  %v3860_v60 = vld [vmem:[#allocation3 + $0x68] sm:$0xff]  ;;  %v16189_v28 = vadd.f32 %v18420_v62, %v18350_v35  ;;  %v16191_v35 = vadd.f32 %v18355_v25, %v18420_v62 }
 0x2b8   : > { %9794 = vst [vmem:[#allocation3 + $0x40] sm:$0x3] %v18057_v17  ;;  %9793 = vst [vmem:[#allocation3 + $0x38] sm:$0xff] %v18057_v17  ;;  %v18515_v58 = vpack.c.bf16 %v3703_v63, %v3702_v20  ;;  %v18519_v11 = vld [vmem:[#allocation3 + $0x49] sm:$0xff]  ;;  %v18523_v54 = vld [vmem:[#allocation3 + $0x60] sm:$0xff]  ;;  %v18545_v30 = vpack.c.bf16 %v3860_v60, %v3859_v23 }
 0x2b9   : > { %3789 = vst [vmem:[#allocation3 + $0x91] sm:$0xff] %v3702_v20  ;;  %3787 = vst [vmem:[#allocation3 + $0x79] sm:$0xff] %v3700_v24  ;;  %v3858_v18 = vld [vmem:[#allocation3 + $0x50] sm:$0xff]  ;;  %15170 = vmatpush3.bf16.msra.mxu1 %v17009_v56  ;;  %v18521_v2 = vld [vmem:[#allocation3 + $0x48] sm:$0xff]  ;;  %v15101_v52 = vpop.f32.mrb[12].mxu0  ;;  %v18529_v33 = vpack.c.bf16 %v3701_v14, %v3700_v24 }
 0x2ba   : > { %3790 = vst [vmem:[#allocation3 + $0x99] sm:$0xff] %v3703_v63  ;;  %v18517_v42 = vld [vmem:[#allocation3 + $0x4a] sm:$0xff]  ;;  %20997 = vst [vmem:[#allocation15_spill] sm:$0xff] %v18519_v11  ;;  %v18527_v57 = vpack.c.bf16 %v3858_v18, %v3857_v22  ;;  %15171 = vmatprep.subr.bf16.mxu1 %v17010_v29  ;;  %v18531_v56 = vld [vmem:[#allocation3 + $0x52] sm:$0xff]  ;;  %v16188_v22 = vadd.f32 %v16187_v12, %v15101_v52  ;;  %v3517_v18 = vpop.f32.mrb[13].mxu0 }
 0x2bb   : > { %20998 = vst [vmem:[#allocation16_spill] sm:$0xff] %v18521_v2  ;;  %20999 = vst [vmem:[#allocation17_spill] sm:$0xff] %v18523_v54  ;;  %v18533_v20 = vld [vmem:[#allocation3 + $0x62] sm:$0xff]  ;;  %v18535_v63 = vld [vmem:[#allocation3 + $0x6a] sm:$0xff]  ;;  %v15102_v34 = vpop.f32.mrb[14].mxu0 }
 0x2bc   : > { %3788 = vst [vmem:[#allocation3 + $0x81] sm:$0xff] %v3701_v14  ;;  %21000 = vst [vmem:[#allocation18_spill] sm:$0xff] %v18527_v57  ;;  %v18537_v10 = vld [vmem:[#allocation3 + $0x51] sm:$0xff]  ;;  %v18539_v4 = vld [vmem:[#allocation3 + $0x61] sm:$0xff]  ;;  %15140 = vmatmul.mubr.bf16.gmra.mrb[36].mxu1 %v18527_v57  ;;  %v16192_v12 = vadd.f32 %v16191_v35, %v15102_v34 }
 0x2bd   : > { %21001 = vst [vmem:[#allocation19_spill] sm:$0xff] %v18537_v10  ;;  %21002 = vst [vmem:[#allocation20_spill] sm:$0xff] %v18539_v4  ;;  %v18541_v1 = vld [vmem:[#allocation3 + $0x50] sm:$0xff]  ;;  %v18549_v14 = vld [vmem:[#allocation3 + $0x68] sm:$0xff]  ;;  %v16193_v4 = vadd.f32 %v18420_v62, %v18360_v39  ;;  %v16190_v10 = vadd.f32 %v16189_v28, %v3517_v18  ;;  %v3706_v39 = vmax.f32 %v16188_v22, 0.0  ;;  %v3520_v28 = vpop.f32.mrb[15].mxu0  ;;  %15143 = vmatprep.mubr.bf16.mxu1 %v18545_v30  ;;  %15172 = vmatpush3.bf16.msra.mxu1 %v17010_v29 }
 0x2be   : > { %21003 = vst [vmem:[#allocation21_spill] sm:$0xff] %v18541_v1  ;;  %21004 = vst [vmem:[#allocation22_spill] sm:$0xff] %v18545_v30  ;;  %v18551_v11 = vld [vmem:[#allocation3 + $0x4a] sm:$0xff]  ;;  %v18553_v5 = vld [vmem:[#allocation3 + $0x52] sm:$0xff]  ;;  %15173 = vmatprep.subr.bf16.mxu1 %v18511_v59  ;;  %v3707_v34 = vmax.f32 %v16192_v12, 0.0 }
 0x2bf   : > { %21005 = vst [vmem:[#allocation23_spill] sm:$0xff] %v18549_v14  ;;  %21006 = vst [vmem:[#allocation24_spill] sm:$0xff] %v18551_v11  ;;  %v18558_v25 = vld [vmem:[#allocation3 + $0x69] sm:$0xff]  ;;  %v3704_v18 = vmax.f32 %v16190_v10, 0.0  ;;  %v16194_v52 = vadd.f32 %v16193_v4, %v3520_v28  ;;  %v16195_v4 = vadd.f32 %v18362_v43, %v18420_v62  ;;  %v16197_v11 = vadd.f32 %v18420_v62, %v18364_v44 }
 0x2c0   : > { %21007 = vst [vmem:[#allocation25_spill] sm:$0xff] %v18553_v5  ;;  %21008 = vst [vmem:[#allocation26_spill] sm:$0xff] %v18558_v25  ;;  %v18565_v23 = vld [vmem:[#allocation3 + $0x62] sm:$0xff]  ;;  %v18567_v60 = vld [vmem:[#allocation3 + $0x6a] sm:$0xff]  ;;  %v18587_v28 = vpack.c.bf16 %v3707_v34, %v3706_v39 }
 0x2c1   : > { %9797 = vst [vmem:[#allocation3 + $0x58] sm:$0x3] %v18057_v17  ;;  %9795 = vst [vmem:[#allocation3 + $0x48] sm:$0xff] %v18057_v17  ;;  %v17012_v24 = vld [vmem:[%s20879_s1 + $0x2a0] sm:$0xff]   ;;  %v18577_v35 = vmax.f32 %v16194_v52, 0.0  ;;  %v3861_v29 = vld [vmem:[#allocation3 + $0x78] sm:$0xff]  ;;  %15174 = vmatpush3.bf16.msra.mxu1 %v18511_v59 }
 0x2c2   : > { %9796 = vst [vmem:[#allocation3 + $0x50] sm:$0xff] %v18057_v17  ;;  %21009 = vst [vmem:[#allocation27_spill] sm:$0xff] %v18565_v23  ;;  %v3863_v22 = vld [vmem:[#allocation3 + $0x90] sm:$0xff]  ;;  %v18591_v52 = vld [vmem:[#allocation3 + $0x79] sm:$0xff]  ;;  %v15105_v43 = vpop.f32.mrb[16].mxu0  ;;  %15175 = vmatprep.subr.bf16.mxu1 %v17012_v24 }
 0x2c3   : > { %21010 = vst [vmem:[#allocation28_spill] sm:$0xff] %v18567_v60  ;;  %9800 = vst [vmem:[#allocation3 + $0x70] sm:$0x3] %v18057_v17  ;;  %v3864_v60 = vld [vmem:[#allocation3 + $0x98] sm:$0xff]  ;;  %v3862_v10 = vld [vmem:[#allocation3 + $0x80] sm:$0xff]  ;;  %v18603_v59 = vpack.c.bf16 %v18577_v35, %v3704_v18 }
 0x2c4   : > { %9798 = vst [vmem:[#allocation3 + $0x60] sm:$0xff] %v18057_v17  ;;  %9799 = vst [vmem:[#allocation3 + $0x68] sm:$0xff] %v18057_v17  ;;  %v18582_v17 = vld [vmem:[%s20879_s1 + $0x2a8] sm:$0xff]   ;;  %v18595_v5 = vld [vmem:[#allocation3 + $0x90] sm:$0xff]  ;;  %v18600_v54 = vpack.c.bf16 %v3862_v10, %v3861_v29  ;;  %v16199_v29 = vadd.f32 %v18369_v46, %v18420_v62  ;;  %v16196_v10 = vadd.f32 %v16195_v4, %v15105_v43 }
 0x2c5   : > { %3793 = vst [vmem:[#allocation3 + $0xc1] sm:$0xff] %v3706_v39  ;;  %3791 = vst [vmem:[#allocation3 + $0xa9] sm:$0xff] %v3704_v18  ;;  %v18589_v12 = vld [vmem:[#allocation3 + $0x7a] sm:$0xff]  ;;  %v18605_v39 = vld [vmem:[#allocation3 + $0x82] sm:$0xff]  ;;  %v18619_v25 = vpack.c.bf16 %v3864_v60, %v3863_v22  ;;  %15176 = vmatpush3.bf16.msra.mxu1 %v17012_v24 }
 0x2c6   : > { %21011 = vst [vmem:[#allocation29_spill] sm:$0xff] %v18577_v35  ;;  %3794 = vst [vmem:[#allocation3 + $0xc9] sm:$0xff] %v3707_v34  ;;  %v18593_v23 = vld [vmem:[#allocation3 + $0x78] sm:$0xff]  ;;  %v18611_v2 = vld [vmem:[#allocation3 + $0x81] sm:$0xff]  ;;  %15144 = vmatmul.mubr.bf16.gmra.mrb[40].mxu1 %v18600_v54  ;;  %15177 = vmatprep.subr.bf16.mxu1 %v18582_v17 }
 0x2c7   : > { %21012 = vst [vmem:[#allocation30_spill] sm:$0xff] %v18591_v52  ;;  %21013 = vst [vmem:[#allocation31_spill] sm:$0xff] %v18593_v23  ;;  %v18607_v34 = vld [vmem:[#allocation3 + $0x92] sm:$0xff]  ;;  %v18609_v14 = vld [vmem:[#allocation3 + $0x9a] sm:$0xff]  ;;  %v3533_v52 = vpop.f32.mrb[17].mxu0  ;;  %15147 = vmatprep.mubr.bf16.mxu1 %v18619_v25  ;;  %v16207_v23 = vadd.f32 %v18383_v41, %v18420_v62 }
 0x2c8   : > { %21014 = vst [vmem:[#allocation32_spill] sm:$0xff] %v18595_v5  ;;  %3792 = vst [vmem:[#allocation3 + $0xb1] sm:$0xff] %v18577_v35  ;;  %v18613_v1 = vld [vmem:[#allocation3 + $0x91] sm:$0xff]  ;;  %v18615_v44 = vld [vmem:[#allocation3 + $0x80] sm:$0xff]  ;;  %v15106_v30 = vpop.f32.mrb[18].mxu0 }
 0x2c9   : > { %21015 = vst [vmem:[#allocation33_spill] sm:$0xff] %v18600_v54  ;;  %21016 = vst [vmem:[#allocation34_spill] sm:$0xff] %v18611_v2  ;;  %v18623_v35 = vld [vmem:[#allocation3 + $0x98] sm:$0xff]  ;;  %v18627_v38 = vld [vmem:[#allocation3 + $0x82] sm:$0xff]  ;;  %v16198_v2 = vadd.f32 %v16197_v11, %v3533_v52  ;;  %v3710_v11 = vmax.f32 %v16196_v10, 0.0  ;;  %v16200_v52 = vadd.f32 %v16199_v29, %v15106_v30  ;;  %v3536_v43 = vpop.f32.mrb[19].mxu0  ;;  %15178 = vmatpush3.bf16.msra.mxu1 %v18582_v17 }
 0x2ca   : > { %21017 = vst [vmem:[#allocation35_spill] sm:$0xff] %v18613_v1  ;;  %21018 = vst [vmem:[#allocation36_spill] sm:$0xff] %v18615_v44  ;;  %v18625_v3 = vld [vmem:[#allocation3 + $0x7a] sm:$0xff]  ;;  %v16201_v1 = vadd.f32 %v18420_v62, %v18374_v49  ;;  %v18641_v4 = vld [vmem:[#allocation3 + $0x92] sm:$0xff] }
 0x2cb   : > { %21019 = vst [vmem:[#allocation37_spill] sm:$0xff] %v18619_v25  ;;  %21020 = vst [vmem:[#allocation38_spill] sm:$0xff] %v18623_v35  ;;  %v18632_v46 = vld [vmem:[#allocation3 + $0x99] sm:$0xff]  ;;  %v3708_v60 = vmax.f32 %v16198_v2, 0.0  ;;  %v3711_v30 = vmax.f32 %v16200_v52, 0.0  ;;  %v16205_v35 = vadd.f32 %v18420_v62, %v18378_v50 }
 0x2cc   : > { %21021 = vst [vmem:[#allocation39_spill] sm:$0xff] %v18625_v3  ;;  %21022 = vst [vmem:[#allocation40_spill] sm:$0xff] %v18627_v38  ;;  %v18636_v22 = vld [vmem:[#allocation3 + $0xd8] sm:$0xff]  ;;  %v16202_v18 = vadd.f32 %v16201_v1, %v3536_v43  ;;  %v3865_v10 = vld [vmem:[#allocation3 + $0xa8] sm:$0xff]  ;;  %v16203_v1 = vadd.f32 %v18376_v8, %v18420_v62  ;;  %v15109_v8 = vpop.f32.mrb[20].mxu0 }
 0x2cd   : > { %21023 = vst [vmem:[#allocation41_spill] sm:$0xff] %v18632_v46  ;;  %9803 = vst [vmem:[#allocation3 + $0x88] sm:$0x3] %v18636_v22  ;;  %v18643_v49 = vld [vmem:[#allocation3 + $0x9a] sm:$0xff]  ;;  %v18656_v38 = vld [vmem:[%s20879_s1 + $0x2b8] sm:$0xff]   ;;  %v18663_v52 = vpack.c.bf16 %v3711_v30, %v3710_v11  ;;  %v3549_v54 = vpop.f32.mrb[21].mxu0 }
 0x2ce   : > { %9801 = vst [vmem:[#allocation3 + $0x78] sm:$0xff] %v18636_v22  ;;  %9802 = vst [vmem:[#allocation3 + $0x80] sm:$0xff] %v18636_v22  ;;  %v3709_v29 = vmax.f32 %v16202_v18, 0.0  ;;  %v3867_v24 = vld [vmem:[#allocation3 + $0xc0] sm:$0xff]  ;;  %v18667_v3 = vld [vmem:[#allocation3 + $0xa9] sm:$0xff]  ;;  %v16204_v41 = vadd.f32 %v16203_v1, %v15109_v8  ;;  %v16206_v32 = vadd.f32 %v16205_v35, %v3549_v54  ;;  %v15110_v1 = vpop.f32.mrb[22].mxu0 }
 0x2cf   : > { %21024 = vst [vmem:[#allocation42_spill] sm:$0xff] %v18641_v4  ;;  %21025 = vst [vmem:[#allocation43_spill] sm:$0xff] %v18643_v49  ;;  %v17014_v49 = vld [vmem:[%s20879_s1 + $0x2b0] sm:$0xff]   ;;  %v3868_v4 = vld [vmem:[#allocation3 + $0xc8] sm:$0xff] }
 0x2d0   : > { %9806 = vst [vmem:[#allocation3 + $0xa0] sm:$0x3] %v18636_v22  ;;  %9804 = vst [vmem:[#allocation3 + $0x90] sm:$0xff] %v18636_v22  ;;  %v18658_v2 = vld [vmem:[#allocation3 + $0xc0] sm:$0xff]  ;;  %v3866_v43 = vld [vmem:[#allocation3 + $0xb0] sm:$0xff]  ;;  %15179 = vmatprep.subr.bf16.mxu1 %v17014_v49  ;;  %v18677_v17 = vpack.c.bf16 %v3709_v29, %v3708_v60  ;;  %v18691_v57 = vpack.c.bf16 %v3868_v4, %v3867_v24 }
 0x2d1   : > { %9805 = vst [vmem:[#allocation3 + $0x98] sm:$0xff] %v18636_v22  ;;  %3797 = vst [vmem:[#allocation3 + $0xf1] sm:$0xff] %v3710_v11  ;;  %v18665_v18 = vld [vmem:[#allocation3 + $0xaa] sm:$0xff]  ;;  %v18675_v44 = vpack.c.bf16 %v3866_v43, %v3865_v10  ;;  %v18679_v11 = vld [vmem:[#allocation3 + $0xb2] sm:$0xff]  ;;  %15180 = vmatpush3.bf16.msra.mxu1 %v17014_v49  ;;  %v16211_v49 = vadd.f32 %v18387_v45, %v18420_v62 }
 0x2d2   : > { %3795 = vst [vmem:[#allocation3 + $0xd9] sm:$0xff] %v3708_v60  ;;  %21026 = vst [vmem:[#allocation44_spill] sm:$0xff] %v18658_v2  ;;  %v18669_v5 = vld [vmem:[#allocation3 + $0xa8] sm:$0xff]  ;;  %v18687_v25 = vld [vmem:[#allocation3 + $0xb0] sm:$0xff]  ;;  %v16208_v60 = vadd.f32 %v16207_v23, %v15110_v1  ;;  %15181 = vmatprep.subr.bf16.mxu1 %v18656_v38  ;;  %v16213_v2 = vadd.f32 %v18420_v62, %v18389_v19 }
 0x2d3   : > { %3798 = vst [vmem:[#allocation3 + $0xf9] sm:$0xff] %v3711_v30  ;;  %21027 = vst [vmem:[#allocation45_spill] sm:$0xff] %v18667_v3  ;;  %v18681_v30 = vld [vmem:[#allocation3 + $0xc2] sm:$0xff]  ;;  %v18683_v3 = vld [vmem:[#allocation3 + $0xca] sm:$0xff]  ;;  %15148 = vmatmul.mubr.bf16.gmra.mrb[44].mxu1 %v18675_v44 }
 0x2d4   : > { %21028 = vst [vmem:[#allocation46_spill] sm:$0xff] %v18669_v5  ;;  %3796 = vst [vmem:[#allocation3 + $0xe1] sm:$0xff] %v3709_v29  ;;  %v18685_v46 = vld [vmem:[#allocation3 + $0xc1] sm:$0xff]  ;;  %v18697_v10 = vld [vmem:[#allocation3 + $0xb1] sm:$0xff]  ;;  %v3714_v29 = vmax.f32 %v16204_v41, 0.0  ;;  %15151 = vmatprep.mubr.bf16.mxu1 %v18691_v57  ;;  %v3715_v23 = vmax.f32 %v16208_v60, 0.0  ;;  %v16215_v60 = vadd.f32 %v18391_v55, %v18420_v62 }
 0x2d5   : > { %21029 = vst [vmem:[#allocation47_spill] sm:$0xff] %v18675_v44  ;;  %21030 = vst [vmem:[#allocation48_spill] sm:$0xff] %v18683_v3  ;;  %v18689_v50 = vld [vmem:[#allocation3 + $0xc8] sm:$0xff]  ;;  %v18701_v27 = vld [vmem:[#allocation3 + $0xb2] sm:$0xff]  ;;  %15182 = vmatpush3.bf16.msra.mxu1 %v18656_v38 }
 0x2d6   : > { %21031 = vst [vmem:[#allocation49_spill] sm:$0xff] %v18685_v46  ;;  %21032 = vst [vmem:[#allocation50_spill] sm:$0xff] %v18687_v25  ;;  %v18699_v43 = vld [vmem:[#allocation3 + $0xaa] sm:$0xff]  ;;  %v16209_v46 = vadd.f32 %v18420_v62, %v18385_v51  ;;  %v18711_v24 = vld [vmem:[#allocation3 + $0xc2] sm:$0xff]  ;;  %v3712_v51 = vmax.f32 %v16206_v32, 0.0  ;;  %v18738_v45 = vpack.c.bf16 %v3715_v23, %v3714_v29 }
 0x2d7   : > { %21033 = vst [vmem:[#allocation51_spill] sm:$0xff] %v18689_v50  ;;  %21034 = vst [vmem:[#allocation52_spill] sm:$0xff] %v18691_v57  ;;  %v18706_v4 = vld [vmem:[#allocation3 + $0xc9] sm:$0xff] }
 0x2d8   : > { %21035 = vst [vmem:[#allocation53_spill] sm:$0xff] %v18697_v10  ;;  %21036 = vst [vmem:[#allocation54_spill] sm:$0xff] %v18699_v43  ;;  %v18713_v8 = vld [vmem:[#allocation3 + $0xca] sm:$0xff] }
 0x2d9   : > { %21037 = vst [vmem:[#allocation55_spill] sm:$0xff] %v18701_v27  ;;  %21038 = vst [vmem:[#allocation56_spill] sm:$0xff] %v18706_v4  ;;  %v3552_v27 = vpop.f32.mrb[23].mxu0  ;;  %v18723_v35 = vld [vmem:[%s20879_s1 + $0x2c0] sm:$0xff]   ;;  %v3869_v41 = vld [vmem:[#allocation3 + $0xd8] sm:$0xff] }
 0x2da   : > { %9809 = vst [vmem:[#allocation3 + $0xb8] sm:$0x3] %v18636_v22  ;;  %9807 = vst [vmem:[#allocation3 + $0xa8] sm:$0xff] %v18636_v22  ;;  %v16210_v54 = vadd.f32 %v16209_v46, %v3552_v27  ;;  %v3871_v1 = vld [vmem:[#allocation3 + $0xf0] sm:$0xff]  ;;  %v4612_v32 = vld [vmem:[#allocation3 + $0xfa] sm:$0xff]  ;;  %v15113_v57 = vpop.f32.mrb[24].mxu0  ;;  %15215 = vmatprep.subr.bf16.mxu1 %v18723_v35 }
 0x2db   : > { %9808 = vst [vmem:[#allocation3 + $0xb0] sm:$0xff] %v18636_v22  ;;  %21039 = vst [vmem:[#allocation57_spill] sm:$0xff] %v18711_v24  ;;  %v3872_v24 = vld [vmem:[#allocation3 + $0xf8] sm:$0xff]  ;;  %v18729_v46 = vld [vmem:[#allocation3 + $0xf0] sm:$0xff] }
 0x2dc   : > { %21040 = vst [vmem:[#allocation58_spill] sm:$0xff] %v18713_v8  ;;  %9812 = vst [vmem:[#allocation3 + $0xd0] sm:$0x3] %v18636_v22  ;;  %v3713_v8 = vmax.f32 %v16210_v54, 0.0  ;;  %v4611_v43 = vld [vmem:[#allocation3 + $0xf2] sm:$0xff]  ;;  %v3870_v50 = vld [vmem:[#allocation3 + $0xe0] sm:$0xff]  ;;  %v18746_v19 = vpack.c.bf16 %v3872_v24, %v3871_v1  ;;  %v16217_v1 = vadd.f32 %v18420_v62, %v18393_v61 }
 0x2dd   : > { %9810 = vst [vmem:[#allocation3 + $0xc0] sm:$0xff] %v18636_v22  ;;  %9811 = vst [vmem:[#allocation3 + $0xc8] sm:$0xff] %v18636_v22  ;;  %v18727_v27 = vld [vmem:[#allocation3 + $0xd8] sm:$0xff]  ;;  %v4610_v5 = vld [vmem:[#allocation3 + $0xe2] sm:$0xff]  ;;  %v18740_v25 = vpack.c.bf16 %v4612_v32, %v4611_v43  ;;  %v18744_v44 = vpack.c.bf16 %v3870_v50, %v3869_v41  ;;  %v3565_v32 = vpop.f32.mrb[25].mxu0 }
 0x2de   : > { %3801 = vst [vmem:[#allocation3 + $0x121] sm:$0xff] %v3714_v29  ;;  %3799 = vst [vmem:[#allocation3 + $0x109] sm:$0xff] %v3712_v51  ;;  %v18731_v10 = vld [vmem:[#allocation3 + $0xd9] sm:$0xff]  ;;  %v18742_v4 = vld [vmem:[#allocation3 + $0xf1] sm:$0xff]  ;;  %v18749_v55 = vpack.c.bf16 %v3713_v8, %v3712_v51 }
 0x2df   : > { %21041 = vst [vmem:[#allocation59_spill] sm:$0xff] %v18727_v27  ;;  %21042 = vst [vmem:[#allocation60_spill] sm:$0xff] %v18729_v46  ;;  %v4609_v54 = vld [vmem:[#allocation3 + $0xda] sm:$0xff]  ;;  %v18769_v41 = vld [vmem:[#allocation3 + $0xe2] sm:$0xff]  ;;  %15152 = vmatmul.mubr.bf16.gmra.mrb[48].mxu1 %v18744_v44 }
 0x2e0   : > { %21043 = vst [vmem:[#allocation61_spill] sm:$0xff] %v18731_v10  ;;  %3802 = vst [vmem:[#allocation3 + $0x129] sm:$0xff] %v3715_v23  ;;  %v18751_v3 = vpack.c.bf16 %v4610_v5, %v4609_v54  ;;  %v18753_v38 = vld [vmem:[#allocation3 + $0xe0] sm:$0xff]  ;;  %v18755_v29 = vld [vmem:[#allocation3 + $0xf8] sm:$0xff]  ;;  %v16212_v23 = vadd.f32 %v16211_v49, %v15113_v57  ;;  %v16214_v57 = vadd.f32 %v16213_v2, %v3565_v32  ;;  %v15114_v49 = vpop.f32.mrb[26].mxu0  ;;  %15155 = vmatprep.mubr.bf16.mxu1 %v18746_v19 }
 0x2e1   : > { %21044 = vst [vmem:[#allocation62_spill] sm:$0xff] %v18742_v4  ;;  %3800 = vst [vmem:[#allocation3 + $0x111] sm:$0xff] %v3713_v8  ;;  %v18757_v43 = vld [vmem:[#allocation3 + $0xe1] sm:$0xff]  ;;  %v18765_v51 = vld [vmem:[#allocation3 + $0xf9] sm:$0xff]  ;;  %v16216_v2 = vadd.f32 %v16215_v60, %v15114_v49  ;;  %v3568_v32 = vpop.f32.mrb[27].mxu0  ;;  %v16219_v60 = vadd.f32 %v18395_v7, %v18420_v62 }
 0x2e2   : > { %21045 = vst [vmem:[#allocation63_spill] sm:$0xff] %v18744_v44  ;;  %21046 = vst [vmem:[#allocation64_spill] sm:$0xff] %v18746_v19  ;;  %v18767_v5 = vld [vmem:[#allocation3 + $0xda] sm:$0xff]  ;;  %v18781_v8 = vld [vmem:[#allocation3 + $0xf2] sm:$0xff]  ;;  %v3718_v61 = vmax.f32 %v16212_v23, 0.0  ;;  %v3716_v24 = vmax.f32 %v16214_v57, 0.0  ;;  %v16223_v57 = vadd.f32 %v18399_v48, %v18420_v62 }
 0x2e3   : > { %21047 = vst [vmem:[#allocation65_spill] sm:$0xff] %v18753_v38  ;;  %21048 = vst [vmem:[#allocation66_spill] sm:$0xff] %v18755_v29  ;;  %v18783_v50 = vld [vmem:[#allocation3 + $0xfa] sm:$0xff]  ;;  %v15117_v27 = vpop.f32.mrb[28].mxu0 }
 0x2e4   : > { %21049 = vst [vmem:[#allocation67_spill] sm:$0xff] %v18757_v43  ;;  %21050 = vst [vmem:[#allocation68_spill] sm:$0xff] %v18765_v51 }
 0x2e5   : > { %21051 = vst [vmem:[#allocation69_spill] sm:$0xff] %v18767_v5  ;;  %21052 = vst [vmem:[#allocation70_spill] sm:$0xff] %v18769_v41  ;;  %v16218_v5 = vadd.f32 %v16217_v1, %v3568_v32  ;;  %v3719_v41 = vmax.f32 %v16216_v2, 0.0  ;;  %v3873_v4 = vld [vmem:[#allocation3 + $0x108] sm:$0xff]  ;;  %v3875_v51 = vld [vmem:[#allocation3 + $0x120] sm:$0xff]  ;;  %v16221_v1 = vadd.f32 %v18420_v62, %v18397_v9 }
 0x2e6   : > { %9815 = vst [vmem:[#allocation3 + $0xe8] sm:$0x3] %v18636_v22  ;;  %9813 = vst [vmem:[#allocation3 + $0xd8] sm:$0xff] %v18636_v22  ;;  %v18797_v43 = vld [vmem:[#allocation3 + $0x109] sm:$0xff]  ;;  %v18807_v29 = vld [vmem:[#allocation3 + $0x121] sm:$0xff] }
 0x2e7   : > { %9814 = vst [vmem:[#allocation3 + $0xe0] sm:$0xff] %v18636_v22  ;;  %21053 = vst [vmem:[#allocation71_spill] sm:$0xff] %v18781_v8  ;;  %v3717_v23 = vmax.f32 %v16218_v5, 0.0  ;;  %v3876_v49 = vld [vmem:[#allocation3 + $0x128] sm:$0xff]  ;;  %v18803_v7 = vpack.c.bf16 %v3719_v41, %v3718_v61 }
 0x2e8   : > { %21054 = vst [vmem:[#allocation72_spill] sm:$0xff] %v18783_v50  ;;  %9816 = vst [vmem:[#allocation3 + $0xf0] sm:$0xff] %v18636_v22  ;;  %v4615_v10 = vld [vmem:[#allocation3 + $0x122] sm:$0xff]  ;;  %v4616_v54 = vld [vmem:[#allocation3 + $0x12a] sm:$0xff]  ;;  %v18811_v19 = vpack.c.bf16 %v3876_v49, %v3875_v51 }
 0x2e9   : > { %9817 = vst [vmem:[#allocation3 + $0xf8] sm:$0xff] %v18636_v22  ;;  %9818 = vst [vmem:[#allocation3 + $0x100] sm:$0x3] %v18636_v22  ;;  %v18793_v8 = vld [vmem:[#allocation3 + $0x108] sm:$0xff]  ;;  %v18795_v50 = vld [vmem:[#allocation3 + $0x120] sm:$0xff]  ;;  %v18805_v46 = vpack.c.bf16 %v4616_v54, %v4615_v10  ;;  %v18813_v9 = vpack.c.bf16 %v3717_v23, %v3716_v24  ;;  %v16220_v10 = vadd.f32 %v16219_v60, %v15117_v27  ;;  %v3581_v54 = vpop.f32.mrb[29].mxu0 }
 0x2ea   : > { %3805 = vst [vmem:[#allocation3 + $0x151] sm:$0xff] %v3718_v61  ;;  %3803 = vst [vmem:[#allocation3 + $0x139] sm:$0xff] %v3716_v24  ;;  %v3874_v2 = vld [vmem:[#allocation3 + $0x110] sm:$0xff]  ;;  %v16222_v27 = vadd.f32 %v16221_v1, %v3581_v54  ;;  %v15118_v60 = vpop.f32.mrb[30].mxu0  ;;  %v18845_v24 = vld [vmem:[#allocation3 + $0x122] sm:$0xff] }
 0x2eb   : > { %21055 = vst [vmem:[#allocation73_spill] sm:$0xff] %v18793_v8  ;;  %21056 = vst [vmem:[#allocation74_spill] sm:$0xff] %v18795_v50  ;;  %v4613_v5 = vld [vmem:[#allocation3 + $0x10a] sm:$0xff]  ;;  %v4614_v32 = vld [vmem:[#allocation3 + $0x112] sm:$0xff]  ;;  %v18809_v38 = vpack.c.bf16 %v3874_v2, %v3873_v4  ;;  %v16225_v2 = vadd.f32 %v18420_v62, %v18401_v36  ;;  %v3722_v36 = vmax.f32 %v16220_v10, 0.0  ;;  %v16224_v62 = vadd.f32 %v16223_v57, %v15118_v60  ;;  %v3584_v1 = vpop.f32.mrb[31].mxu0 }
 0x2ec   : > { %21057 = vst [vmem:[#allocation75_spill] sm:$0xff] %v18797_v43  ;;  %3806 = vst [vmem:[#allocation3 + $0x159] sm:$0xff] %v3719_v41  ;;  %v18815_v44 = vpack.c.bf16 %v4614_v32, %v4613_v5  ;;  %v18817_v48 = vld [vmem:[#allocation3 + $0x110] sm:$0xff]  ;;  %v18819_v41 = vld [vmem:[#allocation3 + $0x128] sm:$0xff]  ;;  %v3720_v32 = vmax.f32 %v16222_v27, 0.0 }
 0x2ed   : > { %21058 = vst [vmem:[#allocation76_spill] sm:$0xff] %v18805_v46  ;;  %21059 = vst [vmem:[#allocation77_spill] sm:$0xff] %v18807_v29  ;;  %v18821_v61 = vld [vmem:[#allocation3 + $0x111] sm:$0xff]  ;;  %v18829_v51 = vld [vmem:[#allocation3 + $0x129] sm:$0xff]  ;;  %15156 = vmatmul.mubr.bf16.gmra.mrb[52].mxu1 %v18809_v38  ;;  %v16226_v5 = vadd.f32 %v16225_v2, %v3584_v1  ;;  %v3723_v46 = vmax.f32 %v16224_v62, 0.0 }
 0x2ee   : > { %3804 = vst [vmem:[#allocation3 + $0x141] sm:$0xff] %v3717_v23  ;;  %21060 = vst [vmem:[#allocation78_spill] sm:$0xff] %v18811_v19  ;;  %v18831_v23 = vld [vmem:[#allocation3 + $0x10a] sm:$0xff]  ;;  %v18833_v49 = vld [vmem:[#allocation3 + $0x112] sm:$0xff]  ;;  %15159 = vmatprep.mubr.bf16.mxu1 %v18811_v19 }
 0x2ef   : > { %21061 = vst [vmem:[#allocation79_spill] sm:$0xff] %v18817_v48  ;;  %21062 = vst [vmem:[#allocation80_spill] sm:$0xff] %v18819_v41  ;;  %v18847_v4 = vld [vmem:[#allocation3 + $0x12a] sm:$0xff]  ;;  %v3721_v10 = vmax.f32 %v16226_v5, 0.0  ;;  %v18863_v62 = vpack.c.bf16 %v3723_v46, %v3722_v36 }
 0x2f0   : > { %21063 = vst [vmem:[#allocation81_spill] sm:$0xff] %v18821_v61  ;;  %21064 = vst [vmem:[#allocation82_spill] sm:$0xff] %v18829_v51 }
 0x2f1   : > { %21065 = vst [vmem:[#allocation83_spill] sm:$0xff] %v18831_v23  ;;  %21066 = vst [vmem:[#allocation84_spill] sm:$0xff] %v18833_v49  ;;  %v3877_v23 = vld [vmem:[#allocation3 + $0x138] sm:$0xff]  ;;  %v3879_v57 = vld [vmem:[#allocation3 + $0x150] sm:$0xff]  ;;  %v18869_v61 = vpack.c.bf16 %v3721_v10, %v3720_v32 }
 0x2f2   : > { %9819 = vst [vmem:[#allocation3 + $0x108] sm:$0xff] %v18636_v22  ;;  %9820 = vst [vmem:[#allocation3 + $0x110] sm:$0xff] %v18636_v22  ;;  %v18855_v51 = vld [vmem:[#allocation3 + $0x138] sm:$0xff]  ;;  %v18857_v54 = vld [vmem:[#allocation3 + $0x150] sm:$0xff] }
 0x2f3   : > { %9821 = vst [vmem:[#allocation3 + $0x118] sm:$0x3] %v18636_v22  ;;  %21067 = vst [vmem:[#allocation85_spill] sm:$0xff] %v18845_v24  ;;  %v3880_v60 = vld [vmem:[#allocation3 + $0x158] sm:$0xff] }
 0x2f4   : > { %21068 = vst [vmem:[#allocation86_spill] sm:$0xff] %v18847_v4  ;;  %9822 = vst [vmem:[#allocation3 + $0x120] sm:$0xff] %v18636_v22  ;;  %v4619_v49 = vld [vmem:[#allocation3 + $0x152] sm:$0xff]  ;;  %v4620_v29 = vld [vmem:[#allocation3 + $0x15a] sm:$0xff]  ;;  %v18879_v19 = vpack.c.bf16 %v3880_v60, %v3879_v57  ;;  %v4285_v60 = vpack.c.bf16 %v18440_v21, %v18436_v13 }
 0x2f5   : > { %9823 = vst [vmem:[#allocation3 + $0x128] sm:$0xff] %v18636_v22  ;;  %9824 = vst [vmem:[#allocation3 + $0x130] sm:$0x3] %v18636_v22  ;;  %v18859_v24 = vld [vmem:[#allocation3 + $0x139] sm:$0xff]  ;;  %v4618_v27 = vld [vmem:[#allocation3 + $0x142] sm:$0xff]  ;;  %v18861_v2 = vpack.c.bf16 %v4620_v29, %v4619_v49 }
 0x2f6   : > { %3809 = vst [vmem:[#allocation3 + $0x181] sm:$0xff] %v3722_v36  ;;  %3807 = vst [vmem:[#allocation3 + $0x169] sm:$0xff] %v3720_v32  ;;  %v3878_v4 = vld [vmem:[#allocation3 + $0x140] sm:$0xff]  ;;  %v18865_v1 = vld [vmem:[#allocation3 + $0x151] sm:$0xff] }
 0x2f7   : > { %21069 = vst [vmem:[#allocation87_spill] sm:$0xff] %v18855_v51  ;;  %21070 = vst [vmem:[#allocation88_spill] sm:$0xff] %v18857_v54  ;;  %v4617_v43 = vld [vmem:[#allocation3 + $0x13a] sm:$0xff]  ;;  %v18867_v5 = vpack.c.bf16 %v3878_v4, %v3877_v23  ;;  %v18891_v49 = vld [vmem:[#allocation3 + $0x142] sm:$0xff] }
 0x2f8   : > { %21071 = vst [vmem:[#allocation89_spill] sm:$0xff] %v18859_v24  ;;  %3810 = vst [vmem:[#allocation3 + $0x189] sm:$0xff] %v3723_v46  ;;  %v18871_v50 = vpack.c.bf16 %v4618_v27, %v4617_v43  ;;  %v18873_v41 = vld [vmem:[#allocation3 + $0x140] sm:$0xff]  ;;  %v18875_v8 = vld [vmem:[#allocation3 + $0x158] sm:$0xff] }
 0x2f9   : > { %21072 = vst [vmem:[#allocation90_spill] sm:$0xff] %v18865_v1  ;;  %3808 = vst [vmem:[#allocation3 + $0x171] sm:$0xff] %v3721_v10  ;;  %v18877_v48 = vld [vmem:[#allocation3 + $0x141] sm:$0xff]  ;;  %v18887_v23 = vld [vmem:[#allocation3 + $0x159] sm:$0xff]  ;;  %15160 = vmatmul.mubr.bf16.gmra.mrb[56].mxu1 %v18867_v5 }
 0x2fa   : > { %21073 = vst [vmem:[#allocation91_spill] sm:$0xff] %v18873_v41  ;;  %21074 = vst [vmem:[#allocation92_spill] sm:$0xff] %v18875_v8  ;;  %v18889_v43 = vld [vmem:[#allocation3 + $0x13a] sm:$0xff]  ;;  %v18901_v10 = vld [vmem:[#allocation3 + $0x152] sm:$0xff]  ;;  %15163 = vmatprep.mubr.bf16.mxu1 %v18879_v19 }
 0x2fb   : > { %21075 = vst [vmem:[#allocation93_spill] sm:$0xff] %v18877_v48  ;;  %21076 = vst [vmem:[#allocation94_spill] sm:$0xff] %v18887_v23  ;;  %v18903_v57 = vld [vmem:[#allocation3 + $0x15a] sm:$0xff] }
 0x2fc   : > { %21077 = vst [vmem:[#allocation95_spill] sm:$0xff] %v18889_v43  ;;  %21078 = vst [vmem:[#allocation96_spill] sm:$0xff] %v18891_v49 }
 0x2fd   : > { %9825 = vst [vmem:[#allocation3 + $0x138] sm:$0xff] %v18636_v22  ;;  %9826 = vst [vmem:[#allocation3 + $0x140] sm:$0xff] %v18636_v22  ;;  %v3881_v27 = vld [vmem:[#allocation3 + $0x168] sm:$0xff]  ;;  %v4991_v36 = vld [vmem:[#allocation3 + $0x180] sm:$0xff] }
 0x2fe   : > { %9827 = vst [vmem:[#allocation3 + $0x148] sm:$0x3] %v18636_v22  ;;  %21079 = vst [vmem:[#allocation97_spill] sm:$0xff] %v18901_v10  ;;  %v18911_v32 = vld [vmem:[#allocation3 + $0x181] sm:$0xff]  ;;  %v18915_v49 = vld [vmem:[#allocation3 + $0x169] sm:$0xff] }
 0x2ff   : > { %21080 = vst [vmem:[#allocation98_spill] sm:$0xff] %v18903_v57  ;;  %9828 = vst [vmem:[#allocation3 + $0x150] sm:$0xff] %v18636_v22  ;;  %v4992_v4 = vld [vmem:[#allocation3 + $0x188] sm:$0xff] }
 0x300   : > { %9829 = vst [vmem:[#allocation3 + $0x158] sm:$0xff] %v18636_v22  ;;  %9830 = vst [vmem:[#allocation3 + $0x160] sm:$0x3] %v18636_v22  ;;  %v5731_v29 = vld [vmem:[#allocation3 + $0x182] sm:$0xff]  ;;  %v5732_v46 = vld [vmem:[#allocation3 + $0x18a] sm:$0xff]  ;;  %v18919_v23 = vpack.c.bf16 %v4992_v4, %v4991_v36 }
 0x301   : > { %v18913_v43 = vld [vmem:[#allocation3 + $0x168] sm:$0xff]  ;;  %v3882_v1 = vld [vmem:[#allocation3 + $0x170] sm:$0xff]  ;;  %v18921_v24 = vpack.c.bf16 %v5732_v46, %v5731_v29  ;;  %9834 = vst [vmem:[#allocation3 + $0x180] sm:$0xff] %v18636_v22  ;;  %v17017_v36 = vld [vmem:[%s20879_s1 + $0x2c8] sm:$0xff]  }
 0x302   : > { %v4621_v10 = vld [vmem:[#allocation3 + $0x16a] sm:$0xff]  ;;  %v4622_v57 = vld [vmem:[#allocation3 + $0x172] sm:$0xff]  ;;  %v18924_v48 = vpack.c.bf16 %v3882_v1, %v3881_v27  ;;  %v17034_v27 = vld [vmem:[%s20879_s1 + $0x350] sm:$0xff]  }
 0x303   : > { %v18926_v54 = vpack.c.bf16 %v4622_v57, %v4621_v10  ;;  %v18928_v8 = vld [vmem:[#allocation3 + $0x170] sm:$0xff]  ;;  %v17018_v10 = vld [vmem:[%s20879_s1 + $0x2d0] sm:$0xff]  }
 0x304   : > { %v18930_v51 = vld [vmem:[#allocation3 + $0x171] sm:$0xff]  ;;  %v18932_v41 = vld [vmem:[#allocation3 + $0x189] sm:$0xff]  ;;  %v6149_v13 = vpack.c.bf16 %v18928_v8, %v18913_v43  ;;  %15164 = vmatmul.mubr.bf16.gmra.mrb[60].mxu1 %v18924_v48  ;;  %v21085_v57 = vld [vmem:[#allocation11_spill] sm:$0xff] }
 0x305   : > { %v6519_v21 = vpack.c.bf16 %v18930_v51, %v18915_v49  ;;  %v6520_v46 = vpack.c.bf16 %v18932_v41, %v18911_v32  ;;  %v18940_v29 = vld [vmem:[#allocation3 + $0x16a] sm:$0xff]  ;;  %v18942_v1 = vld [vmem:[#allocation3 + $0x172] sm:$0xff]  ;;  %9835 = vst [vmem:[#allocation3 + $0x188] sm:$0xff] %v18636_v22  ;;  %9836 = vst [vmem:[#allocation3 + $0x190] sm:$0x3] %v18636_v22  ;;  %15183 = vmatprep.mubr.bf16.mxu1 %v4285_v60 }
 0x306   : > { %v6889_v4 = vpack.c.bf16 %v18942_v1, %v18940_v29  ;;  %9831 = vst [vmem:[#allocation3 + $0x168] sm:$0xff] %v18636_v22  ;;  %9832 = vst [vmem:[#allocation3 + $0x170] sm:$0xff] %v18636_v22  ;;  %v21086_v60 = vld [vmem:[#allocation18_spill] sm:$0xff]  ;;  %v17066_v43 = vld [vmem:[%s20879_s1 + $0x450] sm:$0xff]  }
 0x307   : > { %9833 = vst [vmem:[#allocation3 + $0x178] sm:$0x3] %v18636_v22  ;;  %v17019_v22 = vld [vmem:[%s20879_s1 + $0x2d8] sm:$0xff]   ;;  %v21175_v51 = vld [vmem:[#allocation39_spill] sm:$0xff]  ;;  %v21177_v32 = vld [vmem:[#allocation42_spill] sm:$0xff] }
 0x308   : > { %v21176_v49 = vld [vmem:[#allocation40_spill] sm:$0xff]  ;;  %v17076_v1 = vld [vmem:[%s20879_s1 + $0x4a0] sm:$0xff]  }
 0x309   : > { %v6879_v41 = vpack.c.bf16 %v21176_v49, %v21175_v51  ;;  %v17075_v29 = vld [vmem:[%s20879_s1 + $0x498] sm:$0xff]  }
 0x30c   : > { %15184 = vmatmul.mubr.bf16.vlgmr.msra.gmra.mrb[32].mxu1 %v18432_v37  ;;  %v17021_v37 = vld [vmem:[%s20879_s1 + $0x2e8] sm:$0xff]  }
 0x30d   : > { %15187 = vmatprep.mubr.bf16.mxu1 %v18428_v31  ;;  %15216 = vmatpush3.bf16.msra.mxu1 %v18723_v35  ;;  %v17020_v31 = vld [vmem:[%s20879_s1 + $0x2e0] sm:$0xff]   ;;  %v19004_v35 = vpack.c.bf16 %v18466_v16, %v18464_v15  ;;  %v19020_v15 = vpack.c.bf16 %v18535_v63, %v18533_v20  ;;  %v17030_v20 = vld [vmem:[%s20879_s1 + $0x330] sm:$0xff]   ;;  %v19045_v63 = vpack.c.bf16 %v18679_v11, %v18665_v18  ;;  %v21083_v18 = vld [vmem:[#allocation76_spill] sm:$0xff] }
 0x30e   : > { %15217 = vmatprep.subr.bf16.mxu1 %v17017_v36  ;;  %v17028_v16 = vld [vmem:[%s20879_s1 + $0x320] sm:$0xff]   ;;  %v21084_v11 = vld [vmem:[#allocation8_spill] sm:$0xff] }
 0x311   : > { %15218 = vmatpush3.bf16.msra.mxu1 %v17017_v36  ;;  %v17035_v36 = vld [vmem:[%s20879_s1 + $0x358] sm:$0xff]  }
 0x312   : > { %15219 = vmatprep.subr.bf16.mxu1 %v17018_v10 }
 0x314   : > { %15188 = vmatmul.mubr.bf16.gmra.mrb[36].mxu1 %v18474_v26  ;;  %v17023_v26 = vld [vmem:[%s20879_s1 + $0x2f8] sm:$0xff]  }
 0x315   : > { %15191 = vmatprep.mubr.bf16.mxu1 %v18460_v53  ;;  %15220 = vmatpush3.bf16.msra.mxu1 %v17018_v10  ;;  %v17022_v53 = vld [vmem:[%s20879_s1 + $0x2f0] sm:$0xff]   ;;  %v21087_v10 = vld [vmem:[#allocation22_spill] sm:$0xff] }
 0x316   : > { %15221 = vmatprep.subr.bf16.mxu1 %v17019_v22 }
 0x319   : > { %15222 = vmatpush3.bf16.msra.mxu1 %v17019_v22  ;;  %v21088_v22 = vld [vmem:[#allocation33_spill] sm:$0xff] }
 0x31a   : > { %15223 = vmatprep.subr.bf16.mxu1 %v17020_v31 }
 0x31c   : > { %15192 = vmatmul.mubr.bf16.gmra.mrb[40].mxu1 %v18529_v33  ;;  %v21081_v33 = vpack.c.bf16 %v18444_v0, %v18442_v6  ;;  %v17026_v6 = vld [vmem:[%s20879_s1 + $0x310] sm:$0xff]   ;;  %v19013_v0 = vpack.c.bf16 %v18531_v56, %v18517_v42  ;;  %v17029_v42 = vld [vmem:[%s20879_s1 + $0x328] sm:$0xff]   ;;  %v19036_v56 = vpack.c.bf16 %v18609_v14, %v18607_v34  ;;  %v17031_v14 = vld [vmem:[%s20879_s1 + $0x338] sm:$0xff]  }
 0x31d   : > { %15195 = vmatprep.mubr.bf16.mxu1 %v18515_v58  ;;  %15224 = vmatpush3.bf16.msra.mxu1 %v17020_v31  ;;  %v17024_v58 = vld [vmem:[%s20879_s1 + $0x300] sm:$0xff]  }
 0x31e   : > { %15225 = vmatprep.subr.bf16.mxu1 %v17021_v37  ;;  %v17032_v34 = vld [vmem:[%s20879_s1 + $0x340] sm:$0xff]  }
 0x31f   : > { %v17036_v31 = vld [vmem:[%s20879_s1 + $0x360] sm:$0xff]  }
 0x321   : > { %15226 = vmatpush3.bf16.msra.mxu1 %v17021_v37  ;;  %v17037_v37 = vld [vmem:[%s20879_s1 + $0x368] sm:$0xff]  }
 0x322   : > { %15227 = vmatprep.subr.bf16.mxu1 %v17022_v53 }
 0x324   : > { %15196 = vmatmul.mubr.bf16.gmra.mrb[44].mxu1 %v18603_v59  ;;  %v17025_v59 = vld [vmem:[%s20879_s1 + $0x308] sm:$0xff]  }
 0x325   : > { %15199 = vmatprep.mubr.bf16.mxu1 %v18587_v28  ;;  %15228 = vmatpush3.bf16.msra.mxu1 %v17022_v53  ;;  %v18997_v28 = vpack.c.bf16 %v18476_v47, %v18462_v40  ;;  %v17027_v40 = vld [vmem:[%s20879_s1 + $0x318] sm:$0xff]   ;;  %v19029_v47 = vpack.c.bf16 %v18605_v39, %v18589_v12  ;;  %v21089_v53 = vld [vmem:[#allocation37_spill] sm:$0xff] }
 0x326   : > { %15229 = vmatprep.subr.bf16.mxu1 %v17023_v26  ;;  %v21082_v12 = vld [vmem:[#allocation48_spill] sm:$0xff] }
 0x327   : > { %v19052_v39 = vpack.c.bf16 %v21082_v12, %v18681_v30  ;;  %v17033_v30 = vld [vmem:[%s20879_s1 + $0x348] sm:$0xff]  }
 0x329   : > { %15230 = vmatpush3.bf16.msra.mxu1 %v17023_v26  ;;  %v21090_v26 = vld [vmem:[#allocation47_spill] sm:$0xff] }
 0x32a   : > { %15263 = vmatprep.subr.bf16.mxu1 %v17024_v58 }
 0x32c   : > { %15200 = vmatmul.mubr.bf16.gmra.mrb[48].mxu1 %v18677_v17 }
 0x32d   : > { %15203 = vmatprep.mubr.bf16.mxu1 %v18663_v52 }
 0x334   : > { %15204 = vmatmul.mubr.bf16.gmra.mrb[52].mxu1 %v18749_v55 }
 0x335   : > { %15207 = vmatprep.mubr.bf16.mxu1 %v18738_v45 }
 0x33c   : > { %15208 = vmatmul.mubr.bf16.gmra.mrb[56].mxu1 %v18813_v9 }
 0x33d   : > { %15211 = vmatprep.mubr.bf16.mxu1 %v18803_v7 }
 0x344   : > { %15212 = vmatmul.mubr.bf16.gmra.mrb[60].mxu1 %v18869_v61 }
 0x345   : > { %15231 = vmatprep.mubr.bf16.mxu1 %v21081_v33  ;;  %v17039_v33 = vld [vmem:[%s20879_s1 + $0x378] sm:$0xff]  }
 0x34c   : > { %15232 = vmatmul.mubr.bf16.vlgmr.msra.gmra.mrb[32].mxu1 %v18997_v28 }
 0x34d   : > { %15235 = vmatprep.mubr.bf16.mxu1 %v19004_v35  ;;  %15264 = vmatpush3.bf16.msra.mxu1 %v17024_v58  ;;  %v17038_v58 = vld [vmem:[%s20879_s1 + $0x370] sm:$0xff]  }
 0x34e   : > { %15265 = vmatprep.subr.bf16.mxu1 %v17025_v59 }
 0x351   : > { %15266 = vmatpush3.bf16.msra.mxu1 %v17025_v59  ;;  %v21091_v59 = vld [vmem:[#allocation52_spill] sm:$0xff] }
 0x352   : > { %15267 = vmatprep.subr.bf16.mxu1 %v17026_v6 }
 0x354   : > { %15236 = vmatmul.mubr.bf16.gmra.mrb[36].mxu1 %v19013_v0 }
 0x355   : > { %15239 = vmatprep.mubr.bf16.mxu1 %v19020_v15  ;;  %15268 = vmatpush3.bf16.msra.mxu1 %v17026_v6  ;;  %v21092_v6 = vld [vmem:[#allocation63_spill] sm:$0xff] }
 0x356   : > { %15269 = vmatprep.subr.bf16.mxu1 %v17027_v40 }
 0x359   : > { %15270 = vmatpush3.bf16.msra.mxu1 %v17027_v40  ;;  %v17040_v40 = vld [vmem:[%s20879_s1 + $0x380] sm:$0xff]  }
 0x35a   : > { %15271 = vmatprep.subr.bf16.mxu1 %v17028_v16 }
 0x35c   : > { %15240 = vmatmul.mubr.bf16.gmra.mrb[40].mxu1 %v19029_v47 }
 0x35d   : > { %15243 = vmatprep.mubr.bf16.mxu1 %v19036_v56  ;;  %15272 = vmatpush3.bf16.msra.mxu1 %v17028_v16  ;;  %v21093_v16 = vld [vmem:[#allocation64_spill] sm:$0xff] }
 0x35e   : > { %15273 = vmatprep.subr.bf16.mxu1 %v17029_v42 }
 0x361   : > { %15274 = vmatpush3.bf16.msra.mxu1 %v17029_v42  ;;  %v21094_v42 = vld [vmem:[#allocation78_spill] sm:$0xff] }
 0x362   : > { %15275 = vmatprep.subr.bf16.mxu1 %v17030_v20 }
 0x364   : > { %15244 = vmatmul.mubr.bf16.gmra.mrb[44].mxu1 %v19045_v63 }
 0x365   : > { %15247 = vmatprep.mubr.bf16.mxu1 %v19052_v39  ;;  %15276 = vmatpush3.bf16.msra.mxu1 %v17030_v20  ;;  %v21095_v20 = vld [vmem:[#allocation5_spill] sm:$0xff] }
 0x366   : > { %15277 = vmatprep.subr.bf16.mxu1 %v17031_v14 }
 0x369   : > { %15278 = vmatpush3.bf16.msra.mxu1 %v17031_v14  ;;  %v21096_v14 = vld [vmem:[#allocation9_spill] sm:$0xff] }
 0x36a   : > { %15311 = vmatprep.subr.bf16.mxu1 %v17032_v34  ;;  %v5395_v12 = vpack.c.bf16 %v21096_v14, %v21095_v20  ;;  %v21109_v20 = vld [vmem:[#allocation49_spill] sm:$0xff]  ;;  %v21110_v14 = vld [vmem:[#allocation56_spill] sm:$0xff] }
 0x36c   : > { %15248 = vmatmul.mubr.bf16.gmra.mrb[48].mxu1 %v18751_v3 }
 0x36d   : > { %15251 = vmatprep.mubr.bf16.mxu1 %v18740_v25 }
 0x374   : > { %15252 = vmatmul.mubr.bf16.gmra.mrb[52].mxu1 %v18815_v44 }
 0x375   : > { %15255 = vmatprep.mubr.bf16.mxu1 %v21083_v18 }
 0x37c   : > { %15256 = vmatmul.mubr.bf16.gmra.mrb[56].mxu1 %v18871_v50 }
 0x37d   : > { %15259 = vmatprep.mubr.bf16.mxu1 %v18861_v2 }
 0x384   : > { %15260 = vmatmul.mubr.bf16.gmra.mrb[60].mxu1 %v18926_v54 }
 0x385   : > { %15279 = vmatprep.mubr.bf16.mxu1 %v21084_v11  ;;  %v21098_v11 = vld [vmem:[#allocation12_spill] sm:$0xff] }
 0x38c   : > { %15280 = vmatmul.mubr.bf16.vlgmr.msra.gmra.mrb[32].mxu1 %v21085_v57  ;;  %v21099_v57 = vld [vmem:[#allocation15_spill] sm:$0xff] }
 0x38d   : > { %15283 = vmatprep.mubr.bf16.mxu1 %v21086_v60  ;;  %15312 = vmatpush3.bf16.msra.mxu1 %v17032_v34  ;;  %v21097_v34 = vld [vmem:[#allocation7_spill] sm:$0xff] }
 0x38e   : > { %15313 = vmatprep.subr.bf16.mxu1 %v17033_v30 }
 0x391   : > { %15314 = vmatpush3.bf16.msra.mxu1 %v17033_v30  ;;  %v19110_v30 = vpack.c.bf16 %v21098_v11, %v21097_v34  ;;  %v17047_v34 = vld [vmem:[%s20879_s1 + $0x3b8] sm:$0xff]   ;;  %v17048_v11 = vld [vmem:[%s20879_s1 + $0x3c0] sm:$0xff]  }
 0x392   : > { %15315 = vmatprep.subr.bf16.mxu1 %v17034_v27 }
 0x394   : > { %15284 = vmatmul.mubr.bf16.gmra.mrb[36].mxu1 %v21087_v10  ;;  %v17043_v10 = vld [vmem:[%s20879_s1 + $0x398] sm:$0xff]  }
 0x395   : > { %15287 = vmatprep.mubr.bf16.mxu1 %v21088_v22  ;;  %15316 = vmatpush3.bf16.msra.mxu1 %v17034_v27  ;;  %v21102_v27 = vld [vmem:[#allocation26_spill] sm:$0xff] }
 0x396   : > { %15317 = vmatprep.subr.bf16.mxu1 %v17035_v36  ;;  %v21103_v22 = vld [vmem:[#allocation30_spill] sm:$0xff] }
 0x399   : > { %15318 = vmatpush3.bf16.msra.mxu1 %v17035_v36 }
 0x39a   : > { %15319 = vmatprep.subr.bf16.mxu1 %v17036_v31 }
 0x39c   : > { %15288 = vmatmul.mubr.bf16.gmra.mrb[40].mxu1 %v21089_v53  ;;  %v17044_v53 = vld [vmem:[%s20879_s1 + $0x3a0] sm:$0xff]  }
 0x39d   : > { %15291 = vmatprep.mubr.bf16.mxu1 %v21090_v26  ;;  %15320 = vmatpush3.bf16.msra.mxu1 %v17036_v31  ;;  %v21104_v31 = vld [vmem:[#allocation34_spill] sm:$0xff]  ;;  %v21105_v26 = vld [vmem:[#allocation35_spill] sm:$0xff] }
 0x39e   : > { %15321 = vmatprep.subr.bf16.mxu1 %v17037_v37 }
 0x3a1   : > { %15322 = vmatpush3.bf16.msra.mxu1 %v17037_v37  ;;  %v19133_v37 = vpack.c.bf16 %v21104_v31, %v21103_v22  ;;  %v17061_v22 = vld [vmem:[%s20879_s1 + $0x428] sm:$0xff]  }
 0x3a2   : > { %15323 = vmatprep.subr.bf16.mxu1 %v17038_v58  ;;  %v21126_v31 = vld [vmem:[#allocation50_spill] sm:$0xff] }
 0x3a4   : > { %15292 = vmatmul.mubr.bf16.gmra.mrb[44].mxu1 %v21091_v59  ;;  %v17045_v59 = vld [vmem:[%s20879_s1 + $0x3a8] sm:$0xff]  }
 0x3a5   : > { %15295 = vmatprep.mubr.bf16.mxu1 %v21092_v6  ;;  %15324 = vmatpush3.bf16.msra.mxu1 %v17038_v58  ;;  %v21106_v58 = vld [vmem:[#allocation41_spill] sm:$0xff] }
 0x3a6   : > { %15325 = vmatprep.subr.bf16.mxu1 %v17039_v33  ;;  %v21107_v6 = vld [vmem:[#allocation45_spill] sm:$0xff] }
 0x3a9   : > { %15326 = vmatpush3.bf16.msra.mxu1 %v17039_v33  ;;  %v19142_v33 = vpack.c.bf16 %v21106_v58, %v21105_v26  ;;  %v21129_v58 = vld [vmem:[#allocation51_spill] sm:$0xff] }
 0x3aa   : > { %15359 = vmatprep.subr.bf16.mxu1 %v17040_v40 }
 0x3ac   : > { %15296 = vmatmul.mubr.bf16.gmra.mrb[48].mxu1 %v21093_v16 }
 0x3ad   : > { %15299 = vmatprep.mubr.bf16.mxu1 %v18809_v38  ;;  %v17041_v38 = vld [vmem:[%s20879_s1 + $0x388] sm:$0xff]  }
 0x3b4   : > { %15300 = vmatmul.mubr.bf16.gmra.mrb[52].mxu1 %v21094_v42  ;;  %v17046_v42 = vld [vmem:[%s20879_s1 + $0x3b0] sm:$0xff]  }
 0x3b5   : > { %15303 = vmatprep.mubr.bf16.mxu1 %v18867_v5  ;;  %v21100_v5 = vld [vmem:[#allocation19_spill] sm:$0xff] }
 0x3b6   : > { %v19117_v60 = vpack.c.bf16 %v21100_v5, %v21099_v57  ;;  %v21121_v57 = vld [vmem:[#allocation31_spill] sm:$0xff] }
 0x3bc   : > { %15304 = vmatmul.mubr.bf16.gmra.mrb[56].mxu1 %v18879_v19  ;;  %v17042_v19 = vld [vmem:[%s20879_s1 + $0x390] sm:$0xff]  }
 0x3bd   : > { %15307 = vmatprep.mubr.bf16.mxu1 %v18924_v48  ;;  %v21101_v48 = vld [vmem:[#allocation20_spill] sm:$0xff] }
 0x3be   : > { %v19126_v36 = vpack.c.bf16 %v21102_v27, %v21101_v48  ;;  %v21124_v48 = vld [vmem:[#allocation32_spill] sm:$0xff] }
 0x3c4   : > { %15308 = vmatmul.mubr.bf16.gmra.mrb[60].mxu1 %v18919_v23 }
 0x3c5   : > { %15327 = vmatprep.mubr.bf16.mxu1 %v5395_v12  ;;  %v19155_v12 = vpack.c.bf16 %v21110_v14, %v21109_v20  ;;  %v21132_v20 = vld [vmem:[#allocation65_spill] sm:$0xff]  ;;  %v21133_v14 = vld [vmem:[#allocation59_spill] sm:$0xff] }
 0x3cc   : > { %15328 = vmatmul.mubr.bf16.vlgmr.msra.gmra.mrb[32].mxu1 %v19110_v30 }
 0x3cd   : > { %15331 = vmatprep.mubr.bf16.mxu1 %v19117_v60  ;;  %15360 = vmatpush3.bf16.msra.mxu1 %v17040_v40  ;;  %v21108_v40 = vld [vmem:[#allocation29_spill] sm:$0xff] }
 0x3ce   : > { %15361 = vmatprep.subr.bf16.mxu1 %v17041_v38  ;;  %v5401_v16 = vpack.c.bf16 %v21108_v40, %v21107_v6 }
 0x3d1   : > { %15362 = vmatpush3.bf16.msra.mxu1 %v17041_v38  ;;  %v21120_v38 = vld [vmem:[#allocation36_spill] sm:$0xff] }
 0x3d2   : > { %15363 = vmatprep.subr.bf16.mxu1 %v17042_v19  ;;  %v21122_v5 = vpack.c.bf16 %v21120_v38, %v21121_v57  ;;  %v21152_v38 = vld [vmem:[#allocation61_spill] sm:$0xff] }
 0x3d4   : > { %15332 = vmatmul.mubr.bf16.gmra.mrb[36].mxu1 %v19126_v36 }
 0x3d5   : > { %15335 = vmatprep.mubr.bf16.mxu1 %v19133_v37  ;;  %15364 = vmatpush3.bf16.msra.mxu1 %v17042_v19  ;;  %v21123_v19 = vld [vmem:[#allocation38_spill] sm:$0xff] }
 0x3d6   : > { %15365 = vmatprep.subr.bf16.mxu1 %v17043_v10  ;;  %v21125_v27 = vpack.c.bf16 %v21123_v19, %v21124_v48  ;;  %v21155_v19 = vld [vmem:[#allocation62_spill] sm:$0xff] }
 0x3d9   : > { %15366 = vmatpush3.bf16.msra.mxu1 %v17043_v10  ;;  %v17060_v10 = vld [vmem:[%s20879_s1 + $0x420] sm:$0xff]  }
 0x3da   : > { %15367 = vmatprep.subr.bf16.mxu1 %v17044_v53 }
 0x3dc   : > { %15336 = vmatmul.mubr.bf16.gmra.mrb[40].mxu1 %v19142_v33 }
 0x3dd   : > { %15339 = vmatprep.mubr.bf16.mxu1 %v5401_v16  ;;  %15368 = vmatpush3.bf16.msra.mxu1 %v17044_v53  ;;  %v21127_v53 = vld [vmem:[#allocation46_spill] sm:$0xff]  ;;  %v17062_v16 = vld [vmem:[%s20879_s1 + $0x430] sm:$0xff]  }
 0x3de   : > { %15369 = vmatprep.subr.bf16.mxu1 %v17045_v59  ;;  %v21128_v26 = vpack.c.bf16 %v21126_v31, %v21127_v53  ;;  %v21161_v31 = vld [vmem:[#allocation77_spill] sm:$0xff] }
 0x3e1   : > { %15370 = vmatpush3.bf16.msra.mxu1 %v17045_v59  ;;  %v21130_v59 = vld [vmem:[#allocation44_spill] sm:$0xff] }
 0x3e2   : > { %15371 = vmatprep.subr.bf16.mxu1 %v17046_v42  ;;  %v21131_v40 = vpack.c.bf16 %v21129_v58, %v21130_v59  ;;  %v21164_v58 = vld [vmem:[#allocation89_spill] sm:$0xff] }
 0x3e4   : > { %15340 = vmatmul.mubr.bf16.gmra.mrb[44].mxu1 %v19155_v12 }
 0x3e5   : > { %15343 = vmatprep.mubr.bf16.mxu1 %v18677_v17  ;;  %15372 = vmatpush3.bf16.msra.mxu1 %v17046_v42  ;;  %v17049_v17 = vld [vmem:[%s20879_s1 + $0x3c8] sm:$0xff]   ;;  %v17063_v42 = vld [vmem:[%s20879_s1 + $0x438] sm:$0xff]  }
 0x3e6   : > { %15373 = vmatprep.subr.bf16.mxu1 %v17047_v34 }
 0x3e9   : > { %15374 = vmatpush3.bf16.msra.mxu1 %v17047_v34  ;;  %v21134_v34 = vpack.c.bf16 %v21132_v20, %v21133_v14  ;;  %v21169_v20 = vld [vmem:[#allocation13_spill] sm:$0xff]  ;;  %v21170_v14 = vld [vmem:[#allocation14_spill] sm:$0xff] }
 0x3ea   : > { %15407 = vmatprep.subr.bf16.mxu1 %v17048_v11 }
 0x3ec   : > { %15344 = vmatmul.mubr.bf16.gmra.mrb[48].mxu1 %v18663_v52  ;;  %v17050_v52 = vld [vmem:[%s20879_s1 + $0x3d0] sm:$0xff]  }
 0x3ed   : > { %15347 = vmatprep.mubr.bf16.mxu1 %v18749_v55  ;;  %v17052_v55 = vld [vmem:[%s20879_s1 + $0x3e0] sm:$0xff]  }
 0x3f4   : > { %15348 = vmatmul.mubr.bf16.gmra.mrb[52].mxu1 %v18738_v45  ;;  %v17051_v45 = vld [vmem:[%s20879_s1 + $0x3d8] sm:$0xff]  }
 0x3f5   : > { %15351 = vmatprep.mubr.bf16.mxu1 %v18813_v9  ;;  %v17054_v9 = vld [vmem:[%s20879_s1 + $0x3f0] sm:$0xff]  }
 0x3fc   : > { %15352 = vmatmul.mubr.bf16.gmra.mrb[56].mxu1 %v18803_v7  ;;  %v17053_v7 = vld [vmem:[%s20879_s1 + $0x3e8] sm:$0xff]  }
 0x3fd   : > { %15355 = vmatprep.mubr.bf16.mxu1 %v18869_v61  ;;  %v17055_v61 = vld [vmem:[%s20879_s1 + $0x3f8] sm:$0xff]  }
 0x404   : > { %15356 = vmatmul.mubr.bf16.gmra.mrb[60].mxu1 %v18863_v62  ;;  %v17056_v62 = vld [vmem:[%s20879_s1 + $0x400] sm:$0xff]  }
 0x405   : > { %15375 = vmatprep.mubr.bf16.mxu1 %v18997_v28  ;;  %v19213_v28 = vld [vmem:[#allocation3 + $0x1a1] sm:$0xff] }
 0x40c   : > { %15376 = vmatmul.mubr.bf16.vlgmr.msra.gmra.mrb[32].mxu1 %v19004_v35 }
 0x40d   : > { %15379 = vmatprep.mubr.bf16.mxu1 %v19013_v0  ;;  %15408 = vmatpush3.bf16.msra.mxu1 %v17048_v11  ;;  %v21112_v0 = vld [vmem:[#allocation6_spill] sm:$0xff] }
 0x40e   : > { %15409 = vmatprep.subr.bf16.mxu1 %v17049_v17  ;;  %v21135_v11 = vld [vmem:[#allocation66_spill] sm:$0xff] }
 0x411   : > { %15410 = vmatpush3.bf16.msra.mxu1 %v17049_v17  ;;  %v21136_v17 = vld [vmem:[#allocation60_spill] sm:$0xff] }
 0x412   : > { %15411 = vmatprep.subr.bf16.mxu1 %v17050_v52 }
 0x414   : > { %15380 = vmatmul.mubr.bf16.gmra.mrb[36].mxu1 %v19020_v15  ;;  %v21115_v15 = vld [vmem:[#allocation16_spill] sm:$0xff] }
 0x415   : > { %15383 = vmatprep.mubr.bf16.mxu1 %v19029_v47  ;;  %15412 = vmatpush3.bf16.msra.mxu1 %v17050_v52  ;;  %v21117_v47 = vld [vmem:[#allocation23_spill] sm:$0xff]  ;;  %v21137_v52 = vpack.c.bf16 %v21135_v11, %v21136_v17  ;;  %v21171_v11 = vld [vmem:[#allocation24_spill] sm:$0xff]  ;;  %v21172_v17 = vld [vmem:[#allocation25_spill] sm:$0xff] }
 0x416   : > { %15413 = vmatprep.subr.bf16.mxu1 %v17051_v45 }
 0x419   : > { %15414 = vmatpush3.bf16.msra.mxu1 %v17051_v45  ;;  %v17064_v45 = vld [vmem:[%s20879_s1 + $0x440] sm:$0xff]  }
 0x41a   : > { %15415 = vmatprep.subr.bf16.mxu1 %v17052_v55 }
 0x41c   : > { %15384 = vmatmul.mubr.bf16.gmra.mrb[40].mxu1 %v19036_v56  ;;  %v21118_v56 = vld [vmem:[#allocation17_spill] sm:$0xff] }
 0x41d   : > { %15387 = vmatprep.mubr.bf16.mxu1 %v19045_v63  ;;  %15416 = vmatpush3.bf16.msra.mxu1 %v17052_v55  ;;  %v21119_v63 = vpack.c.bf16 %v21117_v47, %v21118_v56  ;;  %v21138_v55 = vld [vmem:[#allocation79_spill] sm:$0xff] }
 0x41e   : > { %15417 = vmatprep.subr.bf16.mxu1 %v17053_v7  ;;  %v19285_v47 = vld [vmem:[#allocation3 + $0x19a] sm:$0xff]  ;;  %v19287_v56 = vld [vmem:[#allocation3 + $0x1a2] sm:$0xff] }
 0x421   : > { %15418 = vmatpush3.bf16.msra.mxu1 %v17053_v7  ;;  %v21139_v7 = vld [vmem:[#allocation73_spill] sm:$0xff] }
 0x422   : > { %15419 = vmatprep.subr.bf16.mxu1 %v17054_v9 }
 0x424   : > { %15388 = vmatmul.mubr.bf16.gmra.mrb[44].mxu1 %v19052_v39  ;;  %v17058_v39 = vld [vmem:[%s20879_s1 + $0x410] sm:$0xff]  }
 0x425   : > { %15391 = vmatprep.mubr.bf16.mxu1 %v18751_v3  ;;  %15420 = vmatpush3.bf16.msra.mxu1 %v17054_v9  ;;  %v19211_v3 = vld [vmem:[#allocation3 + $0x199] sm:$0xff]  ;;  %v21140_v9 = vpack.c.bf16 %v21138_v55, %v21139_v7  ;;  %v21174_v55 = vld [vmem:[#allocation28_spill] sm:$0xff] }
 0x426   : > { %15421 = vmatprep.subr.bf16.mxu1 %v17055_v61  ;;  %v6521_v35 = vpack.c.bf16 %v19213_v28, %v19211_v3  ;;  %v21180_v3 = vld [vmem:[#allocation55_spill] sm:$0xff] }
 0x429   : > { %15422 = vmatpush3.bf16.msra.mxu1 %v17055_v61  ;;  %v21141_v61 = vld [vmem:[#allocation80_spill] sm:$0xff] }
 0x42a   : > { %15455 = vmatprep.subr.bf16.mxu1 %v17056_v62 }
 0x42c   : > { %15392 = vmatmul.mubr.bf16.gmra.mrb[48].mxu1 %v18740_v25  ;;  %v21111_v25 = vld [vmem:[#allocation10_spill] sm:$0xff] }
 0x42d   : > { %15395 = vmatprep.mubr.bf16.mxu1 %v18815_v44  ;;  %v21113_v44 = vpack.c.bf16 %v21111_v25, %v21112_v0  ;;  %v21144_v0 = vld [vmem:[#allocation91_spill] sm:$0xff] }
 0x434   : > { %15396 = vmatmul.mubr.bf16.gmra.mrb[52].mxu1 %v21083_v18  ;;  %v17059_v18 = vld [vmem:[%s20879_s1 + $0x418] sm:$0xff]  }
 0x435   : > { %15399 = vmatprep.mubr.bf16.mxu1 %v18871_v50  ;;  %v17057_v50 = vld [vmem:[%s20879_s1 + $0x408] sm:$0xff]  }
 0x43c   : > { %15400 = vmatmul.mubr.bf16.gmra.mrb[56].mxu1 %v18861_v2  ;;  %v21114_v2 = vld [vmem:[#allocation21_spill] sm:$0xff] }
 0x43d   : > { %15403 = vmatprep.mubr.bf16.mxu1 %v18926_v54  ;;  %v21116_v54 = vpack.c.bf16 %v21114_v2, %v21115_v15  ;;  %v21147_v2 = vld [vmem:[#allocation92_spill] sm:$0xff] }
 0x43e   : > { %v21148_v15 = vld [vmem:[#allocation88_spill] sm:$0xff] }
 0x444   : > { %15404 = vmatmul.mubr.bf16.gmra.mrb[60].mxu1 %v18921_v24 }
 0x445   : > { %15423 = vmatprep.mubr.bf16.mxu1 %v21113_v44  ;;  %v21145_v44 = vld [vmem:[#allocation87_spill] sm:$0xff] }
 0x44c   : > { %15424 = vmatmul.mubr.bf16.vlgmr.msra.gmra.mrb[32].mxu1 %v21116_v54  ;;  %v21149_v54 = vpack.c.bf16 %v21147_v2, %v21148_v15  ;;  %v21187_v2 = vld [vmem:[#allocation71_spill] sm:$0xff] }
 0x44d   : > { %15427 = vmatprep.mubr.bf16.mxu1 %v21119_v63  ;;  %15456 = vmatpush3.bf16.msra.mxu1 %v17056_v62  ;;  %v21142_v62 = vld [vmem:[#allocation74_spill] sm:$0xff]  ;;  %v6891_v63 = vpack.c.bf16 %v19287_v56, %v19285_v47  ;;  %v17324_v47 = vmov 1983009808  }
 0x44e   : > { %15457 = vmatprep.subr.bf16.mxu1 %v17057_v50  ;;  %v21143_v25 = vpack.c.bf16 %v21141_v61, %v21142_v62  ;;  %v21182_v61 = vld [vmem:[#allocation58_spill] sm:$0xff]  ;;  %v7280_v56 = vunpack.c.l.s4 %v17324_v47 }
 0x451   : > { %15458 = vmatpush3.bf16.msra.mxu1 %v17057_v50  ;;  %v21146_v50 = vpack.c.bf16 %v21144_v0, %v21145_v44  ;;  %v21184_v0 = vld [vmem:[#allocation69_spill] sm:$0xff] }
 0x452   : > { %15459 = vmatprep.subr.bf16.mxu1 %v17058_v39 }
 0x454   : > { %15428 = vmatmul.mubr.bf16.gmra.mrb[36].mxu1 %v21122_v5  ;;  %v21154_v5 = vld [vmem:[#allocation68_spill] sm:$0xff] }
 0x455   : > { %15431 = vmatprep.mubr.bf16.mxu1 %v21125_v27  ;;  %15460 = vmatpush3.bf16.msra.mxu1 %v17058_v39  ;;  %v19291_v39 = vld [vmem:[#allocation3 + $0x1a0] sm:$0xff]  ;;  %v21156_v48 = vpack.c.bf16 %v21154_v5, %v21155_v19  ;;  %v19414_v5 = vld [vmem:[%s20880_s2 + $0x1] ss:$0 sm:$0xff] }
 0x456   : > { %15461 = vmatprep.subr.bf16.mxu1 %v17059_v18  ;;  %9837 = vst [vmem:[#allocation3 + $0x198] sm:$0xff] %v19291_v39  ;;  %9838 = vst [vmem:[#allocation3 + $0x1a0] sm:$0xff] %v19291_v39  ;;  %v6151_v8 = vpack.c.bf16 %v19291_v39, %v19291_v39  ;;  %v21158_v27 = vld [vmem:[#allocation75_spill] sm:$0xff] }
 0x457   : > { %9839 = vst [vmem:[#allocation3 + $0x1a8] sm:$0x3] %v19291_v39  ;;  %v17078_v19 = vld [vmem:[%s20879_s1 + $0x4b0] sm:$0xff]  }
 0x459   : > { %15462 = vmatpush3.bf16.msra.mxu1 %v17059_v18  ;;  %v17069_v18 = vld [vmem:[%s20879_s1 + $0x468] sm:$0xff]  }
 0x45a   : > { %15463 = vmatprep.subr.bf16.mxu1 %v17060_v10 }
 0x45c   : > { %15432 = vmatmul.mubr.bf16.gmra.mrb[40].mxu1 %v21128_v26  ;;  %v21163_v26 = vld [vmem:[#allocation93_spill] sm:$0xff] }
 0x45d   : > { %15435 = vmatprep.mubr.bf16.mxu1 %v21131_v40  ;;  %15464 = vmatpush3.bf16.msra.mxu1 %v17060_v10  ;;  %v21165_v59 = vpack.c.bf16 %v21163_v26, %v21164_v58  ;;  %v21166_v40 = vld [vmem:[#allocation94_spill] sm:$0xff] }
 0x45e   : > { %15465 = vmatprep.subr.bf16.mxu1 %v17061_v22 }
 0x461   : > { %15466 = vmatpush3.bf16.msra.mxu1 %v17061_v22  ;;  %v21160_v22 = vld [vmem:[#allocation82_spill] sm:$0xff] }
 0x462   : > { %15467 = vmatprep.subr.bf16.mxu1 %v17062_v16  ;;  %v21162_v53 = vpack.c.bf16 %v21160_v22, %v21161_v31 }
 0x464   : > { %15436 = vmatmul.mubr.bf16.gmra.mrb[44].mxu1 %v21134_v34  ;;  %v6876_v34 = vpack.c.bf16 %v21170_v14, %v21169_v20 }
 0x465   : > { %15439 = vmatprep.mubr.bf16.mxu1 %v21137_v52  ;;  %15468 = vmatpush3.bf16.msra.mxu1 %v17062_v16  ;;  %v21167_v16 = vld [vmem:[#allocation90_spill] sm:$0xff]  ;;  %v6877_v52 = vpack.c.bf16 %v21172_v17, %v21171_v11  ;;  %v17079_v11 = vld [vmem:[%s20879_s1 + $0x4b8] sm:$0xff]  }
 0x466   : > { %15469 = vmatprep.subr.bf16.mxu1 %v17063_v42 }
 0x469   : > { %15470 = vmatpush3.bf16.msra.mxu1 %v17063_v42  ;;  %v21168_v42 = vpack.c.bf16 %v21166_v40, %v21167_v16 }
 0x46a   : > { %15503 = vmatprep.subr.bf16.mxu1 %v17064_v45 }
 0x46c   : > { %15440 = vmatmul.mubr.bf16.gmra.mrb[48].mxu1 %v21140_v9  ;;  %v21179_v9 = vld [vmem:[#allocation54_spill] sm:$0xff] }
 0x46d   : > { %15443 = vmatprep.mubr.bf16.mxu1 %v21143_v25  ;;  %v6881_v28 = vpack.c.bf16 %v21180_v3, %v21179_v9  ;;  %v21183_v25 = vld [vmem:[#allocation70_spill] sm:$0xff] }
 0x46e   : > { %v21185_v44 = vpack.c.bf16 %v21183_v25, %v21184_v0 }
 0x474   : > { %15444 = vmatmul.mubr.bf16.gmra.mrb[52].mxu1 %v21146_v50  ;;  %v21186_v50 = vld [vmem:[#allocation72_spill] sm:$0xff] }
 0x475   : > { %15447 = vmatprep.mubr.bf16.mxu1 %v21149_v54  ;;  %v21188_v15 = vpack.c.bf16 %v21186_v50, %v21187_v2  ;;  %v21189_v54 = vld [vmem:[#allocation84_spill] sm:$0xff] }
 0x47c   : > { %15448 = vmatmul.mubr.bf16.gmra.mrb[56].mxu1 %v6149_v13  ;;  %v17067_v13 = vld [vmem:[%s20879_s1 + $0x458] sm:$0xff]  }
 0x47d   : > { %15451 = vmatprep.mubr.bf16.mxu1 %v18919_v23  ;;  %v17065_v23 = vld [vmem:[%s20879_s1 + $0x448] sm:$0xff]  }
 0x484   : > { %15452 = vmatmul.mubr.bf16.gmra.mrb[60].mxu1 %v6151_v8  ;;  %v21190_v8 = vld [vmem:[#allocation83_spill] sm:$0xff] }
 0x485   : > { %15471 = vmatprep.mubr.bf16.mxu1 %v19110_v30  ;;  %v17068_v30 = vld [vmem:[%s20879_s1 + $0x460] sm:$0xff]  }
 0x48c   : > { %15472 = vmatmul.mubr.bf16.vlgmr.msra.gmra.mrb[32].mxu1 %v19117_v60  ;;  %v21150_v60 = vld [vmem:[#allocation53_spill] sm:$0xff] }
 0x48d   : > { %15475 = vmatprep.mubr.bf16.mxu1 %v19126_v36  ;;  %15504 = vmatpush3.bf16.msra.mxu1 %v17064_v45  ;;  %v6511_v36 = vpack.c.bf16 %v21150_v60, %v21107_v6  ;;  %v21151_v6 = vld [vmem:[#allocation67_spill] sm:$0xff]  ;;  %v21195_v60 = vld [vmem:[#allocation96_spill] sm:$0xff] }
 0x48e   : > { %15505 = vmatprep.subr.bf16.mxu1 %v17065_v23  ;;  %v21153_v57 = vpack.c.bf16 %v21151_v6, %v21152_v38  ;;  %v21173_v45 = vld [vmem:[#allocation27_spill] sm:$0xff]  ;;  %v17072_v38 = vld [vmem:[%s20879_s1 + $0x480] sm:$0xff]  }
 0x48f   : > { %v6878_v7 = vpack.c.bf16 %v21174_v55, %v21173_v45  ;;  %15551 = vmatprep.subr.bf16.mxu0 %v17072_v38 }
 0x490   : > { %15552 = vmatpush3.bf16.msra.mxu0 %v17072_v38 }
 0x491   : > { %15506 = vmatpush3.bf16.msra.mxu1 %v17065_v23  ;;  %v21191_v23 = vpack.c.bf16 %v21189_v54, %v21190_v8 }
 0x492   : > { %15507 = vmatprep.subr.bf16.mxu1 %v17066_v43 }
 0x494   : > { %15476 = vmatmul.mubr.bf16.gmra.mrb[36].mxu1 %v19133_v37  ;;  %v17070_v37 = vld [vmem:[%s20879_s1 + $0x470] sm:$0xff]  }
 0x495   : > { %15479 = vmatprep.mubr.bf16.mxu1 %v19142_v33  ;;  %15508 = vmatpush3.bf16.msra.mxu1 %v17066_v43  ;;  %v17071_v33 = vld [vmem:[%s20879_s1 + $0x478] sm:$0xff]   ;;  %v21192_v43 = vld [vmem:[#allocation86_spill] sm:$0xff] }
 0x496   : > { %15509 = vmatprep.subr.bf16.mxu1 %v17067_v13 }
 0x499   : > { %15510 = vmatpush3.bf16.msra.mxu1 %v17067_v13  ;;  %v21193_v13 = vld [vmem:[#allocation85_spill] sm:$0xff] }
 0x49a   : > { %15511 = vmatprep.subr.bf16.mxu1 %v17068_v30 }
 0x49c   : > { %15480 = vmatmul.mubr.bf16.gmra.mrb[40].mxu1 %v6511_v36  ;;  %v21196_v36 = vld [vmem:[#allocation95_spill] sm:$0xff] }
 0x49d   : > { %15483 = vmatprep.mubr.bf16.mxu1 %v19155_v12  ;;  %15512 = vmatpush3.bf16.msra.mxu1 %v17068_v30  ;;  %v21157_v12 = vld [vmem:[#allocation81_spill] sm:$0xff]  ;;  %v21194_v30 = vpack.c.bf16 %v21192_v43, %v21193_v13 }
 0x49e   : > { %15513 = vmatprep.subr.bf16.mxu1 %v17069_v18  ;;  %v21159_v10 = vpack.c.bf16 %v21157_v12, %v21158_v27  ;;  %v7281_v12 = vunpack.c.0.s8 %v7280_v56 }
 0x4a1   : > { %15514 = vmatpush3.bf16.msra.mxu1 %v17069_v18  ;;  %v21197_v18 = vpack.c.bf16 %v21195_v60, %v21196_v36 }
 0x4a2   : > { %15515 = vmatprep.subr.bf16.mxu1 %v17070_v37 }
 0x4a4   : > { %15484 = vmatmul.mubr.bf16.gmra.mrb[44].mxu1 %v21153_v57  ;;  %v17073_v57 = vld [vmem:[%s20879_s1 + $0x488] sm:$0xff]  }
 0x4a5   : > { %15487 = vmatprep.mubr.bf16.mxu1 %v21156_v48  ;;  %15516 = vmatpush3.bf16.msra.mxu1 %v17070_v37  ;;  %v21198_v37 = vld [vmem:[#allocation98_spill] sm:$0xff] }
 0x4a6   : > { %15517 = vmatprep.subr.bf16.mxu1 %v17071_v33  ;;  %15553 = vmatprep.subr.bf16.mxu0 %v17073_v57 }
 0x4a7   : > { %15554 = vmatpush3.bf16.msra.mxu0 %v17073_v57 }
 0x4a9   : > { %15518 = vmatpush3.bf16.msra.mxu1 %v17071_v33  ;;  %v21199_v33 = vld [vmem:[#allocation97_spill] sm:$0xff] }
 0x4aa   : > { %v21200_v6 = vpack.c.bf16 %v21198_v37, %v21199_v33 }
 0x4ac   : > { %15488 = vmatmul.mubr.bf16.gmra.mrb[48].mxu1 %v21159_v10 }
 0x4ad   : > { %15491 = vmatprep.mubr.bf16.mxu1 %v21162_v53 }
 0x4b4   : > { %15492 = vmatmul.mubr.bf16.gmra.mrb[52].mxu1 %v21165_v59 }
 0x4b5   : > { %15495 = vmatprep.mubr.bf16.mxu1 %v21168_v42 }
 0x4bc   : > { %15496 = vmatmul.mubr.bf16.gmra.mrb[56].mxu1 %v6519_v21  ;;  %v21178_v21 = vld [vmem:[#allocation43_spill] sm:$0xff] }
 0x4bd   : > { %15499 = vmatprep.mubr.bf16.mxu1 %v6520_v46  ;;  %v6880_v46 = vpack.c.bf16 %v21178_v21, %v21177_v32 }
 0x4c4   : > { %15500 = vmatmul.mubr.bf16.gmra.mrb[60].mxu1 %v6521_v35  ;;  %v21181_v35 = vld [vmem:[#allocation57_spill] sm:$0xff] }
 0x4c5   : > { %15519 = vmatprep.mubr.bf16.mxu1 %v6876_v34  ;;  %v6882_v62 = vpack.c.bf16 %v21182_v61, %v21181_v35 }
 0x4cc   : > { %15520 = vmatmul.mubr.bf16.vlgmr.msra.gmra.mrb[32].mxu1 %v6877_v52 }
 0x4cd   : > { %15523 = vmatprep.mubr.bf16.mxu1 %v6878_v7 }
 0x4d4   : > { %15524 = vmatmul.mubr.bf16.gmra.mrb[36].mxu1 %v6879_v41 }
 0x4d5   : > { %15527 = vmatprep.mubr.bf16.mxu1 %v6880_v46 }
 0x4dc   : > { %15528 = vmatmul.mubr.bf16.gmra.mrb[40].mxu1 %v6881_v28 }
 0x4dd   : > { %15531 = vmatprep.mubr.bf16.mxu1 %v6882_v62 }
 0x4e4   : > { %15532 = vmatmul.mubr.bf16.gmra.mrb[44].mxu1 %v21185_v44 }
 0x4e5   : > { %15535 = vmatprep.mubr.bf16.mxu1 %v21188_v15 }
 0x4ec   : > { %15536 = vmatmul.mubr.bf16.gmra.mrb[48].mxu1 %v21191_v23 }
 0x4ed   : > { %15539 = vmatprep.mubr.bf16.mxu1 %v21194_v30 }
 0x4f4   : > { %15540 = vmatmul.mubr.bf16.gmra.mrb[52].mxu1 %v21197_v18 }
 0x4f5   : > { %15543 = vmatprep.mubr.bf16.mxu1 %v21200_v6 }
 0x4fc   : > { %15544 = vmatmul.mubr.bf16.gmra.mrb[56].mxu1 %v6889_v4  ;;  %v17077_v4 = vld [vmem:[%s20879_s1 + $0x4a8] sm:$0xff]  }
 0x4fd   : > { %15547 = vmatprep.mubr.bf16.mxu1 %v18921_v24  ;;  %v17074_v24 = vld [vmem:[%s20879_s1 + $0x490] sm:$0xff]  }
 0x4fe   : > { %15555 = vmatprep.subr.bf16.mxu0 %v17074_v24 }
 0x4ff   : > { %15556 = vmatpush3.bf16.msra.mxu0 %v17074_v24 }
 0x500   : > { %15557 = vmatprep.subr.bf16.mxu0 %v17075_v29 }
 0x503   : > { %15558 = vmatpush3.bf16.msra.mxu0 %v17075_v29 }
 0x504   : > { %15548 = vmatmul.mubr.bf16.gmra.mrb[60].mxu1 %v6891_v63  ;;  %15559 = vmatprep.subr.bf16.mxu0 %v17076_v1  ;;  %v7282_v63 = vlaneseq }
 0x506   : > { %v7283_v27 = vshrl.u32 %v7282_v63, 7 }
 0x507   : > { %15560 = vmatpush3.bf16.msra.mxu0 %v17076_v1 }
 0x508   : > { %15561 = vmatprep.subr.bf16.mxu0 %v17077_v4  ;;  %v19422_v16 = vsub.s32 %v7281_v12, %v7283_v27 }
 0x50b   : > { %15562 = vmatpush3.bf16.msra.mxu0 %v17077_v4 }
 0x50c   : > { %15563 = vmatprep.subr.bf16.mxu0 %v17078_v19 }
 0x50f   : > { %15564 = vmatpush3.bf16.msra.mxu0 %v17078_v19 }
 0x510   : > { %15565 = vmatprep.subr.bf16.mxu0 %v17079_v11 }
 0x513   : > { %15566 = vmatpush3.bf16.msra.mxu0 %v17079_v11 }
 0x59f   : > { %v15521_v48 = vpop.f32.mrb[32].mxu1 }
 0x5a0   : > { %v16227_v10 = vadd.f32 %v15521_v48, %v19414_v5  ;;  %v6991_v22 = vpop.f32.mrb[33].mxu1 }
 0x5a1   : > { %v16228_v31 = vadd.f32 %v19414_v5, %v6991_v22  ;;  %v15522_v53 = vpop.f32.mrb[34].mxu1 }
 0x5a2   : > { %v7216_v26 = vmax.f32 %v16227_v10, 0.0  ;;  %v16229_v58 = vadd.f32 %v15522_v53, %v19414_v5  ;;  %v6994_v59 = vpop.f32.mrb[35].mxu1 }
 0x5a3   : > { %v7214_v40 = vmax.f32 %v16228_v31, 0.0  ;;  %v16230_v42 = vadd.f32 %v19414_v5, %v6994_v59 }
 0x5a4   : > { %v7217_v20 = vmax.f32 %v16229_v58, 0.0 }
 0x5a5   : > { %v7246_v14 = vmax.f32 %v7214_v40, %v7216_v26  ;;  %v7215_v34 = vmax.f32 %v16230_v42, 0.0 }
 0x5a7   : > { %v7278_v17 = vcombine.high %v7246_v14, %v7246_v14  ;;  %v7285_v52 = vrot.slane %v7246_v14, %v19422_v16  ;;  %v7247_v45 = vmax.f32 %v7215_v34, %v7217_v20  ;;  %v15525_v55 = vpop.f32.mrb[36].mxu1 }
 0x5a8   : > { %v19430_v7 = vadd.f32 %v15525_v55, %v19414_v5  ;;  %v7007_v51 = vpop.f32.mrb[37].mxu1 }
 0x5a9   : > { %v7292_v49 = vrot.slane %v7278_v17, %v19422_v16  ;;  %v7293_v41 = vcombine.high %v7285_v52, %v7285_v52  ;;  %v7615_v32 = vsel %vm7614_vm0, %v7285_v52, -inf  ;;  %v7295_v21 = vcombine.high %v7247_v45, %v7247_v45  ;;  %v19434_v46 = vpop.f32.mrb[38].mxu1 }
 0x5aa   : > { %v7616_v9 = vrot.slane %v7615_v32, 4  ;;  %v7302_v3 = vrot.slane %v7247_v45, %v19422_v16  ;;  %v7220_v28 = vmax.f32 %v19430_v7, 0.0  ;;  %v19439_v35 = vadd.f32 %v19414_v5, %v7007_v51  ;;  %v19441_v61 = vpop.f32.mrb[39].mxu1 }
 0x5ab   : > { %v7294_v62 = vcombine.high %v7292_v49, %v7292_v49  ;;  %v7622_v25 = vsel %vm7614_vm0, %v7293_v41, -inf  ;;  %v7629_v0 = vsel %vm7614_vm0, %v7292_v49, -inf  ;;  %v7309_v44 = vrot.slane %v7295_v21, %v19422_v16 }
 0x5ac   : > { %v7617_v50 = vmax.f32 %v7615_v32, %v7616_v9  ;;  %v7623_v2 = vrot.slane %v7622_v25, 4  ;;  %v7630_v15 = vrot.slane %v7629_v0, 4  ;;  %v7310_v54 = vcombine.high %v7302_v3, %v7302_v3 }
 0x5ad   : > { %v7636_v8 = vsel %vm7614_vm0, %v7294_v62, -inf  ;;  %v7311_v23 = vcombine.high %v7309_v44, %v7309_v44  ;;  %v7643_v43 = vsel %vm7614_vm0, %v7302_v3, -inf  ;;  %v7657_v13 = vsel %vm7614_vm0, %v7309_v44, -inf }
 0x5ae   : > { %v7618_v30 = vrot.slane %v7617_v50, 2  ;;  %v7624_v60 = vmax.f32 %v7622_v25, %v7623_v2  ;;  %v7631_v36 = vmax.f32 %v7629_v0, %v7630_v15  ;;  %v7637_v18 = vrot.slane %v7636_v8, 4 }
 0x5af   : > { %v7644_v37 = vrot.slane %v7643_v43, 4  ;;  %v7650_v33 = vsel %vm7614_vm0, %v7310_v54, -inf  ;;  %v7658_v6 = vrot.slane %v7657_v13, 4  ;;  %v7664_v38 = vsel %vm7614_vm0, %v7311_v23, -inf  ;;  %v19451_v57 = vpop.f32.mrb[40].mxu1 }
 0x5b0   : > { %v7619_v24 = vmax.f32 %v7617_v50, %v7618_v30  ;;  %v7625_v29 = vrot.slane %v7624_v60, 2  ;;  %v7632_v1 = vrot.slane %v7631_v36, 2  ;;  %v7638_v4 = vmax.f32 %v7636_v8, %v7637_v18  ;;  %v19453_v47 = vpop.f32.mrb[41].mxu1 }
 0x5b1   : > { %v7645_v56 = vmax.f32 %v7643_v43, %v7644_v37  ;;  %v7651_v63 = vrot.slane %v7650_v33, 4  ;;  %v7659_v19 = vmax.f32 %v7657_v13, %v7658_v6  ;;  %v7665_v48 = vrot.slane %v7664_v38, 4  ;;  %v19455_v12 = vpop.f32.mrb[42].mxu1 }
 0x5b2   : > { %v7620_v27 = vrot.slane %v7619_v24, 1  ;;  %v7626_v10 = vmax.f32 %v7624_v60, %v7625_v29  ;;  %v7633_v22 = vmax.f32 %v7631_v36, %v7632_v1  ;;  %v7639_v31 = vrot.slane %v7638_v4, 2  ;;  %v19457_v53 = vpop.f32.mrb[43].mxu1 }
 0x5b3   : > { %v7646_v26 = vrot.slane %v7645_v56, 2  ;;  %v7652_v58 = vmax.f32 %v7650_v33, %v7651_v63  ;;  %v7660_v59 = vrot.slane %v7659_v19, 2  ;;  %v7666_v40 = vmax.f32 %v7664_v38, %v7665_v48  ;;  %v19487_v48 = vld [vmem:[#allocation2 + $0x1] sm:$0xff] }
 0x5b4   : > { %v7621_v42 = vmax.f32 %v7619_v24, %v7620_v27  ;;  %v7627_v20 = vrot.slane %v7626_v10, 1  ;;  %v7634_v14 = vrot.slane %v7633_v22, 1  ;;  %v7640_v34 = vmax.f32 %v7638_v4, %v7639_v31  ;;  %v19489_v27 = vld [vmem:[#allocation2 + $0x2] sm:$0xff] }
 0x5b5   : > { %v7647_v11 = vmax.f32 %v7645_v56, %v7646_v26  ;;  %v7653_v17 = vrot.slane %v7652_v58, 2  ;;  %v7661_v52 = vmax.f32 %v7659_v19, %v7660_v59  ;;  %v7667_v45 = vrot.slane %v7666_v40, 2  ;;  %11578 = vst [vmem:[#allocation2] sm:$0xff] %v19291_v39  ;;  %11579 = vst [vmem:[#allocation2 + $0x8] sm:$0xff] %v19291_v39 }
 0x5b6   : > { %v7628_v55 = vmax.f32 %v7626_v10, %v7627_v20  ;;  %v7635_v51 = vmax.f32 %v7633_v22, %v7634_v14  ;;  %v7641_v49 = vrot.slane %v7640_v34, 1  ;;  %v7218_v41 = vmax.f32 %v19439_v35, 0.0 }
 0x5b7   : > { %v7648_v32 = vrot.slane %v7647_v11, 1  ;;  %v7654_v21 = vmax.f32 %v7652_v58, %v7653_v17  ;;  %v7662_v9 = vrot.slane %v7661_v52, 1  ;;  %v7668_v3 = vmax.f32 %v7666_v40, %v7667_v45  ;;  %v19460_v62 = vpop.f32.mrb[44].mxu1 }
 0x5b8   : > { %v7642_v25 = vmax.f32 %v7640_v34, %v7641_v49  ;;  %v8182_v0 = vsel %vm8181_vm1, %v7628_v55, %v7621_v42  ;;  %v7248_v44 = vmax.f32 %v7218_v41, %v7220_v28  ;;  %v16233_v50 = vadd.f32 %v19434_v46, %v19414_v5  ;;  %v19467_v2 = vpop.f32.mrb[45].mxu1 }
 0x5b9   : > { %v8184_v15 = vsel %vm8183_vm2, %v7635_v51, %v8182_v0  ;;  %v7649_v35 = vmax.f32 %v7647_v11, %v7648_v32  ;;  %v7655_v54 = vrot.slane %v7654_v21, 1  ;;  %v7663_v8 = vmax.f32 %v7661_v52, %v7662_v9  ;;  %v19470_v23 = vpop.f32.mrb[46].mxu1 }
 0x5ba   : > { %v7669_v43 = vrot.slane %v7668_v3, 1  ;;  %v8186_v13 = vsel %vm8185_vm3, %v7642_v25, %v8184_v15  ;;  %v7312_v30 = vcombine.high %v7248_v44, %v7248_v44  ;;  %v7319_v60 = vrot.slane %v7248_v44, %v19422_v16  ;;  %v19474_v7 = vpop.f32.mrb[47].mxu1 }
 0x5bb   : > { %v7656_v28 = vmax.f32 %v7654_v21, %v7655_v54  ;;  %v8188_v46 = vsel %vm8187_vm4, %v7649_v35, %v8186_v13  ;;  %v7221_v36 = vmax.f32 %v16233_v50, 0.0  ;;  %v16234_v18 = vadd.f32 %v19414_v5, %v19441_v61 }
 0x5bc   : > { %v7670_v37 = vmax.f32 %v7668_v3, %v7669_v43  ;;  %v7326_v33 = vrot.slane %v7312_v30, %v19422_v16  ;;  %v7327_v6 = vcombine.high %v7319_v60, %v7319_v60  ;;  %v7671_v38 = vsel %vm7614_vm0, %v7319_v60, -inf  ;;  %v17080_v3 = vld [vmem:[%s20879_s1 + $0x4c0] sm:$0xff]  }
 0x5bd   : > { %v8190_v24 = vsel %vm8189_vm5, %v7656_v28, %v8188_v46  ;;  %v7672_v29 = vrot.slane %v7671_v38, 4  ;;  %v7219_v1 = vmax.f32 %v16234_v18, 0.0  ;;  %v16235_v4 = vadd.f32 %v19451_v57, %v19414_v5  ;;  %15575 = vmatprep.subr.bf16.mxu0 %v17080_v3 }
 0x5be   : > { %v8192_v56 = vsel %vm8191_vm6, %v7663_v8, %v8190_v24  ;;  %v7328_v63 = vcombine.high %v7326_v33, %v7326_v33  ;;  %v7678_v19 = vsel %vm7614_vm0, %v7327_v6, -inf  ;;  %v7685_v61 = vsel %vm7614_vm0, %v7326_v33, -inf }
 0x5bf   : > { %v8194_v10 = vsel %vm8193_vm7, %v7670_v37, %v8192_v56  ;;  %v7673_v22 = vmax.f32 %v7671_v38, %v7672_v29  ;;  %v7679_v31 = vrot.slane %v7678_v19, 4  ;;  %v7686_v26 = vrot.slane %v7685_v61, 4  ;;  %v19492_v58 = vpop.f32.mrb[48].mxu1 }
 0x5c0   : > { %8252 = vst [vmem:[#allocation2 + $0x19] sm:$0xff] %v8194_v10  ;;  %v7692_v57 = vsel %vm7614_vm0, %v7328_v63, -inf  ;;  %v7249_v59 = vmax.f32 %v7219_v1, %v7221_v36  ;;  %v7224_v40 = vmax.f32 %v16235_v4, 0.0  ;;  %v16236_v42 = vadd.f32 %v19414_v5, %v19453_v47  ;;  %v19499_v20 = vpop.f32.mrb[49].mxu1 }
 0x5c1   : > { %v7674_v14 = vrot.slane %v7673_v22, 2  ;;  %v7680_v34 = vmax.f32 %v7678_v19, %v7679_v31  ;;  %v7687_v11 = vmax.f32 %v7685_v61, %v7686_v26  ;;  %v7693_v17 = vrot.slane %v7692_v57, 4  ;;  %v19501_v52 = vpop.f32.mrb[50].mxu1 }
 0x5c2   : > { %v7329_v45 = vcombine.high %v7249_v59, %v7249_v59  ;;  %v7336_v55 = vrot.slane %v7249_v59, %v19422_v16  ;;  %v7222_v51 = vmax.f32 %v16236_v42, 0.0  ;;  %v19506_v49 = vadd.f32 %v19455_v12, %v19414_v5  ;;  %v19508_v41 = vpop.f32.mrb[51].mxu1 }
 0x5c3   : > { %v7675_v32 = vmax.f32 %v7673_v22, %v7674_v14  ;;  %v7681_v47 = vrot.slane %v7680_v34, 2  ;;  %v7688_v21 = vrot.slane %v7687_v11, 2  ;;  %v7694_v9 = vmax.f32 %v7692_v57, %v7693_v17 }
 0x5c4   : > { %v7343_v25 = vrot.slane %v7329_v45, %v19422_v16  ;;  %v7344_v0 = vcombine.high %v7336_v55, %v7336_v55  ;;  %v7699_v44 = vsel %vm7614_vm0, %v7336_v55, -inf  ;;  %v7250_v50 = vmax.f32 %v7222_v51, %v7224_v40 }
 0x5c5   : > { %v7676_v15 = vrot.slane %v7675_v32, 1  ;;  %v7682_v35 = vmax.f32 %v7680_v34, %v7681_v47  ;;  %v7689_v12 = vmax.f32 %v7687_v11, %v7688_v21  ;;  %v7695_v54 = vrot.slane %v7694_v9, 2 }
 0x5c6   : > { %v7345_v8 = vcombine.high %v7343_v25, %v7343_v25  ;;  %v7700_v43 = vrot.slane %v7699_v44, 4  ;;  %v7706_v13 = vsel %vm7614_vm0, %v7344_v0, -inf  ;;  %v7713_v30 = vsel %vm7614_vm0, %v7343_v25, -inf }
 0x5c7   : > { %v7677_v60 = vmax.f32 %v7675_v32, %v7676_v15  ;;  %v7683_v28 = vrot.slane %v7682_v35, 1  ;;  %v7690_v46 = vrot.slane %v7689_v12, 1  ;;  %v7696_v36 = vmax.f32 %v7694_v9, %v7695_v54  ;;  %v19517_v18 = vpop.f32.mrb[52].mxu1  ;;  %v19519_v37 = vld [vmem:[#allocation2 + $0x18] sm:$0xff] }
 0x5c8   : > { %v7701_v33 = vmax.f32 %v7699_v44, %v7700_v43  ;;  %v7707_v6 = vrot.slane %v7706_v13, 4  ;;  %v7714_v38 = vrot.slane %v7713_v30, 4  ;;  %v7720_v24 = vsel %vm7614_vm0, %v7345_v8, -inf  ;;  %v19522_v29 = vpop.f32.mrb[53].mxu1  ;;  %v19524_v1 = vld [vmem:[#allocation2 + $0x19] sm:$0xff] }
 0x5c9   : > { %v19526_v4 = vld [vmem:[#allocation2 + $0x1a] sm:$0xff]  ;;  %v7684_v56 = vmax.f32 %v7682_v35, %v7683_v28  ;;  %v7691_v63 = vmax.f32 %v7689_v12, %v7690_v46  ;;  %v7697_v19 = vrot.slane %v7696_v36, 1  ;;  %v7721_v61 = vrot.slane %v7720_v24, 4  ;;  %v19528_v10 = vpop.f32.mrb[54].mxu1 }
 0x5ca   : > { %11581 = vst [vmem:[#allocation2 + $0x18] sm:$0xff] %v19291_v39  ;;  %11582 = vst [vmem:[#allocation2 + $0x20] sm:$0xff] %v19291_v39  ;;  %v7702_v22 = vrot.slane %v7701_v33, 2  ;;  %v7708_v31 = vmax.f32 %v7706_v13, %v7707_v6  ;;  %v7715_v26 = vmax.f32 %v7713_v30, %v7714_v38  ;;  %v7346_v57 = vcombine.high %v7250_v50, %v7250_v50  ;;  %v19532_v59 = vpop.f32.mrb[55].mxu1 }
 0x5cb   : > { %v7698_v40 = vmax.f32 %v7696_v36, %v7697_v19  ;;  %v8195_v42 = vsel %vm8181_vm1, %v7684_v56, %v7677_v60  ;;  %v7722_v14 = vmax.f32 %v7720_v24, %v7721_v61  ;;  %v7353_v34 = vrot.slane %v7250_v50, %v19422_v16 }
 0x5cc   : > { %v8196_v11 = vsel %vm8183_vm2, %v7691_v63, %v8195_v42  ;;  %v7703_v17 = vmax.f32 %v7701_v33, %v7702_v22  ;;  %v7709_v45 = vrot.slane %v7708_v31, 2  ;;  %v7716_v55 = vrot.slane %v7715_v26, 2 }
 0x5cd   : > { %v7723_v51 = vrot.slane %v7722_v14, 2  ;;  %v8197_v32 = vsel %vm8185_vm3, %v7698_v40, %v8196_v11  ;;  %v7360_v47 = vrot.slane %v7346_v57, %v19422_v16  ;;  %v7361_v21 = vcombine.high %v7353_v34, %v7353_v34 }
 0x5ce   : > { %v7704_v9 = vrot.slane %v7703_v17, 1  ;;  %v7710_v3 = vmax.f32 %v7708_v31, %v7709_v45  ;;  %v7717_v25 = vmax.f32 %v7715_v26, %v7716_v55  ;;  %v7727_v0 = vsel %vm7614_vm0, %v7353_v34, -inf }
 0x5cf   : > { %v7724_v44 = vmax.f32 %v7722_v14, %v7723_v51  ;;  %v7362_v15 = vcombine.high %v7360_v47, %v7360_v47  ;;  %v7728_v35 = vrot.slane %v7727_v0, 4  ;;  %v7734_v50 = vsel %vm7614_vm0, %v7361_v21, -inf  ;;  %v19541_v12 = vpop.f32.mrb[56].mxu1 }
 0x5d0   : > { %v7705_v54 = vmax.f32 %v7703_v17, %v7704_v9  ;;  %v7711_v8 = vrot.slane %v7710_v3, 1  ;;  %v7718_v43 = vrot.slane %v7717_v25, 1  ;;  %v7735_v13 = vrot.slane %v7734_v50, 4  ;;  %v19543_v30 = vpop.f32.mrb[57].mxu1 }
 0x5d1   : > { %v7725_v60 = vrot.slane %v7724_v44, 1  ;;  %v7729_v28 = vmax.f32 %v7727_v0, %v7728_v35  ;;  %v7741_v46 = vsel %vm7614_vm0, %v7360_v47, -inf  ;;  %v7748_v36 = vsel %vm7614_vm0, %v7362_v15, -inf  ;;  %v19547_v33 = vpop.f32.mrb[58].mxu1 }
 0x5d2   : > { %v7712_v6 = vmax.f32 %v7710_v3, %v7711_v8  ;;  %v7719_v38 = vmax.f32 %v7717_v25, %v7718_v43  ;;  %v8198_v24 = vsel %vm8187_vm4, %v7705_v54, %v8197_v32  ;;  %v7736_v56 = vmax.f32 %v7734_v50, %v7735_v13  ;;  %v19550_v63 = vpop.f32.mrb[59].mxu1 }
 0x5d3   : > { %v7726_v19 = vmax.f32 %v7724_v44, %v7725_v60  ;;  %v7730_v61 = vrot.slane %v7729_v28, 2  ;;  %v7742_v22 = vrot.slane %v7741_v46, 4  ;;  %v7749_v31 = vrot.slane %v7748_v36, 4 }
 0x5d4   : > { %v8199_v26 = vsel %vm8189_vm5, %v7712_v6, %v8198_v24  ;;  %v7737_v57 = vrot.slane %v7736_v56, 2  ;;  %v7225_v40 = vmax.f32 %v19506_v49, 0.0  ;;  %v16238_v42 = vadd.f32 %v19414_v5, %v19457_v53 }
 0x5d5   : > { %v8200_v14 = vsel %vm8191_vm6, %v7719_v38, %v8199_v26  ;;  %v7731_v34 = vmax.f32 %v7729_v28, %v7730_v61  ;;  %v7743_v11 = vmax.f32 %v7741_v46, %v7742_v22  ;;  %v7750_v17 = vmax.f32 %v7748_v36, %v7749_v31 }
 0x5d6   : > { %v8201_v45 = vsel %vm8193_vm7, %v7726_v19, %v8200_v14  ;;  %v7738_v55 = vmax.f32 %v7736_v56, %v7737_v57  ;;  %v7223_v51 = vmax.f32 %v16238_v42, 0.0  ;;  %v16239_v32 = vadd.f32 %v19460_v62, %v19414_v5 }
 0x5d7   : > { %8253 = vst [vmem:[#allocation2 + $0x31] sm:$0xff] %v8201_v45  ;;  %v7732_v47 = vrot.slane %v7731_v34, 1  ;;  %v7744_v21 = vrot.slane %v7743_v11, 2  ;;  %v7751_v9 = vrot.slane %v7750_v17, 2  ;;  %v16240_v49 = vadd.f32 %v19414_v5, %v19467_v2  ;;  %v19562_v53 = vpop.f32.mrb[60].mxu1 }
 0x5d8   : > { %v7739_v3 = vrot.slane %v7738_v55, 1  ;;  %v7251_v25 = vmax.f32 %v7223_v51, %v7225_v40  ;;  %v7228_v0 = vmax.f32 %v16239_v32, 0.0  ;;  %v19566_v44 = vadd.f32 %v19470_v23, %v19414_v5  ;;  %v19568_v15 = vpop.f32.mrb[61].mxu1 }
 0x5d9   : > { %v7733_v35 = vmax.f32 %v7731_v34, %v7732_v47  ;;  %v7745_v62 = vmax.f32 %v7743_v11, %v7744_v21  ;;  %v7752_v50 = vmax.f32 %v7750_v17, %v7751_v9  ;;  %v7226_v54 = vmax.f32 %v16240_v49, 0.0  ;;  %v19570_v8 = vpop.f32.mrb[62].mxu1 }
 0x5da   : > { %v7740_v43 = vmax.f32 %v7738_v55, %v7739_v3  ;;  %v7363_v13 = vcombine.high %v7251_v25, %v7251_v25  ;;  %v7370_v2 = vrot.slane %v7251_v25, %v19422_v16  ;;  %v7229_v60 = vmax.f32 %v19566_v44, 0.0  ;;  %v19574_v28 = vpop.f32.mrb[63].mxu1 }
 0x5db   : > { %v7746_v46 = vrot.slane %v7745_v62, 1  ;;  %v7753_v36 = vrot.slane %v7752_v50, 1  ;;  %v7252_v23 = vmax.f32 %v7226_v54, %v7228_v0  ;;  %v19578_v6 = vadd.f32 %v19414_v5, %v19474_v7 }
 0x5dc   : > { %v8202_v38 = vsel %vm8181_vm1, %v7740_v43, %v7733_v35  ;;  %v7377_v24 = vrot.slane %v7363_v13, %v19422_v16  ;;  %v7378_v56 = vcombine.high %v7370_v2, %v7370_v2  ;;  %v7755_v19 = vsel %vm7614_vm0, %v7370_v2, -inf }
 0x5dd   : > { %v7747_v61 = vmax.f32 %v7745_v62, %v7746_v46  ;;  %v7754_v22 = vmax.f32 %v7752_v50, %v7753_v36  ;;  %v7756_v31 = vrot.slane %v7755_v19, 4  ;;  %v7380_v26 = vcombine.high %v7252_v23, %v7252_v23 }
 0x5de   : > { %v7379_v57 = vcombine.high %v7377_v24, %v7377_v24  ;;  %v7762_v40 = vsel %vm7614_vm0, %v7378_v56, -inf  ;;  %v7769_v42 = vsel %vm7614_vm0, %v7377_v24, -inf  ;;  %v7387_v14 = vrot.slane %v7252_v23, %v19422_v16  ;;  %v19586_v7 = vld [vmem:[#allocation2 + $0x30] sm:$0xff] }
 0x5df   : > { %v19588_v34 = vld [vmem:[#allocation2 + $0x31] sm:$0xff]  ;;  %v8203_v17 = vsel %vm8183_vm2, %v7747_v61, %v8202_v38  ;;  %v7757_v45 = vmax.f32 %v7755_v19, %v7756_v31  ;;  %v7763_v55 = vrot.slane %v7762_v40, 4  ;;  %v7770_v51 = vrot.slane %v7769_v42, 4 }
 0x5e0   : > { %v19590_v11 = vld [vmem:[#allocation2 + $0x32] sm:$0xff]  ;;  %v7776_v32 = vsel %vm7614_vm0, %v7379_v57, -inf  ;;  %v8204_v47 = vsel %vm8185_vm3, %v7754_v22, %v8203_v17  ;;  %v7394_v21 = vrot.slane %v7380_v26, %v19422_v16  ;;  %v7395_v9 = vcombine.high %v7387_v14, %v7387_v14 }
 0x5e1   : > { %11585 = vst [vmem:[#allocation2 + $0x38] sm:$0xff] %v19291_v39  ;;  %11584 = vst [vmem:[#allocation2 + $0x30] sm:$0xff] %v19291_v39  ;;  %v7758_v49 = vrot.slane %v7757_v45, 2  ;;  %v7764_v3 = vmax.f32 %v7762_v40, %v7763_v55  ;;  %v7771_v25 = vmax.f32 %v7769_v42, %v7770_v51  ;;  %v7777_v0 = vrot.slane %v7776_v32, 4 }
 0x5e2   : > { %v7396_v35 = vcombine.high %v7394_v21, %v7394_v21  ;;  %v7783_v62 = vsel %vm7614_vm0, %v7387_v14, -inf  ;;  %v7790_v50 = vsel %vm7614_vm0, %v7395_v9, -inf  ;;  %v7797_v54 = vsel %vm7614_vm0, %v7394_v21, -inf }
 0x5e3   : > { %v7759_v43 = vmax.f32 %v7757_v45, %v7758_v49  ;;  %v7765_v13 = vrot.slane %v7764_v3, 2  ;;  %v7772_v2 = vrot.slane %v7771_v25, 2  ;;  %v7778_v46 = vmax.f32 %v7776_v32, %v7777_v0 }
 0x5e4   : > { %v7784_v36 = vrot.slane %v7783_v62, 4  ;;  %v7791_v23 = vrot.slane %v7790_v50, 4  ;;  %v7798_v38 = vrot.slane %v7797_v54, 4  ;;  %v7804_v24 = vsel %vm7614_vm0, %v7396_v35, -inf }
 0x5e5   : > { %v7760_v56 = vrot.slane %v7759_v43, 1  ;;  %v7766_v19 = vmax.f32 %v7764_v3, %v7765_v13  ;;  %v7773_v61 = vmax.f32 %v7771_v25, %v7772_v2  ;;  %v7779_v22 = vrot.slane %v7778_v46, 2 }
 0x5e6   : > { %v7785_v31 = vmax.f32 %v7783_v62, %v7784_v36  ;;  %v7792_v26 = vmax.f32 %v7790_v50, %v7791_v23  ;;  %v7799_v57 = vmax.f32 %v7797_v54, %v7798_v38  ;;  %v7805_v40 = vrot.slane %v7804_v24, 4 }
 0x5e7   : > { %v7761_v42 = vmax.f32 %v7759_v43, %v7760_v56  ;;  %v7767_v14 = vrot.slane %v7766_v19, 1  ;;  %v7774_v17 = vrot.slane %v7773_v61, 1  ;;  %v7780_v45 = vmax.f32 %v7778_v46, %v7779_v22 }
 0x5e8   : > { %v7786_v55 = vrot.slane %v7785_v31, 2  ;;  %v7793_v51 = vrot.slane %v7792_v26, 2  ;;  %v7800_v32 = vrot.slane %v7799_v57, 2  ;;  %v7806_v21 = vmax.f32 %v7804_v24, %v7805_v40 }
 0x5e9   : > { %v7768_v9 = vmax.f32 %v7766_v19, %v7767_v14  ;;  %v7775_v49 = vmax.f32 %v7773_v61, %v7774_v17  ;;  %v7781_v0 = vrot.slane %v7780_v45, 1  ;;  %v8205_v35 = vsel %vm8187_vm4, %v7761_v42, %v8204_v47 }
 0x5ea   : > { %v7787_v3 = vmax.f32 %v7785_v31, %v7786_v55  ;;  %v7794_v25 = vmax.f32 %v7792_v26, %v7793_v51  ;;  %v7801_v13 = vmax.f32 %v7799_v57, %v7800_v32  ;;  %v7807_v62 = vrot.slane %v7806_v21, 2 }
 0x5eb   : > { %v7782_v50 = vmax.f32 %v7780_v45, %v7781_v0  ;;  %v8206_v54 = vsel %vm8189_vm5, %v7768_v9, %v8205_v35  ;;  %v7227_v43 = vmax.f32 %v19578_v6, 0.0  ;;  %v16243_v2 = vadd.f32 %v19492_v58, %v19414_v5 }
 0x5ec   : > { %v8207_v46 = vsel %vm8191_vm6, %v7775_v49, %v8206_v54  ;;  %v7788_v36 = vrot.slane %v7787_v3, 1  ;;  %v7795_v23 = vrot.slane %v7794_v25, 1  ;;  %v7802_v38 = vrot.slane %v7801_v13, 1 }
 0x5ed   : > { %v8208_v24 = vsel %vm8193_vm7, %v7782_v50, %v8207_v46  ;;  %v7808_v47 = vmax.f32 %v7806_v21, %v7807_v62  ;;  %v7253_v56 = vmax.f32 %v7227_v43, %v7229_v60  ;;  %v7232_v19 = vmax.f32 %v16243_v2, 0.0 }
 0x5ee   : > { %8254 = vst [vmem:[#allocation2 + $0x49] sm:$0xff] %v8208_v24  ;;  %v7789_v61 = vmax.f32 %v7787_v3, %v7788_v36  ;;  %v7796_v22 = vmax.f32 %v7794_v25, %v7795_v23  ;;  %v7803_v31 = vmax.f32 %v7801_v13, %v7802_v38  ;;  %v16244_v6 = vadd.f32 %v19414_v5, %v19499_v20 }
 0x5ef   : > { %v7809_v58 = vrot.slane %v7808_v47, 1  ;;  %v7397_v26 = vcombine.high %v7253_v56, %v7253_v56  ;;  %v7404_v57 = vrot.slane %v7253_v56, %v19422_v16  ;;  %v16245_v40 = vadd.f32 %v19501_v52, %v19414_v5 }
 0x5f0   : > { %v8209_v42 = vsel %vm8181_vm1, %v7796_v22, %v7789_v61  ;;  %v7230_v14 = vmax.f32 %v16244_v6, 0.0  ;;  %v16246_v44 = vadd.f32 %v19414_v5, %v19508_v41  ;;  %v19621_v60 = vadd.f32 %v19517_v18, %v19414_v5 }
 0x5f1   : > { %v7810_v17 = vmax.f32 %v7808_v47, %v7809_v58  ;;  %v8210_v20 = vsel %vm8183_vm2, %v7803_v31, %v8209_v42  ;;  %v7411_v45 = vrot.slane %v7397_v26, %v19422_v16  ;;  %v7412_v55 = vcombine.high %v7404_v57, %v7404_v57 }
 0x5f2   : > { %v7811_v51 = vsel %vm7614_vm0, %v7404_v57, -inf  ;;  %v7254_v32 = vmax.f32 %v7230_v14, %v7232_v19  ;;  %v7233_v52 = vmax.f32 %v16245_v40, 0.0  ;;  %v7231_v21 = vmax.f32 %v16246_v44, 0.0  ;;  %v19643_v14 = vld [vmem:[#allocation2 + $0xd9] sm:$0xff] }
 0x5f3   : > { %v7413_v9 = vcombine.high %v7411_v45, %v7411_v45  ;;  %v7812_v49 = vrot.slane %v7811_v51, 4  ;;  %v7818_v0 = vsel %vm7614_vm0, %v7412_v55, -inf  ;;  %v7825_v41 = vsel %vm7614_vm0, %v7411_v45, -inf  ;;  %v19645_v44 = vld [vmem:[#allocation2 + $0xda] sm:$0xff] }
 0x5f4   : > { %v7819_v35 = vrot.slane %v7818_v0, 4  ;;  %v7826_v18 = vrot.slane %v7825_v41, 4  ;;  %v8211_v3 = vsel %vm8185_vm3, %v7810_v17, %v8210_v20  ;;  %v7414_v25 = vcombine.high %v7254_v32, %v7254_v32  ;;  %11605 = vst [vmem:[#allocation2 + $0xd8] sm:$0xff] %v19291_v39  ;;  %11606 = vst [vmem:[#allocation2 + $0xe0] sm:$0xff] %v19291_v39 }
 0x5f5   : > { %v7813_v13 = vmax.f32 %v7811_v51, %v7812_v49  ;;  %v7832_v62 = vsel %vm7614_vm0, %v7413_v9, -inf  ;;  %v7421_v50 = vrot.slane %v7254_v32, %v19422_v16  ;;  %v7255_v54 = vmax.f32 %v7231_v21, %v7233_v52  ;;  %v19631_v43 = vld [vmem:[#allocation2 + $0x48] sm:$0xff] }
 0x5f6   : > { %v19633_v2 = vld [vmem:[#allocation2 + $0x49] sm:$0xff]  ;;  %v7820_v36 = vmax.f32 %v7818_v0, %v7819_v35  ;;  %v7827_v23 = vmax.f32 %v7825_v41, %v7826_v18  ;;  %v7833_v38 = vrot.slane %v7832_v62, 4  ;;  %v7428_v24 = vrot.slane %v7414_v25, %v19422_v16 }
 0x5f7   : > { %v19635_v46 = vld [vmem:[#allocation2 + $0x4a] sm:$0xff]  ;;  %v7814_v47 = vrot.slane %v7813_v13, 2  ;;  %v7429_v56 = vcombine.high %v7421_v50, %v7421_v50  ;;  %v7839_v19 = vsel %vm7614_vm0, %v7421_v50, -inf  ;;  %v7431_v61 = vcombine.high %v7255_v54, %v7255_v54 }
 0x5f8   : > { %11588 = vst [vmem:[#allocation2 + $0x50] sm:$0xff] %v19291_v39  ;;  %11587 = vst [vmem:[#allocation2 + $0x48] sm:$0xff] %v19291_v39  ;;  %v7821_v22 = vrot.slane %v7820_v36, 2  ;;  %v7828_v31 = vrot.slane %v7827_v23, 2  ;;  %v7834_v6 = vmax.f32 %v7832_v62, %v7833_v38  ;;  %v7430_v58 = vcombine.high %v7428_v24, %v7428_v24 }
 0x5f9   : > { %v7815_v26 = vmax.f32 %v7813_v13, %v7814_v47  ;;  %v7840_v57 = vrot.slane %v7839_v19, 4  ;;  %v7846_v40 = vsel %vm7614_vm0, %v7429_v56, -inf  ;;  %v7853_v42 = vsel %vm7614_vm0, %v7428_v24, -inf }
 0x5fa   : > { %v7822_v17 = vmax.f32 %v7820_v36, %v7821_v22  ;;  %v7829_v20 = vmax.f32 %v7827_v23, %v7828_v31  ;;  %v7835_v45 = vrot.slane %v7834_v6, 2  ;;  %v7847_v55 = vrot.slane %v7846_v40, 4 }
 0x5fb   : > { %v7816_v51 = vrot.slane %v7815_v26, 1  ;;  %v7841_v32 = vmax.f32 %v7839_v19, %v7840_v57  ;;  %v7854_v52 = vrot.slane %v7853_v42, 4  ;;  %v7860_v21 = vsel %vm7614_vm0, %v7430_v58, -inf }
 0x5fc   : > { %v7823_v9 = vrot.slane %v7822_v17, 1  ;;  %v7830_v49 = vrot.slane %v7829_v20, 1  ;;  %v7836_v0 = vmax.f32 %v7834_v6, %v7835_v45  ;;  %v7848_v41 = vmax.f32 %v7846_v40, %v7847_v55 }
 0x5fd   : > { %v7817_v35 = vmax.f32 %v7815_v26, %v7816_v51  ;;  %v7842_v18 = vrot.slane %v7841_v32, 2  ;;  %v7855_v25 = vmax.f32 %v7853_v42, %v7854_v52  ;;  %v7861_v13 = vrot.slane %v7860_v21, 4 }
 0x5fe   : > { %v7824_v62 = vmax.f32 %v7822_v17, %v7823_v9  ;;  %v7831_v50 = vmax.f32 %v7829_v20, %v7830_v49  ;;  %v7837_v36 = vrot.slane %v7836_v0, 1  ;;  %v7849_v23 = vrot.slane %v7848_v41, 2 }
 0x5ff   : > { %v8212_v38 = vsel %vm8187_vm4, %v7817_v35, %v8211_v3  ;;  %v7843_v24 = vmax.f32 %v7841_v32, %v7842_v18  ;;  %v7856_v47 = vrot.slane %v7855_v25, 2  ;;  %v7862_v56 = vmax.f32 %v7860_v21, %v7861_v13 }
 0x600   : > { %v7838_v19 = vmax.f32 %v7836_v0, %v7837_v36  ;;  %v8213_v22 = vsel %vm8189_vm5, %v7824_v62, %v8212_v38  ;;  %v7850_v31 = vmax.f32 %v7848_v41, %v7849_v23  ;;  %v7438_v6 = vrot.slane %v7255_v54, %v19422_v16 }
 0x601   : > { %v8214_v58 = vsel %vm8191_vm6, %v7831_v50, %v8213_v22  ;;  %v7844_v26 = vrot.slane %v7843_v24, 1  ;;  %v7857_v57 = vmax.f32 %v7855_v25, %v7856_v47  ;;  %v7863_v40 = vrot.slane %v7862_v56, 2 }
 0x602   : > { %v19655_v42 = vsel %vm8193_vm7, %v7838_v19, %v8214_v58  ;;  %v7851_v17 = vrot.slane %v7850_v31, 1  ;;  %v7445_v3 = vrot.slane %v7431_v61, %v19422_v16  ;;  %v7446_v20 = vcombine.high %v7438_v6, %v7438_v6 }
 0x603   : > { %8255 = vst [vmem:[#allocation2 + $0x61] sm:$0xff] %v19655_v42  ;;  %v7845_v45 = vmax.f32 %v7843_v24, %v7844_v26  ;;  %v7858_v55 = vrot.slane %v7857_v57, 1  ;;  %v7864_v51 = vmax.f32 %v7862_v56, %v7863_v40  ;;  %v7867_v32 = vsel %vm7614_vm0, %v7438_v6, -inf }
 0x604   : > { %v7852_v54 = vmax.f32 %v7850_v31, %v7851_v17  ;;  %v7447_v52 = vcombine.high %v7445_v3, %v7445_v3  ;;  %v7868_v21 = vrot.slane %v7867_v32, 4  ;;  %v7874_v9 = vsel %vm7614_vm0, %v7446_v20, -inf }
 0x605   : > { %v7859_v49 = vmax.f32 %v7857_v57, %v7858_v55  ;;  %v7865_v0 = vrot.slane %v7864_v51, 1  ;;  %v7875_v41 = vrot.slane %v7874_v9, 4  ;;  %v7881_v35 = vsel %vm7614_vm0, %v7445_v3, -inf }
 0x606   : > { %v8216_v61 = vsel %vm8181_vm1, %v7852_v54, %v7845_v45  ;;  %v7869_v18 = vmax.f32 %v7867_v32, %v7868_v21  ;;  %v7882_v25 = vrot.slane %v7881_v35, 4  ;;  %v7888_v13 = vsel %vm7614_vm0, %v7447_v52, -inf }
 0x607   : > { %v7866_v62 = vmax.f32 %v7864_v51, %v7865_v0  ;;  %v8217_v50 = vsel %vm8183_vm2, %v7859_v49, %v8216_v61  ;;  %v7876_v36 = vmax.f32 %v7874_v9, %v7875_v41  ;;  %v7889_v23 = vrot.slane %v7888_v13, 4 }
 0x608   : > { %v7870_v38 = vrot.slane %v7869_v18, 2  ;;  %v7883_v24 = vmax.f32 %v7881_v35, %v7882_v25  ;;  %v7236_v47 = vmax.f32 %v19621_v60, 0.0  ;;  %v16248_v56 = vadd.f32 %v19414_v5, %v19522_v29 }
 0x609   : > { %v7877_v19 = vrot.slane %v7876_v36, 2  ;;  %v7890_v22 = vmax.f32 %v7888_v13, %v7889_v23  ;;  %v8218_v31 = vsel %vm8185_vm3, %v7866_v62, %v8217_v50  ;;  %v16249_v6 = vadd.f32 %v19528_v10, %v19414_v5 }
 0x60a   : > { %v7871_v58 = vmax.f32 %v7869_v18, %v7870_v38  ;;  %v7884_v26 = vrot.slane %v7883_v24, 2  ;;  %v7234_v57 = vmax.f32 %v16248_v56, 0.0  ;;  %v8292_v40 = vpack.c.bf16 %v19519_v37, %v19291_v39  ;;  %v19673_v17 = vld [vmem:[#allocation2 + $0x60] sm:$0xff] }
 0x60b   : > { %v19675_v3 = vld [vmem:[#allocation2 + $0x62] sm:$0xff]  ;;  %v7878_v29 = vmax.f32 %v7876_v36, %v7877_v19  ;;  %v7891_v20 = vrot.slane %v7890_v22, 2  ;;  %v7237_v45 = vmax.f32 %v16249_v6, 0.0  ;;  %v16250_v55 = vadd.f32 %v19414_v5, %v19532_v59 }
 0x60c   : > { %v19677_v60 = vld [vmem:[#allocation2 + $0x61] sm:$0xff]  ;;  %v7872_v10 = vrot.slane %v7871_v58, 1  ;;  %v7885_v51 = vmax.f32 %v7883_v24, %v7884_v26  ;;  %v7256_v32 = vmax.f32 %v7234_v57, %v7236_v47  ;;  %15567 = vmatprep.mubr.bf16.mxu0 %v8292_v40  ;;  %v19685_v54 = vadd.f32 %v19541_v12, %v19414_v5 }
 0x60d   : > { %11591 = vst [vmem:[#allocation2 + $0x68] sm:$0xff] %v19291_v39  ;;  %11590 = vst [vmem:[#allocation2 + $0x60] sm:$0xff] %v19291_v39  ;;  %v7879_v52 = vrot.slane %v7878_v29, 1  ;;  %v7892_v21 = vmax.f32 %v7890_v22, %v7891_v20  ;;  %v7235_v9 = vmax.f32 %v16250_v55, 0.0  ;;  %v19689_v49 = vadd.f32 %v19414_v5, %v19543_v30 }
 0x60e   : > { %v7873_v59 = vmax.f32 %v7871_v58, %v7872_v10  ;;  %v7886_v0 = vrot.slane %v7885_v51, 1  ;;  %v7448_v41 = vcombine.high %v7256_v32, %v7256_v32  ;;  %v7455_v35 = vrot.slane %v7256_v32, %v19422_v16 }
 0x60f   : > { %v7880_v61 = vmax.f32 %v7878_v29, %v7879_v52  ;;  %v7893_v18 = vrot.slane %v7892_v21, 1  ;;  %v7257_v25 = vmax.f32 %v7235_v9, %v7237_v45  ;;  %v7240_v13 = vmax.f32 %v19685_v54, 0.0 }
 0x610   : > { %v7887_v62 = vmax.f32 %v7885_v51, %v7886_v0  ;;  %v8219_v12 = vsel %vm8187_vm4, %v7873_v59, %v8218_v31  ;;  %v7462_v50 = vrot.slane %v7448_v41, %v19422_v16  ;;  %v7463_v36 = vcombine.high %v7455_v35, %v7455_v35 }
 0x611   : > { %v7894_v23 = vmax.f32 %v7892_v21, %v7893_v18  ;;  %v8220_v5 = vsel %vm8189_vm5, %v7880_v61, %v8219_v12  ;;  %v7895_v30 = vsel %vm7614_vm0, %v7455_v35, -inf  ;;  %v7465_v38 = vcombine.high %v7257_v25, %v7257_v25 }
 0x612   : > { %v8221_v24 = vsel %vm8191_vm6, %v7887_v62, %v8220_v5  ;;  %v7464_v47 = vcombine.high %v7462_v50, %v7462_v50  ;;  %v7896_v56 = vrot.slane %v7895_v30, 4  ;;  %v7902_v19 = vsel %vm7614_vm0, %v7463_v36, -inf }
 0x613   : > { %v19700_v22 = vsel %vm8193_vm7, %v7894_v23, %v8221_v24  ;;  %v7903_v6 = vrot.slane %v7902_v19, 4  ;;  %v7909_v31 = vsel %vm7614_vm0, %v7462_v50, -inf  ;;  %v7472_v58 = vrot.slane %v7257_v25, %v19422_v16 }
 0x614   : > { %8256 = vst [vmem:[#allocation2 + $0x79] sm:$0xff] %v19700_v22  ;;  %v7897_v26 = vmax.f32 %v7895_v30, %v7896_v56  ;;  %v7910_v57 = vrot.slane %v7909_v31, 4  ;;  %v7916_v40 = vsel %vm7614_vm0, %v7464_v47, -inf  ;;  %v7479_v29 = vrot.slane %v7465_v38, %v19422_v16 }
 0x615   : > { %v7904_v20 = vmax.f32 %v7902_v19, %v7903_v6  ;;  %v7917_v45 = vrot.slane %v7916_v40, 4  ;;  %v7480_v55 = vcombine.high %v7472_v58, %v7472_v58  ;;  %v7923_v10 = vsel %vm7614_vm0, %v7472_v58, -inf }
 0x616   : > { %v7898_v51 = vrot.slane %v7897_v26, 2  ;;  %v7911_v32 = vmax.f32 %v7909_v31, %v7910_v57  ;;  %v7481_v52 = vcombine.high %v7479_v29, %v7479_v29  ;;  %v7924_v21 = vrot.slane %v7923_v10, 4 }
 0x617   : > { %v7905_v9 = vrot.slane %v7904_v20, 2  ;;  %v7918_v59 = vmax.f32 %v7916_v40, %v7917_v45  ;;  %v7930_v0 = vsel %vm7614_vm0, %v7480_v55, -inf  ;;  %v7937_v41 = vsel %vm7614_vm0, %v7479_v29, -inf }
 0x618   : > { %v7899_v35 = vmax.f32 %v7897_v26, %v7898_v51  ;;  %v7912_v61 = vrot.slane %v7911_v32, 2  ;;  %v7925_v18 = vmax.f32 %v7923_v10, %v7924_v21  ;;  %v7931_v25 = vrot.slane %v7930_v0, 4 }
 0x619   : > { %v7906_v62 = vmax.f32 %v7904_v20, %v7905_v9  ;;  %v7919_v12 = vrot.slane %v7918_v59, 2  ;;  %v7938_v50 = vrot.slane %v7937_v41, 4  ;;  %v7944_v36 = vsel %vm7614_vm0, %v7481_v52, -inf }
 0x61a   : > { %v7900_v23 = vrot.slane %v7899_v35, 1  ;;  %v7913_v5 = vmax.f32 %v7911_v32, %v7912_v61  ;;  %v7926_v30 = vrot.slane %v7925_v18, 2  ;;  %v7932_v38 = vmax.f32 %v7930_v0, %v7931_v25 }
 0x61b   : > { %v7907_v24 = vrot.slane %v7906_v62, 1  ;;  %v7920_v47 = vmax.f32 %v7918_v59, %v7919_v12  ;;  %v7939_v56 = vmax.f32 %v7937_v41, %v7938_v50  ;;  %v7945_v19 = vrot.slane %v7944_v36, 4  ;;  %v19711_v6 = vld [vmem:[#allocation2 + $0x78] sm:$0xff] }
 0x61c   : > { %v19713_v31 = vld [vmem:[#allocation2 + $0x7a] sm:$0xff]  ;;  %v7901_v26 = vmax.f32 %v7899_v35, %v7900_v23  ;;  %v7914_v57 = vrot.slane %v7913_v5, 1  ;;  %v7927_v40 = vmax.f32 %v7925_v18, %v7926_v30  ;;  %v7933_v29 = vrot.slane %v7932_v38, 2 }
 0x61d   : > { %v19715_v58 = vld [vmem:[#allocation2 + $0x79] sm:$0xff]  ;;  %v7908_v20 = vmax.f32 %v7906_v62, %v7907_v24  ;;  %v7921_v45 = vrot.slane %v7920_v47, 1  ;;  %v7940_v55 = vrot.slane %v7939_v56, 2  ;;  %v7946_v10 = vmax.f32 %v7944_v36, %v7945_v19 }
 0x61e   : > { %11594 = vst [vmem:[#allocation2 + $0x80] sm:$0xff] %v19291_v39  ;;  %11593 = vst [vmem:[#allocation2 + $0x78] sm:$0xff] %v19291_v39  ;;  %v7915_v51 = vmax.f32 %v7913_v5, %v7914_v57  ;;  %v7928_v32 = vrot.slane %v7927_v40, 1  ;;  %v7934_v52 = vmax.f32 %v7932_v38, %v7933_v29  ;;  %v7238_v21 = vmax.f32 %v19689_v49, 0.0  ;;  %v19728_v49 = vld [vmem:[%s20880_s2 + $0x1] ss:$0 sm:$0xff] }
 0x61f   : > { %v7922_v9 = vmax.f32 %v7920_v47, %v7921_v45  ;;  %v8223_v59 = vsel %vm8181_vm1, %v7908_v20, %v7901_v26  ;;  %v7941_v0 = vmax.f32 %v7939_v56, %v7940_v55  ;;  %v7947_v41 = vrot.slane %v7946_v10, 2 }
 0x620   : > { %v8224_v35 = vsel %vm8183_vm2, %v7915_v51, %v8223_v59  ;;  %v7929_v61 = vmax.f32 %v7927_v40, %v7928_v32  ;;  %v7935_v18 = vrot.slane %v7934_v52, 1  ;;  %v7258_v25 = vmax.f32 %v7238_v21, %v7240_v13 }
 0x621   : > { %v7942_v62 = vrot.slane %v7941_v0, 1  ;;  %v7948_v12 = vmax.f32 %v7946_v10, %v7947_v41  ;;  %v8225_v50 = vsel %vm8185_vm3, %v7922_v9, %v8224_v35  ;;  %v16253_v36 = vadd.f32 %v19728_v49, %v19547_v33 }
 0x622   : > { %v7936_v23 = vmax.f32 %v7934_v52, %v7935_v18  ;;  %v8226_v5 = vsel %vm8187_vm4, %v7929_v61, %v8225_v50  ;;  %v7482_v30 = vcombine.high %v7258_v25, %v7258_v25  ;;  %v7489_v38 = vrot.slane %v7258_v25, %v19422_v16 }
 0x623   : > { %v7943_v54 = vmax.f32 %v7941_v0, %v7942_v62  ;;  %v7949_v13 = vrot.slane %v7948_v12, 1  ;;  %v7241_v24 = vmax.f32 %v16253_v36, 0.0  ;;  %v16254_v47 = vadd.f32 %v19728_v49, %v19550_v63 }
 0x624   : > { %v8227_v56 = vsel %vm8189_vm5, %v7936_v23, %v8226_v5  ;;  %v7496_v19 = vrot.slane %v7482_v30, %v19422_v16  ;;  %v7497_v26 = vcombine.high %v7489_v38, %v7489_v38  ;;  %v7951_v57 = vsel %vm7614_vm0, %v7489_v38, -inf }
 0x625   : > { %v7950_v33 = vmax.f32 %v7948_v12, %v7949_v13  ;;  %v8228_v40 = vsel %vm8191_vm6, %v7943_v54, %v8227_v56  ;;  %v7952_v29 = vrot.slane %v7951_v57, 4  ;;  %v7239_v20 = vmax.f32 %v16254_v47, 0.0 }
 0x626   : > { %v7498_v45 = vcombine.high %v7496_v19, %v7496_v19  ;;  %v7958_v55 = vsel %vm7614_vm0, %v7497_v26, -inf  ;;  %v7965_v10 = vsel %vm7614_vm0, %v7496_v19, -inf  ;;  %v16255_v63 = vadd.f32 %v19728_v49, %v19562_v53 }
 0x627   : > { %v19745_v51 = vsel %vm8193_vm7, %v7950_v33, %v8228_v40  ;;  %v7953_v32 = vmax.f32 %v7951_v57, %v7952_v29  ;;  %v7959_v52 = vrot.slane %v7958_v55, 4  ;;  %v7966_v21 = vrot.slane %v7965_v10, 4 }
 0x628   : > { %8257 = vst [vmem:[#allocation2 + $0x91] sm:$0xff] %v19745_v51  ;;  %v7972_v9 = vsel %vm7614_vm0, %v7498_v45, -inf  ;;  %v7259_v59 = vmax.f32 %v7239_v20, %v7241_v24  ;;  %v7244_v0 = vmax.f32 %v16255_v63, 0.0  ;;  %v16256_v41 = vadd.f32 %v19728_v49, %v19568_v15 }
 0x629   : > { %v7954_v35 = vrot.slane %v7953_v32, 2  ;;  %v7960_v61 = vmax.f32 %v7958_v55, %v7959_v52  ;;  %v7967_v18 = vmax.f32 %v7965_v10, %v7966_v21  ;;  %v7973_v25 = vrot.slane %v7972_v9, 4 }
 0x62a   : > { %v7499_v53 = vcombine.high %v7259_v59, %v7259_v59  ;;  %v7506_v62 = vrot.slane %v7259_v59, %v19422_v16  ;;  %v7242_v12 = vmax.f32 %v16256_v41, 0.0  ;;  %v19754_v50 = vadd.f32 %v19728_v49, %v19570_v8 }
 0x62b   : > { %v7955_v36 = vmax.f32 %v7953_v32, %v7954_v35  ;;  %v7961_v23 = vrot.slane %v7960_v61, 2  ;;  %v7968_v5 = vrot.slane %v7967_v18, 2  ;;  %v7974_v30 = vmax.f32 %v7972_v9, %v7973_v25 }
 0x62c   : > { %v7513_v38 = vrot.slane %v7499_v53, %v19422_v16  ;;  %v7514_v54 = vcombine.high %v7506_v62, %v7506_v62  ;;  %v7979_v15 = vsel %vm7614_vm0, %v7506_v62, -inf  ;;  %v7260_v13 = vmax.f32 %v7242_v12, %v7244_v0 }
 0x62d   : > { %v7956_v24 = vrot.slane %v7955_v36, 1  ;;  %v7962_v47 = vmax.f32 %v7960_v61, %v7961_v23  ;;  %v7969_v56 = vmax.f32 %v7967_v18, %v7968_v5  ;;  %v7975_v19 = vrot.slane %v7974_v30, 2 }
 0x62e   : > { %v7515_v26 = vcombine.high %v7513_v38, %v7513_v38  ;;  %v7980_v57 = vrot.slane %v7979_v15, 4  ;;  %v7986_v33 = vsel %vm7614_vm0, %v7514_v54, -inf  ;;  %v7993_v8 = vsel %vm7614_vm0, %v7513_v38, -inf }
 0x62f   : > { %v7957_v40 = vmax.f32 %v7955_v36, %v7956_v24  ;;  %v7963_v29 = vrot.slane %v7962_v47, 1  ;;  %v7970_v20 = vrot.slane %v7969_v56, 1  ;;  %v7976_v45 = vmax.f32 %v7974_v30, %v7975_v19  ;;  %v19761_v52 = vld [vmem:[#allocation2 + $0x90] sm:$0xff] }
 0x630   : > { %v7981_v55 = vmax.f32 %v7979_v15, %v7980_v57  ;;  %v7987_v10 = vrot.slane %v7986_v33, 4  ;;  %v7994_v63 = vrot.slane %v7993_v8, 4  ;;  %v8000_v32 = vsel %vm7614_vm0, %v7515_v26, -inf  ;;  %v19763_v21 = vld [vmem:[#allocation2 + $0x92] sm:$0xff] }
 0x631   : > { %v19765_v9 = vld [vmem:[#allocation2 + $0x91] sm:$0xff]  ;;  %v7964_v59 = vmax.f32 %v7962_v47, %v7963_v29  ;;  %v7971_v0 = vmax.f32 %v7969_v56, %v7970_v20  ;;  %v7977_v41 = vrot.slane %v7976_v45, 1  ;;  %v8001_v35 = vrot.slane %v8000_v32, 4 }
 0x632   : > { %11596 = vst [vmem:[#allocation2 + $0x90] sm:$0xff] %v19291_v39  ;;  %11597 = vst [vmem:[#allocation2 + $0x98] sm:$0xff] %v19291_v39  ;;  %v7982_v61 = vrot.slane %v7981_v55, 2  ;;  %v7988_v18 = vmax.f32 %v7986_v33, %v7987_v10  ;;  %v7995_v25 = vmax.f32 %v7993_v8, %v7994_v63  ;;  %v7516_v53 = vcombine.high %v7260_v13, %v7260_v13 }
 0x633   : > { %v7978_v62 = vmax.f32 %v7976_v45, %v7977_v41  ;;  %v8230_v12 = vsel %vm8181_vm1, %v7964_v59, %v7957_v40  ;;  %v8002_v36 = vmax.f32 %v8000_v32, %v8001_v35  ;;  %v7523_v23 = vrot.slane %v7260_v13, %v19422_v16 }
 0x634   : > { %v8231_v5 = vsel %vm8183_vm2, %v7971_v0, %v8230_v12  ;;  %v7983_v30 = vmax.f32 %v7981_v55, %v7982_v61  ;;  %v7989_v38 = vrot.slane %v7988_v18, 2  ;;  %v7996_v54 = vrot.slane %v7995_v25, 2 }
 0x635   : > { %v8003_v15 = vrot.slane %v8002_v36, 2  ;;  %v8232_v24 = vsel %vm8185_vm3, %v7978_v62, %v8231_v5  ;;  %v7530_v47 = vrot.slane %v7516_v53, %v19422_v16  ;;  %v7531_v56 = vcombine.high %v7523_v23, %v7523_v23 }
 0x636   : > { %v7984_v19 = vrot.slane %v7983_v30, 1  ;;  %v7990_v26 = vmax.f32 %v7988_v18, %v7989_v38  ;;  %v7997_v57 = vmax.f32 %v7995_v25, %v7996_v54  ;;  %v8007_v33 = vsel %vm7614_vm0, %v7523_v23, -inf  ;;  %v17081_v38 = vld [vmem:[%s20879_s1 + $0x4c8] sm:$0xff]  }
 0x637   : > { %v8004_v8 = vmax.f32 %v8002_v36, %v8003_v15  ;;  %v7532_v40 = vcombine.high %v7530_v47, %v7530_v47  ;;  %v8008_v29 = vrot.slane %v8007_v33, 4  ;;  %v8014_v13 = vsel %vm7614_vm0, %v7531_v56, -inf }
 0x638   : > { %v7985_v20 = vmax.f32 %v7983_v30, %v7984_v19  ;;  %v7991_v45 = vrot.slane %v7990_v26, 1  ;;  %v7998_v55 = vrot.slane %v7997_v57, 1  ;;  %v8015_v10 = vrot.slane %v8014_v13, 4 }
 0x639   : > { %v8005_v63 = vrot.slane %v8004_v8, 1  ;;  %v8009_v32 = vmax.f32 %v8007_v33, %v8008_v29  ;;  %v8021_v59 = vsel %vm7614_vm0, %v7530_v47, -inf  ;;  %v8028_v0 = vsel %vm7614_vm0, %v7532_v40, -inf }
 0x63a   : > { %v7992_v41 = vmax.f32 %v7990_v26, %v7991_v45  ;;  %v7999_v35 = vmax.f32 %v7997_v57, %v7998_v55  ;;  %v8233_v61 = vsel %vm8187_vm4, %v7985_v20, %v8232_v24  ;;  %v8016_v18 = vmax.f32 %v8014_v13, %v8015_v10 }
 0x63b   : > { %v8006_v25 = vmax.f32 %v8004_v8, %v8005_v63  ;;  %v8010_v53 = vrot.slane %v8009_v32, 2  ;;  %v8022_v62 = vrot.slane %v8021_v59, 4  ;;  %v8029_v12 = vrot.slane %v8028_v0, 4  ;;  %v17312_v8 = vld [vmem:[%s20879_s1 + $0x4c0] sm:$0xff]  }
 0x63c   : > { %v8234_v36 = vsel %vm8189_vm5, %v7992_v41, %v8233_v61  ;;  %v8017_v23 = vrot.slane %v8016_v18, 2  ;;  %v7245_v5 = vmax.f32 %v19754_v50, 0.0  ;;  %v19783_v30 = vpack.c.bf16 %v19631_v43, %v19586_v7  ;;  %v17083_v41 = vld [vmem:[%s20879_s1 + $0x4d8] sm:$0xff]  }
 0x63d   : > { %v8235_v54 = vsel %vm8191_vm6, %v7999_v35, %v8234_v36  ;;  %v8011_v15 = vmax.f32 %v8009_v32, %v8010_v53  ;;  %v8023_v24 = vmax.f32 %v8021_v59, %v8022_v62  ;;  %v8030_v47 = vmax.f32 %v8028_v0, %v8029_v12 }
 0x63e   : > { %v19790_v56 = vsel %vm8193_vm7, %v8006_v25, %v8235_v54  ;;  %v8018_v19 = vmax.f32 %v8016_v18, %v8017_v23  ;;  %15568 = vmatmul.mubr.bf16.vlgmr.msra.gmra.mrb[32].mxu0 %v19783_v30  ;;  %v16258_v50 = vadd.f32 %v19728_v49, %v19574_v28  ;;  %v19797_v26 = vpack.c.bf16 %v19711_v6, %v19673_v17  ;;  %v17082_v28 = vld [vmem:[%s20879_s1 + $0x4d0] sm:$0xff]  }
 0x63f   : > { %8258 = vst [vmem:[#allocation2 + $0xa9] sm:$0xff] %v19790_v56  ;;  %v8024_v57 = vrot.slane %v8023_v24, 2  ;;  %v8031_v33 = vrot.slane %v8030_v47, 2  ;;  %15576 = vmatpush3.bf16.msra.mxu0 %v17312_v8  ;;  %v8460_v49 = vpack.c.bf16 %v19700_v22, %v19655_v42  ;;  %v8012_v13 = vrot.slane %v8011_v15, 1  ;;  %v17091_v42 = vld [vmem:[%s20879_s1 + $0x518] sm:$0xff]  }
 0x640   : > { %v8019_v40 = vrot.slane %v8018_v19, 1  ;;  %v7243_v29 = vmax.f32 %v16258_v50, 0.0  ;;  %15577 = vmatprep.subr.bf16.mxu0 %v17081_v38  ;;  %15571 = vmatprep.mubr.bf16.mxu0 %v19797_v26  ;;  %v8461_v45 = vpack.c.bf16 %v19790_v56, %v19745_v51  ;;  %v8792_v61 = vpack.c.bf16 %v19761_v52, %v19711_v6  ;;  %v17108_v6 = vld [vmem:[%s20879_s1 + $0x5a0] sm:$0xff]  }
 0x641   : > { %v8025_v20 = vmax.f32 %v8023_v24, %v8024_v57  ;;  %v8032_v63 = vmax.f32 %v8030_v47, %v8031_v33  ;;  %v8013_v35 = vmax.f32 %v8011_v15, %v8012_v13  ;;  %v8458_v12 = vpack.c.bf16 %v19524_v1, %v19487_v48 }
 0x642   : > { %v7261_v55 = vmax.f32 %v7243_v29, %v7245_v5  ;;  %v8020_v10 = vmax.f32 %v8018_v19, %v8019_v40  ;;  %v17084_v19 = vld [vmem:[%s20879_s1 + $0x4e0] sm:$0xff]   ;;  %v8958_v8 = vpack.c.bf16 %v19745_v51, %v19715_v58  ;;  %v9124_v29 = vpack.c.bf16 %v19763_v21, %v19713_v31 }
 0x643   : > { %15578 = vmatpush3.bf16.msra.mxu0 %v17081_v38  ;;  %v8026_v32 = vrot.slane %v8025_v20, 1  ;;  %v8033_v23 = vrot.slane %v8032_v63, 1  ;;  %v8624_v22 = vpack.c.bf16 %v19526_v4, %v19489_v27  ;;  %v17094_v27 = vld [vmem:[%s20879_s1 + $0x530] sm:$0xff]   ;;  %v17144_v51 = vld [vmem:[%s20879_s1 + $0x6c0] sm:$0xff]  }
 0x644   : > { %v7533_v59 = vcombine.high %v7261_v55, %v7261_v55  ;;  %v7540_v0 = vrot.slane %v7261_v55, %v19422_v16  ;;  %15579 = vmatprep.subr.bf16.mxu0 %v17082_v28  ;;  %v8237_v5 = vsel %vm8181_vm1, %v8020_v10, %v8013_v35  ;;  %15767 = vmatprep.subr.bf16.mxu1 %v17144_v51 }
 0x645   : > { %v8027_v15 = vmax.f32 %v8025_v20, %v8026_v32  ;;  %v8034_v10 = vmax.f32 %v8032_v63, %v8033_v23  ;;  %15768 = vmatpush3.bf16.msra.mxu1 %v17144_v51 }
 0x646   : > { %v7547_v18 = vrot.slane %v7533_v59, %v19422_v16  ;;  %v7548_v25 = vcombine.high %v7540_v0, %v7540_v0  ;;  %v8035_v53 = vsel %vm7614_vm0, %v7540_v0, -inf  ;;  %v19819_v62 = vld [vmem:[#allocation2 + $0xa8] sm:$0xff]  ;;  %v9456_v0 = vpack.c.bf16 %v19790_v56, %v19765_v9  ;;  %v17140_v9 = vld [vmem:[%s20879_s1 + $0x6a0] sm:$0xff]  }
 0x647   : > { %v19823_v36 = vld [vmem:[#allocation2 + $0xaa] sm:$0xff]  ;;  %v8036_v38 = vrot.slane %v8035_v53, 4  ;;  %15580 = vmatpush3.bf16.msra.mxu0 %v17082_v28  ;;  %v19828_v54 = vpack.c.bf16 %v19819_v62, %v19761_v52  ;;  %v8238_v32 = vsel %vm8183_vm2, %v8027_v15, %v8237_v5 }
 0x648   : > { %11599 = vst [vmem:[#allocation2 + $0xa8] sm:$0xff] %v19291_v39  ;;  %11600 = vst [vmem:[#allocation2 + $0xb0] sm:$0xff] %v19291_v39  ;;  %v7549_v24 = vcombine.high %v7547_v18, %v7547_v18  ;;  %v8042_v47 = vsel %vm7614_vm0, %v7548_v25, -inf  ;;  %v8049_v48 = vsel %vm7614_vm0, %v7547_v18, -inf  ;;  %15581 = vmatprep.subr.bf16.mxu0 %v17083_v41  ;;  %v17085_v59 = vld [vmem:[%s20879_s1 + $0x4e8] sm:$0xff]   ;;  %v8239_v63 = vsel %vm8185_vm3, %v8034_v10, %v8238_v32  ;;  %v17088_v10 = vld [vmem:[%s20879_s1 + $0x500] sm:$0xff]  }
 0x649   : > { %v8037_v50 = vmax.f32 %v8035_v53, %v8036_v38  ;;  %v8043_v57 = vrot.slane %v8042_v47, 4  ;;  %v8050_v33 = vrot.slane %v8049_v48, 4  ;;  %15572 = vmatmul.mubr.bf16.gmra.mrb[36].mxu0 %v19828_v54  ;;  %v17109_v52 = vld [vmem:[%s20879_s1 + $0x5a8] sm:$0xff]  }
 0x64a   : > { %v8056_v40 = vsel %vm7614_vm0, %v7549_v24, -inf  ;;  %15591 = vmatprep.mubr.bf16.mxu0 %v8458_v12 }
 0x64b   : > { %v8038_v28 = vrot.slane %v8037_v50, 2  ;;  %v8044_v13 = vmax.f32 %v8042_v47, %v8043_v57  ;;  %v8051_v20 = vmax.f32 %v8049_v48, %v8050_v33  ;;  %v8057_v55 = vrot.slane %v8056_v40, 4  ;;  %15582 = vmatpush3.bf16.msra.mxu0 %v17083_v41  ;;  %v17086_v41 = vld [vmem:[%s20879_s1 + $0x4f0] sm:$0xff]  }
 0x64c   : > { %15583 = vmatprep.subr.bf16.mxu0 %v17084_v19 }
 0x64d   : > { %v8039_v35 = vmax.f32 %v8037_v50, %v8038_v28  ;;  %v8045_v18 = vrot.slane %v8044_v13, 2  ;;  %v8052_v25 = vrot.slane %v8051_v20, 2  ;;  %v8058_v53 = vmax.f32 %v8056_v40, %v8057_v55 }
 0x64f   : > { %v8040_v12 = vrot.slane %v8039_v35, 1  ;;  %v8046_v38 = vmax.f32 %v8044_v13, %v8045_v18  ;;  %v8053_v24 = vmax.f32 %v8051_v20, %v8052_v25  ;;  %v8059_v47 = vrot.slane %v8058_v53, 2  ;;  %15584 = vmatpush3.bf16.msra.mxu0 %v17084_v19  ;;  %v17087_v19 = vld [vmem:[%s20879_s1 + $0x4f8] sm:$0xff]  }
 0x650   : > { %15585 = vmatprep.subr.bf16.mxu0 %v17085_v59 }
 0x651   : > { %v8041_v23 = vmax.f32 %v8039_v35, %v8040_v12  ;;  %v8047_v5 = vrot.slane %v8046_v38, 1  ;;  %v8054_v15 = vrot.slane %v8053_v24, 1  ;;  %v8060_v48 = vmax.f32 %v8058_v53, %v8059_v47  ;;  %v17089_v35 = vld [vmem:[%s20879_s1 + $0x508] sm:$0xff]   ;;  %v17090_v53 = vld [vmem:[%s20879_s1 + $0x510] sm:$0xff]   ;;  %v17096_v47 = vld [vmem:[%s20879_s1 + $0x540] sm:$0xff]  }
 0x653   : > { %v8048_v50 = vmax.f32 %v8046_v38, %v8047_v5  ;;  %v8061_v57 = vrot.slane %v8060_v48, 1  ;;  %v8240_v33 = vsel %vm8187_vm4, %v8041_v23, %v8239_v63  ;;  %15586 = vmatpush3.bf16.msra.mxu0 %v17085_v59  ;;  %v8055_v40 = vmax.f32 %v8053_v24, %v8054_v15  ;;  %v17093_v24 = vld [vmem:[%s20879_s1 + $0x528] sm:$0xff]   ;;  %v17098_v5 = vld [vmem:[%s20879_s1 + $0x550] sm:$0xff]  }
 0x654   : > { %15587 = vmatprep.subr.bf16.mxu0 %v17086_v41  ;;  %v19870_v59 = vpack.c.bf16 %v19633_v2, %v19588_v34  ;;  %v19917_v63 = vpack.c.bf16 %v19635_v46, %v19590_v11  ;;  %v19924_v23 = vpack.c.bf16 %v19713_v31, %v19675_v3  ;;  %v19933_v15 = vpack.c.bf16 %v19823_v36, %v19763_v21  ;;  %v17125_v31 = vld [vmem:[%s20879_s1 + $0x628] sm:$0xff]   ;;  %v17126_v21 = vld [vmem:[%s20879_s1 + $0x630] sm:$0xff]  }
 0x655   : > { %v8062_v28 = vmax.f32 %v8060_v48, %v8061_v57  ;;  %v8241_v13 = vsel %vm8189_vm5, %v8048_v50, %v8240_v33  ;;  %v17099_v48 = vld [vmem:[%s20879_s1 + $0x558] sm:$0xff]   ;;  %v8790_v50 = vpack.c.bf16 %v19586_v7, %v19519_v37  ;;  %v17100_v57 = vld [vmem:[%s20879_s1 + $0x560] sm:$0xff]   ;;  %v17101_v33 = vld [vmem:[%s20879_s1 + $0x568] sm:$0xff]  }
 0x656   : > { %v8242_v20 = vsel %vm8191_vm6, %v8055_v40, %v8241_v13  ;;  %v17102_v37 = vld [vmem:[%s20879_s1 + $0x570] sm:$0xff]   ;;  %v17103_v7 = vld [vmem:[%s20879_s1 + $0x578] sm:$0xff]   ;;  %v17104_v40 = vld [vmem:[%s20879_s1 + $0x580] sm:$0xff]  }
 0x657   : > { %v19860_v55 = vsel %vm8193_vm7, %v8062_v28, %v8242_v20  ;;  %15588 = vmatpush3.bf16.msra.mxu0 %v17086_v41  ;;  %v17097_v41 = vld [vmem:[%s20879_s1 + $0x548] sm:$0xff]   ;;  %v17106_v13 = vld [vmem:[%s20879_s1 + $0x590] sm:$0xff]  }
 0x658   : > { %8259 = vst [vmem:[#allocation2 + $0xc1] sm:$0xff] %v19860_v55  ;;  %15589 = vmatprep.subr.bf16.mxu0 %v17087_v19  ;;  %v8959_v32 = vpack.c.bf16 %v19860_v55, %v19790_v56  ;;  %v17105_v28 = vld [vmem:[%s20879_s1 + $0x588] sm:$0xff]   ;;  %v17142_v56 = vld [vmem:[%s20879_s1 + $0x6b0] sm:$0xff]  }
 0x659   : > { %v17113_v20 = vld [vmem:[%s20879_s1 + $0x5c8] sm:$0xff]  }
 0x65b   : > { %15590 = vmatpush3.bf16.msra.mxu0 %v17087_v19  ;;  %v8791_v19 = vpack.c.bf16 %v19673_v17, %v19631_v43  ;;  %v17107_v43 = vld [vmem:[%s20879_s1 + $0x598] sm:$0xff]   ;;  %v8956_v17 = vpack.c.bf16 %v19588_v34, %v19524_v1  ;;  %v17110_v1 = vld [vmem:[%s20879_s1 + $0x5b0] sm:$0xff]  }
 0x65c   : > { %15599 = vmatprep.subr.bf16.mxu0 %v17088_v10  ;;  %v17111_v34 = vld [vmem:[%s20879_s1 + $0x5b8] sm:$0xff]  }
 0x65e   : > { %15592 = vmatmul.mubr.bf16.vlgmr.msra.gmra.mrb[32].mxu0 %v19870_v59 }
 0x65f   : > { %15600 = vmatpush3.bf16.msra.mxu0 %v17088_v10  ;;  %15595 = vmatprep.mubr.bf16.mxu0 %v8460_v49  ;;  %v19879_v18 = vld [vmem:[#allocation2 + $0xc0] sm:$0xff]  ;;  %v17114_v10 = vld [vmem:[%s20879_s1 + $0x5d0] sm:$0xff]  }
 0x660   : > { %v19881_v25 = vld [vmem:[#allocation2 + $0xc2] sm:$0xff]  ;;  %15601 = vmatprep.subr.bf16.mxu0 %v17089_v35  ;;  %v8793_v12 = vpack.c.bf16 %v19879_v18, %v19819_v62  ;;  %v8957_v62 = vpack.c.bf16 %v19677_v60, %v19633_v2  ;;  %v17115_v2 = vld [vmem:[%s20879_s1 + $0x5d8] sm:$0xff]  }
 0x661   : > { %v9125_v38 = vpack.c.bf16 %v19881_v25, %v19823_v36  ;;  %11602 = vst [vmem:[#allocation2 + $0xc0] sm:$0xff] %v19291_v39  ;;  %11603 = vst [vmem:[#allocation2 + $0xc8] sm:$0xff] %v19291_v39  ;;  %v17092_v49 = vld [vmem:[%s20879_s1 + $0x520] sm:$0xff]  }
 0x662   : > { %v17128_v36 = vld [vmem:[%s20879_s1 + $0x640] sm:$0xff]  }
 0x663   : > { %15602 = vmatpush3.bf16.msra.mxu0 %v17089_v35  ;;  %v9122_v35 = vpack.c.bf16 %v19590_v11, %v19526_v4  ;;  %v17146_v4 = vld [vmem:[%s20879_s1 + $0x6d0] sm:$0xff]   ;;  %v17117_v11 = vld [vmem:[%s20879_s1 + $0x5e8] sm:$0xff]  }
 0x664   : > { %15603 = vmatprep.subr.bf16.mxu0 %v17090_v53 }
 0x666   : > { %15596 = vmatmul.mubr.bf16.gmra.mrb[36].mxu0 %v8461_v45  ;;  %v17095_v45 = vld [vmem:[%s20879_s1 + $0x538] sm:$0xff]  }
 0x667   : > { %15604 = vmatpush3.bf16.msra.mxu0 %v17090_v53  ;;  %15615 = vmatprep.mubr.bf16.mxu0 %v8624_v22  ;;  %v17116_v53 = vld [vmem:[%s20879_s1 + $0x5e0] sm:$0xff]   ;;  %v17119_v22 = vld [vmem:[%s20879_s1 + $0x5f8] sm:$0xff]  }
 0x668   : > { %15605 = vmatprep.subr.bf16.mxu0 %v17091_v42 }
 0x66b   : > { %15606 = vmatpush3.bf16.msra.mxu0 %v17091_v42  ;;  %v17148_v42 = vld [vmem:[%s20879_s1 + $0x6e0] sm:$0xff]  }
 0x66c   : > { %15607 = vmatprep.subr.bf16.mxu0 %v17092_v49 }
 0x66f   : > { %15608 = vmatpush3.bf16.msra.mxu0 %v17092_v49  ;;  %v17149_v49 = vld [vmem:[%s20879_s1 + $0x6e8] sm:$0xff]  }
 0x670   : > { %15609 = vmatprep.subr.bf16.mxu0 %v17093_v24 }
 0x673   : > { %15610 = vmatpush3.bf16.msra.mxu0 %v17093_v24  ;;  %v17120_v24 = vld [vmem:[%s20879_s1 + $0x600] sm:$0xff]  }
 0x674   : > { %15611 = vmatprep.subr.bf16.mxu0 %v17094_v27 }
 0x677   : > { %15612 = vmatpush3.bf16.msra.mxu0 %v17094_v27  ;;  %v9123_v27 = vpack.c.bf16 %v19675_v3, %v19635_v46  ;;  %v17123_v46 = vld [vmem:[%s20879_s1 + $0x618] sm:$0xff]   ;;  %v17124_v3 = vld [vmem:[%s20879_s1 + $0x620] sm:$0xff]  }
 0x678   : > { %15613 = vmatprep.subr.bf16.mxu0 %v17095_v45 }
 0x67b   : > { %15614 = vmatpush3.bf16.msra.mxu0 %v17095_v45  ;;  %v17121_v45 = vld [vmem:[%s20879_s1 + $0x608] sm:$0xff]  }
 0x67c   : > { %15623 = vmatprep.subr.bf16.mxu0 %v17096_v47 }
 0x67e   : > { %15616 = vmatmul.mubr.bf16.vlgmr.msra.gmra.mrb[32].mxu0 %v19917_v63 }
 0x67f   : > { %15619 = vmatprep.mubr.bf16.mxu0 %v19924_v23  ;;  %15624 = vmatpush3.bf16.msra.mxu0 %v17096_v47  ;;  %v17122_v47 = vld [vmem:[%s20879_s1 + $0x610] sm:$0xff]  }
 0x680   : > { %15625 = vmatprep.subr.bf16.mxu0 %v17097_v41 }
 0x683   : > { %15626 = vmatpush3.bf16.msra.mxu0 %v17097_v41  ;;  %v9291_v41 = vpack.c.bf16 %v19291_v39, %v19879_v18  ;;  %v17134_v18 = vld [vmem:[%s20879_s1 + $0x670] sm:$0xff]  }
 0x684   : > { %15627 = vmatprep.subr.bf16.mxu0 %v17098_v5 }
 0x686   : > { %15620 = vmatmul.mubr.bf16.gmra.mrb[36].mxu0 %v19933_v15 }
 0x687   : > { %15628 = vmatpush3.bf16.msra.mxu0 %v17098_v5  ;;  %15639 = vmatprep.mubr.bf16.mxu0 %v8790_v50  ;;  %v17131_v5 = vld [vmem:[%s20879_s1 + $0x658] sm:$0xff]   ;;  %v9455_v50 = vpack.c.bf16 %v19715_v58, %v19677_v60  ;;  %v9457_v60 = vpack.c.bf16 %v19643_v14, %v19860_v55  ;;  %v17141_v14 = vld [vmem:[%s20879_s1 + $0x6a8] sm:$0xff]   ;;  %v9623_v55 = vpack.c.bf16 %v19645_v44, %v19881_v25  ;;  %v13301_v44 = vld [vmem:[%s20880_s2 + $0x2] ss:$0 sm:$0xff] }
 0x688   : > { %15629 = vmatprep.subr.bf16.mxu0 %v17099_v48  ;;  %v17139_v58 = vld [vmem:[%s20879_s1 + $0x698] sm:$0xff]  }
 0x68b   : > { %15630 = vmatpush3.bf16.msra.mxu0 %v17099_v48  ;;  %v17136_v48 = vld [vmem:[%s20879_s1 + $0x680] sm:$0xff]  }
 0x68c   : > { %15631 = vmatprep.subr.bf16.mxu0 %v17100_v57 }
 0x68f   : > { %15632 = vmatpush3.bf16.msra.mxu0 %v17100_v57  ;;  %v17137_v57 = vld [vmem:[%s20879_s1 + $0x688] sm:$0xff]  }
 0x690   : > { %15633 = vmatprep.subr.bf16.mxu0 %v17101_v33 }
 0x693   : > { %15634 = vmatpush3.bf16.msra.mxu0 %v17101_v33  ;;  %v17138_v33 = vld [vmem:[%s20879_s1 + $0x690] sm:$0xff]  }
 0x694   : > { %15635 = vmatprep.subr.bf16.mxu0 %v17102_v37 }
 0x697   : > { %15636 = vmatpush3.bf16.msra.mxu0 %v17102_v37  ;;  %v17151_v37 = vld [vmem:[%s20879_s1 + $0x6f8] sm:$0xff]  }
 0x698   : > { %15637 = vmatprep.subr.bf16.mxu0 %v17103_v7 }
 0x69b   : > { %15638 = vmatpush3.bf16.msra.mxu0 %v17103_v7 }
 0x69c   : > { %15647 = vmatprep.subr.bf16.mxu0 %v17104_v40 }
 0x69e   : > { %15640 = vmatmul.mubr.bf16.vlgmr.msra.gmra.mrb[32].mxu0 %v8791_v19 }
 0x69f   : > { %15643 = vmatprep.mubr.bf16.mxu0 %v8792_v61  ;;  %15648 = vmatpush3.bf16.msra.mxu0 %v17104_v40  ;;  %v17112_v61 = vld [vmem:[%s20879_s1 + $0x5c0] sm:$0xff]  }
 0x6a0   : > { %15649 = vmatprep.subr.bf16.mxu0 %v17105_v28 }
 0x6a3   : > { %15650 = vmatpush3.bf16.msra.mxu0 %v17105_v28 }
 0x6a4   : > { %15651 = vmatprep.subr.bf16.mxu0 %v17106_v13 }
 0x6a6   : > { %15644 = vmatmul.mubr.bf16.gmra.mrb[36].mxu0 %v8793_v12  ;;  %v17118_v12 = vld [vmem:[%s20879_s1 + $0x5f0] sm:$0xff]  }
 0x6a7   : > { %15652 = vmatpush3.bf16.msra.mxu0 %v17106_v13  ;;  %15663 = vmatprep.mubr.bf16.mxu0 %v8956_v17 }
 0x6a8   : > { %15653 = vmatprep.subr.bf16.mxu0 %v17107_v43 }
 0x6ab   : > { %15654 = vmatpush3.bf16.msra.mxu0 %v17107_v43 }
 0x6ac   : > { %15655 = vmatprep.subr.bf16.mxu0 %v17108_v6 }
 0x6af   : > { %15656 = vmatpush3.bf16.msra.mxu0 %v17108_v6 }
 0x6b0   : > { %15657 = vmatprep.subr.bf16.mxu0 %v17109_v52 }
 0x6b3   : > { %15658 = vmatpush3.bf16.msra.mxu0 %v17109_v52 }
 0x6b4   : > { %15659 = vmatprep.subr.bf16.mxu0 %v17110_v1 }
 0x6b7   : > { %15660 = vmatpush3.bf16.msra.mxu0 %v17110_v1 }
 0x6b8   : > { %15661 = vmatprep.subr.bf16.mxu0 %v17111_v34 }
 0x6bb   : > { %15662 = vmatpush3.bf16.msra.mxu0 %v17111_v34 }
 0x6bc   : > { %15671 = vmatprep.subr.bf16.mxu0 %v17112_v61 }
 0x6be   : > { %15664 = vmatmul.mubr.bf16.vlgmr.msra.gmra.mrb[32].mxu0 %v8957_v62 }
 0x6bf   : > { %15667 = vmatprep.mubr.bf16.mxu0 %v8958_v8  ;;  %15672 = vmatpush3.bf16.msra.mxu0 %v17112_v61  ;;  %v17145_v8 = vld [vmem:[%s20879_s1 + $0x6c8] sm:$0xff]  }
 0x6c0   : > { %15673 = vmatprep.subr.bf16.mxu0 %v17113_v20  ;;  %15769 = vmatprep.subr.bf16.mxu1 %v17145_v8 }
 0x6c1   : > { %15770 = vmatpush3.bf16.msra.mxu1 %v17145_v8 }
 0x6c2   : > { %15771 = vmatprep.subr.bf16.mxu1 %v17146_v4 }
 0x6c3   : > { %15674 = vmatpush3.bf16.msra.mxu0 %v17113_v20 }
 0x6c4   : > { %15675 = vmatprep.subr.bf16.mxu0 %v17114_v10 }
 0x6c5   : > { %15772 = vmatpush3.bf16.msra.mxu1 %v17146_v4 }
 0x6c6   : > { %15668 = vmatmul.mubr.bf16.gmra.mrb[36].mxu0 %v8959_v32  ;;  %v17147_v32 = vld [vmem:[%s20879_s1 + $0x6d8] sm:$0xff]  }
 0x6c7   : > { %15676 = vmatpush3.bf16.msra.mxu0 %v17114_v10  ;;  %15687 = vmatprep.mubr.bf16.mxu0 %v9122_v35 }
 0x6c8   : > { %15677 = vmatprep.subr.bf16.mxu0 %v17115_v2  ;;  %15773 = vmatprep.subr.bf16.mxu1 %v17147_v32 }
 0x6c9   : > { %15774 = vmatpush3.bf16.msra.mxu1 %v17147_v32 }
 0x6ca   : > { %15775 = vmatprep.subr.bf16.mxu1 %v17148_v42 }
 0x6cb   : > { %15678 = vmatpush3.bf16.msra.mxu0 %v17115_v2 }
 0x6cc   : > { %15679 = vmatprep.subr.bf16.mxu0 %v17116_v53 }
 0x6cd   : > { %15776 = vmatpush3.bf16.msra.mxu1 %v17148_v42 }
 0x6ce   : > { %15777 = vmatprep.subr.bf16.mxu1 %v17149_v49 }
 0x6cf   : > { %15680 = vmatpush3.bf16.msra.mxu0 %v17116_v53 }
 0x6d0   : > { %15681 = vmatprep.subr.bf16.mxu0 %v17117_v11 }
 0x6d1   : > { %15778 = vmatpush3.bf16.msra.mxu1 %v17149_v49 }
 0x6d3   : > { %15682 = vmatpush3.bf16.msra.mxu0 %v17117_v11 }
 0x6d4   : > { %15683 = vmatprep.subr.bf16.mxu0 %v17118_v12 }
 0x6d7   : > { %15684 = vmatpush3.bf16.msra.mxu0 %v17118_v12 }
 0x6d8   : > { %15685 = vmatprep.subr.bf16.mxu0 %v17119_v22 }
 0x6db   : > { %15686 = vmatpush3.bf16.msra.mxu0 %v17119_v22 }
 0x6dc   : > { %15695 = vmatprep.subr.bf16.mxu0 %v17120_v24 }
 0x6de   : > { %15688 = vmatmul.mubr.bf16.vlgmr.msra.gmra.mrb[32].mxu0 %v9123_v27 }
 0x6df   : > { %15691 = vmatprep.mubr.bf16.mxu0 %v9124_v29  ;;  %15696 = vmatpush3.bf16.msra.mxu0 %v17120_v24  ;;  %v17129_v29 = vld [vmem:[%s20879_s1 + $0x648] sm:$0xff]  }
 0x6e0   : > { %15697 = vmatprep.subr.bf16.mxu0 %v17121_v45 }
 0x6e3   : > { %15698 = vmatpush3.bf16.msra.mxu0 %v17121_v45 }
 0x6e4   : > { %15699 = vmatprep.subr.bf16.mxu0 %v17122_v47 }
 0x6e6   : > { %15692 = vmatmul.mubr.bf16.gmra.mrb[36].mxu0 %v9125_v38  ;;  %v17130_v38 = vld [vmem:[%s20879_s1 + $0x650] sm:$0xff]  }
 0x6e7   : > { %15700 = vmatpush3.bf16.msra.mxu0 %v17122_v47  ;;  %15711 = vmatprep.mubr.bf16.mxu0 %v19783_v30  ;;  %v17127_v30 = vld [vmem:[%s20879_s1 + $0x638] sm:$0xff]  }
 0x6e8   : > { %15701 = vmatprep.subr.bf16.mxu0 %v17123_v46 }
 0x6eb   : > { %15702 = vmatpush3.bf16.msra.mxu0 %v17123_v46 }
 0x6ec   : > { %15703 = vmatprep.subr.bf16.mxu0 %v17124_v3 }
 0x6ef   : > { %15704 = vmatpush3.bf16.msra.mxu0 %v17124_v3 }
 0x6f0   : > { %15705 = vmatprep.subr.bf16.mxu0 %v17125_v31 }
 0x6f3   : > { %15706 = vmatpush3.bf16.msra.mxu0 %v17125_v31 }
 0x6f4   : > { %15707 = vmatprep.subr.bf16.mxu0 %v17126_v21 }
 0x6f7   : > { %15708 = vmatpush3.bf16.msra.mxu0 %v17126_v21 }
 0x6f8   : > { %15709 = vmatprep.subr.bf16.mxu0 %v17127_v30 }
 0x6fb   : > { %15710 = vmatpush3.bf16.msra.mxu0 %v17127_v30 }
 0x6fc   : > { %15719 = vmatprep.subr.bf16.mxu0 %v17128_v36 }
 0x6fe   : > { %15712 = vmatmul.mubr.bf16.vlgmr.msra.gmra.mrb[32].mxu0 %v19797_v26  ;;  %v17132_v26 = vld [vmem:[%s20879_s1 + $0x660] sm:$0xff]  }
 0x6ff   : > { %15715 = vmatprep.mubr.bf16.mxu0 %v19828_v54  ;;  %15720 = vmatpush3.bf16.msra.mxu0 %v17128_v36  ;;  %v17133_v54 = vld [vmem:[%s20879_s1 + $0x668] sm:$0xff]  }
 0x700   : > { %15721 = vmatprep.subr.bf16.mxu0 %v17129_v29 }
 0x703   : > { %15722 = vmatpush3.bf16.msra.mxu0 %v17129_v29 }
 0x704   : > { %15723 = vmatprep.subr.bf16.mxu0 %v17130_v38 }
 0x706   : > { %15716 = vmatmul.mubr.bf16.gmra.mrb[36].mxu0 %v9291_v41 }
 0x707   : > { %15724 = vmatpush3.bf16.msra.mxu0 %v17130_v38  ;;  %15735 = vmatprep.mubr.bf16.mxu0 %v19870_v59  ;;  %v17135_v59 = vld [vmem:[%s20879_s1 + $0x678] sm:$0xff]   ;;  %v17153_v38 = vld [vmem:[%s20879_s1 + $0x708] sm:$0xff]  }
 0x708   : > { %15725 = vmatprep.subr.bf16.mxu0 %v17131_v5 }
 0x70b   : > { %15726 = vmatpush3.bf16.msra.mxu0 %v17131_v5 }
 0x70c   : > { %15727 = vmatprep.subr.bf16.mxu0 %v17132_v26 }
 0x70f   : > { %15728 = vmatpush3.bf16.msra.mxu0 %v17132_v26 }
 0x710   : > { %15729 = vmatprep.subr.bf16.mxu0 %v17133_v54 }
 0x713   : > { %15730 = vmatpush3.bf16.msra.mxu0 %v17133_v54 }
 0x714   : > { %15731 = vmatprep.subr.bf16.mxu0 %v17134_v18 }
 0x717   : > { %15732 = vmatpush3.bf16.msra.mxu0 %v17134_v18 }
 0x718   : > { %15733 = vmatprep.subr.bf16.mxu0 %v17135_v59 }
 0x71b   : > { %15734 = vmatpush3.bf16.msra.mxu0 %v17135_v59  ;;  %v17154_v59 = vld [vmem:[%s20879_s1 + $0x710] sm:$0xff]  }
 0x71c   : > { %15743 = vmatprep.subr.bf16.mxu0 %v17136_v48 }
 0x71e   : > { %15736 = vmatmul.mubr.bf16.vlgmr.msra.gmra.mrb[32].mxu0 %v9455_v50 }
 0x71f   : > { %15739 = vmatprep.mubr.bf16.mxu0 %v9456_v0  ;;  %15744 = vmatpush3.bf16.msra.mxu0 %v17136_v48  ;;  %v17143_v0 = vld [vmem:[%s20879_s1 + $0x6b8] sm:$0xff]  }
 0x720   : > { %15745 = vmatprep.subr.bf16.mxu0 %v17137_v57 }
 0x723   : > { %15746 = vmatpush3.bf16.msra.mxu0 %v17137_v57  ;;  %v10030_v57 = vld [vmem:[#allocation3 + $0x1] sm:$0xff] }
 0x724   : > { %15747 = vmatprep.subr.bf16.mxu0 %v17138_v33 }
 0x726   : > { %15740 = vmatmul.mubr.bf16.gmra.mrb[36].mxu0 %v9457_v60 }
 0x727   : > { %15748 = vmatpush3.bf16.msra.mxu0 %v17138_v33  ;;  %15759 = vmatprep.mubr.bf16.mxu0 %v19917_v63  ;;  %v17150_v63 = vld [vmem:[%s20879_s1 + $0x6f0] sm:$0xff]  }
 0x728   : > { %15749 = vmatprep.subr.bf16.mxu0 %v17139_v58  ;;  %15779 = vmatprep.subr.bf16.mxu1 %v17150_v63 }
 0x729   : > { %15780 = vmatpush3.bf16.msra.mxu1 %v17150_v63 }
 0x72a   : > { %15781 = vmatprep.subr.bf16.mxu1 %v17151_v37 }
 0x72b   : > { %15750 = vmatpush3.bf16.msra.mxu0 %v17139_v58 }
 0x72c   : > { %15751 = vmatprep.subr.bf16.mxu0 %v17140_v9 }
 0x72d   : > { %15782 = vmatpush3.bf16.msra.mxu1 %v17151_v37  ;;  %v17156_v37 = vld [vmem:[%s20879_s1 + $0x720] sm:$0xff]  }
 0x72f   : > { %15752 = vmatpush3.bf16.msra.mxu0 %v17140_v9 }
 0x730   : > { %15753 = vmatprep.subr.bf16.mxu0 %v17141_v14 }
 0x733   : > { %15754 = vmatpush3.bf16.msra.mxu0 %v17141_v14  ;;  %v17155_v14 = vld [vmem:[%s20879_s1 + $0x718] sm:$0xff]  }
 0x734   : > { %15755 = vmatprep.subr.bf16.mxu0 %v17142_v56 }
 0x737   : > { %15756 = vmatpush3.bf16.msra.mxu0 %v17142_v56 }
 0x738   : > { %15757 = vmatprep.subr.bf16.mxu0 %v17143_v0 }
 0x73b   : > { %15758 = vmatpush3.bf16.msra.mxu0 %v17143_v0 }
 0x73c   : > { %15983 = vmatprep.subr.bf16.mxu0 %v19291_v39 }
 0x73e   : > { %15760 = vmatmul.mubr.bf16.vlgmr.msra.gmra.mrb[32].mxu0 %v19924_v23  ;;  %v17152_v23 = vld [vmem:[%s20879_s1 + $0x700] sm:$0xff]  }
 0x73f   : > { %15763 = vmatprep.mubr.bf16.mxu0 %v19933_v15  ;;  %15791 = vmatprep.subr.bf16.mxu1 %v17152_v23 }
 0x746   : > { %15764 = vmatmul.mubr.bf16.gmra.mrb[36].mxu0 %v9623_v55 }
 0x747   : > { %15999 = vmatprep.mubr.msk.bf16.mxu0 %vm17325_vm8, %v19291_v39 }
 0x811   : > { %v15761_v25 = vpop.f32.mrb[32].mxu0 }
 0x812   : > { %v16259_v15 = vadd.f32 %v15761_v25, %v13301_v44  ;;  %v9723_v7 = vpop.f32.mrb[33].mxu0  ;;  %v17159_v25 = vld [vmem:[%s20879_s1 + $0x738] sm:$0xff]  }
 0x813   : > { %v16260_v40 = vadd.f32 %v13301_v44, %v9723_v7  ;;  %v15762_v19 = vpop.f32.mrb[34].mxu0  ;;  %v17161_v7 = vld [vmem:[%s20879_s1 + $0x748] sm:$0xff]  }
 0x814   : > { %v20150_v28 = vmax.f32 %v16259_v15, 0.0  ;;  %v16261_v13 = vadd.f32 %v15762_v19, %v13301_v44  ;;  %v9726_v43 = vpop.f32.mrb[35].mxu0  ;;  %v17160_v15 = vld [vmem:[%s20879_s1 + $0x740] sm:$0xff]   ;;  %v10196_v19 = vld [vmem:[#allocation3 + $0x2] sm:$0xff] }
 0x815   : > { %v20152_v17 = vmax.f32 %v16260_v40, 0.0  ;;  %v16262_v6 = vadd.f32 %v13301_v44, %v9726_v43  ;;  %v17162_v40 = vld [vmem:[%s20879_s1 + $0x750] sm:$0xff]  }
 0x816   : > { %9842 = vst [vmem:[#allocation3 + $0x49] sm:$0xff] %v20150_v28  ;;  %v20155_v52 = vmax.f32 %v16261_v13, 0.0  ;;  %v17163_v13 = vld [vmem:[%s20879_s1 + $0x758] sm:$0xff]  }
 0x817   : > { %9840 = vst [vmem:[#allocation3 + $0x19] sm:$0xff] %v20152_v17  ;;  %v20158_v1 = vmax.f32 %v16262_v6, 0.0  ;;  %v10046_v55 = vpack.c.bf16 %v20152_v17, %v10030_v57  ;;  %v17164_v6 = vld [vmem:[%s20879_s1 + $0x760] sm:$0xff]  }
 0x818   : > { %9843 = vst [vmem:[#allocation3 + $0x61] sm:$0xff] %v20155_v52  ;;  %v10545_v34 = vpack.c.bf16 %v20155_v52, %v20150_v28  ;;  %v17172_v57 = vld [vmem:[%s20879_s1 + $0x7a0] sm:$0xff]  }
 0x819   : > { %9841 = vst [vmem:[#allocation3 + $0x31] sm:$0xff] %v20158_v1  ;;  %v15765_v61 = vpop.f32.mrb[36].mxu0  ;;  %v20166_v62 = vpack.c.bf16 %v20150_v28, %v20158_v1  ;;  %v10544_v20 = vpack.c.bf16 %v20158_v1, %v20152_v17  ;;  %v17183_v17 = vld [vmem:[%s20879_s1 + $0x7f8] sm:$0xff]   ;;  %v17184_v1 = vld [vmem:[%s20879_s1 + $0x800] sm:$0xff]  }
 0x81a   : > { %v16263_v10 = vadd.f32 %v15765_v61, %v13301_v44  ;;  %v9739_v2 = vpop.f32.mrb[37].mxu0  ;;  %v17165_v61 = vld [vmem:[%s20879_s1 + $0x768] sm:$0xff]   ;;  %v17188_v28 = vld [vmem:[%s20879_s1 + $0x820] sm:$0xff]  }
 0x81b   : > { %v16264_v35 = vadd.f32 %v13301_v44, %v9739_v2  ;;  %v15766_v51 = vpop.f32.mrb[38].mxu0  ;;  %v17167_v2 = vld [vmem:[%s20879_s1 + $0x778] sm:$0xff]  }
 0x81c   : > { %v20170_v8 = vmax.f32 %v16263_v10, 0.0  ;;  %v16265_v53 = vadd.f32 %v15766_v51, %v13301_v44  ;;  %v9742_v4 = vpop.f32.mrb[39].mxu0  ;;  %v17166_v10 = vld [vmem:[%s20879_s1 + $0x770] sm:$0xff]  }
 0x81d   : > { %v20172_v11 = vmax.f32 %v16264_v35, 0.0  ;;  %v16266_v32 = vadd.f32 %v13301_v44, %v9742_v4  ;;  %v20179_v22 = vld [vmem:[#allocation3 + $0x48] sm:$0xff]  ;;  %v17158_v44 = vld [vmem:[%s20879_s1 + $0x730] sm:$0xff]   ;;  %v17168_v35 = vld [vmem:[%s20879_s1 + $0x780] sm:$0xff]  }
 0x81e   : > { %9846 = vst [vmem:[#allocation3 + $0xa9] sm:$0xff] %v20170_v8  ;;  %v20175_v12 = vmax.f32 %v16265_v53, 0.0  ;;  %v20177_v42 = vld [vmem:[#allocation3 + $0x18] sm:$0xff]  ;;  %v20192_v47 = vld [vmem:[#allocation3 + $0x4a] sm:$0xff] }
 0x81f   : > { %9844 = vst [vmem:[#allocation3 + $0x79] sm:$0xff] %v20172_v11  ;;  %v20182_v49 = vmax.f32 %v16266_v32, 0.0  ;;  %v9880_v24 = vpack.c.bf16 %v20177_v42, %v19291_v39  ;;  %v20186_v27 = vld [vmem:[#allocation3 + $0x60] sm:$0xff]  ;;  %v20190_v45 = vpack.c.bf16 %v20172_v11, %v20155_v52  ;;  %v17169_v53 = vld [vmem:[%s20879_s1 + $0x788] sm:$0xff]  }
 0x820   : > { %v20194_v46 = vld [vmem:[#allocation3 + $0x62] sm:$0xff]  ;;  %9847 = vst [vmem:[#allocation3 + $0xc1] sm:$0xff] %v20175_v12  ;;  %v20197_v3 = vld [vmem:[#allocation3 + $0x30] sm:$0xff]  ;;  %v10379_v21 = vpack.c.bf16 %v20186_v27, %v20179_v22  ;;  %v10547_v30 = vpack.c.bf16 %v20175_v12, %v20170_v8  ;;  %v20219_v5 = vld [vmem:[#allocation3 + $0x1a] sm:$0xff] }
 0x821   : > { %v20199_v31 = vld [vmem:[#allocation3 + $0x32] sm:$0xff]  ;;  %v10711_v36 = vpack.c.bf16 %v20194_v46, %v20192_v47  ;;  %9845 = vst [vmem:[#allocation3 + $0x91] sm:$0xff] %v20182_v49  ;;  %15783 = vmatprep.mubr.bf16.mxu1 %v9880_v24  ;;  %v20210_v29 = vpack.c.bf16 %v20179_v22, %v20197_v3  ;;  %v20217_v41 = vpack.c.bf16 %v20170_v8, %v20182_v49  ;;  %v17170_v32 = vld [vmem:[%s20879_s1 + $0x790] sm:$0xff]   ;;  %v17179_v22 = vld [vmem:[%s20879_s1 + $0x7d8] sm:$0xff]  }
 0x822   : > { %v10378_v26 = vpack.c.bf16 %v20197_v3, %v20177_v42  ;;  %v10546_v54 = vpack.c.bf16 %v20182_v49, %v20172_v11  ;;  %v10710_v18 = vpack.c.bf16 %v20199_v31, %v20219_v5  ;;  %v10212_v43 = vpack.c.bf16 %v20219_v5, %v10196_v19  ;;  %v17175_v42 = vld [vmem:[%s20879_s1 + $0x7b8] sm:$0xff]   ;;  %v17176_v3 = vld [vmem:[%s20879_s1 + $0x7c0] sm:$0xff]   ;;  %v17189_v52 = vld [vmem:[%s20879_s1 + $0x828] sm:$0xff]  }
 0x823   : > { %15784 = vmatmul.mubr.bf16.vlgmr.msra.gmra.mrb[64].mxu1 %v20210_v29  ;;  %v20304_v51 = vpack.c.bf16 %v20192_v47, %v20199_v31  ;;  %v17191_v8 = vld [vmem:[%s20879_s1 + $0x838] sm:$0xff]   ;;  %v17192_v11 = vld [vmem:[%s20879_s1 + $0x840] sm:$0xff]   ;;  %v17193_v49 = vld [vmem:[%s20879_s1 + $0x848] sm:$0xff]  }
 0x824   : > { %15792 = vmatpush3.bf16.msra.mxu1 %v17152_v23  ;;  %v17157_v23 = vld [vmem:[%s20879_s1 + $0x728] sm:$0xff]   ;;  %v17194_v31 = vld [vmem:[%s20879_s1 + $0x850] sm:$0xff]   ;;  %v17195_v47 = vld [vmem:[%s20879_s1 + $0x858] sm:$0xff]  }
 0x825   : > { %15793 = vmatprep.subr.bf16.mxu1 %v17153_v38  ;;  %v20239_v60 = vld [vmem:[#allocation3 + $0xa8] sm:$0xff]  ;;  %v11033_v19 = vld [vmem:[#allocation3 + $0xd9] sm:$0xff] }
 0x826   : > { %v20231_v48 = vld [vmem:[#allocation3 + $0x78] sm:$0xff]  ;;  %v20318_v24 = vld [vmem:[#allocation3 + $0xaa] sm:$0xff] }
 0x827   : > { %v20235_v50 = vpack.c.bf16 %v20231_v48, %v20186_v27  ;;  %v20251_v56 = vld [vmem:[#allocation3 + $0x7a] sm:$0xff]  ;;  %v17180_v27 = vld [vmem:[%s20879_s1 + $0x7e0] sm:$0xff]  }
 0x828   : > { %15794 = vmatpush3.bf16.msra.mxu1 %v17153_v38  ;;  %v20237_v33 = vld [vmem:[#allocation3 + $0x90] sm:$0xff]  ;;  %v20311_v4 = vpack.c.bf16 %v20251_v56, %v20194_v46 }
 0x829   : > { %v20241_v58 = vld [vmem:[#allocation3 + $0x92] sm:$0xff]  ;;  %15787 = vmatprep.mubr.bf16.mxu1 %v20235_v50  ;;  %15795 = vmatprep.subr.bf16.mxu1 %v17154_v59  ;;  %v20246_v9 = vpack.c.bf16 %v20239_v60, %v20237_v33  ;;  %v10380_v0 = vpack.c.bf16 %v20237_v33, %v20231_v48  ;;  %v17182_v48 = vld [vmem:[%s20879_s1 + $0x7f0] sm:$0xff]  }
 0x82a   : > { %v10712_v63 = vpack.c.bf16 %v20241_v58, %v20251_v56  ;;  %v20322_v38 = vpack.c.bf16 %v20318_v24, %v20241_v58  ;;  %v17186_v33 = vld [vmem:[%s20879_s1 + $0x810] sm:$0xff]   ;;  %v17196_v46 = vld [vmem:[%s20879_s1 + $0x860] sm:$0xff]   ;;  %v17201_v58 = vld [vmem:[%s20879_s1 + $0x888] sm:$0xff]  }
 0x82b   : > { %15788 = vmatmul.mubr.bf16.gmra.mrb[68].mxu1 %v20246_v9  ;;  %v17202_v56 = vld [vmem:[%s20879_s1 + $0x890] sm:$0xff]  }
 0x82c   : > { %15796 = vmatpush3.bf16.msra.mxu1 %v17154_v59  ;;  %15807 = vmatprep.mubr.bf16.mxu1 %v10046_v55  ;;  %v17171_v59 = vld [vmem:[%s20879_s1 + $0x798] sm:$0xff]   ;;  %v17174_v55 = vld [vmem:[%s20879_s1 + $0x7b0] sm:$0xff]  }
 0x82d   : > { %15797 = vmatprep.subr.bf16.mxu1 %v17155_v14 }
 0x830   : > { %15798 = vmatpush3.bf16.msra.mxu1 %v17155_v14  ;;  %v17173_v14 = vld [vmem:[%s20879_s1 + $0x7a8] sm:$0xff]  }
 0x831   : > { %15799 = vmatprep.subr.bf16.mxu1 %v17156_v37 }
 0x834   : > { %15800 = vmatpush3.bf16.msra.mxu1 %v17156_v37  ;;  %v17178_v37 = vld [vmem:[%s20879_s1 + $0x7d0] sm:$0xff]  }
 0x835   : > { %15801 = vmatprep.subr.bf16.mxu1 %v17157_v23 }
 0x838   : > { %15802 = vmatpush3.bf16.msra.mxu1 %v17157_v23  ;;  %v20358_v23 = vld [vmem:[#allocation3 + $0xc0] sm:$0xff] }
 0x839   : > { %15803 = vmatprep.subr.bf16.mxu1 %v17158_v44 }
 0x83c   : > { %15804 = vmatpush3.bf16.msra.mxu1 %v17158_v44  ;;  %v10381_v44 = vpack.c.bf16 %v20358_v23, %v20239_v60  ;;  %v17187_v60 = vld [vmem:[%s20879_s1 + $0x818] sm:$0xff]  }
 0x83d   : > { %15805 = vmatprep.subr.bf16.mxu1 %v17159_v25 }
 0x840   : > { %15806 = vmatpush3.bf16.msra.mxu1 %v17159_v25  ;;  %v17206_v25 = vld [vmem:[%s20879_s1 + $0x8b0] sm:$0xff]  }
 0x841   : > { %15815 = vmatprep.subr.bf16.mxu1 %v17160_v15 }
 0x843   : > { %15808 = vmatmul.mubr.bf16.vlgmr.msra.gmra.mrb[64].mxu1 %v20166_v62 }
 0x844   : > { %15811 = vmatprep.mubr.bf16.mxu1 %v20190_v45  ;;  %15816 = vmatpush3.bf16.msra.mxu1 %v17160_v15  ;;  %v17208_v15 = vld [vmem:[%s20879_s1 + $0x8c0] sm:$0xff]  }
 0x845   : > { %15817 = vmatprep.subr.bf16.mxu1 %v17161_v7 }
 0x848   : > { %15818 = vmatpush3.bf16.msra.mxu1 %v17161_v7  ;;  %v17209_v7 = vld [vmem:[%s20879_s1 + $0x8c8] sm:$0xff]  }
 0x849   : > { %15819 = vmatprep.subr.bf16.mxu1 %v17162_v40 }
 0x84b   : > { %15812 = vmatmul.mubr.bf16.gmra.mrb[68].mxu1 %v20217_v41 }
 0x84c   : > { %15820 = vmatpush3.bf16.msra.mxu1 %v17162_v40  ;;  %15831 = vmatprep.mubr.bf16.mxu1 %v10212_v43  ;;  %v17210_v40 = vld [vmem:[%s20879_s1 + $0x8d0] sm:$0xff]   ;;  %v17211_v43 = vld [vmem:[%s20879_s1 + $0x8d8] sm:$0xff]  }
 0x84d   : > { %15821 = vmatprep.subr.bf16.mxu1 %v17163_v13 }
 0x850   : > { %15822 = vmatpush3.bf16.msra.mxu1 %v17163_v13  ;;  %v11045_v13 = vpack.c.bf16 %v11033_v19, %v20175_v12  ;;  %v17213_v12 = vld [vmem:[%s20879_s1 + $0x8e8] sm:$0xff]  }
 0x851   : > { %15823 = vmatprep.subr.bf16.mxu1 %v17164_v6 }
 0x854   : > { %15824 = vmatpush3.bf16.msra.mxu1 %v17164_v6  ;;  %v17215_v6 = vld [vmem:[%s20879_s1 + $0x8f8] sm:$0xff]  }
 0x855   : > { %15825 = vmatprep.subr.bf16.mxu1 %v17165_v61 }
 0x858   : > { %15826 = vmatpush3.bf16.msra.mxu1 %v17165_v61  ;;  %v11199_v61 = vld [vmem:[#allocation3 + $0xda] sm:$0xff] }
 0x859   : > { %15827 = vmatprep.subr.bf16.mxu1 %v17166_v10 }
 0x85c   : > { %15828 = vmatpush3.bf16.msra.mxu1 %v17166_v10 }
 0x85d   : > { %15829 = vmatprep.subr.bf16.mxu1 %v17167_v2 }
 0x860   : > { %15830 = vmatpush3.bf16.msra.mxu1 %v17167_v2  ;;  %v17216_v2 = vld [vmem:[%s20879_s1 + $0x900] sm:$0xff]  }
 0x861   : > { %15839 = vmatprep.subr.bf16.mxu1 %v17168_v35  ;;  %15984 = vmatpush3.bf16.msra.mxu0 %v17216_v2 }
 0x862   : > { %15985 = vmatprep.subr.bf16.mxu0 %v19291_v39 }
 0x863   : > { %15832 = vmatmul.mubr.bf16.vlgmr.msra.gmra.mrb[64].mxu1 %v20304_v51 }
 0x864   : > { %15835 = vmatprep.mubr.bf16.mxu1 %v20311_v4  ;;  %15840 = vmatpush3.bf16.msra.mxu1 %v17168_v35  ;;  %v17217_v35 = vld [vmem:[%s20879_s1 + $0x908] sm:$0xff]  }
 0x865   : > { %15841 = vmatprep.subr.bf16.mxu1 %v17169_v53  ;;  %15986 = vmatpush3.bf16.msra.mxu0 %v17217_v35 }
 0x866   : > { %15987 = vmatprep.subr.bf16.mxu0 %v19291_v39 }
 0x868   : > { %15842 = vmatpush3.bf16.msra.mxu1 %v17169_v53  ;;  %v17219_v53 = vld [vmem:[%s20879_s1 + $0x918] sm:$0xff]  }
 0x869   : > { %15843 = vmatprep.subr.bf16.mxu1 %v17170_v32 }
 0x86b   : > { %15836 = vmatmul.mubr.bf16.gmra.mrb[68].mxu1 %v20322_v38 }
 0x86c   : > { %15844 = vmatpush3.bf16.msra.mxu1 %v17170_v32  ;;  %15855 = vmatprep.mubr.bf16.mxu1 %v10378_v26  ;;  %v17177_v26 = vld [vmem:[%s20879_s1 + $0x7c8] sm:$0xff]  }
 0x86d   : > { %15845 = vmatprep.subr.bf16.mxu1 %v17171_v59  ;;  %v17221_v32 = vld [vmem:[%s20879_s1 + $0x928] sm:$0xff]  }
 0x870   : > { %15846 = vmatpush3.bf16.msra.mxu1 %v17171_v59  ;;  %v20548_v59 = vld [vmem:[%s20880_s2 + $0x3] ss:$0 sm:$0xff] }
 0x871   : > { %15847 = vmatprep.subr.bf16.mxu1 %v17172_v57 }
 0x874   : > { %15848 = vmatpush3.bf16.msra.mxu1 %v17172_v57 }
 0x875   : > { %15849 = vmatprep.subr.bf16.mxu1 %v17173_v14 }
 0x878   : > { %15850 = vmatpush3.bf16.msra.mxu1 %v17173_v14 }
 0x879   : > { %15851 = vmatprep.subr.bf16.mxu1 %v17174_v55 }
 0x87c   : > { %15852 = vmatpush3.bf16.msra.mxu1 %v17174_v55 }
 0x87d   : > { %15853 = vmatprep.subr.bf16.mxu1 %v17175_v42 }
 0x880   : > { %15854 = vmatpush3.bf16.msra.mxu1 %v17175_v42 }
 0x881   : > { %15863 = vmatprep.subr.bf16.mxu1 %v17176_v3 }
 0x883   : > { %15856 = vmatmul.mubr.bf16.vlgmr.msra.gmra.mrb[64].mxu1 %v10379_v21  ;;  %v17181_v21 = vld [vmem:[%s20879_s1 + $0x7e8] sm:$0xff]  }
 0x884   : > { %15859 = vmatprep.mubr.bf16.mxu1 %v10380_v0  ;;  %15864 = vmatpush3.bf16.msra.mxu1 %v17176_v3  ;;  %v10879_v0 = vpack.c.bf16 %v19291_v39, %v20358_v23 }
 0x885   : > { %15865 = vmatprep.subr.bf16.mxu1 %v17177_v26 }
 0x888   : > { %15866 = vmatpush3.bf16.msra.mxu1 %v17177_v26 }
 0x889   : > { %15867 = vmatprep.subr.bf16.mxu1 %v17178_v37 }
 0x88b   : > { %15860 = vmatmul.mubr.bf16.gmra.mrb[68].mxu1 %v10381_v44 }
 0x88c   : > { %15868 = vmatpush3.bf16.msra.mxu1 %v17178_v37  ;;  %15879 = vmatprep.mubr.bf16.mxu1 %v10544_v20  ;;  %v17185_v20 = vld [vmem:[%s20879_s1 + $0x808] sm:$0xff]  }
 0x88d   : > { %15869 = vmatprep.subr.bf16.mxu1 %v17179_v22 }
 0x890   : > { %15870 = vmatpush3.bf16.msra.mxu1 %v17179_v22 }
 0x891   : > { %15871 = vmatprep.subr.bf16.mxu1 %v17180_v27 }
 0x894   : > { %15872 = vmatpush3.bf16.msra.mxu1 %v17180_v27 }
 0x895   : > { %15873 = vmatprep.subr.bf16.mxu1 %v17181_v21 }
 0x898   : > { %15874 = vmatpush3.bf16.msra.mxu1 %v17181_v21 }
 0x899   : > { %15875 = vmatprep.subr.bf16.mxu1 %v17182_v48 }
 0x89c   : > { %15876 = vmatpush3.bf16.msra.mxu1 %v17182_v48 }
 0x89d   : > { %15877 = vmatprep.subr.bf16.mxu1 %v17183_v17 }
 0x8a0   : > { %15878 = vmatpush3.bf16.msra.mxu1 %v17183_v17 }
 0x8a1   : > { %15887 = vmatprep.subr.bf16.mxu1 %v17184_v1 }
 0x8a3   : > { %15880 = vmatmul.mubr.bf16.vlgmr.msra.gmra.mrb[64].mxu1 %v10545_v34  ;;  %v17190_v34 = vld [vmem:[%s20879_s1 + $0x830] sm:$0xff]  }
 0x8a4   : > { %15883 = vmatprep.mubr.bf16.mxu1 %v10546_v54  ;;  %15888 = vmatpush3.bf16.msra.mxu1 %v17184_v1  ;;  %v17198_v54 = vld [vmem:[%s20879_s1 + $0x870] sm:$0xff]  }
 0x8a5   : > { %15889 = vmatprep.subr.bf16.mxu1 %v17185_v20 }
 0x8a8   : > { %15890 = vmatpush3.bf16.msra.mxu1 %v17185_v20 }
 0x8a9   : > { %15891 = vmatprep.subr.bf16.mxu1 %v17186_v33 }
 0x8ab   : > { %15884 = vmatmul.mubr.bf16.gmra.mrb[68].mxu1 %v10547_v30  ;;  %v20431_v30 = vld [vmem:[#allocation3 + $0xc2] sm:$0xff] }
 0x8ac   : > { %15892 = vmatpush3.bf16.msra.mxu1 %v17186_v33  ;;  %15903 = vmatprep.mubr.bf16.mxu1 %v10710_v18  ;;  %v10713_v5 = vpack.c.bf16 %v20431_v30, %v20318_v24  ;;  %v17200_v18 = vld [vmem:[%s20879_s1 + $0x880] sm:$0xff]   ;;  %v11211_v10 = vpack.c.bf16 %v11199_v61, %v20431_v30  ;;  %v17222_v24 = vld [vmem:[%s20879_s1 + $0x930] sm:$0xff]  }
 0x8ad   : > { %15893 = vmatprep.subr.bf16.mxu1 %v17187_v60 }
 0x8b0   : > { %15894 = vmatpush3.bf16.msra.mxu1 %v17187_v60 }
 0x8b1   : > { %15895 = vmatprep.subr.bf16.mxu1 %v17188_v28 }
 0x8b4   : > { %15896 = vmatpush3.bf16.msra.mxu1 %v17188_v28 }
 0x8b5   : > { %15897 = vmatprep.subr.bf16.mxu1 %v17189_v52 }
 0x8b8   : > { %15898 = vmatpush3.bf16.msra.mxu1 %v17189_v52 }
 0x8b9   : > { %15899 = vmatprep.subr.bf16.mxu1 %v17190_v34 }
 0x8bc   : > { %15900 = vmatpush3.bf16.msra.mxu1 %v17190_v34 }
 0x8bd   : > { %15901 = vmatprep.subr.bf16.mxu1 %v17191_v8 }
 0x8c0   : > { %15902 = vmatpush3.bf16.msra.mxu1 %v17191_v8 }
 0x8c1   : > { %15911 = vmatprep.subr.bf16.mxu1 %v17192_v11 }
 0x8c3   : > { %15904 = vmatmul.mubr.bf16.vlgmr.msra.gmra.mrb[64].mxu1 %v10711_v36  ;;  %v17197_v36 = vld [vmem:[%s20879_s1 + $0x868] sm:$0xff]  }
 0x8c4   : > { %15907 = vmatprep.mubr.bf16.mxu1 %v10712_v63  ;;  %15912 = vmatpush3.bf16.msra.mxu1 %v17192_v11  ;;  %v17203_v63 = vld [vmem:[%s20879_s1 + $0x898] sm:$0xff]  }
 0x8c5   : > { %15913 = vmatprep.subr.bf16.mxu1 %v17193_v49 }
 0x8c8   : > { %15914 = vmatpush3.bf16.msra.mxu1 %v17193_v49 }
 0x8c9   : > { %15915 = vmatprep.subr.bf16.mxu1 %v17194_v31 }
 0x8cb   : > { %15908 = vmatmul.mubr.bf16.gmra.mrb[68].mxu1 %v10713_v5 }
 0x8cc   : > { %15916 = vmatpush3.bf16.msra.mxu1 %v17194_v31  ;;  %15927 = vmatprep.mubr.bf16.mxu1 %v20210_v29  ;;  %v17199_v29 = vld [vmem:[%s20879_s1 + $0x878] sm:$0xff]  }
 0x8cd   : > { %15917 = vmatprep.subr.bf16.mxu1 %v17195_v47 }
 0x8d0   : > { %15918 = vmatpush3.bf16.msra.mxu1 %v17195_v47 }
 0x8d1   : > { %15919 = vmatprep.subr.bf16.mxu1 %v17196_v46 }
 0x8d4   : > { %15920 = vmatpush3.bf16.msra.mxu1 %v17196_v46 }
 0x8d5   : > { %15921 = vmatprep.subr.bf16.mxu1 %v17197_v36 }
 0x8d8   : > { %15922 = vmatpush3.bf16.msra.mxu1 %v17197_v36 }
 0x8d9   : > { %15923 = vmatprep.subr.bf16.mxu1 %v17198_v54 }
 0x8dc   : > { %15924 = vmatpush3.bf16.msra.mxu1 %v17198_v54 }
 0x8dd   : > { %15925 = vmatprep.subr.bf16.mxu1 %v17199_v29 }
 0x8e0   : > { %15926 = vmatpush3.bf16.msra.mxu1 %v17199_v29 }
 0x8e1   : > { %15935 = vmatprep.subr.bf16.mxu1 %v17200_v18 }
 0x8e3   : > { %15928 = vmatmul.mubr.bf16.vlgmr.msra.gmra.mrb[64].mxu1 %v20235_v50  ;;  %v17204_v50 = vld [vmem:[%s20879_s1 + $0x8a0] sm:$0xff]  }
 0x8e4   : > { %15931 = vmatprep.mubr.bf16.mxu1 %v20246_v9  ;;  %15936 = vmatpush3.bf16.msra.mxu1 %v17200_v18  ;;  %v17205_v9 = vld [vmem:[%s20879_s1 + $0x8a8] sm:$0xff]  }
 0x8e5   : > { %15937 = vmatprep.subr.bf16.mxu1 %v17201_v58 }
 0x8e8   : > { %15938 = vmatpush3.bf16.msra.mxu1 %v17201_v58 }
 0x8e9   : > { %15939 = vmatprep.subr.bf16.mxu1 %v17202_v56 }
 0x8eb   : > { %15932 = vmatmul.mubr.bf16.gmra.mrb[68].mxu1 %v10879_v0 }
 0x8ec   : > { %15940 = vmatpush3.bf16.msra.mxu1 %v17202_v56  ;;  %15951 = vmatprep.mubr.bf16.mxu1 %v20166_v62  ;;  %v17207_v62 = vld [vmem:[%s20879_s1 + $0x8b8] sm:$0xff]  }
 0x8ed   : > { %15941 = vmatprep.subr.bf16.mxu1 %v17203_v63 }
 0x8f0   : > { %15942 = vmatpush3.bf16.msra.mxu1 %v17203_v63 }
 0x8f1   : > { %15943 = vmatprep.subr.bf16.mxu1 %v17204_v50 }
 0x8f4   : > { %15944 = vmatpush3.bf16.msra.mxu1 %v17204_v50 }
 0x8f5   : > { %15945 = vmatprep.subr.bf16.mxu1 %v17205_v9 }
 0x8f8   : > { %15946 = vmatpush3.bf16.msra.mxu1 %v17205_v9 }
 0x8f9   : > { %15947 = vmatprep.subr.bf16.mxu1 %v17206_v25 }
 0x8fc   : > { %15948 = vmatpush3.bf16.msra.mxu1 %v17206_v25 }
 0x8fd   : > { %15949 = vmatprep.subr.bf16.mxu1 %v17207_v62 }
 0x900   : > { %15950 = vmatpush3.bf16.msra.mxu1 %v17207_v62 }
 0x901   : > { %15959 = vmatprep.subr.bf16.mxu1 %v17208_v15 }
 0x903   : > { %15952 = vmatmul.mubr.bf16.vlgmr.msra.gmra.mrb[64].mxu1 %v20190_v45  ;;  %v17212_v45 = vld [vmem:[%s20879_s1 + $0x8e0] sm:$0xff]  }
 0x904   : > { %15955 = vmatprep.mubr.bf16.mxu1 %v20217_v41  ;;  %15960 = vmatpush3.bf16.msra.mxu1 %v17208_v15  ;;  %v17214_v41 = vld [vmem:[%s20879_s1 + $0x8f0] sm:$0xff]  }
 0x905   : > { %15961 = vmatprep.subr.bf16.mxu1 %v17209_v7 }
 0x908   : > { %15962 = vmatpush3.bf16.msra.mxu1 %v17209_v7 }
 0x909   : > { %15963 = vmatprep.subr.bf16.mxu1 %v17210_v40 }
 0x90b   : > { %15956 = vmatmul.mubr.bf16.gmra.mrb[68].mxu1 %v11045_v13 }
 0x90c   : > { %15964 = vmatpush3.bf16.msra.mxu1 %v17210_v40  ;;  %15975 = vmatprep.mubr.bf16.mxu1 %v20304_v51  ;;  %v17218_v51 = vld [vmem:[%s20879_s1 + $0x910] sm:$0xff]  }
 0x90d   : > { %15965 = vmatprep.subr.bf16.mxu1 %v17211_v43  ;;  %15988 = vmatpush3.bf16.msra.mxu0 %v17218_v51 }
 0x90e   : > { %15989 = vmatprep.subr.bf16.mxu0 %v19291_v39 }
 0x910   : > { %15966 = vmatpush3.bf16.msra.mxu1 %v17211_v43 }
 0x911   : > { %15967 = vmatprep.subr.bf16.mxu1 %v17212_v45  ;;  %15990 = vmatpush3.bf16.msra.mxu0 %v17219_v53 }
 0x912   : > { %15991 = vmatprep.subr.bf16.mxu0 %v19291_v39 }
 0x914   : > { %15968 = vmatpush3.bf16.msra.mxu1 %v17212_v45 }
 0x915   : > { %15969 = vmatprep.subr.bf16.mxu1 %v17213_v12 }
 0x918   : > { %15970 = vmatpush3.bf16.msra.mxu1 %v17213_v12 }
 0x919   : > { %15971 = vmatprep.subr.bf16.mxu1 %v17214_v41 }
 0x91c   : > { %15972 = vmatpush3.bf16.msra.mxu1 %v17214_v41 }
 0x91d   : > { %15973 = vmatprep.subr.bf16.mxu1 %v17215_v6 }
 0x920   : > { %15974 = vmatpush3.bf16.msra.mxu1 %v17215_v6 }
 0x923   : > { %15976 = vmatmul.mubr.bf16.vlgmr.msra.gmra.mrb[64].mxu1 %v20311_v4  ;;  %v17220_v4 = vld [vmem:[%s20879_s1 + $0x920] sm:$0xff]  }
 0x924   : > { %15979 = vmatprep.mubr.bf16.mxu1 %v20322_v38  ;;  %15992 = vmatpush3.bf16.msra.mxu0 %v17220_v4  ;;  %v17223_v38 = vld [vmem:[%s20879_s1 + $0x938] sm:$0xff]  }
 0x925   : > { %15993 = vmatprep.subr.bf16.mxu0 %v19291_v39 }
 0x928   : > { %15994 = vmatpush3.bf16.msra.mxu0 %v17221_v32 }
 0x929   : > { %15995 = vmatprep.subr.bf16.mxu0 %v19291_v39 }
 0x92b   : > { %15980 = vmatmul.mubr.bf16.gmra.mrb[68].mxu1 %v11211_v10 }
 0x92c   : > { %15996 = vmatpush3.bf16.msra.mxu0 %v17222_v24 }
 0x92d   : > { %15997 = vmatprep.subr.bf16.mxu0 %v19291_v39 }
 0x930   : > { %15998 = vmatpush3.bf16.msra.mxu0 %v17223_v38 }
 0x931   : > { %16003 = vmatprep.subr.bf16.mxu0 %v19291_v39 }
 0x9f6   : > { %v15977_v57 = vpop.f32.mrb[64].mxu1 }
 0x9f7   : > { %v16267_v14 = vadd.f32 %v15977_v57, %v20548_v59  ;;  %v11311_v55 = vpop.f32.mrb[65].mxu1 }
 0x9f8   : > { %v16268_v42 = vadd.f32 %v20548_v59, %v11311_v55  ;;  %v15978_v3 = vpop.f32.mrb[66].mxu1 }
 0x9f9   : > { %v16269_v26 = vadd.f32 %v15978_v3, %v20548_v59  ;;  %v11314_v37 = vpop.f32.mrb[67].mxu1  ;;  %v11368_v44 = vmax.f32 %v16267_v14, 0.0 }
 0x9fa   : > { %v16270_v23 = vadd.f32 %v20548_v59, %v11314_v37  ;;  %v11366_v27 = vmax.f32 %v16268_v42, 0.0 }
 0x9fb   : > { %v11369_v22 = vmax.f32 %v16269_v26, 0.0 }
 0x9fc   : > { %v11367_v21 = vmax.f32 %v16270_v23, 0.0 }
 0x9fd   : > { %v11375_v48 = vmax.f32 %v11368_v44, %v11369_v22 }
 0x9fe   : > { %v11374_v17 = vmax.f32 %v11366_v27, %v11367_v21  ;;  %v15981_v1 = vpop.f32.mrb[68].mxu1 }
 0x9ff   : > { %v11399_v20 = vcombine.high %v11375_v48, %v11375_v48  ;;  %v11406_v33 = vrot.slane %v11375_v48, %v19422_v16  ;;  %v11327_v60 = vpop.f32.mrb[69].mxu1  ;;  %v20559_v31 = vadd.f32 %v15981_v1, %v20548_v59 }
 0xa00   : > { %v11382_v28 = vcombine.high %v11374_v17, %v11374_v17  ;;  %v11389_v52 = vrot.slane %v11374_v17, %v19422_v16  ;;  %v15982_v34 = vpop.f32.mrb[70].mxu1  ;;  %v16272_v3 = vadd.f32 %v20548_v59, %v11327_v60 }
 0xa01   : > { %v11413_v8 = vrot.slane %v11399_v20, %v19422_v16  ;;  %v11414_v11 = vcombine.high %v11406_v33, %v11406_v33  ;;  %v11494_v49 = vsel %vm7614_vm0, %v11406_v33, -inf  ;;  %v11330_v30 = vpop.f32.mrb[71].mxu1  ;;  %v11372_v48 = vmax.f32 %v20559_v31, 0.0 }
 0xa02   : > { %v11495_v5 = vrot.slane %v11494_v49, 4  ;;  %v11396_v47 = vrot.slane %v11382_v28, %v19422_v16  ;;  %v11397_v46 = vcombine.high %v11389_v52, %v11389_v52  ;;  %v11466_v36 = vsel %vm7614_vm0, %v11389_v52, -inf }
 0xa03   : > { %v11415_v54 = vcombine.high %v11413_v8, %v11413_v8  ;;  %v11501_v29 = vsel %vm7614_vm0, %v11414_v11, -inf  ;;  %v11508_v18 = vsel %vm7614_vm0, %v11413_v8, -inf  ;;  %v11467_v58 = vrot.slane %v11466_v36, 4 }
 0xa04   : > { %v11496_v56 = vmax.f32 %v11494_v49, %v11495_v5  ;;  %v11502_v0 = vrot.slane %v11501_v29, 4  ;;  %v11509_v63 = vrot.slane %v11508_v18, 4  ;;  %v11398_v50 = vcombine.high %v11396_v47, %v11396_v47 }
 0xa05   : > { %v11515_v9 = vsel %vm7614_vm0, %v11415_v54, -inf  ;;  %v11468_v25 = vmax.f32 %v11466_v36, %v11467_v58  ;;  %v11473_v62 = vsel %vm7614_vm0, %v11397_v46, -inf  ;;  %v11480_v15 = vsel %vm7614_vm0, %v11396_v47, -inf }
 0xa06   : > { %v11497_v7 = vrot.slane %v11496_v56, 2  ;;  %v11503_v40 = vmax.f32 %v11501_v29, %v11502_v0  ;;  %v11510_v19 = vmax.f32 %v11508_v18, %v11509_v63  ;;  %v11516_v13 = vrot.slane %v11515_v9, 4 }
 0xa07   : > { %v11469_v43 = vrot.slane %v11468_v25, 2  ;;  %v11474_v45 = vrot.slane %v11473_v62, 4  ;;  %v11481_v12 = vrot.slane %v11480_v15, 4  ;;  %v11487_v41 = vsel %vm7614_vm0, %v11398_v50, -inf }
 0xa08   : > { %v11498_v6 = vmax.f32 %v11496_v56, %v11497_v7  ;;  %v11504_v61 = vrot.slane %v11503_v40, 2  ;;  %v11511_v10 = vrot.slane %v11510_v19, 2  ;;  %v11517_v2 = vmax.f32 %v11515_v9, %v11516_v13 }
 0xa09   : > { %v11470_v35 = vmax.f32 %v11468_v25, %v11469_v43  ;;  %v11475_v51 = vmax.f32 %v11473_v62, %v11474_v45  ;;  %v11482_v53 = vmax.f32 %v11480_v15, %v11481_v12  ;;  %v11488_v4 = vrot.slane %v11487_v41, 4 }
 0xa0a   : > { %v11499_v32 = vrot.slane %v11498_v6, 1  ;;  %v11505_v24 = vmax.f32 %v11503_v40, %v11504_v61  ;;  %v11512_v38 = vmax.f32 %v11510_v19, %v11511_v10  ;;  %v11518_v57 = vrot.slane %v11517_v2, 2 }
 0xa0b   : > { %v11476_v14 = vrot.slane %v11475_v51, 2  ;;  %v11483_v55 = vrot.slane %v11482_v53, 2  ;;  %v11489_v42 = vmax.f32 %v11487_v41, %v11488_v4  ;;  %v11471_v44 = vrot.slane %v11470_v35, 1 }
 0xa0c   : > { %v11506_v26 = vrot.slane %v11505_v24, 1  ;;  %v11513_v37 = vrot.slane %v11512_v38, 1  ;;  %v11519_v23 = vmax.f32 %v11517_v2, %v11518_v57  ;;  %v11500_v17 = vmax.f32 %v11498_v6, %v11499_v32 }
 0xa0d   : > { %v11477_v22 = vmax.f32 %v11475_v51, %v11476_v14  ;;  %v11484_v27 = vmax.f32 %v11482_v53, %v11483_v55  ;;  %v11490_v21 = vrot.slane %v11489_v42, 2  ;;  %v16273_v11 = vadd.f32 %v15982_v34, %v20548_v59 }
 0xa0e   : > { %v11507_v1 = vmax.f32 %v11505_v24, %v11506_v26  ;;  %v11514_v20 = vmax.f32 %v11512_v38, %v11513_v37  ;;  %v11520_v33 = vrot.slane %v11519_v23, 1  ;;  %v11472_v5 = vmax.f32 %v11470_v35, %v11471_v44 }
 0xa0f   : > { %v11478_v28 = vrot.slane %v11477_v22, 1  ;;  %v11485_v52 = vrot.slane %v11484_v27, 1  ;;  %v11491_v8 = vmax.f32 %v11489_v42, %v11490_v21  ;;  %v16274_v47 = vadd.f32 %v20548_v59, %v11330_v30 }
 0xa10   : > { %v11521_v49 = vmax.f32 %v11519_v23, %v11520_v33  ;;  %v11651_v60 = vsel %vm8181_vm1, %v11507_v1, %v11500_v17  ;;  %v11370_v18 = vmax.f32 %v16272_v3, 0.0  ;;  %v11373_v58 = vmax.f32 %v16273_v11, 0.0 }
 0xa11   : > { %v11652_v46 = vsel %vm8183_vm2, %v11514_v20, %v11651_v60  ;;  %v11479_v36 = vmax.f32 %v11477_v22, %v11478_v28  ;;  %v11486_v54 = vmax.f32 %v11484_v27, %v11485_v52  ;;  %v11492_v31 = vrot.slane %v11491_v8, 1 }
 0xa12   : > { %v11653_v29 = vsel %vm8185_vm3, %v11521_v49, %v11652_v46  ;;  %v11371_v56 = vmax.f32 %v16274_v47, 0.0  ;;  %v11377_v50 = vmax.f32 %v11372_v48, %v11373_v58 }
 0xa13   : > { %11665 = vst [vmem:[#allocation2 + $0x31] sm:$0xf] %v11653_v29  ;;  %v11493_v0 = vmax.f32 %v11491_v8, %v11492_v31  ;;  %v11648_v34 = vsel %vm8181_vm1, %v11479_v36, %v11472_v5 }
 0xa14   : > { %v11649_v63 = vsel %vm8183_vm2, %v11486_v54, %v11648_v34  ;;  %v11376_v9 = vmax.f32 %v11370_v18, %v11371_v56  ;;  %v11433_v30 = vcombine.high %v11377_v50, %v11377_v50  ;;  %v11440_v25 = vrot.slane %v11377_v50, %v19422_v16 }
 0xa15   : > { %v11650_v59 = vsel %vm8185_vm3, %v11493_v0, %v11649_v63 }
 0xa16   : > { %11664 = vst [vmem:[#allocation2 + $0x19] sm:$0xf] %v11650_v59  ;;  %v11416_v62 = vcombine.high %v11376_v9, %v11376_v9  ;;  %v11423_v15 = vrot.slane %v11376_v9, %v19422_v16  ;;  %v11447_v7 = vrot.slane %v11433_v30, %v19422_v16  ;;  %v11448_v40 = vcombine.high %v11440_v25, %v11440_v25 }
 0xa17   : > { %v11550_v19 = vsel %vm7614_vm0, %v11440_v25, -inf }
 0xa18   : > { %v11430_v13 = vrot.slane %v11416_v62, %v19422_v16  ;;  %v11551_v43 = vrot.slane %v11550_v19, 4  ;;  %v11431_v45 = vcombine.high %v11423_v15, %v11423_v15  ;;  %v11522_v12 = vsel %vm7614_vm0, %v11423_v15, -inf }
 0xa19   : > { %v11449_v41 = vcombine.high %v11447_v7, %v11447_v7  ;;  %v11557_v6 = vsel %vm7614_vm0, %v11448_v40, -inf  ;;  %v11564_v61 = vsel %vm7614_vm0, %v11447_v7, -inf  ;;  %v11523_v53 = vrot.slane %v11522_v12, 4 }
 0xa1a   : > { %v11432_v10 = vcombine.high %v11430_v13, %v11430_v13  ;;  %v11552_v2 = vmax.f32 %v11550_v19, %v11551_v43  ;;  %v11558_v35 = vrot.slane %v11557_v6, 4  ;;  %v11565_v51 = vrot.slane %v11564_v61, 4 }
 0xa1b   : > { %v11571_v4 = vsel %vm7614_vm0, %v11449_v41, -inf  ;;  %v11529_v32 = vsel %vm7614_vm0, %v11431_v45, -inf  ;;  %v11536_v16 = vsel %vm7614_vm0, %v11430_v13, -inf  ;;  %v11524_v42 = vmax.f32 %v11522_v12, %v11523_v53  ;;  %v17226_v41 = vld [vmem:[%s20879_s1 + $0x940] sm:$0xff]   ;;  %v17232_v53 = vld [vmem:[%s20879_s1 + $0x970] sm:$0xff]  }
 0xa1c   : > { %v11543_v24 = vsel %vm7614_vm0, %v11432_v10, -inf  ;;  %v11553_v38 = vrot.slane %v11552_v2, 2  ;;  %v11559_v57 = vmax.f32 %v11557_v6, %v11558_v35  ;;  %v11566_v14 = vmax.f32 %v11564_v61, %v11565_v51  ;;  %v17227_v61 = vld [vmem:[%s20879_s1 + $0x948] sm:$0xff]   ;;  %v17228_v10 = vld [vmem:[%s20879_s1 + $0x950] sm:$0xff]   ;;  %v17230_v35 = vld [vmem:[%s20879_s1 + $0x960] sm:$0xff]  }
 0xa1d   : > { %v11572_v55 = vrot.slane %v11571_v4, 4  ;;  %v11530_v3 = vrot.slane %v11529_v32, 4  ;;  %v11537_v26 = vrot.slane %v11536_v16, 4  ;;  %v11544_v37 = vrot.slane %v11543_v24, 4  ;;  %v17224_v45 = vld [vmem:[#allocation2] ss:$24 sps:$4 sm:$0xff]  }
 0xa1e   : > { %v11554_v23 = vmax.f32 %v11552_v2, %v11553_v38  ;;  %v11560_v44 = vrot.slane %v11559_v57, 2  ;;  %v11567_v22 = vrot.slane %v11566_v14, 2  ;;  %v11525_v21 = vrot.slane %v11524_v42, 2  ;;  %v17229_v2 = vld [vmem:[%s20879_s1 + $0x958] sm:$0xff]   ;;  %v17231_v51 = vld [vmem:[%s20879_s1 + $0x968] sm:$0xff]  }
 0xa1f   : > { %v11573_v27 = vmax.f32 %v11571_v4, %v11572_v55  ;;  %v11531_v48 = vmax.f32 %v11529_v32, %v11530_v3  ;;  %v11538_v17 = vmax.f32 %v11536_v16, %v11537_v26  ;;  %v11545_v1 = vmax.f32 %v11543_v24, %v11544_v37  ;;  %v17233_v4 = vld [vmem:[%s20879_s1 + $0x978] sm:$0xff]   ;;  %v17236_v24 = vld [vmem:[%s20879_s1 + $0x980] sm:$0xff]   ;;  %v17241_v3 = vld [vmem:[%s20879_s1 + $0x9a8] sm:$0xff]  }
 0xa20   : > { %v11555_v20 = vrot.slane %v11554_v23, 1  ;;  %v11561_v33 = vmax.f32 %v11559_v57, %v11560_v44  ;;  %v11568_v28 = vmax.f32 %v11566_v14, %v11567_v22  ;;  %v11526_v8 = vmax.f32 %v11524_v42, %v11525_v21  ;;  %v17234_v16 = vld [vmem:[#allocation2 + $0x1] ss:$24 sps:$4 sm:$0xff]   ;;  %v17237_v57 = vld [vmem:[%s20879_s1 + $0x988] sm:$0xff]   ;;  %v17238_v14 = vld [vmem:[%s20879_s1 + $0x990] sm:$0xff]  }
 0xa21   : > { %v11574_v52 = vrot.slane %v11573_v27, 2  ;;  %v11532_v11 = vrot.slane %v11531_v48, 2  ;;  %v11539_v49 = vrot.slane %v11538_v17, 2  ;;  %v11546_v60 = vrot.slane %v11545_v1, 2  ;;  %v17239_v55 = vld [vmem:[%s20879_s1 + $0x998] sm:$0xff]   ;;  %v17240_v42 = vld [vmem:[%s20879_s1 + $0x9a0] sm:$0xff]  }
 0xa22   : > { %v11562_v5 = vrot.slane %v11561_v33, 1  ;;  %v11569_v47 = vrot.slane %v11568_v28, 1  ;;  %v11527_v36 = vrot.slane %v11526_v8, 1  ;;  %v11556_v18 = vmax.f32 %v11554_v23, %v11555_v20  ;;  %v17242_v26 = vld [vmem:[%s20879_s1 + $0x9b0] sm:$0xff]   ;;  %v17243_v37 = vld [vmem:[%s20879_s1 + $0x9b8] sm:$0xff]   ;;  %v17246_v22 = vld [vmem:[%s20879_s1 + $0x9c0] sm:$0xff]  }
 0xa23   : > { %v11575_v46 = vmax.f32 %v11573_v27, %v11574_v52  ;;  %v11533_v54 = vmax.f32 %v11531_v48, %v11532_v11  ;;  %v11540_v31 = vmax.f32 %v11538_v17, %v11539_v49  ;;  %v11547_v29 = vmax.f32 %v11545_v1, %v11546_v60  ;;  %v17244_v44 = vld [vmem:[#allocation2 + $0x2] ss:$24 sps:$4 sm:$0xff]   ;;  %v17247_v21 = vld [vmem:[%s20879_s1 + $0x9c8] sm:$0xff]   ;;  %v17248_v48 = vld [vmem:[%s20879_s1 + $0x9d0] sm:$0xff]  }
 0xa24   : > { %v11563_v58 = vmax.f32 %v11561_v33, %v11562_v5  ;;  %v11570_v56 = vmax.f32 %v11568_v28, %v11569_v47  ;;  %v11528_v30 = vmax.f32 %v11526_v8, %v11527_v36  ;;  %v17249_v17 = vld [vmem:[%s20879_s1 + $0x9d8] sm:$0xff]   ;;  %v17250_v1 = vld [vmem:[%s20879_s1 + $0x9e0] sm:$0xff]   ;;  %v17251_v20 = vld [vmem:[%s20879_s1 + $0x9e8] sm:$0xff]  }
 0xa25   : > { %v11576_v0 = vrot.slane %v11575_v46, 1  ;;  %v11534_v34 = vrot.slane %v11533_v54, 1  ;;  %v11541_v63 = vrot.slane %v11540_v31, 1  ;;  %v11548_v50 = vrot.slane %v11547_v29, 1  ;;  %v17252_v33 = vld [vmem:[%s20879_s1 + $0x9f0] sm:$0xff]   ;;  %v17253_v28 = vld [vmem:[%s20879_s1 + $0x9f8] sm:$0xff]  }
 0xa26   : > { %v11657_v59 = vsel %vm8181_vm1, %v11563_v58, %v11556_v18  ;;  %v17254_v8 = vld [vmem:[#allocation2 + $0x18] ss:$24 sps:$4 sm:$0xff]   ;;  %v17256_v11 = vld [vmem:[%s20879_s1 + $0xa00] sm:$0xff]   ;;  %v17257_v60 = vld [vmem:[%s20879_s1 + $0xa08] sm:$0xff]  }
 0xa27   : > { %v11577_v9 = vmax.f32 %v11575_v46, %v11576_v0  ;;  %v11658_v25 = vsel %vm8183_vm2, %v11570_v56, %v11657_v59  ;;  %v11535_v62 = vmax.f32 %v11533_v54, %v11534_v34  ;;  %v11542_v15 = vmax.f32 %v11540_v31, %v11541_v63  ;;  %v17258_v5 = vld [vmem:[%s20879_s1 + $0xa10] sm:$0xff]   ;;  %v17259_v47 = vld [vmem:[%s20879_s1 + $0xa18] sm:$0xff]   ;;  %v17260_v46 = vld [vmem:[%s20879_s1 + $0xa20] sm:$0xff]  }
 0xa28   : > { %v11549_v7 = vmax.f32 %v11547_v29, %v11548_v50  ;;  %v17261_v36 = vld [vmem:[%s20879_s1 + $0xa28] sm:$0xff]   ;;  %v17262_v54 = vld [vmem:[%s20879_s1 + $0xa30] sm:$0xff]   ;;  %v17263_v31 = vld [vmem:[%s20879_s1 + $0xa38] sm:$0xff]  }
 0xa29   : > { %v11659_v40 = vsel %vm8185_vm3, %v11577_v9, %v11658_v25  ;;  %v11654_v19 = vsel %vm8181_vm1, %v11535_v62, %v11528_v30  ;;  %v17264_v18 = vld [vmem:[#allocation2 + $0x19] ss:$24 sps:$4 sm:$0xff]   ;;  %v17266_v58 = vld [vmem:[%s20879_s1 + $0xa40] sm:$0xff]   ;;  %v17267_v0 = vld [vmem:[%s20879_s1 + $0xa48] sm:$0xff]  }
 0xa2a   : > { %11667 = vst [vmem:[#allocation2 + $0x61] sm:$0xf] %v11659_v40  ;;  %v11655_v13 = vsel %vm8183_vm2, %v11542_v15, %v11654_v19  ;;  %v17268_v34 = vld [vmem:[%s20879_s1 + $0xa50] sm:$0xff]   ;;  %v17269_v63 = vld [vmem:[%s20879_s1 + $0xa58] sm:$0xff]   ;;  %v17270_v50 = vld [vmem:[%s20879_s1 + $0xa60] sm:$0xff]  }
 0xa2b   : > { %v11656_v43 = vsel %vm8185_vm3, %v11549_v7, %v11655_v13  ;;  %v17271_v9 = vld [vmem:[%s20879_s1 + $0xa68] sm:$0xff]   ;;  %v17272_v59 = vld [vmem:[%s20879_s1 + $0xa70] sm:$0xff]   ;;  %v17273_v30 = vld [vmem:[%s20879_s1 + $0xa78] sm:$0xff]  }
 0xa2c   : > { %11666 = vst [vmem:[#allocation2 + $0x49] sm:$0xf] %v11656_v43  ;;  %v17274_v62 = vld [vmem:[#allocation2 + $0x1a] ss:$24 sps:$4 sm:$0xff]   ;;  %v17276_v15 = vld [vmem:[%s20879_s1 + $0xa80] sm:$0xff]   ;;  %v17277_v40 = vld [vmem:[%s20879_s1 + $0xa88] sm:$0xff]  }
 0xa2d   : > { %v17278_v19 = vld [vmem:[%s20879_s1 + $0xa90] sm:$0xff]   ;;  %v17279_v13 = vld [vmem:[%s20879_s1 + $0xa98] sm:$0xff]   ;;  %v17280_v43 = vld [vmem:[%s20879_s1 + $0xaa0] sm:$0xff]  }
 0xa33   : > { %v17225_v12 = vld [vmem:[#allocation2 + $0x30] ss:$24 sps:$4 sm:$0xff]  }
 0xa34   : > { %v11692_v6 = vpack.c.bf16 %v17225_v12, %v17224_v45  ;;  %v17235_v32 = vld [vmem:[#allocation2 + $0x31] ss:$24 sps:$4 sm:$0xff]  }
 0xa35   : > { %v11817_v38 = vpack.c.bf16 %v17235_v32, %v17234_v16  ;;  %v17245_v23 = vld [vmem:[#allocation2 + $0x32] ss:$24 sps:$4 sm:$0xff]  }
 0xa36   : > { %16000 = vmatmul.mubr.bf16.vlgmr.msra.gmra.mrb[40].mxu0 %v11692_v6  ;;  %v11942_v27 = vpack.c.bf16 %v17245_v23, %v17244_v44  ;;  %v17255_v52 = vld [vmem:[#allocation2 + $0x48] ss:$24 sps:$4 sm:$0xff]   ;;  %v17282_v12 = vld [vmem:[%s20879_s1 + $0xab0] sm:$0xff]  }
 0xa37   : > { %16004 = vmatpush3.bf16.msra.mxu0 %v17226_v41  ;;  %16019 = vmatprep.mubr.msk.bf16.mxu0 %vm17325_vm8, %v19291_v39  ;;  %v12067_v49 = vpack.c.bf16 %v17255_v52, %v17254_v8  ;;  %v17265_v29 = vld [vmem:[#allocation2 + $0x49] ss:$24 sps:$4 sm:$0xff]   ;;  %v17283_v41 = vld [vmem:[%s20879_s1 + $0xab8] sm:$0xff]   ;;  %v17292_v16 = vld [vmem:[%s20879_s1 + $0xaf0] sm:$0xff]  }
 0xa38   : > { %16005 = vmatprep.subr.bf16.mxu0 %v19291_v39  ;;  %v12192_v56 = vpack.c.bf16 %v17265_v29, %v17264_v18  ;;  %v17275_v25 = vld [vmem:[#allocation2 + $0x4a] ss:$24 sps:$4 sm:$0xff]   ;;  %v17302_v44 = vld [vmem:[%s20879_s1 + $0xb30] sm:$0xff]  }
 0xa39   : > { %v12317_v7 = vpack.c.bf16 %v17275_v25, %v17274_v62  ;;  %v17281_v45 = vld [vmem:[%s20879_s1 + $0xaa8] sm:$0xff]  }
 0xa3a   : > { %v17284_v6 = vld [vmem:[#allocation2 + $0x30] ss:$24 sps:$4 sm:$0xff]  }
 0xa3b   : > { %16006 = vmatpush3.bf16.msra.mxu0 %v17227_v61  ;;  %v17285_v61 = vld [vmem:[#allocation2 + $0x60] ss:$24 sps:$4 sm:$0xff]   ;;  %v17291_v32 = vld [vmem:[%s20879_s1 + $0xae8] sm:$0xff]  }
 0xa3c   : > { %16007 = vmatprep.subr.bf16.mxu0 %v19291_v39  ;;  %v17301_v23 = vld [vmem:[%s20879_s1 + $0xb28] sm:$0xff]  }
 0xa3f   : > { %16008 = vmatpush3.bf16.msra.mxu0 %v17228_v10  ;;  %v17286_v10 = vld [vmem:[%s20879_s1 + $0xac0] sm:$0xff]  }
 0xa40   : > { %16009 = vmatprep.subr.bf16.mxu0 %v19291_v39 }
 0xa43   : > { %16010 = vmatpush3.bf16.msra.mxu0 %v17229_v2  ;;  %v12442_v2 = vpack.c.bf16 %v17285_v61, %v17284_v6 }
 0xa44   : > { %16011 = vmatprep.subr.bf16.mxu0 %v19291_v39 }
 0xa47   : > { %16012 = vmatpush3.bf16.msra.mxu0 %v17230_v35  ;;  %v17287_v35 = vld [vmem:[%s20879_s1 + $0xac8] sm:$0xff]  }
 0xa48   : > { %16013 = vmatprep.subr.bf16.mxu0 %v19291_v39 }
 0xa4b   : > { %16014 = vmatpush3.bf16.msra.mxu0 %v17231_v51  ;;  %v17288_v51 = vld [vmem:[%s20879_s1 + $0xad0] sm:$0xff]  }
 0xa4c   : > { %16015 = vmatprep.subr.bf16.mxu0 %v19291_v39 }
 0xa4f   : > { %16016 = vmatpush3.bf16.msra.mxu0 %v17232_v53  ;;  %v17289_v53 = vld [vmem:[%s20879_s1 + $0xad8] sm:$0xff]  }
 0xa50   : > { %16017 = vmatprep.subr.bf16.mxu0 %v19291_v39 }
 0xa53   : > { %16018 = vmatpush3.bf16.msra.mxu0 %v17233_v4  ;;  %v17290_v4 = vld [vmem:[%s20879_s1 + $0xae0] sm:$0xff]  }
 0xa54   : > { %16023 = vmatprep.subr.bf16.mxu0 %v19291_v39 }
 0xa56   : > { %16020 = vmatmul.mubr.bf16.vlgmr.msra.gmra.mrb[40].mxu0 %v11817_v38  ;;  %v17294_v38 = vld [vmem:[#allocation2 + $0x31] ss:$24 sps:$4 sm:$0xff]  }
 0xa57   : > { %16024 = vmatpush3.bf16.msra.mxu0 %v17236_v24  ;;  %16039 = vmatprep.mubr.msk.bf16.mxu0 %vm17325_vm8, %v19291_v39  ;;  %v17293_v24 = vld [vmem:[%s20879_s1 + $0xaf8] sm:$0xff]  }
 0xa58   : > { %16025 = vmatprep.subr.bf16.mxu0 %v19291_v39 }
 0xa5b   : > { %16026 = vmatpush3.bf16.msra.mxu0 %v17237_v57  ;;  %v17295_v57 = vld [vmem:[#allocation2 + $0x61] ss:$24 sps:$4 sm:$0xff]  }
 0xa5c   : > { %16027 = vmatprep.subr.bf16.mxu0 %v19291_v39 }
 0xa5f   : > { %16028 = vmatpush3.bf16.msra.mxu0 %v17238_v14  ;;  %v17296_v14 = vld [vmem:[%s20879_s1 + $0xb00] sm:$0xff]  }
 0xa60   : > { %16029 = vmatprep.subr.bf16.mxu0 %v19291_v39 }
 0xa63   : > { %16030 = vmatpush3.bf16.msra.mxu0 %v17239_v55  ;;  %v12567_v55 = vpack.c.bf16 %v17295_v57, %v17294_v38 }
 0xa64   : > { %16031 = vmatprep.subr.bf16.mxu0 %v19291_v39 }
 0xa67   : > { %16032 = vmatpush3.bf16.msra.mxu0 %v17240_v42  ;;  %v17297_v42 = vld [vmem:[%s20879_s1 + $0xb08] sm:$0xff]  }
 0xa68   : > { %16033 = vmatprep.subr.bf16.mxu0 %v19291_v39 }
 0xa6b   : > { %16034 = vmatpush3.bf16.msra.mxu0 %v17241_v3  ;;  %v17298_v3 = vld [vmem:[%s20879_s1 + $0xb10] sm:$0xff]  }
 0xa6c   : > { %16035 = vmatprep.subr.bf16.mxu0 %v19291_v39 }
 0xa6f   : > { %16036 = vmatpush3.bf16.msra.mxu0 %v17242_v26  ;;  %v17299_v26 = vld [vmem:[%s20879_s1 + $0xb18] sm:$0xff]  }
 0xa70   : > { %16037 = vmatprep.subr.bf16.mxu0 %v19291_v39 }
 0xa73   : > { %16038 = vmatpush3.bf16.msra.mxu0 %v17243_v37  ;;  %v17300_v37 = vld [vmem:[%s20879_s1 + $0xb20] sm:$0xff]  }
 0xa74   : > { %16043 = vmatprep.subr.bf16.mxu0 %v19291_v39 }
 0xa76   : > { %16040 = vmatmul.mubr.bf16.vlgmr.msra.gmra.mrb[40].mxu0 %v11942_v27  ;;  %v17304_v27 = vld [vmem:[#allocation2 + $0x32] ss:$24 sps:$4 sm:$0xff]  }
 0xa77   : > { %16044 = vmatpush3.bf16.msra.mxu0 %v17246_v22  ;;  %16059 = vmatprep.mubr.msk.bf16.mxu0 %vm17325_vm8, %v19291_v39  ;;  %v17303_v22 = vld [vmem:[%s20879_s1 + $0xb38] sm:$0xff]  }
 0xa78   : > { %16045 = vmatprep.subr.bf16.mxu0 %v19291_v39 }
 0xa7b   : > { %16046 = vmatpush3.bf16.msra.mxu0 %v17247_v21  ;;  %v17305_v21 = vld [vmem:[#allocation2 + $0x62] ss:$24 sps:$4 sm:$0xff]  }
 0xa7c   : > { %16047 = vmatprep.subr.bf16.mxu0 %v19291_v39 }
 0xa7f   : > { %16048 = vmatpush3.bf16.msra.mxu0 %v17248_v48  ;;  %v12692_v48 = vpack.c.bf16 %v17305_v21, %v17304_v27 }
 0xa80   : > { %16049 = vmatprep.subr.bf16.mxu0 %v19291_v39 }
 0xa83   : > { %16050 = vmatpush3.bf16.msra.mxu0 %v17249_v17  ;;  %v13737_v17 = vld [vmem:[%s20880_s2 + $0x4] ss:$0 sm:$0xff] }
 0xa84   : > { %16051 = vmatprep.subr.bf16.mxu0 %v19291_v39 }
 0xa87   : > { %16052 = vmatpush3.bf16.msra.mxu0 %v17250_v1 }
 0xa88   : > { %16053 = vmatprep.subr.bf16.mxu0 %v19291_v39 }
 0xa8b   : > { %16054 = vmatpush3.bf16.msra.mxu0 %v17251_v20 }
 0xa8c   : > { %16055 = vmatprep.subr.bf16.mxu0 %v19291_v39 }
 0xa8f   : > { %16056 = vmatpush3.bf16.msra.mxu0 %v17252_v33 }
 0xa90   : > { %16057 = vmatprep.subr.bf16.mxu0 %v19291_v39 }
 0xa93   : > { %16058 = vmatpush3.bf16.msra.mxu0 %v17253_v28 }
 0xa94   : > { %16063 = vmatprep.subr.bf16.mxu0 %v19291_v39 }
 0xa96   : > { %16060 = vmatmul.mubr.bf16.vlgmr.msra.gmra.mrb[40].mxu0 %v12067_v49 }
 0xa97   : > { %16064 = vmatpush3.bf16.msra.mxu0 %v17256_v11  ;;  %16079 = vmatprep.mubr.msk.bf16.mxu0 %vm17325_vm8, %v19291_v39 }
 0xa98   : > { %16065 = vmatprep.subr.bf16.mxu0 %v19291_v39 }
 0xa9b   : > { %16066 = vmatpush3.bf16.msra.mxu0 %v17257_v60 }
 0xa9c   : > { %16067 = vmatprep.subr.bf16.mxu0 %v19291_v39 }
 0xa9f   : > { %16068 = vmatpush3.bf16.msra.mxu0 %v17258_v5 }
 0xaa0   : > { %16069 = vmatprep.subr.bf16.mxu0 %v19291_v39 }
 0xaa3   : > { %16070 = vmatpush3.bf16.msra.mxu0 %v17259_v47 }
 0xaa4   : > { %16071 = vmatprep.subr.bf16.mxu0 %v19291_v39 }
 0xaa7   : > { %16072 = vmatpush3.bf16.msra.mxu0 %v17260_v46 }
 0xaa8   : > { %16073 = vmatprep.subr.bf16.mxu0 %v19291_v39 }
 0xaab   : > { %16074 = vmatpush3.bf16.msra.mxu0 %v17261_v36 }
 0xaac   : > { %16075 = vmatprep.subr.bf16.mxu0 %v19291_v39 }
 0xaaf   : > { %16076 = vmatpush3.bf16.msra.mxu0 %v17262_v54 }
 0xab0   : > { %16077 = vmatprep.subr.bf16.mxu0 %v19291_v39 }
 0xab3   : > { %16078 = vmatpush3.bf16.msra.mxu0 %v17263_v31 }
 0xab4   : > { %16083 = vmatprep.subr.bf16.mxu0 %v19291_v39 }
 0xab6   : > { %16080 = vmatmul.mubr.bf16.vlgmr.msra.gmra.mrb[40].mxu0 %v12192_v56 }
 0xab7   : > { %16084 = vmatpush3.bf16.msra.mxu0 %v17266_v58  ;;  %16099 = vmatprep.mubr.msk.bf16.mxu0 %vm17325_vm8, %v19291_v39 }
 0xab8   : > { %16085 = vmatprep.subr.bf16.mxu0 %v19291_v39 }
 0xabb   : > { %16086 = vmatpush3.bf16.msra.mxu0 %v17267_v0 }
 0xabc   : > { %16087 = vmatprep.subr.bf16.mxu0 %v19291_v39 }
 0xabf   : > { %16088 = vmatpush3.bf16.msra.mxu0 %v17268_v34 }
 0xac0   : > { %16089 = vmatprep.subr.bf16.mxu0 %v19291_v39 }
 0xac3   : > { %16090 = vmatpush3.bf16.msra.mxu0 %v17269_v63 }
 0xac4   : > { %16091 = vmatprep.subr.bf16.mxu0 %v19291_v39 }
 0xac7   : > { %16092 = vmatpush3.bf16.msra.mxu0 %v17270_v50 }
 0xac8   : > { %16093 = vmatprep.subr.bf16.mxu0 %v19291_v39 }
 0xacb   : > { %16094 = vmatpush3.bf16.msra.mxu0 %v17271_v9 }
 0xacc   : > { %16095 = vmatprep.subr.bf16.mxu0 %v19291_v39 }
 0xacf   : > { %16096 = vmatpush3.bf16.msra.mxu0 %v17272_v59 }
 0xad0   : > { %16097 = vmatprep.subr.bf16.mxu0 %v19291_v39 }
 0xad3   : > { %16098 = vmatpush3.bf16.msra.mxu0 %v17273_v30 }
 0xad4   : > { %16103 = vmatprep.subr.bf16.mxu0 %v19291_v39 }
 0xad6   : > { %16100 = vmatmul.mubr.bf16.vlgmr.msra.gmra.mrb[40].mxu0 %v12317_v7 }
 0xad7   : > { %16104 = vmatpush3.bf16.msra.mxu0 %v17276_v15  ;;  %16119 = vmatprep.mubr.msk.bf16.mxu0 %vm17325_vm8, %v19291_v39 }
 0xad8   : > { %16105 = vmatprep.subr.bf16.mxu0 %v19291_v39 }
 0xadb   : > { %16106 = vmatpush3.bf16.msra.mxu0 %v17277_v40 }
 0xadc   : > { %16107 = vmatprep.subr.bf16.mxu0 %v19291_v39 }
 0xadf   : > { %16108 = vmatpush3.bf16.msra.mxu0 %v17278_v19 }
 0xae0   : > { %16109 = vmatprep.subr.bf16.mxu0 %v19291_v39 }
 0xae3   : > { %16110 = vmatpush3.bf16.msra.mxu0 %v17279_v13 }
 0xae4   : > { %16111 = vmatprep.subr.bf16.mxu0 %v19291_v39 }
 0xae7   : > { %16112 = vmatpush3.bf16.msra.mxu0 %v17280_v43 }
 0xae8   : > { %16113 = vmatprep.subr.bf16.mxu0 %v19291_v39 }
 0xaeb   : > { %16114 = vmatpush3.bf16.msra.mxu0 %v17281_v45 }
 0xaec   : > { %16115 = vmatprep.subr.bf16.mxu0 %v19291_v39 }
 0xaef   : > { %16116 = vmatpush3.bf16.msra.mxu0 %v17282_v12 }
 0xaf0   : > { %16117 = vmatprep.subr.bf16.mxu0 %v19291_v39 }
 0xaf3   : > { %16118 = vmatpush3.bf16.msra.mxu0 %v17283_v41 }
 0xaf4   : > { %16123 = vmatprep.subr.bf16.mxu0 %v19291_v39 }
 0xaf6   : > { %16120 = vmatmul.mubr.bf16.vlgmr.msra.gmra.mrb[40].mxu0 %v12442_v2 }
 0xaf7   : > { %16124 = vmatpush3.bf16.msra.mxu0 %v17286_v10  ;;  %16139 = vmatprep.mubr.msk.bf16.mxu0 %vm17325_vm8, %v19291_v39 }
 0xaf8   : > { %16125 = vmatprep.subr.bf16.mxu0 %v19291_v39 }
 0xafb   : > { %16126 = vmatpush3.bf16.msra.mxu0 %v17287_v35 }
 0xafc   : > { %16127 = vmatprep.subr.bf16.mxu0 %v19291_v39 }
 0xaff   : > { %16128 = vmatpush3.bf16.msra.mxu0 %v17288_v51 }
 0xb00   : > { %16129 = vmatprep.subr.bf16.mxu0 %v19291_v39 }
 0xb03   : > { %16130 = vmatpush3.bf16.msra.mxu0 %v17289_v53 }
 0xb04   : > { %16131 = vmatprep.subr.bf16.mxu0 %v19291_v39 }
 0xb07   : > { %16132 = vmatpush3.bf16.msra.mxu0 %v17290_v4 }
 0xb08   : > { %16133 = vmatprep.subr.bf16.mxu0 %v19291_v39 }
 0xb0b   : > { %16134 = vmatpush3.bf16.msra.mxu0 %v17291_v32 }
 0xb0c   : > { %16135 = vmatprep.subr.bf16.mxu0 %v19291_v39 }
 0xb0f   : > { %16136 = vmatpush3.bf16.msra.mxu0 %v17292_v16 }
 0xb10   : > { %16137 = vmatprep.subr.bf16.mxu0 %v19291_v39 }
 0xb13   : > { %16138 = vmatpush3.bf16.msra.mxu0 %v17293_v24 }
 0xb14   : > { %16143 = vmatprep.subr.bf16.mxu0 %v19291_v39 }
 0xb16   : > { %16140 = vmatmul.mubr.bf16.vlgmr.msra.gmra.mrb[40].mxu0 %v12567_v55 }
 0xb17   : > { %16144 = vmatpush3.bf16.msra.mxu0 %v17296_v14  ;;  %16159 = vmatprep.mubr.msk.bf16.mxu0 %vm17325_vm8, %v19291_v39 }
 0xb18   : > { %16145 = vmatprep.subr.bf16.mxu0 %v19291_v39 }
 0xb1b   : > { %16146 = vmatpush3.bf16.msra.mxu0 %v17297_v42 }
 0xb1c   : > { %16147 = vmatprep.subr.bf16.mxu0 %v19291_v39 }
 0xb1f   : > { %16148 = vmatpush3.bf16.msra.mxu0 %v17298_v3 }
 0xb20   : > { %16149 = vmatprep.subr.bf16.mxu0 %v19291_v39 }
 0xb23   : > { %16150 = vmatpush3.bf16.msra.mxu0 %v17299_v26 }
 0xb24   : > { %16151 = vmatprep.subr.bf16.mxu0 %v19291_v39 }
 0xb27   : > { %16152 = vmatpush3.bf16.msra.mxu0 %v17300_v37 }
 0xb28   : > { %16153 = vmatprep.subr.bf16.mxu0 %v19291_v39 }
 0xb2b   : > { %16154 = vmatpush3.bf16.msra.mxu0 %v17301_v23 }
 0xb2c   : > { %16155 = vmatprep.subr.bf16.mxu0 %v19291_v39 }
 0xb2f   : > { %16156 = vmatpush3.bf16.msra.mxu0 %v17302_v44 }
 0xb30   : > { %16157 = vmatprep.subr.bf16.mxu0 %v19291_v39 }
 0xb33   : > { %16158 = vmatpush3.bf16.msra.mxu0 %v17303_v22 }
 0xb36   : > { %16160 = vmatmul.mubr.bf16.vlgmr.msra.gmra.mrb[40].mxu0 %v12692_v48 }
 0xc09   : > { %v12792_v1 = vpop.f32.mrb[40].mxu0 }
 0xc0a   : > { %v16275_v20 = vadd.f32 %v13737_v17, %v12792_v1  ;;  %v16161_v33 = vpop.f32.mrb[41].mxu0 }
 0xc0b   : > { %v12795_v28 = vpop.f32.mrb[42].mxu0 }
 0xc0c   : > { %v12805_v52 = vmax.f32 %v16275_v20, 0.0  ;;  %v16276_v39 = vadd.f32 %v13737_v17, %v12795_v28  ;;  %v16162_v8 = vpop.f32.mrb[43].mxu0 }
 0xc0e   : > { %v12809_v11 = vcombine.high %v12805_v52, %v12805_v52  ;;  %12813 = vst [vmem:[%s170_s30] sm:$0xf] %v12805_v52  ;;  %v12806_v49 = vmax.f32 %v16276_v39, 0.0 }
 0xc10   : > { %12814 = vst [vmem:[%s170_s30 + $0x4] sm:$0xf] %v12809_v11  ;;  %v12810_v60 = vcombine.high %v12806_v49, %v12806_v49  ;;  %12815 = vst [vmem:[%s170_s30 + $0x8] sm:$0xf] %v12806_v49 }
 0xc12   : > { %12816 = vst [vmem:[%s170_s30 + $0xc] sm:$0xf] %v12810_v60 }
 0xc13 PF: > { %s13_s12 = sadd.s32 1, %s17321_s12  }
 0xc14   : > { %p10_p4 = scmp.ge.s32.totalorder %s13_s12, 4  }
 0xc16   :  { %12 = sbr.rel (!%p10_p4) target bundleno = 1 (0x1), region = 114 }

</bundles_post_ra>
